<compile_context>
chip_gen: v7x
topology: tpu7x:2x2x1
jax: 0.10.0
libtpu: 0.0.40
codegen_flags: <defaults>
</compile_context>

<pallas_src>
import jax
import jax.numpy as jnp
from jax.experimental import pallas as pl
from jax.experimental.pallas import tpu as pltpu


# ----------------------------------------------------------------------------
# In-kernel helpers
# ----------------------------------------------------------------------------
def _store_reflect(dst_ref, val, p):
    """Write `val` (H, W, C) into `dst_ref` ((H+2p, W+2p, C) VMEM scratch)
    with reflect padding of width p (PyTorch 'reflect' semantics)."""
    H, W, _ = val.shape
    if p == 0:
        dst_ref[...] = val
        return
    # Rows: build the row-extended value with a cheap leading-dim concat.
    rows = ([val[r:r + 1] for r in range(p, 0, -1)]
            + [val]
            + [val[H - 1 - r:H - r] for r in range(1, p + 1)])
    v = jnp.concatenate(rows, axis=0)                       # (H+2p, W, C)
    # Interior columns (full padded height).
    dst_ref[:, pl.ds(p, W), :] = v
    # Mirrored border columns (corners come for free from the row-extended v).
    for c in range(1, p + 1):
        dst_ref[:, pl.ds(p - c, 1), :] = v[:, c:c + 1, :]
        dst_ref[:, pl.ds(p + W - 1 + c, 1), :] = v[:, W - 1 - c:W - c, :]


def _conv3x3(pad_ref, wmat_ref, b_ref, out_hw, *, dil, off, relu):
    """3x3 conv (stride 1, dilation `dil`) on an already reflect-padded VMEM
    scratch ref.  `off` is the extra window offset when the scratch buffer is
    padded wider than this conv needs.  wmat_ref is (9*Cin, Cout)."""
    H, W = out_hw
    Cin = pad_ref.shape[-1]
    Cout = wmat_ref.shape[-1]

    if Cin % 128 == 0:
        # Lane-aligned channels (real module: Ch=128): im2col tap stacking,
        # a single MXU matmul with K = 9*Cin.
        cols = [pad_ref[pl.ds(off + i * dil, H), pl.ds(off + j * dil, W), :]
                for i in range(3) for j in range(3)]
        xcol = jnp.concatenate(cols, axis=-1).reshape(H * W, 9 * Cin)
        acc = jnp.dot(xcol, wmat_ref[...], preferred_element_type=jnp.float32)
    else:
        # Small-channel fallback: per-tap matmuls, f32 accumulation.
        wm = wmat_ref[...]                                  # (9*Cin, Cout)
        acc = jnp.zeros((H * W, Cout), jnp.float32)
        t = 0
        for i in range(3):
            for j in range(3):
                win = pad_ref[pl.ds(off + i * dil, H),
                              pl.ds(off + j * dil, W), :]   # (H, W, Cin)
                acc = acc + jnp.dot(win.reshape(H * W, Cin),
                                    wm[t * Cin:(t + 1) * Cin],
                                    preferred_element_type=jnp.float32)
                t += 1

    acc = acc + b_ref[...]                                  # (1, Cout)
    if relu:
        acc = jnp.where(acc >= 0.0, acc, 0.2 * acc)         # LeakyReLU(0.2)
    return acc.reshape(H, W, Cout)


# ----------------------------------------------------------------------------
# Fused ResBlock kernel (one batch element per grid step)
# ----------------------------------------------------------------------------
def _res_block_kernel(x_ref,
                      w0_ref, b0_ref,
                      w11_ref, b11_ref,
                      w12_ref, b12_ref,
                      w21a_ref, w21b_ref, w21c_ref, b21_ref,
                      w2_ref, b2_ref,
                      w3_ref, b3_ref,
                      o_ref,
                      xp_ref, tp_ref, u1p_ref, u2p_ref):
    H, W, Ch = o_ref.shape

    x = x_ref[...]                                          # (H, W, Ch) f32
    _store_reflect(xp_ref, x, 1)

    # t = LeakyReLU(conv0(x)); stored reflect-padded by 3 (serves pad-2 and
    # pad-3 reads: reflect-pad nests, interior crop of pad-3 == pad-2).
    t = _conv3x3(xp_ref, w0_ref, b0_ref, (H, W), dil=1, off=0, relu=True)
    _store_reflect(tp_ref, t, 3)

    # t2 = LeakyReLU(conv1_1(t))  (dilation 2, pad 2 -> offset 1 inside tp)
    t2 = _conv3x3(tp_ref, w11_ref, b11_ref, (H, W), dil=2, off=1, relu=True)
    # t3 = LeakyReLU(conv1_2(t))  (dilation 3, pad 3 -> offset 0 inside tp)
    t3 = _conv3x3(tp_ref, w12_ref, b12_ref, (H, W), dil=3, off=0, relu=True)

    # u1 = conv2_1(concat([t, t2, t3]))  -- concat folded into 3 partial dots.
    u1 = (jnp.dot(t.reshape(H * W, Ch), w21a_ref[...],
                  preferred_element_type=jnp.float32)
          + jnp.dot(t2.reshape(H * W, -1), w21b_ref[...],
                    preferred_element_type=jnp.float32)
          + jnp.dot(t3.reshape(H * W, -1), w21c_ref[...],
                    preferred_element_type=jnp.float32)
          + b21_ref[...])
    _store_reflect(u1p_ref, u1.reshape(H, W, Ch), 1)

    # u2 = LeakyReLU(conv2(u1))
    u2 = _conv3x3(u1p_ref, w2_ref, b2_ref, (H, W), dil=1, off=0, relu=True)
    _store_reflect(u2p_ref, u2, 1)

    # u3 = LeakyReLU(conv3(u2)); out = x + u3
    u3 = _conv3x3(u2p_ref, w3_ref, b3_ref, (H, W), dil=1, off=0, relu=True)
    o_ref[...] = (x + u3).astype(o_ref.dtype)


# ----------------------------------------------------------------------------
# Parameter prep (outside-kernel glue on tiny weight tensors)
# ----------------------------------------------------------------------------
def _prep_params(params):
    def mat(w):                                             # HWIO -> (9*Cin, Cout)
        kh, kw, ci, co = w.shape
        return w.reshape(kh * kw * ci, co)

    Ch = params["w0"].shape[-1]
    C2 = Ch // 2
    w21 = params["w21"][0, 0]                               # (2*Ch, Ch)
    return dict(
        w0=mat(params["w0"]),   b0=params["b0"].reshape(1, -1),
        w11=mat(params["w11"]), b11=params["b11"].reshape(1, -1),
        w12=mat(params["w12"]), b12=params["b12"].reshape(1, -1),
        w21a=w21[:Ch], w21b=w21[Ch:Ch + C2], w21c=w21[Ch + C2:],
        b21=params["b21"].reshape(1, -1),
        w2=mat(params["w2"]),   b2=params["b2"].reshape(1, -1),
        w3=mat(params["w3"]),   b3=params["b3"].reshape(1, -1),
    )


# ----------------------------------------------------------------------------
# Public forward: NCHW in / NCHW out (matches the PyTorch module)
# ----------------------------------------------------------------------------
def res_block_forward(x_nchw, params):
    x = jnp.transpose(x_nchw, (0, 2, 3, 1)).astype(jnp.float32)   # NCHW -> NHWC
    N, H, W, Ch = x.shape
    p = _prep_params(params)

    weight_args = [p["w0"], p["b0"], p["w11"], p["b11"], p["w12"], p["b12"],
                   p["w21a"], p["w21b"], p["w21c"], p["b21"],
                   p["w2"], p["b2"], p["w3"], p["b3"]]

    io_spec = pl.BlockSpec((None, H, W, Ch), lambda n: (n, 0, 0, 0))
    w_specs = [pl.BlockSpec(a.shape, lambda n: (0, 0)) for a in weight_args]

    out = pl.pallas_call(
        _res_block_kernel,
        out_shape=jax.ShapeDtypeStruct((N, H, W, Ch), jnp.float32),
        grid_spec=pltpu.PrefetchScalarGridSpec(
            num_scalar_prefetch=0,
            grid=(N,),
            in_specs=[io_spec] + w_specs,
            out_specs=pl.BlockSpec((None, H, W, Ch), lambda n: (n, 0, 0, 0)),
            scratch_shapes=[
                pltpu.VMEM((H + 2, W + 2, Ch), jnp.float32),   # reflect-pad(x, 1)
                pltpu.VMEM((H + 6, W + 6, Ch), jnp.float32),   # reflect-pad(t, 3)
                pltpu.VMEM((H + 2, W + 2, Ch), jnp.float32),   # reflect-pad(u1, 1)
                pltpu.VMEM((H + 2, W + 2, Ch), jnp.float32),   # reflect-pad(u2, 1)
            ]),
        compiler_params=pltpu.CompilerParams(
            dimension_semantics=("parallel",),
            vmem_limit_bytes=32 * 1024 * 1024),
    )(x, *weight_args)

    return jnp.transpose(out, (0, 3, 1, 2))                       # NHWC -> NCHW


# ----------------------------------------------------------------------------
# Deterministic synthetic ResBlock params (PyTorch OIHW -> HWIO)
# ----------------------------------------------------------------------------
def init_resblock_params(key, Ch, kSize=3):
    def conv_init(k, cout, cin, kh, kw):
        kw_key, kb_key = jax.random.split(k)
        w = 0.1 * jax.random.normal(kw_key, (cout, cin, kh, kw), jnp.float32)
        b = 0.1 * jax.random.normal(kb_key, (cout,), jnp.float32)
        return jnp.transpose(w, (2, 3, 1, 0)), b                  # OIHW -> HWIO

    ks = jax.random.split(key, 6)
    p = {}
    p["w0"],  p["b0"]  = conv_init(ks[0], Ch,      Ch,     kSize, kSize)
    p["w11"], p["b11"] = conv_init(ks[1], Ch // 2, Ch,     kSize, kSize)
    p["w12"], p["b12"] = conv_init(ks[2], Ch // 2, Ch,     kSize, kSize)
    p["w21"], p["b21"] = conv_init(ks[3], Ch,      Ch * 2, 1,     1)
    p["w2"],  p["b2"]  = conv_init(ks[4], Ch,      Ch,     kSize, kSize)
    p["w3"],  p["b3"]  = conv_init(ks[5], Ch,      Ch,     kSize, kSize)
    return p


# ----------------------------------------------------------------------------
# Pure-JAX reference (correctness check for the fused Pallas kernel)
# ----------------------------------------------------------------------------
def _conv_ref(x, w, b, pad, dilation=1):
    xp = jnp.pad(x, ((0, 0), (pad, pad), (pad, pad), (0, 0)),
                 mode="reflect") if pad > 0 else x
    y = jax.lax.conv_general_dilated(
        xp, w, window_strides=(1, 1), padding="VALID",
        rhs_dilation=(dilation, dilation),
        dimension_numbers=("NHWC", "HWIO", "NHWC"))
    return y + b.reshape(1, 1, 1, -1)


def _lrelu(x):
    return jnp.where(x >= 0, x, 0.2 * x)


def res_block_ref(x_nchw, p):
    x = jnp.transpose(x_nchw, (0, 2, 3, 1)).astype(jnp.float32)
    t = _lrelu(_conv_ref(x, p["w0"], p["b0"], pad=1))
    t2 = _lrelu(_conv_ref(t, p["w11"], p["b11"], pad=2, dilation=2))
    t3 = _lrelu(_conv_ref(t, p["w12"], p["b12"], pad=3, dilation=3))
    u = _conv_ref(jnp.concatenate([t, t2, t3], axis=-1), p["w21"], p["b21"],
                  pad=0)
    u = _lrelu(_conv_ref(u, p["w2"], p["b2"], pad=1))
    u = _lrelu(_conv_ref(u, p["w3"], p["b3"], pad=1))
    return jnp.transpose(x + u, (0, 3, 1, 2))


if __name__ == "__main__":
    key = jax.random.PRNGKey(0)
    k_x, k_p = jax.random.split(key)

    N, Ch, H, W = 2, 4, 16, 16
    x = jax.random.normal(k_x, (N, Ch, H, W), jnp.float32)
    params = init_resblock_params(k_p, Ch)

    out = jax.block_until_ready(jax.jit(res_block_forward)(x, params))
    ref = jax.block_until_ready(res_block_ref(x, params))

    assert out.shape == (N, Ch, H, W)
    max_err = float(jnp.max(jnp.abs(out - ref)))
    assert jnp.allclose(out, ref, atol=2e-4, rtol=2e-4), max_err

    print("KERNEL_OK")
</pallas_src>

<mosaic_0001>
module attributes {stable_mosaic.version = 11 : i64} {
  func.func @_res_block_kernel(%arg0: i32, %arg1: memref<1x16x16x4xf32, #tpu.memory_space<vmem>>, %arg2: memref<36x4xf32, #tpu.memory_space<vmem>>, %arg3: memref<1x4xf32, #tpu.memory_space<vmem>>, %arg4: memref<36x2xf32, #tpu.memory_space<vmem>>, %arg5: memref<1x2xf32, #tpu.memory_space<vmem>>, %arg6: memref<36x2xf32, #tpu.memory_space<vmem>>, %arg7: memref<1x2xf32, #tpu.memory_space<vmem>>, %arg8: memref<4x4xf32, #tpu.memory_space<vmem>>, %arg9: memref<2x4xf32, #tpu.memory_space<vmem>>, %arg10: memref<2x4xf32, #tpu.memory_space<vmem>>, %arg11: memref<1x4xf32, #tpu.memory_space<vmem>>, %arg12: memref<36x4xf32, #tpu.memory_space<vmem>>, %arg13: memref<1x4xf32, #tpu.memory_space<vmem>>, %arg14: memref<36x4xf32, #tpu.memory_space<vmem>>, %arg15: memref<1x4xf32, #tpu.memory_space<vmem>>, %arg16: memref<1x16x16x4xf32, #tpu.memory_space<vmem>>, %arg17: memref<18x18x4xf32, #tpu.memory_space<vmem>>, %arg18: memref<22x22x4xf32, #tpu.memory_space<vmem>>, %arg19: memref<18x18x4xf32, #tpu.memory_space<vmem>>, %arg20: memref<18x18x4xf32, #tpu.memory_space<vmem>>) attributes {dimension_semantics = [#tpu.dimension_semantics<parallel>], iteration_bounds = array<i64: 2>, scalar_prefetch = 0 : i64, scratch_operands = 4 : i64, tpu.core_type = #tpu.core_type<tc>, window_params = [{transform_indices = @transform_0, window_bounds = array<i64: 1, 16, 16, 4>}, {pipeline_mode = #tpu.pipeline_mode<synchronous>, transform_indices = @transform_1, window_bounds = array<i64: 36, 4>}, {pipeline_mode = #tpu.pipeline_mode<synchronous>, transform_indices = @transform_2, window_bounds = array<i64: 1, 4>}, {pipeline_mode = #tpu.pipeline_mode<synchronous>, transform_indices = @transform_3, window_bounds = array<i64: 36, 2>}, {pipeline_mode = #tpu.pipeline_mode<synchronous>, transform_indices = @transform_4, window_bounds = array<i64: 1, 2>}, {pipeline_mode = #tpu.pipeline_mode<synchronous>, transform_indices = @transform_5, window_bounds = array<i64: 36, 2>}, {pipeline_mode = #tpu.pipeline_mode<synchronous>, transform_indices = @transform_6, window_bounds = array<i64: 1, 2>}, {pipeline_mode = #tpu.pipeline_mode<synchronous>, transform_indices = @transform_7, window_bounds = array<i64: 4, 4>}, {pipeline_mode = #tpu.pipeline_mode<synchronous>, transform_indices = @transform_8, window_bounds = array<i64: 2, 4>}, {pipeline_mode = #tpu.pipeline_mode<synchronous>, transform_indices = @transform_9, window_bounds = array<i64: 2, 4>}, {pipeline_mode = #tpu.pipeline_mode<synchronous>, transform_indices = @transform_10, window_bounds = array<i64: 1, 4>}, {pipeline_mode = #tpu.pipeline_mode<synchronous>, transform_indices = @transform_11, window_bounds = array<i64: 36, 4>}, {pipeline_mode = #tpu.pipeline_mode<synchronous>, transform_indices = @transform_12, window_bounds = array<i64: 1, 4>}, {pipeline_mode = #tpu.pipeline_mode<synchronous>, transform_indices = @transform_13, window_bounds = array<i64: 36, 4>}, {pipeline_mode = #tpu.pipeline_mode<synchronous>, transform_indices = @transform_14, window_bounds = array<i64: 1, 4>}, {transform_indices = @transform_15, window_bounds = array<i64: 1, 16, 16, 4>}]} {
    %c0 = arith.constant 0 : index
    %c0_0 = arith.constant 0 : index
    %c0_1 = arith.constant 0 : index
    %c0_2 = arith.constant 0 : index
    %0 = vector.load %arg1[%c0, %c0_0, %c0_1, %c0_2] : memref<1x16x16x4xf32, #tpu.memory_space<vmem>>, vector<1x16x16x4xf32>
    %1 = vector.shape_cast %0 : vector<1x16x16x4xf32> to vector<16x16x4xf32>
    %2 = vector.extract_strided_slice %1 {offsets = [1, 0, 0], sizes = [1, 16, 4], strides = [1, 1, 1]} : vector<16x16x4xf32> to vector<1x16x4xf32>
    %3 = vector.extract_strided_slice %1 {offsets = [14, 0, 0], sizes = [1, 16, 4], strides = [1, 1, 1]} : vector<16x16x4xf32> to vector<1x16x4xf32>
    %4 = tpu.concatenate %2, %1, %3 in 0 : vector<1x16x4xf32>, vector<16x16x4xf32>, vector<1x16x4xf32> -> vector<18x16x4xf32>
    %c0_3 = arith.constant 0 : index
    %c1 = arith.constant 1 : index
    %c0_4 = arith.constant 0 : index
    %5 = vector.load %arg17[%c0_3, %c1, %c0_4] : memref<18x18x4xf32, #tpu.memory_space<vmem>>, vector<18x16x4xf32>
    tpu.vector_store %arg17[%c0_3, %c1, %c0_4], %4 {strides = array<i32>} : memref<18x18x4xf32, #tpu.memory_space<vmem>>, vector<18x16x4xf32>,
    %6 = vector.extract_strided_slice %4 {offsets = [0, 1, 0], sizes = [18, 1, 4], strides = [1, 1, 1]} : vector<18x16x4xf32> to vector<18x1x4xf32>
    %c0_5 = arith.constant 0 : index
    %c0_6 = arith.constant 0 : index
    %c0_7 = arith.constant 0 : index
    %7 = vector.load %arg17[%c0_5, %c0_6, %c0_7] : memref<18x18x4xf32, #tpu.memory_space<vmem>>, vector<18x1x4xf32>
    tpu.vector_store %arg17[%c0_5, %c0_6, %c0_7], %6 {strides = array<i32>} : memref<18x18x4xf32, #tpu.memory_space<vmem>>, vector<18x1x4xf32>,
    %8 = vector.extract_strided_slice %4 {offsets = [0, 14, 0], sizes = [18, 1, 4], strides = [1, 1, 1]} : vector<18x16x4xf32> to vector<18x1x4xf32>
    %c0_8 = arith.constant 0 : index
    %c17 = arith.constant 17 : index
    %c0_9 = arith.constant 0 : index
    %9 = vector.load %arg17[%c0_8, %c17, %c0_9] : memref<18x18x4xf32, #tpu.memory_space<vmem>>, vector<18x1x4xf32>
    tpu.vector_store %arg17[%c0_8, %c17, %c0_9], %8 {strides = array<i32>} : memref<18x18x4xf32, #tpu.memory_space<vmem>>, vector<18x1x4xf32>,
    %c0_10 = arith.constant 0 : index
    %c0_11 = arith.constant 0 : index
    %10 = vector.load %arg2[%c0_10, %c0_11] : memref<36x4xf32, #tpu.memory_space<vmem>>, vector<36x4xf32>
    %cst = arith.constant 0.000000e+00 : f32
    %11 = vector.broadcast %cst : f32 to vector<256x4xf32>
    %c0_12 = arith.constant 0 : index
    %c0_13 = arith.constant 0 : index
    %c0_14 = arith.constant 0 : index
    %12 = vector.load %arg17[%c0_12, %c0_13, %c0_14] : memref<18x18x4xf32, #tpu.memory_space<vmem>>, vector<16x16x4xf32>
    %13 = vector.shape_cast %12 : vector<16x16x4xf32> to vector<256x4xf32>
    %14 = vector.extract_strided_slice %10 {offsets = [0, 0], sizes = [4, 4], strides = [1, 1]} : vector<36x4xf32> to vector<4x4xf32>
    %cst_15 = arith.constant dense<0.000000e+00> : vector<256x4xf32>
    %15 = tpu.matmul %13, %14, %cst_15 {dimension_numbers = #tpu.dot_dimension_numbers<[1], [0], [0], [1], [0, 0, 1, 1], [], []>} : vector<256x4xf32>, vector<4x4xf32>, vector<256x4xf32> -> vector<256x4xf32>
    %16 = arith.addf %11, %15 : vector<256x4xf32>
    %c0_16 = arith.constant 0 : index
    %c1_17 = arith.constant 1 : index
    %c0_18 = arith.constant 0 : index
    %17 = vector.load %arg17[%c0_16, %c1_17, %c0_18] : memref<18x18x4xf32, #tpu.memory_space<vmem>>, vector<16x16x4xf32>
    %18 = vector.shape_cast %17 : vector<16x16x4xf32> to vector<256x4xf32>
    %19 = vector.extract_strided_slice %10 {offsets = [4, 0], sizes = [4, 4], strides = [1, 1]} : vector<36x4xf32> to vector<4x4xf32>
    %cst_19 = arith.constant dense<0.000000e+00> : vector<256x4xf32>
    %20 = tpu.matmul %18, %19, %cst_19 {dimension_numbers = #tpu.dot_dimension_numbers<[1], [0], [0], [1], [0, 0, 1, 1], [], []>} : vector<256x4xf32>, vector<4x4xf32>, vector<256x4xf32> -> vector<256x4xf32>
    %21 = arith.addf %16, %20 : vector<256x4xf32>
    %c0_20 = arith.constant 0 : index
    %c2 = arith.constant 2 : index
    %c0_21 = arith.constant 0 : index
    %22 = vector.load %arg17[%c0_20, %c2, %c0_21] : memref<18x18x4xf32, #tpu.memory_space<vmem>>, vector<16x16x4xf32>
    %23 = vector.shape_cast %22 : vector<16x16x4xf32> to vector<256x4xf32>
    %24 = vector.extract_strided_slice %10 {offsets = [8, 0], sizes = [4, 4], strides = [1, 1]} : vector<36x4xf32> to vector<4x4xf32>
    %cst_22 = arith.constant dense<0.000000e+00> : vector<256x4xf32>
    %25 = tpu.matmul %23, %24, %cst_22 {dimension_numbers = #tpu.dot_dimension_numbers<[1], [0], [0], [1], [0, 0, 1, 1], [], []>} : vector<256x4xf32>, vector<4x4xf32>, vector<256x4xf32> -> vector<256x4xf32>
    %26 = arith.addf %21, %25 : vector<256x4xf32>
    %c1_23 = arith.constant 1 : index
    %c0_24 = arith.constant 0 : index
    %c0_25 = arith.constant 0 : index
    %27 = vector.load %arg17[%c1_23, %c0_24, %c0_25] : memref<18x18x4xf32, #tpu.memory_space<vmem>>, vector<16x16x4xf32>
    %28 = vector.shape_cast %27 : vector<16x16x4xf32> to vector<256x4xf32>
    %29 = vector.extract_strided_slice %10 {offsets = [12, 0], sizes = [4, 4], strides = [1, 1]} : vector<36x4xf32> to vector<4x4xf32>
    %cst_26 = arith.constant dense<0.000000e+00> : vector<256x4xf32>
    %30 = tpu.matmul %28, %29, %cst_26 {dimension_numbers = #tpu.dot_dimension_numbers<[1], [0], [0], [1], [0, 0, 1, 1], [], []>} : vector<256x4xf32>, vector<4x4xf32>, vector<256x4xf32> -> vector<256x4xf32>
    %31 = arith.addf %26, %30 : vector<256x4xf32>
    %c1_27 = arith.constant 1 : index
    %c1_28 = arith.constant 1 : index
    %c0_29 = arith.constant 0 : index
    %32 = vector.load %arg17[%c1_27, %c1_28, %c0_29] : memref<18x18x4xf32, #tpu.memory_space<vmem>>, vector<16x16x4xf32>
    %33 = vector.shape_cast %32 : vector<16x16x4xf32> to vector<256x4xf32>
    %34 = vector.extract_strided_slice %10 {offsets = [16, 0], sizes = [4, 4], strides = [1, 1]} : vector<36x4xf32> to vector<4x4xf32>
    %cst_30 = arith.constant dense<0.000000e+00> : vector<256x4xf32>
    %35 = tpu.matmul %33, %34, %cst_30 {dimension_numbers = #tpu.dot_dimension_numbers<[1], [0], [0], [1], [0, 0, 1, 1], [], []>} : vector<256x4xf32>, vector<4x4xf32>, vector<256x4xf32> -> vector<256x4xf32>
    %36 = arith.addf %31, %35 : vector<256x4xf32>
    %c1_31 = arith.constant 1 : index
    %c2_32 = arith.constant 2 : index
    %c0_33 = arith.constant 0 : index
    %37 = vector.load %arg17[%c1_31, %c2_32, %c0_33] : memref<18x18x4xf32, #tpu.memory_space<vmem>>, vector<16x16x4xf32>
    %38 = vector.shape_cast %37 : vector<16x16x4xf32> to vector<256x4xf32>
    %39 = vector.extract_strided_slice %10 {offsets = [20, 0], sizes = [4, 4], strides = [1, 1]} : vector<36x4xf32> to vector<4x4xf32>
    %cst_34 = arith.constant dense<0.000000e+00> : vector<256x4xf32>
    %40 = tpu.matmul %38, %39, %cst_34 {dimension_numbers = #tpu.dot_dimension_numbers<[1], [0], [0], [1], [0, 0, 1, 1], [], []>} : vector<256x4xf32>, vector<4x4xf32>, vector<256x4xf32> -> vector<256x4xf32>
    %41 = arith.addf %36, %40 : vector<256x4xf32>
    %c2_35 = arith.constant 2 : index
    %c0_36 = arith.constant 0 : index
    %c0_37 = arith.constant 0 : index
    %42 = vector.load %arg17[%c2_35, %c0_36, %c0_37] : memref<18x18x4xf32, #tpu.memory_space<vmem>>, vector<16x16x4xf32>
    %43 = vector.shape_cast %42 : vector<16x16x4xf32> to vector<256x4xf32>
    %44 = vector.extract_strided_slice %10 {offsets = [24, 0], sizes = [4, 4], strides = [1, 1]} : vector<36x4xf32> to vector<4x4xf32>
    %cst_38 = arith.constant dense<0.000000e+00> : vector<256x4xf32>
    %45 = tpu.matmul %43, %44, %cst_38 {dimension_numbers = #tpu.dot_dimension_numbers<[1], [0], [0], [1], [0, 0, 1, 1], [], []>} : vector<256x4xf32>, vector<4x4xf32>, vector<256x4xf32> -> vector<256x4xf32>
    %46 = arith.addf %41, %45 : vector<256x4xf32>
    %c2_39 = arith.constant 2 : index
    %c1_40 = arith.constant 1 : index
    %c0_41 = arith.constant 0 : index
    %47 = vector.load %arg17[%c2_39, %c1_40, %c0_41] : memref<18x18x4xf32, #tpu.memory_space<vmem>>, vector<16x16x4xf32>
    %48 = vector.shape_cast %47 : vector<16x16x4xf32> to vector<256x4xf32>
    %49 = vector.extract_strided_slice %10 {offsets = [28, 0], sizes = [4, 4], strides = [1, 1]} : vector<36x4xf32> to vector<4x4xf32>
    %cst_42 = arith.constant dense<0.000000e+00> : vector<256x4xf32>
    %50 = tpu.matmul %48, %49, %cst_42 {dimension_numbers = #tpu.dot_dimension_numbers<[1], [0], [0], [1], [0, 0, 1, 1], [], []>} : vector<256x4xf32>, vector<4x4xf32>, vector<256x4xf32> -> vector<256x4xf32>
    %51 = arith.addf %46, %50 : vector<256x4xf32>
    %c2_43 = arith.constant 2 : index
    %c2_44 = arith.constant 2 : index
    %c0_45 = arith.constant 0 : index
    %52 = vector.load %arg17[%c2_43, %c2_44, %c0_45] : memref<18x18x4xf32, #tpu.memory_space<vmem>>, vector<16x16x4xf32>
    %53 = vector.shape_cast %52 : vector<16x16x4xf32> to vector<256x4xf32>
    %54 = vector.extract_strided_slice %10 {offsets = [32, 0], sizes = [4, 4], strides = [1, 1]} : vector<36x4xf32> to vector<4x4xf32>
    %cst_46 = arith.constant dense<0.000000e+00> : vector<256x4xf32>
    %55 = tpu.matmul %53, %54, %cst_46 {dimension_numbers = #tpu.dot_dimension_numbers<[1], [0], [0], [1], [0, 0, 1, 1], [], []>} : vector<256x4xf32>, vector<4x4xf32>, vector<256x4xf32> -> vector<256x4xf32>
    %56 = arith.addf %51, %55 : vector<256x4xf32>
    %c0_47 = arith.constant 0 : index
    %c0_48 = arith.constant 0 : index
    %57 = vector.load %arg3[%c0_47, %c0_48] : memref<1x4xf32, #tpu.memory_space<vmem>>, vector<1x4xf32>
    %58 = vector.broadcast %57 : vector<1x4xf32> to vector<256x4xf32>
    %59 = arith.addf %56, %58 : vector<256x4xf32>
    %cst_49 = arith.constant 0.000000e+00 : f32
    %60 = vector.broadcast %cst_49 : f32 to vector<256x4xf32>
    %61 = arith.cmpf oge, %59, %60 : vector<256x4xf32>
    %cst_50 = arith.constant 2.000000e-01 : f32
    %62 = vector.broadcast %cst_50 : f32 to vector<256x4xf32>
    %63 = arith.mulf %62, %59 : vector<256x4xf32>
    %64 = arith.select %61, %59, %63 : vector<256x4xi1>, vector<256x4xf32>
    %65 = vector.shape_cast %64 : vector<256x4xf32> to vector<16x16x4xf32>
    %66 = vector.extract_strided_slice %65 {offsets = [3, 0, 0], sizes = [1, 16, 4], strides = [1, 1, 1]} : vector<16x16x4xf32> to vector<1x16x4xf32>
    %67 = vector.extract_strided_slice %65 {offsets = [2, 0, 0], sizes = [1, 16, 4], strides = [1, 1, 1]} : vector<16x16x4xf32> to vector<1x16x4xf32>
    %68 = vector.extract_strided_slice %65 {offsets = [1, 0, 0], sizes = [1, 16, 4], strides = [1, 1, 1]} : vector<16x16x4xf32> to vector<1x16x4xf32>
    %69 = vector.extract_strided_slice %65 {offsets = [14, 0, 0], sizes = [1, 16, 4], strides = [1, 1, 1]} : vector<16x16x4xf32> to vector<1x16x4xf32>
    %70 = vector.extract_strided_slice %65 {offsets = [13, 0, 0], sizes = [1, 16, 4], strides = [1, 1, 1]} : vector<16x16x4xf32> to vector<1x16x4xf32>
    %71 = vector.extract_strided_slice %65 {offsets = [12, 0, 0], sizes = [1, 16, 4], strides = [1, 1, 1]} : vector<16x16x4xf32> to vector<1x16x4xf32>
    %72 = tpu.concatenate %66, %67, %68, %65, %69, %70, %71 in 0 : vector<1x16x4xf32>, vector<1x16x4xf32>, vector<1x16x4xf32>, vector<16x16x4xf32>, vector<1x16x4xf32>, vector<1x16x4xf32>, vector<1x16x4xf32> -> vector<22x16x4xf32>
    %c0_51 = arith.constant 0 : index
    %c3 = arith.constant 3 : index
    %c0_52 = arith.constant 0 : index
    %73 = vector.load %arg18[%c0_51, %c3, %c0_52] : memref<22x22x4xf32, #tpu.memory_space<vmem>>, vector<22x16x4xf32>
    tpu.vector_store %arg18[%c0_51, %c3, %c0_52], %72 {strides = array<i32>} : memref<22x22x4xf32, #tpu.memory_space<vmem>>, vector<22x16x4xf32>,
    %74 = vector.extract_strided_slice %72 {offsets = [0, 1, 0], sizes = [22, 1, 4], strides = [1, 1, 1]} : vector<22x16x4xf32> to vector<22x1x4xf32>
    %c0_53 = arith.constant 0 : index
    %c2_54 = arith.constant 2 : index
    %c0_55 = arith.constant 0 : index
    %75 = vector.load %arg18[%c0_53, %c2_54, %c0_55] : memref<22x22x4xf32, #tpu.memory_space<vmem>>, vector<22x1x4xf32>
    tpu.vector_store %arg18[%c0_53, %c2_54, %c0_55], %74 {strides = array<i32>} : memref<22x22x4xf32, #tpu.memory_space<vmem>>, vector<22x1x4xf32>,
    %76 = vector.extract_strided_slice %72 {offsets = [0, 14, 0], sizes = [22, 1, 4], strides = [1, 1, 1]} : vector<22x16x4xf32> to vector<22x1x4xf32>
    %c0_56 = arith.constant 0 : index
    %c19 = arith.constant 19 : index
    %c0_57 = arith.constant 0 : index
    %77 = vector.load %arg18[%c0_56, %c19, %c0_57] : memref<22x22x4xf32, #tpu.memory_space<vmem>>, vector<22x1x4xf32>
    tpu.vector_store %arg18[%c0_56, %c19, %c0_57], %76 {strides = array<i32>} : memref<22x22x4xf32, #tpu.memory_space<vmem>>, vector<22x1x4xf32>,
    %78 = vector.extract_strided_slice %72 {offsets = [0, 2, 0], sizes = [22, 1, 4], strides = [1, 1, 1]} : vector<22x16x4xf32> to vector<22x1x4xf32>
    %c0_58 = arith.constant 0 : index
    %c1_59 = arith.constant 1 : index
    %c0_60 = arith.constant 0 : index
    %79 = vector.load %arg18[%c0_58, %c1_59, %c0_60] : memref<22x22x4xf32, #tpu.memory_space<vmem>>, vector<22x1x4xf32>
    tpu.vector_store %arg18[%c0_58, %c1_59, %c0_60], %78 {strides = array<i32>} : memref<22x22x4xf32, #tpu.memory_space<vmem>>, vector<22x1x4xf32>,
    %80 = vector.extract_strided_slice %72 {offsets = [0, 13, 0], sizes = [22, 1, 4], strides = [1, 1, 1]} : vector<22x16x4xf32> to vector<22x1x4xf32>
    %c0_61 = arith.constant 0 : index
    %c20 = arith.constant 20 : index
    %c0_62 = arith.constant 0 : index
    %81 = vector.load %arg18[%c0_61, %c20, %c0_62] : memref<22x22x4xf32, #tpu.memory_space<vmem>>, vector<22x1x4xf32>
    tpu.vector_store %arg18[%c0_61, %c20, %c0_62], %80 {strides = array<i32>} : memref<22x22x4xf32, #tpu.memory_space<vmem>>, vector<22x1x4xf32>,
    %82 = vector.extract_strided_slice %72 {offsets = [0, 3, 0], sizes = [22, 1, 4], strides = [1, 1, 1]} : vector<22x16x4xf32> to vector<22x1x4xf32>
    %c0_63 = arith.constant 0 : index
    %c0_64 = arith.constant 0 : index
    %c0_65 = arith.constant 0 : index
    %83 = vector.load %arg18[%c0_63, %c0_64, %c0_65] : memref<22x22x4xf32, #tpu.memory_space<vmem>>, vector<22x1x4xf32>
    tpu.vector_store %arg18[%c0_63, %c0_64, %c0_65], %82 {strides = array<i32>} : memref<22x22x4xf32, #tpu.memory_space<vmem>>, vector<22x1x4xf32>,
    %84 = vector.extract_strided_slice %72 {offsets = [0, 12, 0], sizes = [22, 1, 4], strides = [1, 1, 1]} : vector<22x16x4xf32> to vector<22x1x4xf32>
    %c0_66 = arith.constant 0 : index
    %c21 = arith.constant 21 : index
    %c0_67 = arith.constant 0 : index
    %85 = vector.load %arg18[%c0_66, %c21, %c0_67] : memref<22x22x4xf32, #tpu.memory_space<vmem>>, vector<22x1x4xf32>
    tpu.vector_store %arg18[%c0_66, %c21, %c0_67], %84 {strides = array<i32>} : memref<22x22x4xf32, #tpu.memory_space<vmem>>, vector<22x1x4xf32>,
    %c0_68 = arith.constant 0 : index
    %c0_69 = arith.constant 0 : index
    %86 = vector.load %arg4[%c0_68, %c0_69] : memref<36x2xf32, #tpu.memory_space<vmem>>, vector<36x2xf32>
    %cst_70 = arith.constant 0.000000e+00 : f32
    %87 = vector.broadcast %cst_70 : f32 to vector<256x2xf32>
    %c1_71 = arith.constant 1 : index
    %c1_72 = arith.constant 1 : index
    %c0_73 = arith.constant 0 : index
    %88 = vector.load %arg18[%c1_71, %c1_72, %c0_73] : memref<22x22x4xf32, #tpu.memory_space<vmem>>, vector<16x16x4xf32>
    %89 = vector.shape_cast %88 : vector<16x16x4xf32> to vector<256x4xf32>
    %90 = vector.extract_strided_slice %86 {offsets = [0, 0], sizes = [4, 2], strides = [1, 1]} : vector<36x2xf32> to vector<4x2xf32>
    %cst_74 = arith.constant dense<0.000000e+00> : vector<256x2xf32>
    %91 = tpu.matmul %89, %90, %cst_74 {dimension_numbers = #tpu.dot_dimension_numbers<[1], [0], [0], [1], [0, 0, 1, 1], [], []>} : vector<256x4xf32>, vector<4x2xf32>, vector<256x2xf32> -> vector<256x2xf32>
    %92 = arith.addf %87, %91 : vector<256x2xf32>
    %c1_75 = arith.constant 1 : index
    %c3_76 = arith.constant 3 : index
    %c0_77 = arith.constant 0 : index
    %93 = vector.load %arg18[%c1_75, %c3_76, %c0_77] : memref<22x22x4xf32, #tpu.memory_space<vmem>>, vector<16x16x4xf32>
    %94 = vector.shape_cast %93 : vector<16x16x4xf32> to vector<256x4xf32>
    %95 = vector.extract_strided_slice %86 {offsets = [4, 0], sizes = [4, 2], strides = [1, 1]} : vector<36x2xf32> to vector<4x2xf32>
    %cst_78 = arith.constant dense<0.000000e+00> : vector<256x2xf32>
    %96 = tpu.matmul %94, %95, %cst_78 {dimension_numbers = #tpu.dot_dimension_numbers<[1], [0], [0], [1], [0, 0, 1, 1], [], []>} : vector<256x4xf32>, vector<4x2xf32>, vector<256x2xf32> -> vector<256x2xf32>
    %97 = arith.addf %92, %96 : vector<256x2xf32>
    %c1_79 = arith.constant 1 : index
    %c5 = arith.constant 5 : index
    %c0_80 = arith.constant 0 : index
    %98 = vector.load %arg18[%c1_79, %c5, %c0_80] : memref<22x22x4xf32, #tpu.memory_space<vmem>>, vector<16x16x4xf32>
    %99 = vector.shape_cast %98 : vector<16x16x4xf32> to vector<256x4xf32>
    %100 = vector.extract_strided_slice %86 {offsets = [8, 0], sizes = [4, 2], strides = [1, 1]} : vector<36x2xf32> to vector<4x2xf32>
    %cst_81 = arith.constant dense<0.000000e+00> : vector<256x2xf32>
    %101 = tpu.matmul %99, %100, %cst_81 {dimension_numbers = #tpu.dot_dimension_numbers<[1], [0], [0], [1], [0, 0, 1, 1], [], []>} : vector<256x4xf32>, vector<4x2xf32>, vector<256x2xf32> -> vector<256x2xf32>
    %102 = arith.addf %97, %101 : vector<256x2xf32>
    %c3_82 = arith.constant 3 : index
    %c1_83 = arith.constant 1 : index
    %c0_84 = arith.constant 0 : index
    %103 = vector.load %arg18[%c3_82, %c1_83, %c0_84] : memref<22x22x4xf32, #tpu.memory_space<vmem>>, vector<16x16x4xf32>
    %104 = vector.shape_cast %103 : vector<16x16x4xf32> to vector<256x4xf32>
    %105 = vector.extract_strided_slice %86 {offsets = [12, 0], sizes = [4, 2], strides = [1, 1]} : vector<36x2xf32> to vector<4x2xf32>
    %cst_85 = arith.constant dense<0.000000e+00> : vector<256x2xf32>
    %106 = tpu.matmul %104, %105, %cst_85 {dimension_numbers = #tpu.dot_dimension_numbers<[1], [0], [0], [1], [0, 0, 1, 1], [], []>} : vector<256x4xf32>, vector<4x2xf32>, vector<256x2xf32> -> vector<256x2xf32>
    %107 = arith.addf %102, %106 : vector<256x2xf32>
    %c3_86 = arith.constant 3 : index
    %c3_87 = arith.constant 3 : index
    %c0_88 = arith.constant 0 : index
    %108 = vector.load %arg18[%c3_86, %c3_87, %c0_88] : memref<22x22x4xf32, #tpu.memory_space<vmem>>, vector<16x16x4xf32>
    %109 = vector.shape_cast %108 : vector<16x16x4xf32> to vector<256x4xf32>
    %110 = vector.extract_strided_slice %86 {offsets = [16, 0], sizes = [4, 2], strides = [1, 1]} : vector<36x2xf32> to vector<4x2xf32>
    %cst_89 = arith.constant dense<0.000000e+00> : vector<256x2xf32>
    %111 = tpu.matmul %109, %110, %cst_89 {dimension_numbers = #tpu.dot_dimension_numbers<[1], [0], [0], [1], [0, 0, 1, 1], [], []>} : vector<256x4xf32>, vector<4x2xf32>, vector<256x2xf32> -> vector<256x2xf32>
    %112 = arith.addf %107, %111 : vector<256x2xf32>
    %c3_90 = arith.constant 3 : index
    %c5_91 = arith.constant 5 : index
    %c0_92 = arith.constant 0 : index
    %113 = vector.load %arg18[%c3_90, %c5_91, %c0_92] : memref<22x22x4xf32, #tpu.memory_space<vmem>>, vector<16x16x4xf32>
    %114 = vector.shape_cast %113 : vector<16x16x4xf32> to vector<256x4xf32>
    %115 = vector.extract_strided_slice %86 {offsets = [20, 0], sizes = [4, 2], strides = [1, 1]} : vector<36x2xf32> to vector<4x2xf32>
    %cst_93 = arith.constant dense<0.000000e+00> : vector<256x2xf32>
    %116 = tpu.matmul %114, %115, %cst_93 {dimension_numbers = #tpu.dot_dimension_numbers<[1], [0], [0], [1], [0, 0, 1, 1], [], []>} : vector<256x4xf32>, vector<4x2xf32>, vector<256x2xf32> -> vector<256x2xf32>
    %117 = arith.addf %112, %116 : vector<256x2xf32>
    %c5_94 = arith.constant 5 : index
    %c1_95 = arith.constant 1 : index
    %c0_96 = arith.constant 0 : index
    %118 = vector.load %arg18[%c5_94, %c1_95, %c0_96] : memref<22x22x4xf32, #tpu.memory_space<vmem>>, vector<16x16x4xf32>
    %119 = vector.shape_cast %118 : vector<16x16x4xf32> to vector<256x4xf32>
    %120 = vector.extract_strided_slice %86 {offsets = [24, 0], sizes = [4, 2], strides = [1, 1]} : vector<36x2xf32> to vector<4x2xf32>
    %cst_97 = arith.constant dense<0.000000e+00> : vector<256x2xf32>
    %121 = tpu.matmul %119, %120, %cst_97 {dimension_numbers = #tpu.dot_dimension_numbers<[1], [0], [0], [1], [0, 0, 1, 1], [], []>} : vector<256x4xf32>, vector<4x2xf32>, vector<256x2xf32> -> vector<256x2xf32>
    %122 = arith.addf %117, %121 : vector<256x2xf32>
    %c5_98 = arith.constant 5 : index
    %c3_99 = arith.constant 3 : index
    %c0_100 = arith.constant 0 : index
    %123 = vector.load %arg18[%c5_98, %c3_99, %c0_100] : memref<22x22x4xf32, #tpu.memory_space<vmem>>, vector<16x16x4xf32>
    %124 = vector.shape_cast %123 : vector<16x16x4xf32> to vector<256x4xf32>
    %125 = vector.extract_strided_slice %86 {offsets = [28, 0], sizes = [4, 2], strides = [1, 1]} : vector<36x2xf32> to vector<4x2xf32>
    %cst_101 = arith.constant dense<0.000000e+00> : vector<256x2xf32>
    %126 = tpu.matmul %124, %125, %cst_101 {dimension_numbers = #tpu.dot_dimension_numbers<[1], [0], [0], [1], [0, 0, 1, 1], [], []>} : vector<256x4xf32>, vector<4x2xf32>, vector<256x2xf32> -> vector<256x2xf32>
    %127 = arith.addf %122, %126 : vector<256x2xf32>
    %c5_102 = arith.constant 5 : index
    %c5_103 = arith.constant 5 : index
    %c0_104 = arith.constant 0 : index
    %128 = vector.load %arg18[%c5_102, %c5_103, %c0_104] : memref<22x22x4xf32, #tpu.memory_space<vmem>>, vector<16x16x4xf32>
    %129 = vector.shape_cast %128 : vector<16x16x4xf32> to vector<256x4xf32>
    %130 = vector.extract_strided_slice %86 {offsets = [32, 0], sizes = [4, 2], strides = [1, 1]} : vector<36x2xf32> to vector<4x2xf32>
    %cst_105 = arith.constant dense<0.000000e+00> : vector<256x2xf32>
    %131 = tpu.matmul %129, %130, %cst_105 {dimension_numbers = #tpu.dot_dimension_numbers<[1], [0], [0], [1], [0, 0, 1, 1], [], []>} : vector<256x4xf32>, vector<4x2xf32>, vector<256x2xf32> -> vector<256x2xf32>
    %132 = arith.addf %127, %131 : vector<256x2xf32>
    %c0_106 = arith.constant 0 : index
    %c0_107 = arith.constant 0 : index
    %133 = vector.load %arg5[%c0_106, %c0_107] : memref<1x2xf32, #tpu.memory_space<vmem>>, vector<1x2xf32>
    %134 = vector.broadcast %133 : vector<1x2xf32> to vector<256x2xf32>
    %135 = arith.addf %132, %134 : vector<256x2xf32>
    %cst_108 = arith.constant 0.000000e+00 : f32
    %136 = vector.broadcast %cst_108 : f32 to vector<256x2xf32>
    %137 = arith.cmpf oge, %135, %136 : vector<256x2xf32>
    %cst_109 = arith.constant 2.000000e-01 : f32
    %138 = vector.broadcast %cst_109 : f32 to vector<256x2xf32>
    %139 = arith.mulf %138, %135 : vector<256x2xf32>
    %140 = arith.select %137, %135, %139 : vector<256x2xi1>, vector<256x2xf32>
    %141 = vector.shape_cast %140 : vector<256x2xf32> to vector<16x16x2xf32>
    %c0_110 = arith.constant 0 : index
    %c0_111 = arith.constant 0 : index
    %142 = vector.load %arg6[%c0_110, %c0_111] : memref<36x2xf32, #tpu.memory_space<vmem>>, vector<36x2xf32>
    %cst_112 = arith.constant 0.000000e+00 : f32
    %143 = vector.broadcast %cst_112 : f32 to vector<256x2xf32>
    %c0_113 = arith.constant 0 : index
    %c0_114 = arith.constant 0 : index
    %c0_115 = arith.constant 0 : index
    %144 = vector.load %arg18[%c0_113, %c0_114, %c0_115] : memref<22x22x4xf32, #tpu.memory_space<vmem>>, vector<16x16x4xf32>
    %145 = vector.shape_cast %144 : vector<16x16x4xf32> to vector<256x4xf32>
    %146 = vector.extract_strided_slice %142 {offsets = [0, 0], sizes = [4, 2], strides = [1, 1]} : vector<36x2xf32> to vector<4x2xf32>
    %cst_116 = arith.constant dense<0.000000e+00> : vector<256x2xf32>
    %147 = tpu.matmul %145, %146, %cst_116 {dimension_numbers = #tpu.dot_dimension_numbers<[1], [0], [0], [1], [0, 0, 1, 1], [], []>} : vector<256x4xf32>, vector<4x2xf32>, vector<256x2xf32> -> vector<256x2xf32>
    %148 = arith.addf %143, %147 : vector<256x2xf32>
    %c0_117 = arith.constant 0 : index
    %c3_118 = arith.constant 3 : index
    %c0_119 = arith.constant 0 : index
    %149 = vector.load %arg18[%c0_117, %c3_118, %c0_119] : memref<22x22x4xf32, #tpu.memory_space<vmem>>, vector<16x16x4xf32>
    %150 = vector.shape_cast %149 : vector<16x16x4xf32> to vector<256x4xf32>
    %151 = vector.extract_strided_slice %142 {offsets = [4, 0], sizes = [4, 2], strides = [1, 1]} : vector<36x2xf32> to vector<4x2xf32>
    %cst_120 = arith.constant dense<0.000000e+00> : vector<256x2xf32>
    %152 = tpu.matmul %150, %151, %cst_120 {dimension_numbers = #tpu.dot_dimension_numbers<[1], [0], [0], [1], [0, 0, 1, 1], [], []>} : vector<256x4xf32>, vector<4x2xf32>, vector<256x2xf32> -> vector<256x2xf32>
    %153 = arith.addf %148, %152 : vector<256x2xf32>
    %c0_121 = arith.constant 0 : index
    %c6 = arith.constant 6 : index
    %c0_122 = arith.constant 0 : index
    %154 = vector.load %arg18[%c0_121, %c6, %c0_122] : memref<22x22x4xf32, #tpu.memory_space<vmem>>, vector<16x16x4xf32>
    %155 = vector.shape_cast %154 : vector<16x16x4xf32> to vector<256x4xf32>
    %156 = vector.extract_strided_slice %142 {offsets = [8, 0], sizes = [4, 2], strides = [1, 1]} : vector<36x2xf32> to vector<4x2xf32>
    %cst_123 = arith.constant dense<0.000000e+00> : vector<256x2xf32>
    %157 = tpu.matmul %155, %156, %cst_123 {dimension_numbers = #tpu.dot_dimension_numbers<[1], [0], [0], [1], [0, 0, 1, 1], [], []>} : vector<256x4xf32>, vector<4x2xf32>, vector<256x2xf32> -> vector<256x2xf32>
    %158 = arith.addf %153, %157 : vector<256x2xf32>
    %c3_124 = arith.constant 3 : index
    %c0_125 = arith.constant 0 : index
    %c0_126 = arith.constant 0 : index
    %159 = vector.load %arg18[%c3_124, %c0_125, %c0_126] : memref<22x22x4xf32, #tpu.memory_space<vmem>>, vector<16x16x4xf32>
    %160 = vector.shape_cast %159 : vector<16x16x4xf32> to vector<256x4xf32>
    %161 = vector.extract_strided_slice %142 {offsets = [12, 0], sizes = [4, 2], strides = [1, 1]} : vector<36x2xf32> to vector<4x2xf32>
    %cst_127 = arith.constant dense<0.000000e+00> : vector<256x2xf32>
    %162 = tpu.matmul %160, %161, %cst_127 {dimension_numbers = #tpu.dot_dimension_numbers<[1], [0], [0], [1], [0, 0, 1, 1], [], []>} : vector<256x4xf32>, vector<4x2xf32>, vector<256x2xf32> -> vector<256x2xf32>
    %163 = arith.addf %158, %162 : vector<256x2xf32>
    %c3_128 = arith.constant 3 : index
    %c3_129 = arith.constant 3 : index
    %c0_130 = arith.constant 0 : index
    %164 = vector.load %arg18[%c3_128, %c3_129, %c0_130] : memref<22x22x4xf32, #tpu.memory_space<vmem>>, vector<16x16x4xf32>
    %165 = vector.shape_cast %164 : vector<16x16x4xf32> to vector<256x4xf32>
    %166 = vector.extract_strided_slice %142 {offsets = [16, 0], sizes = [4, 2], strides = [1, 1]} : vector<36x2xf32> to vector<4x2xf32>
    %cst_131 = arith.constant dense<0.000000e+00> : vector<256x2xf32>
    %167 = tpu.matmul %165, %166, %cst_131 {dimension_numbers = #tpu.dot_dimension_numbers<[1], [0], [0], [1], [0, 0, 1, 1], [], []>} : vector<256x4xf32>, vector<4x2xf32>, vector<256x2xf32> -> vector<256x2xf32>
    %168 = arith.addf %163, %167 : vector<256x2xf32>
    %c3_132 = arith.constant 3 : index
    %c6_133 = arith.constant 6 : index
    %c0_134 = arith.constant 0 : index
    %169 = vector.load %arg18[%c3_132, %c6_133, %c0_134] : memref<22x22x4xf32, #tpu.memory_space<vmem>>, vector<16x16x4xf32>
    %170 = vector.shape_cast %169 : vector<16x16x4xf32> to vector<256x4xf32>
    %171 = vector.extract_strided_slice %142 {offsets = [20, 0], sizes = [4, 2], strides = [1, 1]} : vector<36x2xf32> to vector<4x2xf32>
    %cst_135 = arith.constant dense<0.000000e+00> : vector<256x2xf32>
    %172 = tpu.matmul %170, %171, %cst_135 {dimension_numbers = #tpu.dot_dimension_numbers<[1], [0], [0], [1], [0, 0, 1, 1], [], []>} : vector<256x4xf32>, vector<4x2xf32>, vector<256x2xf32> -> vector<256x2xf32>
    %173 = arith.addf %168, %172 : vector<256x2xf32>
    %c6_136 = arith.constant 6 : index
    %c0_137 = arith.constant 0 : index
    %c0_138 = arith.constant 0 : index
    %174 = vector.load %arg18[%c6_136, %c0_137, %c0_138] : memref<22x22x4xf32, #tpu.memory_space<vmem>>, vector<16x16x4xf32>
    %175 = vector.shape_cast %174 : vector<16x16x4xf32> to vector<256x4xf32>
    %176 = vector.extract_strided_slice %142 {offsets = [24, 0], sizes = [4, 2], strides = [1, 1]} : vector<36x2xf32> to vector<4x2xf32>
    %cst_139 = arith.constant dense<0.000000e+00> : vector<256x2xf32>
    %177 = tpu.matmul %175, %176, %cst_139 {dimension_numbers = #tpu.dot_dimension_numbers<[1], [0], [0], [1], [0, 0, 1, 1], [], []>} : vector<256x4xf32>, vector<4x2xf32>, vector<256x2xf32> -> vector<256x2xf32>
    %178 = arith.addf %173, %177 : vector<256x2xf32>
    %c6_140 = arith.constant 6 : index
    %c3_141 = arith.constant 3 : index
    %c0_142 = arith.constant 0 : index
    %179 = vector.load %arg18[%c6_140, %c3_141, %c0_142] : memref<22x22x4xf32, #tpu.memory_space<vmem>>, vector<16x16x4xf32>
    %180 = vector.shape_cast %179 : vector<16x16x4xf32> to vector<256x4xf32>
    %181 = vector.extract_strided_slice %142 {offsets = [28, 0], sizes = [4, 2], strides = [1, 1]} : vector<36x2xf32> to vector<4x2xf32>
    %cst_143 = arith.constant dense<0.000000e+00> : vector<256x2xf32>
    %182 = tpu.matmul %180, %181, %cst_143 {dimension_numbers = #tpu.dot_dimension_numbers<[1], [0], [0], [1], [0, 0, 1, 1], [], []>} : vector<256x4xf32>, vector<4x2xf32>, vector<256x2xf32> -> vector<256x2xf32>
    %183 = arith.addf %178, %182 : vector<256x2xf32>
    %c6_144 = arith.constant 6 : index
    %c6_145 = arith.constant 6 : index
    %c0_146 = arith.constant 0 : index
    %184 = vector.load %arg18[%c6_144, %c6_145, %c0_146] : memref<22x22x4xf32, #tpu.memory_space<vmem>>, vector<16x16x4xf32>
    %185 = vector.shape_cast %184 : vector<16x16x4xf32> to vector<256x4xf32>
    %186 = vector.extract_strided_slice %142 {offsets = [32, 0], sizes = [4, 2], strides = [1, 1]} : vector<36x2xf32> to vector<4x2xf32>
    %cst_147 = arith.constant dense<0.000000e+00> : vector<256x2xf32>
    %187 = tpu.matmul %185, %186, %cst_147 {dimension_numbers = #tpu.dot_dimension_numbers<[1], [0], [0], [1], [0, 0, 1, 1], [], []>} : vector<256x4xf32>, vector<4x2xf32>, vector<256x2xf32> -> vector<256x2xf32>
    %188 = arith.addf %183, %187 : vector<256x2xf32>
    %c0_148 = arith.constant 0 : index
    %c0_149 = arith.constant 0 : index
    %189 = vector.load %arg7[%c0_148, %c0_149] : memref<1x2xf32, #tpu.memory_space<vmem>>, vector<1x2xf32>
    %190 = vector.broadcast %189 : vector<1x2xf32> to vector<256x2xf32>
    %191 = arith.addf %188, %190 : vector<256x2xf32>
    %cst_150 = arith.constant 0.000000e+00 : f32
    %192 = vector.broadcast %cst_150 : f32 to vector<256x2xf32>
    %193 = arith.cmpf oge, %191, %192 : vector<256x2xf32>
    %cst_151 = arith.constant 2.000000e-01 : f32
    %194 = vector.broadcast %cst_151 : f32 to vector<256x2xf32>
    %195 = arith.mulf %194, %191 : vector<256x2xf32>
    %196 = arith.select %193, %191, %195 : vector<256x2xi1>, vector<256x2xf32>
    %197 = vector.shape_cast %196 : vector<256x2xf32> to vector<16x16x2xf32>
    %198 = vector.shape_cast %65 : vector<16x16x4xf32> to vector<256x4xf32>
    %c0_152 = arith.constant 0 : index
    %c0_153 = arith.constant 0 : index
    %199 = vector.load %arg8[%c0_152, %c0_153] : memref<4x4xf32, #tpu.memory_space<vmem>>, vector<4x4xf32>
    %cst_154 = arith.constant dense<0.000000e+00> : vector<256x4xf32>
    %200 = tpu.matmul %198, %199, %cst_154 {dimension_numbers = #tpu.dot_dimension_numbers<[1], [0], [0], [1], [0, 0, 1, 1], [], []>} : vector<256x4xf32>, vector<4x4xf32>, vector<256x4xf32> -> vector<256x4xf32>
    %201 = vector.shape_cast %141 : vector<16x16x2xf32> to vector<256x2xf32>
    %c0_155 = arith.constant 0 : index
    %c0_156 = arith.constant 0 : index
    %202 = vector.load %arg9[%c0_155, %c0_156] : memref<2x4xf32, #tpu.memory_space<vmem>>, vector<2x4xf32>
    %cst_157 = arith.constant dense<0.000000e+00> : vector<256x4xf32>
    %203 = tpu.matmul %201, %202, %cst_157 {dimension_numbers = #tpu.dot_dimension_numbers<[1], [0], [0], [1], [0, 0, 1, 1], [], []>} : vector<256x2xf32>, vector<2x4xf32>, vector<256x4xf32> -> vector<256x4xf32>
    %204 = arith.addf %200, %203 : vector<256x4xf32>
    %205 = vector.shape_cast %197 : vector<16x16x2xf32> to vector<256x2xf32>
    %c0_158 = arith.constant 0 : index
    %c0_159 = arith.constant 0 : index
    %206 = vector.load %arg10[%c0_158, %c0_159] : memref<2x4xf32, #tpu.memory_space<vmem>>, vector<2x4xf32>
    %cst_160 = arith.constant dense<0.000000e+00> : vector<256x4xf32>
    %207 = tpu.matmul %205, %206, %cst_160 {dimension_numbers = #tpu.dot_dimension_numbers<[1], [0], [0], [1], [0, 0, 1, 1], [], []>} : vector<256x2xf32>, vector<2x4xf32>, vector<256x4xf32> -> vector<256x4xf32>
    %208 = arith.addf %204, %207 : vector<256x4xf32>
    %c0_161 = arith.constant 0 : index
    %c0_162 = arith.constant 0 : index
    %209 = vector.load %arg11[%c0_161, %c0_162] : memref<1x4xf32, #tpu.memory_space<vmem>>, vector<1x4xf32>
    %210 = vector.broadcast %209 : vector<1x4xf32> to vector<256x4xf32>
    %211 = arith.addf %208, %210 : vector<256x4xf32>
    %212 = vector.shape_cast %211 : vector<256x4xf32> to vector<16x16x4xf32>
    %213 = vector.extract_strided_slice %212 {offsets = [1, 0, 0], sizes = [1, 16, 4], strides = [1, 1, 1]} : vector<16x16x4xf32> to vector<1x16x4xf32>
    %214 = vector.extract_strided_slice %212 {offsets = [14, 0, 0], sizes = [1, 16, 4], strides = [1, 1, 1]} : vector<16x16x4xf32> to vector<1x16x4xf32>
    %215 = tpu.concatenate %213, %212, %214 in 0 : vector<1x16x4xf32>, vector<16x16x4xf32>, vector<1x16x4xf32> -> vector<18x16x4xf32>
    %c0_163 = arith.constant 0 : index
    %c1_164 = arith.constant 1 : index
    %c0_165 = arith.constant 0 : index
    %216 = vector.load %arg19[%c0_163, %c1_164, %c0_165] : memref<18x18x4xf32, #tpu.memory_space<vmem>>, vector<18x16x4xf32>
    tpu.vector_store %arg19[%c0_163, %c1_164, %c0_165], %215 {strides = array<i32>} : memref<18x18x4xf32, #tpu.memory_space<vmem>>, vector<18x16x4xf32>,
    %217 = vector.extract_strided_slice %215 {offsets = [0, 1, 0], sizes = [18, 1, 4], strides = [1, 1, 1]} : vector<18x16x4xf32> to vector<18x1x4xf32>
    %c0_166 = arith.constant 0 : index
    %c0_167 = arith.constant 0 : index
    %c0_168 = arith.constant 0 : index
    %218 = vector.load %arg19[%c0_166, %c0_167, %c0_168] : memref<18x18x4xf32, #tpu.memory_space<vmem>>, vector<18x1x4xf32>
    tpu.vector_store %arg19[%c0_166, %c0_167, %c0_168], %217 {strides = array<i32>} : memref<18x18x4xf32, #tpu.memory_space<vmem>>, vector<18x1x4xf32>,
    %219 = vector.extract_strided_slice %215 {offsets = [0, 14, 0], sizes = [18, 1, 4], strides = [1, 1, 1]} : vector<18x16x4xf32> to vector<18x1x4xf32>
    %c0_169 = arith.constant 0 : index
    %c17_170 = arith.constant 17 : index
    %c0_171 = arith.constant 0 : index
    %220 = vector.load %arg19[%c0_169, %c17_170, %c0_171] : memref<18x18x4xf32, #tpu.memory_space<vmem>>, vector<18x1x4xf32>
    tpu.vector_store %arg19[%c0_169, %c17_170, %c0_171], %219 {strides = array<i32>} : memref<18x18x4xf32, #tpu.memory_space<vmem>>, vector<18x1x4xf32>,
    %c0_172 = arith.constant 0 : index
    %c0_173 = arith.constant 0 : index
    %221 = vector.load %arg12[%c0_172, %c0_173] : memref<36x4xf32, #tpu.memory_space<vmem>>, vector<36x4xf32>
    %cst_174 = arith.constant 0.000000e+00 : f32
    %222 = vector.broadcast %cst_174 : f32 to vector<256x4xf32>
    %c0_175 = arith.constant 0 : index
    %c0_176 = arith.constant 0 : index
    %c0_177 = arith.constant 0 : index
    %223 = vector.load %arg19[%c0_175, %c0_176, %c0_177] : memref<18x18x4xf32, #tpu.memory_space<vmem>>, vector<16x16x4xf32>
    %224 = vector.shape_cast %223 : vector<16x16x4xf32> to vector<256x4xf32>
    %225 = vector.extract_strided_slice %221 {offsets = [0, 0], sizes = [4, 4], strides = [1, 1]} : vector<36x4xf32> to vector<4x4xf32>
    %cst_178 = arith.constant dense<0.000000e+00> : vector<256x4xf32>
    %226 = tpu.matmul %224, %225, %cst_178 {dimension_numbers = #tpu.dot_dimension_numbers<[1], [0], [0], [1], [0, 0, 1, 1], [], []>} : vector<256x4xf32>, vector<4x4xf32>, vector<256x4xf32> -> vector<256x4xf32>
    %227 = arith.addf %222, %226 : vector<256x4xf32>
    %c0_179 = arith.constant 0 : index
    %c1_180 = arith.constant 1 : index
    %c0_181 = arith.constant 0 : index
    %228 = vector.load %arg19[%c0_179, %c1_180, %c0_181] : memref<18x18x4xf32, #tpu.memory_space<vmem>>, vector<16x16x4xf32>
    %229 = vector.shape_cast %228 : vector<16x16x4xf32> to vector<256x4xf32>
    %230 = vector.extract_strided_slice %221 {offsets = [4, 0], sizes = [4, 4], strides = [1, 1]} : vector<36x4xf32> to vector<4x4xf32>
    %cst_182 = arith.constant dense<0.000000e+00> : vector<256x4xf32>
    %231 = tpu.matmul %229, %230, %cst_182 {dimension_numbers = #tpu.dot_dimension_numbers<[1], [0], [0], [1], [0, 0, 1, 1], [], []>} : vector<256x4xf32>, vector<4x4xf32>, vector<256x4xf32> -> vector<256x4xf32>
    %232 = arith.addf %227, %231 : vector<256x4xf32>
    %c0_183 = arith.constant 0 : index
    %c2_184 = arith.constant 2 : index
    %c0_185 = arith.constant 0 : index
    %233 = vector.load %arg19[%c0_183, %c2_184, %c0_185] : memref<18x18x4xf32, #tpu.memory_space<vmem>>, vector<16x16x4xf32>
    %234 = vector.shape_cast %233 : vector<16x16x4xf32> to vector<256x4xf32>
    %235 = vector.extract_strided_slice %221 {offsets = [8, 0], sizes = [4, 4], strides = [1, 1]} : vector<36x4xf32> to vector<4x4xf32>
    %cst_186 = arith.constant dense<0.000000e+00> : vector<256x4xf32>
    %236 = tpu.matmul %234, %235, %cst_186 {dimension_numbers = #tpu.dot_dimension_numbers<[1], [0], [0], [1], [0, 0, 1, 1], [], []>} : vector<256x4xf32>, vector<4x4xf32>, vector<256x4xf32> -> vector<256x4xf32>
    %237 = arith.addf %232, %236 : vector<256x4xf32>
    %c1_187 = arith.constant 1 : index
    %c0_188 = arith.constant 0 : index
    %c0_189 = arith.constant 0 : index
    %238 = vector.load %arg19[%c1_187, %c0_188, %c0_189] : memref<18x18x4xf32, #tpu.memory_space<vmem>>, vector<16x16x4xf32>
    %239 = vector.shape_cast %238 : vector<16x16x4xf32> to vector<256x4xf32>
    %240 = vector.extract_strided_slice %221 {offsets = [12, 0], sizes = [4, 4], strides = [1, 1]} : vector<36x4xf32> to vector<4x4xf32>
    %cst_190 = arith.constant dense<0.000000e+00> : vector<256x4xf32>
    %241 = tpu.matmul %239, %240, %cst_190 {dimension_numbers = #tpu.dot_dimension_numbers<[1], [0], [0], [1], [0, 0, 1, 1], [], []>} : vector<256x4xf32>, vector<4x4xf32>, vector<256x4xf32> -> vector<256x4xf32>
    %242 = arith.addf %237, %241 : vector<256x4xf32>
    %c1_191 = arith.constant 1 : index
    %c1_192 = arith.constant 1 : index
    %c0_193 = arith.constant 0 : index
    %243 = vector.load %arg19[%c1_191, %c1_192, %c0_193] : memref<18x18x4xf32, #tpu.memory_space<vmem>>, vector<16x16x4xf32>
    %244 = vector.shape_cast %243 : vector<16x16x4xf32> to vector<256x4xf32>
    %245 = vector.extract_strided_slice %221 {offsets = [16, 0], sizes = [4, 4], strides = [1, 1]} : vector<36x4xf32> to vector<4x4xf32>
    %cst_194 = arith.constant dense<0.000000e+00> : vector<256x4xf32>
    %246 = tpu.matmul %244, %245, %cst_194 {dimension_numbers = #tpu.dot_dimension_numbers<[1], [0], [0], [1], [0, 0, 1, 1], [], []>} : vector<256x4xf32>, vector<4x4xf32>, vector<256x4xf32> -> vector<256x4xf32>
    %247 = arith.addf %242, %246 : vector<256x4xf32>
    %c1_195 = arith.constant 1 : index
    %c2_196 = arith.constant 2 : index
    %c0_197 = arith.constant 0 : index
    %248 = vector.load %arg19[%c1_195, %c2_196, %c0_197] : memref<18x18x4xf32, #tpu.memory_space<vmem>>, vector<16x16x4xf32>
    %249 = vector.shape_cast %248 : vector<16x16x4xf32> to vector<256x4xf32>
    %250 = vector.extract_strided_slice %221 {offsets = [20, 0], sizes = [4, 4], strides = [1, 1]} : vector<36x4xf32> to vector<4x4xf32>
    %cst_198 = arith.constant dense<0.000000e+00> : vector<256x4xf32>
    %251 = tpu.matmul %249, %250, %cst_198 {dimension_numbers = #tpu.dot_dimension_numbers<[1], [0], [0], [1], [0, 0, 1, 1], [], []>} : vector<256x4xf32>, vector<4x4xf32>, vector<256x4xf32> -> vector<256x4xf32>
    %252 = arith.addf %247, %251 : vector<256x4xf32>
    %c2_199 = arith.constant 2 : index
    %c0_200 = arith.constant 0 : index
    %c0_201 = arith.constant 0 : index
    %253 = vector.load %arg19[%c2_199, %c0_200, %c0_201] : memref<18x18x4xf32, #tpu.memory_space<vmem>>, vector<16x16x4xf32>
    %254 = vector.shape_cast %253 : vector<16x16x4xf32> to vector<256x4xf32>
    %255 = vector.extract_strided_slice %221 {offsets = [24, 0], sizes = [4, 4], strides = [1, 1]} : vector<36x4xf32> to vector<4x4xf32>
    %cst_202 = arith.constant dense<0.000000e+00> : vector<256x4xf32>
    %256 = tpu.matmul %254, %255, %cst_202 {dimension_numbers = #tpu.dot_dimension_numbers<[1], [0], [0], [1], [0, 0, 1, 1], [], []>} : vector<256x4xf32>, vector<4x4xf32>, vector<256x4xf32> -> vector<256x4xf32>
    %257 = arith.addf %252, %256 : vector<256x4xf32>
    %c2_203 = arith.constant 2 : index
    %c1_204 = arith.constant 1 : index
    %c0_205 = arith.constant 0 : index
    %258 = vector.load %arg19[%c2_203, %c1_204, %c0_205] : memref<18x18x4xf32, #tpu.memory_space<vmem>>, vector<16x16x4xf32>
    %259 = vector.shape_cast %258 : vector<16x16x4xf32> to vector<256x4xf32>
    %260 = vector.extract_strided_slice %221 {offsets = [28, 0], sizes = [4, 4], strides = [1, 1]} : vector<36x4xf32> to vector<4x4xf32>
    %cst_206 = arith.constant dense<0.000000e+00> : vector<256x4xf32>
    %261 = tpu.matmul %259, %260, %cst_206 {dimension_numbers = #tpu.dot_dimension_numbers<[1], [0], [0], [1], [0, 0, 1, 1], [], []>} : vector<256x4xf32>, vector<4x4xf32>, vector<256x4xf32> -> vector<256x4xf32>
    %262 = arith.addf %257, %261 : vector<256x4xf32>
    %c2_207 = arith.constant 2 : index
    %c2_208 = arith.constant 2 : index
    %c0_209 = arith.constant 0 : index
    %263 = vector.load %arg19[%c2_207, %c2_208, %c0_209] : memref<18x18x4xf32, #tpu.memory_space<vmem>>, vector<16x16x4xf32>
    %264 = vector.shape_cast %263 : vector<16x16x4xf32> to vector<256x4xf32>
    %265 = vector.extract_strided_slice %221 {offsets = [32, 0], sizes = [4, 4], strides = [1, 1]} : vector<36x4xf32> to vector<4x4xf32>
    %cst_210 = arith.constant dense<0.000000e+00> : vector<256x4xf32>
    %266 = tpu.matmul %264, %265, %cst_210 {dimension_numbers = #tpu.dot_dimension_numbers<[1], [0], [0], [1], [0, 0, 1, 1], [], []>} : vector<256x4xf32>, vector<4x4xf32>, vector<256x4xf32> -> vector<256x4xf32>
    %267 = arith.addf %262, %266 : vector<256x4xf32>
    %c0_211 = arith.constant 0 : index
    %c0_212 = arith.constant 0 : index
    %268 = vector.load %arg13[%c0_211, %c0_212] : memref<1x4xf32, #tpu.memory_space<vmem>>, vector<1x4xf32>
    %269 = vector.broadcast %268 : vector<1x4xf32> to vector<256x4xf32>
    %270 = arith.addf %267, %269 : vector<256x4xf32>
    %cst_213 = arith.constant 0.000000e+00 : f32
    %271 = vector.broadcast %cst_213 : f32 to vector<256x4xf32>
    %272 = arith.cmpf oge, %270, %271 : vector<256x4xf32>
    %cst_214 = arith.constant 2.000000e-01 : f32
    %273 = vector.broadcast %cst_214 : f32 to vector<256x4xf32>
    %274 = arith.mulf %273, %270 : vector<256x4xf32>
    %275 = arith.select %272, %270, %274 : vector<256x4xi1>, vector<256x4xf32>
    %276 = vector.shape_cast %275 : vector<256x4xf32> to vector<16x16x4xf32>
    %277 = vector.extract_strided_slice %276 {offsets = [1, 0, 0], sizes = [1, 16, 4], strides = [1, 1, 1]} : vector<16x16x4xf32> to vector<1x16x4xf32>
    %278 = vector.extract_strided_slice %276 {offsets = [14, 0, 0], sizes = [1, 16, 4], strides = [1, 1, 1]} : vector<16x16x4xf32> to vector<1x16x4xf32>
    %279 = tpu.concatenate %277, %276, %278 in 0 : vector<1x16x4xf32>, vector<16x16x4xf32>, vector<1x16x4xf32> -> vector<18x16x4xf32>
    %c0_215 = arith.constant 0 : index
    %c1_216 = arith.constant 1 : index
    %c0_217 = arith.constant 0 : index
    %280 = vector.load %arg20[%c0_215, %c1_216, %c0_217] : memref<18x18x4xf32, #tpu.memory_space<vmem>>, vector<18x16x4xf32>
    tpu.vector_store %arg20[%c0_215, %c1_216, %c0_217], %279 {strides = array<i32>} : memref<18x18x4xf32, #tpu.memory_space<vmem>>, vector<18x16x4xf32>,
    %281 = vector.extract_strided_slice %279 {offsets = [0, 1, 0], sizes = [18, 1, 4], strides = [1, 1, 1]} : vector<18x16x4xf32> to vector<18x1x4xf32>
    %c0_218 = arith.constant 0 : index
    %c0_219 = arith.constant 0 : index
    %c0_220 = arith.constant 0 : index
    %282 = vector.load %arg20[%c0_218, %c0_219, %c0_220] : memref<18x18x4xf32, #tpu.memory_space<vmem>>, vector<18x1x4xf32>
    tpu.vector_store %arg20[%c0_218, %c0_219, %c0_220], %281 {strides = array<i32>} : memref<18x18x4xf32, #tpu.memory_space<vmem>>, vector<18x1x4xf32>,
    %283 = vector.extract_strided_slice %279 {offsets = [0, 14, 0], sizes = [18, 1, 4], strides = [1, 1, 1]} : vector<18x16x4xf32> to vector<18x1x4xf32>
    %c0_221 = arith.constant 0 : index
    %c17_222 = arith.constant 17 : index
    %c0_223 = arith.constant 0 : index
    %284 = vector.load %arg20[%c0_221, %c17_222, %c0_223] : memref<18x18x4xf32, #tpu.memory_space<vmem>>, vector<18x1x4xf32>
    tpu.vector_store %arg20[%c0_221, %c17_222, %c0_223], %283 {strides = array<i32>} : memref<18x18x4xf32, #tpu.memory_space<vmem>>, vector<18x1x4xf32>,
    %c0_224 = arith.constant 0 : index
    %c0_225 = arith.constant 0 : index
    %285 = vector.load %arg14[%c0_224, %c0_225] : memref<36x4xf32, #tpu.memory_space<vmem>>, vector<36x4xf32>
    %cst_226 = arith.constant 0.000000e+00 : f32
    %286 = vector.broadcast %cst_226 : f32 to vector<256x4xf32>
    %c0_227 = arith.constant 0 : index
    %c0_228 = arith.constant 0 : index
    %c0_229 = arith.constant 0 : index
    %287 = vector.load %arg20[%c0_227, %c0_228, %c0_229] : memref<18x18x4xf32, #tpu.memory_space<vmem>>, vector<16x16x4xf32>
    %288 = vector.shape_cast %287 : vector<16x16x4xf32> to vector<256x4xf32>
    %289 = vector.extract_strided_slice %285 {offsets = [0, 0], sizes = [4, 4], strides = [1, 1]} : vector<36x4xf32> to vector<4x4xf32>
    %cst_230 = arith.constant dense<0.000000e+00> : vector<256x4xf32>
    %290 = tpu.matmul %288, %289, %cst_230 {dimension_numbers = #tpu.dot_dimension_numbers<[1], [0], [0], [1], [0, 0, 1, 1], [], []>} : vector<256x4xf32>, vector<4x4xf32>, vector<256x4xf32> -> vector<256x4xf32>
    %291 = arith.addf %286, %290 : vector<256x4xf32>
    %c0_231 = arith.constant 0 : index
    %c1_232 = arith.constant 1 : index
    %c0_233 = arith.constant 0 : index
    %292 = vector.load %arg20[%c0_231, %c1_232, %c0_233] : memref<18x18x4xf32, #tpu.memory_space<vmem>>, vector<16x16x4xf32>
    %293 = vector.shape_cast %292 : vector<16x16x4xf32> to vector<256x4xf32>
    %294 = vector.extract_strided_slice %285 {offsets = [4, 0], sizes = [4, 4], strides = [1, 1]} : vector<36x4xf32> to vector<4x4xf32>
    %cst_234 = arith.constant dense<0.000000e+00> : vector<256x4xf32>
    %295 = tpu.matmul %293, %294, %cst_234 {dimension_numbers = #tpu.dot_dimension_numbers<[1], [0], [0], [1], [0, 0, 1, 1], [], []>} : vector<256x4xf32>, vector<4x4xf32>, vector<256x4xf32> -> vector<256x4xf32>
    %296 = arith.addf %291, %295 : vector<256x4xf32>
    %c0_235 = arith.constant 0 : index
    %c2_236 = arith.constant 2 : index
    %c0_237 = arith.constant 0 : index
    %297 = vector.load %arg20[%c0_235, %c2_236, %c0_237] : memref<18x18x4xf32, #tpu.memory_space<vmem>>, vector<16x16x4xf32>
    %298 = vector.shape_cast %297 : vector<16x16x4xf32> to vector<256x4xf32>
    %299 = vector.extract_strided_slice %285 {offsets = [8, 0], sizes = [4, 4], strides = [1, 1]} : vector<36x4xf32> to vector<4x4xf32>
    %cst_238 = arith.constant dense<0.000000e+00> : vector<256x4xf32>
    %300 = tpu.matmul %298, %299, %cst_238 {dimension_numbers = #tpu.dot_dimension_numbers<[1], [0], [0], [1], [0, 0, 1, 1], [], []>} : vector<256x4xf32>, vector<4x4xf32>, vector<256x4xf32> -> vector<256x4xf32>
    %301 = arith.addf %296, %300 : vector<256x4xf32>
    %c1_239 = arith.constant 1 : index
    %c0_240 = arith.constant 0 : index
    %c0_241 = arith.constant 0 : index
    %302 = vector.load %arg20[%c1_239, %c0_240, %c0_241] : memref<18x18x4xf32, #tpu.memory_space<vmem>>, vector<16x16x4xf32>
    %303 = vector.shape_cast %302 : vector<16x16x4xf32> to vector<256x4xf32>
    %304 = vector.extract_strided_slice %285 {offsets = [12, 0], sizes = [4, 4], strides = [1, 1]} : vector<36x4xf32> to vector<4x4xf32>
    %cst_242 = arith.constant dense<0.000000e+00> : vector<256x4xf32>
    %305 = tpu.matmul %303, %304, %cst_242 {dimension_numbers = #tpu.dot_dimension_numbers<[1], [0], [0], [1], [0, 0, 1, 1], [], []>} : vector<256x4xf32>, vector<4x4xf32>, vector<256x4xf32> -> vector<256x4xf32>
    %306 = arith.addf %301, %305 : vector<256x4xf32>
    %c1_243 = arith.constant 1 : index
    %c1_244 = arith.constant 1 : index
    %c0_245 = arith.constant 0 : index
    %307 = vector.load %arg20[%c1_243, %c1_244, %c0_245] : memref<18x18x4xf32, #tpu.memory_space<vmem>>, vector<16x16x4xf32>
    %308 = vector.shape_cast %307 : vector<16x16x4xf32> to vector<256x4xf32>
    %309 = vector.extract_strided_slice %285 {offsets = [16, 0], sizes = [4, 4], strides = [1, 1]} : vector<36x4xf32> to vector<4x4xf32>
    %cst_246 = arith.constant dense<0.000000e+00> : vector<256x4xf32>
    %310 = tpu.matmul %308, %309, %cst_246 {dimension_numbers = #tpu.dot_dimension_numbers<[1], [0], [0], [1], [0, 0, 1, 1], [], []>} : vector<256x4xf32>, vector<4x4xf32>, vector<256x4xf32> -> vector<256x4xf32>
    %311 = arith.addf %306, %310 : vector<256x4xf32>
    %c1_247 = arith.constant 1 : index
    %c2_248 = arith.constant 2 : index
    %c0_249 = arith.constant 0 : index
    %312 = vector.load %arg20[%c1_247, %c2_248, %c0_249] : memref<18x18x4xf32, #tpu.memory_space<vmem>>, vector<16x16x4xf32>
    %313 = vector.shape_cast %312 : vector<16x16x4xf32> to vector<256x4xf32>
    %314 = vector.extract_strided_slice %285 {offsets = [20, 0], sizes = [4, 4], strides = [1, 1]} : vector<36x4xf32> to vector<4x4xf32>
    %cst_250 = arith.constant dense<0.000000e+00> : vector<256x4xf32>
    %315 = tpu.matmul %313, %314, %cst_250 {dimension_numbers = #tpu.dot_dimension_numbers<[1], [0], [0], [1], [0, 0, 1, 1], [], []>} : vector<256x4xf32>, vector<4x4xf32>, vector<256x4xf32> -> vector<256x4xf32>
    %316 = arith.addf %311, %315 : vector<256x4xf32>
    %c2_251 = arith.constant 2 : index
    %c0_252 = arith.constant 0 : index
    %c0_253 = arith.constant 0 : index
    %317 = vector.load %arg20[%c2_251, %c0_252, %c0_253] : memref<18x18x4xf32, #tpu.memory_space<vmem>>, vector<16x16x4xf32>
    %318 = vector.shape_cast %317 : vector<16x16x4xf32> to vector<256x4xf32>
    %319 = vector.extract_strided_slice %285 {offsets = [24, 0], sizes = [4, 4], strides = [1, 1]} : vector<36x4xf32> to vector<4x4xf32>
    %cst_254 = arith.constant dense<0.000000e+00> : vector<256x4xf32>
    %320 = tpu.matmul %318, %319, %cst_254 {dimension_numbers = #tpu.dot_dimension_numbers<[1], [0], [0], [1], [0, 0, 1, 1], [], []>} : vector<256x4xf32>, vector<4x4xf32>, vector<256x4xf32> -> vector<256x4xf32>
    %321 = arith.addf %316, %320 : vector<256x4xf32>
    %c2_255 = arith.constant 2 : index
    %c1_256 = arith.constant 1 : index
    %c0_257 = arith.constant 0 : index
    %322 = vector.load %arg20[%c2_255, %c1_256, %c0_257] : memref<18x18x4xf32, #tpu.memory_space<vmem>>, vector<16x16x4xf32>
    %323 = vector.shape_cast %322 : vector<16x16x4xf32> to vector<256x4xf32>
    %324 = vector.extract_strided_slice %285 {offsets = [28, 0], sizes = [4, 4], strides = [1, 1]} : vector<36x4xf32> to vector<4x4xf32>
    %cst_258 = arith.constant dense<0.000000e+00> : vector<256x4xf32>
    %325 = tpu.matmul %323, %324, %cst_258 {dimension_numbers = #tpu.dot_dimension_numbers<[1], [0], [0], [1], [0, 0, 1, 1], [], []>} : vector<256x4xf32>, vector<4x4xf32>, vector<256x4xf32> -> vector<256x4xf32>
    %326 = arith.addf %321, %325 : vector<256x4xf32>
    %c2_259 = arith.constant 2 : index
    %c2_260 = arith.constant 2 : index
    %c0_261 = arith.constant 0 : index
    %327 = vector.load %arg20[%c2_259, %c2_260, %c0_261] : memref<18x18x4xf32, #tpu.memory_space<vmem>>, vector<16x16x4xf32>
    %328 = vector.shape_cast %327 : vector<16x16x4xf32> to vector<256x4xf32>
    %329 = vector.extract_strided_slice %285 {offsets = [32, 0], sizes = [4, 4], strides = [1, 1]} : vector<36x4xf32> to vector<4x4xf32>
    %cst_262 = arith.constant dense<0.000000e+00> : vector<256x4xf32>
    %330 = tpu.matmul %328, %329, %cst_262 {dimension_numbers = #tpu.dot_dimension_numbers<[1], [0], [0], [1], [0, 0, 1, 1], [], []>} : vector<256x4xf32>, vector<4x4xf32>, vector<256x4xf32> -> vector<256x4xf32>
    %331 = arith.addf %326, %330 : vector<256x4xf32>
    %c0_263 = arith.constant 0 : index
    %c0_264 = arith.constant 0 : index
    %332 = vector.load %arg15[%c0_263, %c0_264] : memref<1x4xf32, #tpu.memory_space<vmem>>, vector<1x4xf32>
    %333 = vector.broadcast %332 : vector<1x4xf32> to vector<256x4xf32>
    %334 = arith.addf %331, %333 : vector<256x4xf32>
    %cst_265 = arith.constant 0.000000e+00 : f32
    %335 = vector.broadcast %cst_265 : f32 to vector<256x4xf32>
    %336 = arith.cmpf oge, %334, %335 : vector<256x4xf32>
    %cst_266 = arith.constant 2.000000e-01 : f32
    %337 = vector.broadcast %cst_266 : f32 to vector<256x4xf32>
    %338 = arith.mulf %337, %334 : vector<256x4xf32>
    %339 = arith.select %336, %334, %338 : vector<256x4xi1>, vector<256x4xf32>
    %340 = vector.shape_cast %339 : vector<256x4xf32> to vector<16x16x4xf32>
    %341 = arith.addf %1, %340 : vector<16x16x4xf32>
    %c0_267 = arith.constant 0 : index
    %c0_268 = arith.constant 0 : index
    %c0_269 = arith.constant 0 : index
    %c0_270 = arith.constant 0 : index
    %342 = vector.load %arg16[%c0_267, %c0_268, %c0_269, %c0_270] : memref<1x16x16x4xf32, #tpu.memory_space<vmem>>, vector<1x16x16x4xf32>
    %343 = vector.shape_cast %342 : vector<1x16x16x4xf32> to vector<16x16x4xf32>
    %344 = vector.shape_cast %341 : vector<16x16x4xf32> to vector<1x16x16x4xf32>
    tpu.vector_store %arg16[%c0_267, %c0_268, %c0_269, %c0_270], %344 {strides = array<i32>} : memref<1x16x16x4xf32, #tpu.memory_space<vmem>>, vector<1x16x16x4xf32>,
    return
  }
  func.func @transform_0(%arg0: i32) -> (i32, i32, i32, i32) {
    %c0_i32 = arith.constant 0 : i32
    %c0_i32_0 = arith.constant 0 : i32
    %c0_i32_1 = arith.constant 0 : i32
    %c0_i32_2 = arith.constant 0 : i32
    return %arg0, %c0_i32, %c0_i32_0, %c0_i32_1 : i32, i32, i32, i32
  }
  func.func @transform_1(%arg0: i32) -> (i32, i32) {
    %c0_i32 = arith.constant 0 : i32
    %c0_i32_0 = arith.constant 0 : i32
    %c0_i32_1 = arith.constant 0 : i32
    return %c0_i32, %c0_i32_0 : i32, i32
  }
  func.func @transform_2(%arg0: i32) -> (i32, i32) {
    %c0_i32 = arith.constant 0 : i32
    %c0_i32_0 = arith.constant 0 : i32
    %c0_i32_1 = arith.constant 0 : i32
    return %c0_i32, %c0_i32_0 : i32, i32
  }
  func.func @transform_3(%arg0: i32) -> (i32, i32) {
    %c0_i32 = arith.constant 0 : i32
    %c0_i32_0 = arith.constant 0 : i32
    %c0_i32_1 = arith.constant 0 : i32
    return %c0_i32, %c0_i32_0 : i32, i32
  }
  func.func @transform_4(%arg0: i32) -> (i32, i32) {
    %c0_i32 = arith.constant 0 : i32
    %c0_i32_0 = arith.constant 0 : i32
    %c0_i32_1 = arith.constant 0 : i32
    return %c0_i32, %c0_i32_0 : i32, i32
  }
  func.func @transform_5(%arg0: i32) -> (i32, i32) {
    %c0_i32 = arith.constant 0 : i32
    %c0_i32_0 = arith.constant 0 : i32
    %c0_i32_1 = arith.constant 0 : i32
    return %c0_i32, %c0_i32_0 : i32, i32
  }
  func.func @transform_6(%arg0: i32) -> (i32, i32) {
    %c0_i32 = arith.constant 0 : i32
    %c0_i32_0 = arith.constant 0 : i32
    %c0_i32_1 = arith.constant 0 : i32
    return %c0_i32, %c0_i32_0 : i32, i32
  }
  func.func @transform_7(%arg0: i32) -> (i32, i32) {
    %c0_i32 = arith.constant 0 : i32
    %c0_i32_0 = arith.constant 0 : i32
    %c0_i32_1 = arith.constant 0 : i32
    return %c0_i32, %c0_i32_0 : i32, i32
  }
  func.func @transform_8(%arg0: i32) -> (i32, i32) {
    %c0_i32 = arith.constant 0 : i32
    %c0_i32_0 = arith.constant 0 : i32
    %c0_i32_1 = arith.constant 0 : i32
    return %c0_i32, %c0_i32_0 : i32, i32
  }
  func.func @transform_9(%arg0: i32) -> (i32, i32) {
    %c0_i32 = arith.constant 0 : i32
    %c0_i32_0 = arith.constant 0 : i32
    %c0_i32_1 = arith.constant 0 : i32
    return %c0_i32, %c0_i32_0 : i32, i32
  }
  func.func @transform_10(%arg0: i32) -> (i32, i32) {
    %c0_i32 = arith.constant 0 : i32
    %c0_i32_0 = arith.constant 0 : i32
    %c0_i32_1 = arith.constant 0 : i32
    return %c0_i32, %c0_i32_0 : i32, i32
  }
  func.func @transform_11(%arg0: i32) -> (i32, i32) {
    %c0_i32 = arith.constant 0 : i32
    %c0_i32_0 = arith.constant 0 : i32
    %c0_i32_1 = arith.constant 0 : i32
    return %c0_i32, %c0_i32_0 : i32, i32
  }
  func.func @transform_12(%arg0: i32) -> (i32, i32) {
    %c0_i32 = arith.constant 0 : i32
    %c0_i32_0 = arith.constant 0 : i32
    %c0_i32_1 = arith.constant 0 : i32
    return %c0_i32, %c0_i32_0 : i32, i32
  }
  func.func @transform_13(%arg0: i32) -> (i32, i32) {
    %c0_i32 = arith.constant 0 : i32
    %c0_i32_0 = arith.constant 0 : i32
    %c0_i32_1 = arith.constant 0 : i32
    return %c0_i32, %c0_i32_0 : i32, i32
  }
  func.func @transform_14(%arg0: i32) -> (i32, i32) {
    %c0_i32 = arith.constant 0 : i32
    %c0_i32_0 = arith.constant 0 : i32
    %c0_i32_1 = arith.constant 0 : i32
    return %c0_i32, %c0_i32_0 : i32, i32
  }
  func.func @transform_15(%arg0: i32) -> (i32, i32, i32, i32) {
    %c0_i32 = arith.constant 0 : i32
    %c0_i32_0 = arith.constant 0 : i32
    %c0_i32_1 = arith.constant 0 : i32
    %c0_i32_2 = arith.constant 0 : i32
    return %arg0, %c0_i32, %c0_i32_0, %c0_i32_1 : i32, i32, i32, i32
  }
}

</mosaic_0001>

<bundles_post_ra>
// kernel: res_block_forward.1
= control target key start
LH: loop header
LB: loop body
LE: loop exit
PB: predicated region body
PF: predicated region fallthrough
CT: control target
= control target key end

     0   :  { %s26843_s18 = smov 0   ;;  %s32157_s0 = inlined_call_operand.vmem [shape: f32[2,16,16,4], index: 0, kind: input, shape index: {}]   ;;  %s32158_s1 = inlined_call_operand.vmem [shape: f32[36,4], index: 1, kind: input, shape index: {}]   ;;  %s32159_s2 = inlined_call_operand.vmem [shape: f32[1,4], index: 2, kind: input, shape index: {}]   ;;  %s32160_s3 = inlined_call_operand.vmem [shape: f32[36,2], index: 3, kind: input, shape index: {}]   ;;  %s32161_s4 = inlined_call_operand.vmem [shape: f32[1,2], index: 4, kind: input, shape index: {}]   ;;  %s32162_s5 = inlined_call_operand.vmem [shape: f32[36,2], index: 5, kind: input, shape index: {}]   ;;  %s32163_s6 = inlined_call_operand.vmem [shape: f32[1,2], index: 6, kind: input, shape index: {}]   ;;  %s32164_s7 = inlined_call_operand.vmem [shape: f32[4,4], index: 7, kind: input, shape index: {}]   ;;  %s32165_s8 = inlined_call_operand.vmem [shape: f32[2,4], index: 8, kind: input, shape index: {}]   ;;  %s32166_s9 = inlined_call_operand.vmem [shape: f32[2,4], index: 9, kind: input, shape index: {}]   ;;  %s32167_s10 = inlined_call_operand.vmem [shape: f32[1,4], index: 10, kind: input, shape index: {}]   ;;  %s32168_s11 = inlined_call_operand.vmem [shape: f32[36,4], index: 11, kind: input, shape index: {}]   ;;  %s32169_s12 = inlined_call_operand.vmem [shape: f32[1,4], index: 12, kind: input, shape index: {}]   ;;  %s32170_s13 = inlined_call_operand.vmem [shape: f32[36,4], index: 13, kind: input, shape index: {}]   ;;  %s32171_s14 = inlined_call_operand.vmem [shape: f32[1,4], index: 14, kind: input, shape index: {}]   ;;  %s32172_s15 = inlined_call_operand.vmem [shape: f32[2,16,16,4], index: 15, kind: output, shape index: {}]  }
   0x1 LB: > { %s19816_s19 = sadd.s32 4294967295, %s26761_s18   ;;  %p19820_p0 = scmp.ge.s32.totalorder %s26761_s18, 1  ;;  %s26761_s18 = sphi %s26843_s18, %s25_s18  }
   0x2   : > { %p437_p1 = scmp.lt.s32.totalorder %s26761_s18, 3 }
   0x4   : > { %p438_p2 = pnand %p19820_p0, %p437_p1 }
   0x6   : > { %441 = sbr.rel (%p438_p2) target bundleno = 3235 (0xca3), region = 80 }
   0xd   : > { %v26854_v0 = vld [vmem:[%s32158_s1 + $0x8] sm:$0xff]  ;;  %vm769_vm0 = vcmask 1043456   ;;  %p485_p3 = scmp.lt.s32.totalorder %s19816_s19, 1  ;;  %v26860_v2 = vld [vmem:[%s32158_s1] sm:$0xff]  ;;  %v26867_v3 = vld [vmem:[%s32158_s1 + $0x10] sm:$0xff]  ;;  %vm527_vm1 = vcmask 31744  }
   0xe   : > { %v1741_v1 = vrot.slane %v26854_v0, 4  ;;  %v672_v4 = vrot.slane %v26860_v2, 4  ;;  %vm564_vm2 = vcmask 25601   ;;  %vm583_vm3 = vcmask 30726  }
   0xf   : > { %s32919_s19 = smov (!%p485_p3, %s19816_s19), 1  ;;  %v32173_v30 = vrot.slane %v26867_v3, 4  ;;  %vm4284_vm4 = vcmask 29701   ;;  %vm4330_vm5 = vcmask 28676   ;;  %vm4261_vm7 = vcmask 26626  }
  0x10   : > { %23153 = vmatprep.subr.msk.mxu0 %vm769_vm0, %v1741_v1  ;;  %s21417_s26 = sshll.u32 %s32919_s19, 8  ;;  %23003 = vmatprep.subr.msk.mxu1 %vm769_vm0, %v672_v4  ;;  %vm4307_vm9 = vcmask 27651  }
  0x11   : > { %23154 = vmatpush3.msk.msra.mxu0 %vm769_vm0, %v1741_v1  ;;  %s26879_s29 = scalar_lea.vmem %s32157_s0, %s21417_s26  ;;  %23004 = vmatpush3.msk.msra.mxu1 %vm769_vm0, %v672_v4  ;;  %s32026_s21 = scalar_lea.vmem %s32172_s15, %s21417_s26 }
  0x12   : > { %23203 = vmatprep.subr.msk.mxu0 %vm769_vm0, %v26867_v3  ;;  %v26885_v5 = vld [vmem:[%s26879_s29] sm:$0xff]  ;;  %v26888_v6 = vld [vmem:[%s26879_s29 + $0x8] sm:$0xff]  ;;  %v26891_v7 = vld [vmem:[%s26879_s29 + $0x10] sm:$0xff]  ;;  %23053 = vmatprep.subr.msk.mxu1 %vm769_vm0, %v26860_v2 }
  0x13   : > { %32457 = vst [vmem:[#allocation6_spill] sm:$0xff] %v26885_v5  ;;  %32458 = vst [vmem:[#allocation7_spill] sm:$0xff] %v26888_v6  ;;  %v26912_v8 = vld [vmem:[%s26879_s29 + $0x18] sm:$0xff]  ;;  %v26915_v9 = vld [vmem:[%s26879_s29 + $0x20] sm:$0xff] }
  0x14   : > { %32459 = vst [vmem:[#allocation8_spill] sm:$0xff] %v26891_v7  ;;  %530 = vst.msk [vmem:[#allocation2 + $0x19] sm:$0xff] %vm527_vm1, %v26885_v5  ;;  %v26918_v10 = vld [vmem:[%s26879_s29 + $0x28] sm:$0xff]  ;;  %v26937_v11 = vld [vmem:[%s26879_s29 + $0x30] sm:$0xff] }
  0x15   : > { %566 = vst.msk [vmem:[#allocation2 + $0x17] sm:$0x2] %vm564_vm2, %v26885_v5  ;;  %567 = vst.msk [vmem:[#allocation2 + $0x2f] sm:$0x2] %vm564_vm2, %v26891_v7  ;;  %v26940_v12 = vld [vmem:[%s26879_s29 + $0x38] sm:$0xff]  ;;  %v26943_v13 = vld [vmem:[%s26879_s29 + $0x40] sm:$0xff] }
  0x16   : > { %531 = vst.msk [vmem:[#allocation2 + $0x21] sm:$0xff] %vm527_vm1, %v26888_v6  ;;  %532 = vst.msk [vmem:[#allocation2 + $0x31] sm:$0xff] %vm527_vm1, %v26891_v7  ;;  %v26958_v14 = vld [vmem:[%s26879_s29 + $0x48] sm:$0xff]  ;;  %v26961_v15 = vld [vmem:[%s26879_s29 + $0x50] sm:$0xff] }
  0x17   : > { %585 = vst.msk [vmem:[#allocation2 + $0x23] sm:$0x40] %vm583_vm3, %v26888_v6  ;;  %32460 = vst [vmem:[#allocation9_spill] sm:$0xff] %v26912_v8  ;;  %v26964_v16 = vld [vmem:[%s26879_s29 + $0x58] sm:$0xff]  ;;  %v26979_v17 = vld [vmem:[%s26879_s29 + $0x60] sm:$0xff] }
  0x18   : > { %528 = vst.msk [vmem:[#allocation2 + $0x1] sm:$0xff] %vm527_vm1, %v26891_v7  ;;  %32461 = vst [vmem:[#allocation10_spill] sm:$0xff] %v26915_v9  ;;  %v26982_v18 = vld [vmem:[%s26879_s29 + $0x68] sm:$0xff]  ;;  %v26985_v19 = vld [vmem:[%s26879_s29 + $0x70] sm:$0xff] }
  0x19   : > { %565 = vst.msk [vmem:[#allocation2 - $0x1] sm:$0x2] %vm564_vm2, %v26891_v7  ;;  %32462 = vst [vmem:[#allocation11_spill] sm:$0xff] %v26918_v10  ;;  %v27000_v20 = vld [vmem:[%s26879_s29 + $0x78] sm:$0xff]  ;;  %v27003_v21 = vld [vmem:[%s26879_s29 + $0x80] sm:$0xff] }
  0x1a   : > { %533 = vst.msk [vmem:[#allocation2 + $0x39] sm:$0xff] %vm527_vm1, %v26912_v8  ;;  %529 = vst.msk [vmem:[#allocation2 + $0x9] sm:$0xff] %vm527_vm1, %v26912_v8  ;;  %v27006_v22 = vld [vmem:[%s26879_s29 + $0x88] sm:$0xff]  ;;  %v27021_v23 = vld [vmem:[%s26879_s29 + $0x90] sm:$0xff] }
  0x1b   : > { %584 = vst.msk [vmem:[#allocation2 + $0xb] sm:$0x40] %vm583_vm3, %v26912_v8  ;;  %586 = vst.msk [vmem:[#allocation2 + $0x3b] sm:$0x40] %vm583_vm3, %v26912_v8  ;;  %v27024_v24 = vld [vmem:[%s26879_s29 + $0x98] sm:$0xff]  ;;  %v27027_v25 = vld [vmem:[%s26879_s29 + $0xa0] sm:$0xff] }
  0x1c   : > { %534 = vst.msk [vmem:[#allocation2 + $0x49] sm:$0xff] %vm527_vm1, %v26915_v9  ;;  %535 = vst.msk [vmem:[#allocation2 + $0x51] sm:$0xff] %vm527_vm1, %v26918_v10  ;;  %v27042_v26 = vld [vmem:[%s26879_s29 + $0xa8] sm:$0xff]  ;;  %v27045_v27 = vld [vmem:[%s26879_s29 + $0xb0] sm:$0xff] }
  0x1d   : > { %568 = vst.msk [vmem:[#allocation2 + $0x47] sm:$0x2] %vm564_vm2, %v26915_v9  ;;  %32463 = vst [vmem:[#allocation12_spill] sm:$0xff] %v26937_v11  ;;  %v27048_v28 = vld [vmem:[%s26879_s29 + $0xb8] sm:$0xff]  ;;  %v27053_v31 = vld [vmem:[#allocation2 + $0x20] sm:$0xff] }
  0x1e   : > { %587 = vst.msk [vmem:[#allocation2 + $0x53] sm:$0x40] %vm583_vm3, %v26918_v10  ;;  %32464 = vst [vmem:[#allocation13_spill] sm:$0xff] %v26940_v12  ;;  %v27050_v29 = vld [vmem:[#allocation2 + $0x18] sm:$0xff]  ;;  %v27055_v32 = vld [vmem:[#allocation2 + $0x30] sm:$0xff] }
  0x1f   : > { %32465 = vst [vmem:[#allocation14_spill] sm:$0xff] %v26943_v13  ;;  %536 = vst.msk [vmem:[#allocation2 + $0x61] sm:$0xff] %vm527_vm1, %v26937_v11  ;;  %23155 = vmatprep.mubr.msk.f32.mxu0 %vm527_vm1, %v27050_v29  ;;  %v27093_v37 = vld [vmem:[%s26879_s29 + $0xc0] sm:$0xff]  ;;  %v27096_v38 = vld [vmem:[%s26879_s29 + $0xc8] sm:$0xff] }
  0x20   : > { %569 = vst.msk [vmem:[#allocation2 + $0x5f] sm:$0x2] %vm564_vm2, %v26937_v11  ;;  %570 = vst.msk [vmem:[#allocation2 + $0x77] sm:$0x2] %vm564_vm2, %v26943_v13  ;;  %23156 = vmatmul.mubr.msk.f32.vlgmr.msra.gmra.mrb[0].mxu0 %vm527_vm1, %v27053_v31  ;;  %v27099_v39 = vld [vmem:[%s26879_s29 + $0xd0] sm:$0xff]  ;;  %v27114_v40 = vld [vmem:[%s26879_s29 + $0xd8] sm:$0xff] }
  0x21   : > { %537 = vst.msk [vmem:[#allocation2 + $0x69] sm:$0xff] %vm527_vm1, %v26940_v12  ;;  %538 = vst.msk [vmem:[#allocation2 + $0x79] sm:$0xff] %vm527_vm1, %v26943_v13  ;;  %23204 = vmatpush3.msk.msra.mxu0 %vm769_vm0, %v26867_v3  ;;  %23158 = vmatprep.mubr.msk.f32.mxu0 %vm527_vm1, %v27055_v32  ;;  %v27077_v33 = vld [vmem:[#allocation2 + $0x38] sm:$0xff]  ;;  %v27117_v41 = vld [vmem:[%s26879_s29 + $0xe0] sm:$0xff] }
  0x22   : > { %588 = vst.msk [vmem:[#allocation2 + $0x6b] sm:$0x40] %vm583_vm3, %v26940_v12  ;;  %32466 = vst [vmem:[#allocation15_spill] sm:$0xff] %v26958_v14  ;;  %23253 = vmatprep.subr.msk.mxu0 %vm769_vm0, %v32173_v30  ;;  %v27120_v42 = vld [vmem:[%s26879_s29 + $0xe8] sm:$0xff]  ;;  %v27145_v43 = vld [vmem:[%s26879_s29 + $0xf0] sm:$0xff] }
  0x23   : > { %32467 = vst [vmem:[#allocation16_spill] sm:$0xff] %v26961_v15  ;;  %32468 = vst [vmem:[#allocation17_spill] sm:$0xff] %v26964_v16  ;;  %v27088_v35 = vld [vmem:[#allocation2 + $0x50] sm:$0xff]  ;;  %v27148_v44 = vld [vmem:[%s26879_s29 + $0xf8] sm:$0xff] }
  0x24   : > { %539 = vst.msk [vmem:[#allocation2 + $0x81] sm:$0xff] %vm527_vm1, %v26958_v14  ;;  %540 = vst.msk [vmem:[#allocation2 + $0x91] sm:$0xff] %vm527_vm1, %v26961_v15  ;;  %v27079_v34 = vld [vmem:[#allocation2 + $0x48] sm:$0xff]  ;;  %23159 = vmatmul.mubr.msk.f32.gmra.mrb[2].mxu0 %vm527_vm1, %v27077_v33  ;;  %v27166_v49 = vld [vmem:[#allocation2 + $0x19] sm:$0xff] }
  0x25   : > { %589 = vst.msk [vmem:[#allocation2 + $0x83] sm:$0x40] %vm583_vm3, %v26958_v14  ;;  %590 = vst.msk [vmem:[#allocation2 + $0x9b] sm:$0x40] %vm583_vm3, %v26964_v16  ;;  %23161 = vmatprep.mubr.msk.f32.mxu0 %vm527_vm1, %v27079_v34  ;;  %v639_v45 = vld [vmem:[#allocation2 + $0x1] sm:$0xff]  ;;  %v640_v47 = vld [vmem:[#allocation2 + $0x9] sm:$0xff] }
  0x26   : > { %571 = vst.msk [vmem:[#allocation2 + $0x8f] sm:$0x2] %vm564_vm2, %v26961_v15  ;;  %32469 = vst [vmem:[#allocation18_spill] sm:$0xff] %v26979_v17  ;;  %23005 = vmatprep.mubr.msk.f32.mxu1 %vm527_vm1, %v639_v45  ;;  %v27180_v51 = vld [vmem:[#allocation2 + $0x21] sm:$0xff]  ;;  %v27186_v53 = vld [vmem:[#allocation2 + $0x31] sm:$0xff] }
  0x27   : > { %541 = vst.msk [vmem:[#allocation2 + $0x99] sm:$0xff] %vm527_vm1, %v26964_v16  ;;  %32470 = vst [vmem:[#allocation19_spill] sm:$0xff] %v26982_v18  ;;  %v27090_v36 = vld [vmem:[#allocation2 + $0x60] sm:$0xff]  ;;  %23006 = vmatmul.mubr.msk.f32.vlgmr.msra.gmra.mrb[0].mxu1 %vm527_vm1, %v640_v47  ;;  %v27202_v57 = vld [vmem:[#allocation2 + $0x49] sm:$0xff] }
  0x28   : > { %32471 = vst [vmem:[#allocation20_spill] sm:$0xff] %v26985_v19  ;;  %542 = vst.msk [vmem:[#allocation2 + $0xa9] sm:$0xff] %vm527_vm1, %v26979_v17  ;;  %23162 = vmatmul.mubr.msk.f32.gmra.mrb[4].mxu0 %vm527_vm1, %v27088_v35  ;;  %v27152_v46 = vld [vmem:[#allocation2 + $0x68] sm:$0xff]  ;;  %v27163_v48 = vld [vmem:[#allocation2 + $0x78] sm:$0xff]  ;;  %23008 = vmatprep.mubr.msk.f32.mxu1 %vm527_vm1, %v27166_v49 }
  0x29   : > { %572 = vst.msk [vmem:[#allocation2 + $0xa7] sm:$0x2] %vm564_vm2, %v26979_v17  ;;  %573 = vst.msk [vmem:[#allocation2 + $0xbf] sm:$0x2] %vm564_vm2, %v26985_v19  ;;  %23164 = vmatprep.mubr.msk.f32.mxu0 %vm527_vm1, %v27090_v36  ;;  %23054 = vmatpush3.msk.msra.mxu1 %vm769_vm0, %v26860_v2  ;;  %v27196_v55 = vld [vmem:[#allocation2 + $0x39] sm:$0xff]  ;;  %v27212_v59 = vld [vmem:[#allocation2 + $0x51] sm:$0xff] }
  0x2a   : > { %543 = vst.msk [vmem:[#allocation2 + $0xb1] sm:$0xff] %vm527_vm1, %v26982_v18  ;;  %544 = vst.msk [vmem:[#allocation2 + $0xc1] sm:$0xff] %vm527_vm1, %v26985_v19  ;;  %23103 = vmatprep.subr.msk.mxu1 %vm769_vm0, %v26854_v0  ;;  %v27218_v61 = vld [vmem:[#allocation2 + $0x61] sm:$0xff]  ;;  %v27228_v63 = vld [vmem:[#allocation2 + $0x69] sm:$0xff] }
  0x2b   : > { %591 = vst.msk [vmem:[#allocation2 + $0xb3] sm:$0x40] %vm583_vm3, %v26982_v18  ;;  %32472 = vst [vmem:[#allocation21_spill] sm:$0xff] %v27000_v20  ;;  %v27178_v50 = vld [vmem:[#allocation2 + $0x80] sm:$0xff]  ;;  %23009 = vmatmul.mubr.msk.f32.gmra.mrb[2].mxu1 %vm527_vm1, %v27180_v51  ;;  %v27250_v30 = vld [vmem:[#allocation2 + $0x91] sm:$0xff] }
  0x2c   : > { %32473 = vst [vmem:[#allocation22_spill] sm:$0xff] %v27003_v21  ;;  %32474 = vst [vmem:[#allocation23_spill] sm:$0xff] %v27006_v22  ;;  %23165 = vmatmul.mubr.msk.f32.gmra.mrb[6].mxu0 %vm527_vm1, %v27152_v46  ;;  %23011 = vmatprep.mubr.msk.f32.mxu1 %vm527_vm1, %v27186_v53  ;;  %v27234_v2 = vld [vmem:[#allocation2 + $0x79] sm:$0xff]  ;;  %v27244_v45 = vld [vmem:[#allocation2 + $0x81] sm:$0xff] }
  0x2d   : > { %545 = vst.msk [vmem:[#allocation2 + $0xc9] sm:$0xff] %vm527_vm1, %v27000_v20  ;;  %546 = vst.msk [vmem:[#allocation2 + $0xd9] sm:$0xff] %vm527_vm1, %v27003_v21  ;;  %23167 = vmatprep.mubr.msk.f32.mxu0 %vm527_vm1, %v27163_v48  ;;  %v27182_v52 = vld [vmem:[#allocation2 + $0x90] sm:$0xff]  ;;  %v27379_v8 = vld [vmem:[%s32158_s1 + $0x18] sm:$0xff] }
  0x2e   : > { %592 = vst.msk [vmem:[#allocation2 + $0xcb] sm:$0x40] %vm583_vm3, %v27000_v20  ;;  %593 = vst.msk [vmem:[#allocation2 + $0xe3] sm:$0x40] %vm583_vm3, %v27006_v22  ;;  %v27194_v54 = vld [vmem:[#allocation2 + $0x98] sm:$0xff] }
  0x2f   : > { %574 = vst.msk [vmem:[#allocation2 + $0xd7] sm:$0x2] %vm564_vm2, %v27003_v21  ;;  %32475 = vst [vmem:[#allocation24_spill] sm:$0xff] %v27021_v23  ;;  %23012 = vmatmul.mubr.msk.f32.gmra.mrb[4].mxu1 %vm527_vm1, %v27196_v55 }
  0x30   : > { %547 = vst.msk [vmem:[#allocation2 + $0xe1] sm:$0xff] %vm527_vm1, %v27006_v22  ;;  %32476 = vst [vmem:[#allocation25_spill] sm:$0xff] %v27024_v24  ;;  %23168 = vmatmul.mubr.msk.f32.gmra.mrb[8].mxu0 %vm527_vm1, %v27178_v50  ;;  %v27198_v56 = vld [vmem:[#allocation2 + $0xa8] sm:$0xff]  ;;  %23014 = vmatprep.mubr.msk.f32.mxu1 %vm527_vm1, %v27202_v57 }
  0x31   : > { %32477 = vst [vmem:[#allocation26_spill] sm:$0xff] %v27027_v25  ;;  %548 = vst.msk [vmem:[#allocation2 + $0xf1] sm:$0xff] %vm527_vm1, %v27021_v23  ;;  %23170 = vmatprep.mubr.msk.f32.mxu0 %vm527_vm1, %v27182_v52  ;;  %v27210_v58 = vld [vmem:[#allocation2 + $0xb0] sm:$0xff]  ;;  %v27214_v60 = vld [vmem:[#allocation2 + $0xc0] sm:$0xff] }
  0x32   : > { %575 = vst.msk [vmem:[#allocation2 + $0xef] sm:$0x2] %vm564_vm2, %v27021_v23  ;;  %576 = vst.msk [vmem:[#allocation2 + $0x107] sm:$0x2] %vm564_vm2, %v27027_v25 }
  0x33   : > { %549 = vst.msk [vmem:[#allocation2 + $0xf9] sm:$0xff] %vm527_vm1, %v27024_v24  ;;  %550 = vst.msk [vmem:[#allocation2 + $0x109] sm:$0xff] %vm527_vm1, %v27027_v25  ;;  %23015 = vmatmul.mubr.msk.f32.gmra.mrb[6].mxu1 %vm527_vm1, %v27212_v59 }
  0x34   : > { %594 = vst.msk [vmem:[#allocation2 + $0xfb] sm:$0x40] %vm583_vm3, %v27024_v24  ;;  %32478 = vst [vmem:[#allocation27_spill] sm:$0xff] %v27042_v26  ;;  %23171 = vmatmul.mubr.msk.f32.gmra.mrb[10].mxu0 %vm527_vm1, %v27194_v54  ;;  %23017 = vmatprep.mubr.msk.f32.mxu1 %vm527_vm1, %v27218_v61  ;;  %v27226_v62 = vld [vmem:[#allocation2 + $0xc8] sm:$0xff] }
  0x35   : > { %32479 = vst [vmem:[#allocation28_spill] sm:$0xff] %v27045_v27  ;;  %32480 = vst [vmem:[#allocation29_spill] sm:$0xff] %v27048_v28  ;;  %23173 = vmatprep.mubr.msk.f32.mxu0 %vm527_vm1, %v27198_v56 }
  0x36   : > { %551 = vst.msk [vmem:[#allocation2 + $0x111] sm:$0xff] %vm527_vm1, %v27042_v26  ;;  %552 = vst.msk [vmem:[#allocation2 + $0x121] sm:$0xff] %vm527_vm1, %v27045_v27  ;;  %v27230_v1 = vld [vmem:[#allocation2 + $0xd8] sm:$0xff] }
  0x37   : > { %595 = vst.msk [vmem:[#allocation2 + $0x113] sm:$0x40] %vm583_vm3, %v27042_v26  ;;  %596 = vst.msk [vmem:[#allocation2 + $0x12b] sm:$0x40] %vm583_vm3, %v27048_v28  ;;  %23018 = vmatmul.mubr.msk.f32.gmra.mrb[8].mxu1 %vm527_vm1, %v27228_v63  ;;  %v27242_v4 = vld [vmem:[#allocation2 + $0xe0] sm:$0xff] }
  0x38   : > { %577 = vst.msk [vmem:[#allocation2 + $0x11f] sm:$0x2] %vm564_vm2, %v27045_v27  ;;  %32481 = vst [vmem:[#allocation30_spill] sm:$0xff] %v27093_v37  ;;  %23174 = vmatmul.mubr.msk.f32.gmra.mrb[12].mxu0 %vm527_vm1, %v27210_v58  ;;  %23020 = vmatprep.mubr.msk.f32.mxu1 %vm527_vm1, %v27234_v2  ;;  %v27298_v26 = vld [vmem:[#allocation2 + $0xd9] sm:$0xff]  ;;  %v27308_v24 = vld [vmem:[#allocation2 + $0xe1] sm:$0xff] }
  0x39   : > { %553 = vst.msk [vmem:[#allocation2 + $0x129] sm:$0xff] %vm527_vm1, %v27048_v28  ;;  %32482 = vst [vmem:[#allocation31_spill] sm:$0xff] %v27096_v38  ;;  %23176 = vmatprep.mubr.msk.f32.mxu0 %vm527_vm1, %v27214_v60  ;;  %v27246_v47 = vld [vmem:[#allocation2 + $0xf0] sm:$0xff] }
  0x3a   : > { %32483 = vst [vmem:[#allocation32_spill] sm:$0xff] %v27099_v39  ;;  %554 = vst.msk [vmem:[#allocation2 + $0x139] sm:$0xff] %vm527_vm1, %v27093_v37  ;;  %v27292_v28 = vld [vmem:[#allocation2 + $0xc9] sm:$0xff]  ;;  %v27314_v22 = vld [vmem:[#allocation2 + $0xf1] sm:$0xff] }
  0x3b   : > { %578 = vst.msk [vmem:[#allocation2 + $0x137] sm:$0x2] %vm564_vm2, %v27093_v37  ;;  %579 = vst.msk [vmem:[#allocation2 + $0x14f] sm:$0x2] %vm564_vm2, %v27099_v39  ;;  %23021 = vmatmul.mubr.msk.f32.gmra.mrb[10].mxu1 %vm527_vm1, %v27244_v45  ;;  %v27324_v20 = vld [vmem:[#allocation2 + $0xf9] sm:$0xff]  ;;  %v27330_v18 = vld [vmem:[#allocation2 + $0x109] sm:$0xff] }
  0x3c   : > { %555 = vst.msk [vmem:[#allocation2 + $0x141] sm:$0xff] %vm527_vm1, %v27096_v38  ;;  %556 = vst.msk [vmem:[#allocation2 + $0x151] sm:$0xff] %vm527_vm1, %v27099_v39  ;;  %23177 = vmatmul.mubr.msk.f32.gmra.mrb[14].mxu0 %vm527_vm1, %v27226_v62  ;;  %23023 = vmatprep.mubr.msk.f32.mxu1 %vm527_vm1, %v27250_v30 }
  0x3d   : > { %597 = vst.msk [vmem:[#allocation2 + $0x143] sm:$0x40] %vm583_vm3, %v27096_v38  ;;  %32484 = vst [vmem:[#allocation33_spill] sm:$0xff] %v27114_v40  ;;  %23179 = vmatprep.mubr.msk.f32.mxu0 %vm527_vm1, %v27230_v1  ;;  %v27274_v39 = vld [vmem:[#allocation2 + $0x110] sm:$0xff]  ;;  %v27282_v38 = vld [vmem:[#allocation2 + $0xc1] sm:$0xff] }
  0x3e   : > { %32485 = vst [vmem:[#allocation34_spill] sm:$0xff] %v27117_v41  ;;  %32486 = vst [vmem:[#allocation35_spill] sm:$0xff] %v27120_v42  ;;  %v27340_v16 = vld [vmem:[#allocation2 + $0x111] sm:$0xff]  ;;  %v27346_v14 = vld [vmem:[#allocation2 + $0x121] sm:$0xff] }
  0x3f   : > { %557 = vst.msk [vmem:[#allocation2 + $0x159] sm:$0xff] %vm527_vm1, %v27114_v40  ;;  %558 = vst.msk [vmem:[#allocation2 + $0x169] sm:$0xff] %vm527_vm1, %v27117_v41  ;;  %v27278_v37 = vld [vmem:[#allocation2 + $0x120] sm:$0xff] }
  0x40   : > { %598 = vst.msk [vmem:[#allocation2 + $0x15b] sm:$0x40] %vm583_vm3, %v27114_v40  ;;  %599 = vst.msk [vmem:[#allocation2 + $0x173] sm:$0x40] %vm583_vm3, %v27120_v42  ;;  %23180 = vmatmul.mubr.msk.f32.gmra.mrb[16].mxu0 %vm527_vm1, %v27242_v4  ;;  %v27276_v40 = vld [vmem:[#allocation2 + $0xb1] sm:$0xff]  ;;  %v27290_v27 = vld [vmem:[#allocation2 + $0x128] sm:$0xff] }
  0x41   : > { %580 = vst.msk [vmem:[#allocation2 + $0x167] sm:$0x2] %vm564_vm2, %v27117_v41  ;;  %582 = vst.msk [vmem:[#allocation2 + $0x197] sm:$0x2] %vm564_vm2, %v27117_v41  ;;  %23182 = vmatprep.mubr.msk.f32.mxu0 %vm527_vm1, %v27246_v47  ;;  %v27356_v12 = vld [vmem:[#allocation2 + $0x129] sm:$0xff]  ;;  %v27360_v9 = vld [vmem:[#allocation2 + $0x139] sm:$0xff] }
  0x42   : > { %562 = vst.msk [vmem:[#allocation2 + $0x199] sm:$0xff] %vm527_vm1, %v27117_v41  ;;  %559 = vst.msk [vmem:[#allocation2 + $0x171] sm:$0xff] %vm527_vm1, %v27120_v42  ;;  %v27262_v41 = vld [vmem:[#allocation2 + $0x108] sm:$0xff]  ;;  %v27294_v25 = vld [vmem:[#allocation2 + $0x138] sm:$0xff] }
  0x43   : > { %563 = vst.msk [vmem:[#allocation2 + $0x1a1] sm:$0xff] %vm527_vm1, %v27120_v42  ;;  %32487 = vst [vmem:[#allocation36_spill] sm:$0xff] %v27145_v43  ;;  %v27306_v23 = vld [vmem:[#allocation2 + $0x140] sm:$0xff]  ;;  %v27310_v21 = vld [vmem:[#allocation2 + $0x150] sm:$0xff] }
  0x44   : > { %601 = vst.msk [vmem:[#allocation2 + $0x1a3] sm:$0x40] %vm583_vm3, %v27120_v42  ;;  %32488 = vst [vmem:[#allocation37_spill] sm:$0xff] %v27148_v44  ;;  %v27266_v42 = vld [vmem:[#allocation2 + $0xa9] sm:$0xff]  ;;  %v27368_v10 = vld [vmem:[#allocation2 + $0x141] sm:$0xff] }
  0x45   : > { %560 = vst.msk [vmem:[#allocation2 + $0x181] sm:$0xff] %vm527_vm1, %v27145_v43  ;;  %561 = vst.msk [vmem:[#allocation2 + $0x189] sm:$0xff] %vm527_vm1, %v27148_v44  ;;  %v27372_v7 = vld [vmem:[#allocation2 + $0x151] sm:$0xff] }
  0x46   : > { %581 = vst.msk [vmem:[#allocation2 + $0x17f] sm:$0x2] %vm564_vm2, %v27145_v43  ;;  %v27258_v43 = vld [vmem:[#allocation2 + $0xf8] sm:$0xff]  ;;  %32489 = vst [vmem:[#allocation38_spill] sm:$0xff] %v27356_v12  ;;  %v27392_v6 = vld [vmem:[#allocation2 + $0x169] sm:$0xff] }
  0x47   : > { %600 = vst.msk [vmem:[#allocation2 + $0x18b] sm:$0x40] %vm583_vm3, %v27148_v44  ;;  %v27260_v44 = vld [vmem:[#allocation2 + $0x99] sm:$0xff]  ;;  %23183 = vmatmul.mubr.msk.f32.gmra.mrb[18].mxu0 %vm527_vm1, %v27258_v43  ;;  %32490 = vst [vmem:[#allocation39_spill] sm:$0xff] %v27360_v9 }
  0x48   : > { %23024 = vmatmul.mubr.msk.f32.gmra.mrb[12].mxu1 %vm527_vm1, %v27260_v44  ;;  %23185 = vmatprep.mubr.msk.f32.mxu0 %vm527_vm1, %v27262_v41  ;;  %v27322_v19 = vld [vmem:[#allocation2 + $0x158] sm:$0xff]  ;;  %v27326_v17 = vld [vmem:[#allocation2 + $0x168] sm:$0xff]  ;;  %32491 = vst [vmem:[#allocation40_spill] sm:$0xff] %v27368_v10  ;;  %32492 = vst [vmem:[#allocation41_spill] sm:$0xff] %v27372_v7 }
  0x49   : > { %23026 = vmatprep.mubr.msk.f32.mxu1 %vm527_vm1, %v27266_v42  ;;  %v27338_v15 = vld [vmem:[#allocation2 + $0x170] sm:$0xff]  ;;  %v27388_v5 = vld [vmem:[#allocation2 + $0x159] sm:$0xff]  ;;  %32495 = vst [vmem:[#allocation43_spill] sm:$0xff] %v27392_v6 }
  0x4a   : > { %32494 = vst [vmem:[#allocation42_spill] sm:$0xff] %v27388_v5 }
  0x4b   : > { %23186 = vmatmul.mubr.msk.f32.gmra.mrb[20].mxu0 %vm527_vm1, %v27274_v39 }
  0x4c   : > { %23027 = vmatmul.mubr.msk.f32.gmra.mrb[14].mxu1 %vm527_vm1, %v27276_v40  ;;  %23188 = vmatprep.mubr.msk.f32.mxu0 %vm527_vm1, %v27278_v37  ;;  %v27354_v11 = vld [vmem:[#allocation2 + $0x188] sm:$0xff] }
  0x4d   : > { %23029 = vmatprep.mubr.msk.f32.mxu1 %vm527_vm1, %v27282_v38  ;;  %v27342_v13 = vld [vmem:[#allocation2 + $0x180] sm:$0xff] }
  0x4f   : > { %23189 = vmatmul.mubr.msk.f32.gmra.mrb[22].mxu0 %vm527_vm1, %v27290_v27 }
  0x50   : > { %23030 = vmatmul.mubr.msk.f32.gmra.mrb[16].mxu1 %vm527_vm1, %v27292_v28  ;;  %23191 = vmatprep.mubr.msk.f32.mxu0 %vm527_vm1, %v27294_v25 }
  0x51   : > { %23032 = vmatprep.mubr.msk.f32.mxu1 %vm527_vm1, %v27298_v26 }
  0x53   : > { %23192 = vmatmul.mubr.msk.f32.gmra.mrb[24].mxu0 %vm527_vm1, %v27306_v23 }
  0x54   : > { %23033 = vmatmul.mubr.msk.f32.gmra.mrb[18].mxu1 %vm527_vm1, %v27308_v24  ;;  %23194 = vmatprep.mubr.msk.f32.mxu0 %vm527_vm1, %v27310_v21 }
  0x55   : > { %23035 = vmatprep.mubr.msk.f32.mxu1 %vm527_vm1, %v27314_v22 }
  0x57   : > { %23195 = vmatmul.mubr.msk.f32.gmra.mrb[26].mxu0 %vm527_vm1, %v27322_v19 }
  0x58   : > { %23036 = vmatmul.mubr.msk.f32.gmra.mrb[20].mxu1 %vm527_vm1, %v27324_v20  ;;  %23197 = vmatprep.mubr.msk.f32.mxu0 %vm527_vm1, %v27326_v17 }
  0x59   : > { %23038 = vmatprep.mubr.msk.f32.mxu1 %vm527_vm1, %v27330_v18 }
  0x5b   : > { %23198 = vmatmul.mubr.msk.f32.gmra.mrb[28].mxu0 %vm527_vm1, %v27338_v15 }
  0x5c   : > { %23039 = vmatmul.mubr.msk.f32.gmra.mrb[22].mxu1 %vm527_vm1, %v27340_v16  ;;  %23200 = vmatprep.mubr.msk.f32.mxu0 %vm527_vm1, %v27342_v13 }
  0x5d   : > { %23041 = vmatprep.mubr.msk.f32.mxu1 %vm527_vm1, %v27346_v14 }
  0x5f   : > { %23201 = vmatmul.mubr.msk.f32.gmra.mrb[30].mxu0 %vm527_vm1, %v27354_v11 }
  0x60   : > { %23042 = vmatmul.mubr.msk.f32.gmra.mrb[24].mxu1 %vm527_vm1, %v27356_v12  ;;  %23205 = vmatprep.mubr.msk.f32.mxu0 %vm527_vm1, %v27166_v49  ;;  %v32493_v49 = vrot.slane %v26867_v3, 4  ;;  %v607_v3 = vld [vmem:[#allocation2] sm:$0xff] }
  0x61   : > { %23044 = vmatprep.mubr.msk.f32.mxu1 %vm527_vm1, %v27360_v9 }
  0x63   : > { %23206 = vmatmul.mubr.msk.f32.vlgmr.msra.gmra.mrb[0].mxu0 %vm527_vm1, %v27180_v51  ;;  %v27402_v51 = vld [vmem:[#allocation2 + $0x171] sm:$0xff] }
  0x64   : > { %23045 = vmatmul.mubr.msk.f32.gmra.mrb[26].mxu1 %vm527_vm1, %v27368_v10  ;;  %23254 = vmatpush3.msk.msra.mxu0 %vm769_vm0, %v32493_v49  ;;  %32496 = vst [vmem:[#allocation44_spill] sm:$0xff] %v27402_v51  ;;  %v608_v49 = vld [vmem:[#allocation2 + $0x8] sm:$0xff] }
  0x65   : > { %23047 = vmatprep.mubr.msk.f32.mxu1 %vm527_vm1, %v27372_v7  ;;  %23208 = vmatprep.mubr.msk.f32.mxu0 %vm527_vm1, %v27186_v53 }
  0x66   : > { %23303 = vmatprep.subr.msk.mxu0 %vm769_vm0, %v27379_v8 }
  0x67   : > { %23209 = vmatmul.mubr.msk.f32.gmra.mrb[2].mxu0 %vm527_vm1, %v27196_v55 }
  0x68   : > { %23048 = vmatmul.mubr.msk.f32.gmra.mrb[28].mxu1 %vm527_vm1, %v27388_v5  ;;  %23211 = vmatprep.mubr.msk.f32.mxu0 %vm527_vm1, %v27202_v57 }
  0x69   : > { %23050 = vmatprep.mubr.msk.f32.mxu1 %vm527_vm1, %v27392_v6 }
  0x6b   : > { %23212 = vmatmul.mubr.msk.f32.gmra.mrb[4].mxu0 %vm527_vm1, %v27212_v59 }
  0x6c   : > { %23051 = vmatmul.mubr.msk.f32.gmra.mrb[30].mxu1 %vm527_vm1, %v27402_v51  ;;  %23214 = vmatprep.mubr.msk.f32.mxu0 %vm527_vm1, %v27218_v61 }
  0x6d   : > { %23055 = vmatprep.mubr.msk.f32.mxu1 %vm527_vm1, %v607_v3  ;;  %v2486_v3 = vld [vmem:[#allocation2 + $0x22] sm:$0xff] }
  0x6f   : > { %23215 = vmatmul.mubr.msk.f32.gmra.mrb[6].mxu0 %vm527_vm1, %v27228_v63 }
  0x70   : > { %23056 = vmatmul.mubr.msk.f32.vlgmr.msra.gmra.mrb[0].mxu1 %vm527_vm1, %v608_v49  ;;  %23217 = vmatprep.mubr.msk.f32.mxu0 %vm527_vm1, %v27234_v2  ;;  %v32212_v49 = vrot.slane %v27379_v8, 4 }
  0x71   : > { %23058 = vmatprep.mubr.msk.f32.mxu1 %vm527_vm1, %v27050_v29  ;;  %23104 = vmatpush3.msk.msra.mxu1 %vm769_vm0, %v26854_v0  ;;  %v27500_v0 = vld [vmem:[#allocation2 + $0x181] sm:$0xff]  ;;  %v27510_v29 = vld [vmem:[#allocation2 + $0x189] sm:$0xff] }
  0x72   : > { %32497 = vst [vmem:[#allocation45_spill] sm:$0xff] %v27500_v0  ;;  %32498 = vst [vmem:[#allocation46_spill] sm:$0xff] %v27510_v29 }
  0x73   : > { %23218 = vmatmul.mubr.msk.f32.gmra.mrb[8].mxu0 %vm527_vm1, %v27244_v45 }
  0x74   : > { %23059 = vmatmul.mubr.msk.f32.gmra.mrb[2].mxu1 %vm527_vm1, %v27053_v31  ;;  %23220 = vmatprep.mubr.msk.f32.mxu0 %vm527_vm1, %v27250_v30  ;;  %v2485_v31 = vld [vmem:[#allocation2 + $0x1a] sm:$0xff] }
  0x75   : > { %23061 = vmatprep.mubr.msk.f32.mxu1 %vm527_vm1, %v27055_v32 }
  0x77   : > { %23221 = vmatmul.mubr.msk.f32.gmra.mrb[10].mxu0 %vm527_vm1, %v27260_v44 }
  0x78   : > { %23062 = vmatmul.mubr.msk.f32.gmra.mrb[4].mxu1 %vm527_vm1, %v27077_v33  ;;  %23223 = vmatprep.mubr.msk.f32.mxu0 %vm527_vm1, %v27266_v42 }
  0x79   : > { %23064 = vmatprep.mubr.msk.f32.mxu1 %vm527_vm1, %v27079_v34 }
  0x7b   : > { %23224 = vmatmul.mubr.msk.f32.gmra.mrb[12].mxu0 %vm527_vm1, %v27276_v40 }
  0x7c   : > { %23065 = vmatmul.mubr.msk.f32.gmra.mrb[6].mxu1 %vm527_vm1, %v27088_v35  ;;  %23226 = vmatprep.mubr.msk.f32.mxu0 %vm527_vm1, %v27282_v38 }
  0x7d   : > { %23067 = vmatprep.mubr.msk.f32.mxu1 %vm527_vm1, %v27090_v36 }
  0x7f   : > { %23227 = vmatmul.mubr.msk.f32.gmra.mrb[14].mxu0 %vm527_vm1, %v27292_v28 }
  0x80   : > { %23068 = vmatmul.mubr.msk.f32.gmra.mrb[8].mxu1 %vm527_vm1, %v27152_v46  ;;  %23229 = vmatprep.mubr.msk.f32.mxu0 %vm527_vm1, %v27298_v26 }
  0x81   : > { %23070 = vmatprep.mubr.msk.f32.mxu1 %vm527_vm1, %v27163_v48 }
  0x83   : > { %23230 = vmatmul.mubr.msk.f32.gmra.mrb[16].mxu0 %vm527_vm1, %v27308_v24 }
  0x84   : > { %23071 = vmatmul.mubr.msk.f32.gmra.mrb[10].mxu1 %vm527_vm1, %v27178_v50  ;;  %23232 = vmatprep.mubr.msk.f32.mxu0 %vm527_vm1, %v27314_v22 }
  0x85   : > { %23073 = vmatprep.mubr.msk.f32.mxu1 %vm527_vm1, %v27182_v52 }
  0x87   : > { %23233 = vmatmul.mubr.msk.f32.gmra.mrb[18].mxu0 %vm527_vm1, %v27324_v20 }
  0x88   : > { %23074 = vmatmul.mubr.msk.f32.gmra.mrb[12].mxu1 %vm527_vm1, %v27194_v54  ;;  %23235 = vmatprep.mubr.msk.f32.mxu0 %vm527_vm1, %v27330_v18 }
  0x89   : > { %23076 = vmatprep.mubr.msk.f32.mxu1 %vm527_vm1, %v27198_v56 }
  0x8b   : > { %23236 = vmatmul.mubr.msk.f32.gmra.mrb[20].mxu0 %vm527_vm1, %v27340_v16 }
  0x8c   : > { %23077 = vmatmul.mubr.msk.f32.gmra.mrb[14].mxu1 %vm527_vm1, %v27210_v58  ;;  %23238 = vmatprep.mubr.msk.f32.mxu0 %vm527_vm1, %v27346_v14 }
  0x8d   : > { %23079 = vmatprep.mubr.msk.f32.mxu1 %vm527_vm1, %v27214_v60 }
  0x8f   : > { %23239 = vmatmul.mubr.msk.f32.gmra.mrb[22].mxu0 %vm527_vm1, %v27356_v12  ;;  %v27569_v12 = vld [vmem:[#allocation2 + $0x92] sm:$0xff] }
  0x90   : > { %23080 = vmatmul.mubr.msk.f32.gmra.mrb[16].mxu1 %vm527_vm1, %v27226_v62  ;;  %23241 = vmatprep.mubr.msk.f32.mxu0 %vm527_vm1, %v27360_v9  ;;  %v27559_v9 = vld [vmem:[#allocation2 + $0x7a] sm:$0xff]  ;;  %32507 = vst [vmem:[#allocation55_spill] sm:$0xff] %v27569_v12 }
  0x91   : > { %23082 = vmatprep.mubr.msk.f32.mxu1 %vm527_vm1, %v27230_v1  ;;  %32505 = vst [vmem:[#allocation53_spill] sm:$0xff] %v27559_v9 }
  0x93   : > { %23242 = vmatmul.mubr.msk.f32.gmra.mrb[24].mxu0 %vm527_vm1, %v27368_v10  ;;  %v27557_v10 = vld [vmem:[#allocation2 + $0x6a] sm:$0xff] }
  0x94   : > { %23083 = vmatmul.mubr.msk.f32.gmra.mrb[18].mxu1 %vm527_vm1, %v27242_v4  ;;  %23244 = vmatprep.mubr.msk.f32.mxu0 %vm527_vm1, %v27372_v7  ;;  %v27548_v7 = vld [vmem:[#allocation2 + $0x62] sm:$0xff]  ;;  %32504 = vst [vmem:[#allocation52_spill] sm:$0xff] %v27557_v10 }
  0x95   : > { %23085 = vmatprep.mubr.msk.f32.mxu1 %vm527_vm1, %v27246_v47  ;;  %32503 = vst [vmem:[#allocation51_spill] sm:$0xff] %v27548_v7 }
  0x97   : > { %23245 = vmatmul.mubr.msk.f32.gmra.mrb[26].mxu0 %vm527_vm1, %v27388_v5  ;;  %v27546_v5 = vld [vmem:[#allocation2 + $0x52] sm:$0xff] }
  0x98   : > { %23086 = vmatmul.mubr.msk.f32.gmra.mrb[20].mxu1 %vm527_vm1, %v27258_v43  ;;  %23247 = vmatprep.mubr.msk.f32.mxu0 %vm527_vm1, %v27392_v6  ;;  %v1320_v6 = vld [vmem:[#allocation2 + $0x2] sm:$0xff]  ;;  %32502 = vst [vmem:[#allocation50_spill] sm:$0xff] %v27546_v5 }
  0x99   : > { %23088 = vmatprep.mubr.msk.f32.mxu1 %vm527_vm1, %v27262_v41 }
  0x9b   : > { %23248 = vmatmul.mubr.msk.f32.gmra.mrb[28].mxu0 %vm527_vm1, %v27402_v51  ;;  %v27520_v51 = vld [vmem:[#allocation2 + $0x32] sm:$0xff] }
  0x9c   : > { %23089 = vmatmul.mubr.msk.f32.gmra.mrb[22].mxu1 %vm527_vm1, %v27274_v39  ;;  %23250 = vmatprep.mubr.msk.f32.mxu0 %vm527_vm1, %v27500_v0  ;;  %32499 = vst [vmem:[#allocation47_spill] sm:$0xff] %v27520_v51  ;;  %v27533_v0 = vld [vmem:[#allocation2 + $0x4a] sm:$0xff] }
  0x9d   : > { %23091 = vmatprep.mubr.msk.f32.mxu1 %vm527_vm1, %v27278_v37  ;;  %32501 = vst [vmem:[#allocation49_spill] sm:$0xff] %v27533_v0 }
  0x9f   : > { %23251 = vmatmul.mubr.msk.f32.gmra.mrb[30].mxu0 %vm527_vm1, %v27510_v29  ;;  %v27531_v29 = vld [vmem:[#allocation2 + $0x3a] sm:$0xff] }
  0xa0   : > { %23092 = vmatmul.mubr.msk.f32.gmra.mrb[24].mxu1 %vm527_vm1, %v27290_v27  ;;  %23255 = vmatprep.mubr.msk.f32.mxu0 %vm527_vm1, %v2485_v31  ;;  %32500 = vst [vmem:[#allocation48_spill] sm:$0xff] %v27531_v29 }
  0xa1   : > { %23094 = vmatprep.mubr.msk.f32.mxu1 %vm527_vm1, %v27294_v25 }
  0xa3   : > { %23256 = vmatmul.mubr.msk.f32.vlgmr.msra.gmra.mrb[0].mxu0 %vm527_vm1, %v2486_v3 }
  0xa4   : > { %23095 = vmatmul.mubr.msk.f32.gmra.mrb[26].mxu1 %vm527_vm1, %v27306_v23  ;;  %23304 = vmatpush3.msk.msra.mxu0 %vm769_vm0, %v27379_v8 }
  0xa5   : > { %23097 = vmatprep.mubr.msk.f32.mxu1 %vm527_vm1, %v27310_v21  ;;  %23258 = vmatprep.mubr.msk.f32.mxu0 %vm527_vm1, %v27520_v51 }
  0xa6   : > { %23353 = vmatprep.subr.msk.mxu0 %vm769_vm0, %v32212_v49  ;;  %v1321_v49 = vld [vmem:[#allocation2 + $0xa] sm:$0xff] }
  0xa7   : > { %23259 = vmatmul.mubr.msk.f32.gmra.mrb[2].mxu0 %vm527_vm1, %v27531_v29 }
  0xa8   : > { %23098 = vmatmul.mubr.msk.f32.gmra.mrb[28].mxu1 %vm527_vm1, %v27322_v19  ;;  %23261 = vmatprep.mubr.msk.f32.mxu0 %vm527_vm1, %v27533_v0 }
  0xa9   : > { %23100 = vmatprep.mubr.msk.f32.mxu1 %vm527_vm1, %v27326_v17 }
  0xab   : > { %23262 = vmatmul.mubr.msk.f32.gmra.mrb[4].mxu0 %vm527_vm1, %v27546_v5 }
  0xac   : > { %23101 = vmatmul.mubr.msk.f32.gmra.mrb[30].mxu1 %vm527_vm1, %v27338_v15  ;;  %23264 = vmatprep.mubr.msk.f32.mxu0 %vm527_vm1, %v27548_v7 }
  0xad   : > { %23105 = vmatprep.mubr.msk.f32.mxu1 %vm527_vm1, %v1320_v6  ;;  %v27567_v6 = vld [vmem:[#allocation2 + $0x82] sm:$0xff] }
  0xae   : > { %32506 = vst [vmem:[#allocation54_spill] sm:$0xff] %v27567_v6 }
  0xaf   : > { %23265 = vmatmul.mubr.msk.f32.gmra.mrb[6].mxu0 %vm527_vm1, %v27557_v10 }
  0xb0   : > { %23106 = vmatmul.mubr.msk.f32.vlgmr.msra.gmra.mrb[0].mxu1 %vm527_vm1, %v1321_v49  ;;  %23267 = vmatprep.mubr.msk.f32.mxu0 %vm527_vm1, %v27559_v9  ;;  %v27580_v49 = vld [vmem:[#allocation2 + $0xaa] sm:$0xff] }
  0xb1   : > { %23108 = vmatprep.mubr.msk.f32.mxu1 %vm527_vm1, %v2485_v31  ;;  %v27578_v31 = vld [vmem:[#allocation2 + $0x9a] sm:$0xff]  ;;  %32509 = vst [vmem:[#allocation57_spill] sm:$0xff] %v27580_v49 }
  0xb2   : > { %32508 = vst [vmem:[#allocation56_spill] sm:$0xff] %v27578_v31 }
  0xb3   : > { %23268 = vmatmul.mubr.msk.f32.gmra.mrb[8].mxu0 %vm527_vm1, %v27567_v6 }
  0xb4   : > { %23109 = vmatmul.mubr.msk.f32.gmra.mrb[2].mxu1 %vm527_vm1, %v2486_v3  ;;  %23270 = vmatprep.mubr.msk.f32.mxu0 %vm527_vm1, %v27569_v12  ;;  %v27590_v3 = vld [vmem:[#allocation2 + $0xb2] sm:$0xff] }
  0xb5   : > { %23111 = vmatprep.mubr.msk.f32.mxu1 %vm527_vm1, %v27520_v51  ;;  %32510 = vst [vmem:[#allocation58_spill] sm:$0xff] %v27590_v3  ;;  %v27592_v51 = vld [vmem:[#allocation2 + $0xc2] sm:$0xff] }
  0xb6   : > { %32511 = vst [vmem:[#allocation59_spill] sm:$0xff] %v27592_v51 }
  0xb7   : > { %23271 = vmatmul.mubr.msk.f32.gmra.mrb[10].mxu0 %vm527_vm1, %v27578_v31 }
  0xb8   : > { %23112 = vmatmul.mubr.msk.f32.gmra.mrb[4].mxu1 %vm527_vm1, %v27531_v29  ;;  %23273 = vmatprep.mubr.msk.f32.mxu0 %vm527_vm1, %v27580_v49  ;;  %v27604_v29 = vld [vmem:[#allocation2 + $0xda] sm:$0xff] }
  0xb9   : > { %23114 = vmatprep.mubr.msk.f32.mxu1 %vm527_vm1, %v27533_v0  ;;  %v27602_v0 = vld [vmem:[#allocation2 + $0xca] sm:$0xff]  ;;  %32513 = vst [vmem:[#allocation61_spill] sm:$0xff] %v27604_v29 }
  0xba   : > { %32512 = vst [vmem:[#allocation60_spill] sm:$0xff] %v27602_v0 }
  0xbb   : > { %23274 = vmatmul.mubr.msk.f32.gmra.mrb[12].mxu0 %vm527_vm1, %v27590_v3 }
  0xbc   : > { %23115 = vmatmul.mubr.msk.f32.gmra.mrb[6].mxu1 %vm527_vm1, %v27546_v5  ;;  %23276 = vmatprep.mubr.msk.f32.mxu0 %vm527_vm1, %v27592_v51  ;;  %v27616_v5 = vld [vmem:[#allocation2 + $0xf2] sm:$0xff] }
  0xbd   : > { %23117 = vmatprep.mubr.msk.f32.mxu1 %vm527_vm1, %v27548_v7  ;;  %v27614_v7 = vld [vmem:[#allocation2 + $0xe2] sm:$0xff]  ;;  %32515 = vst [vmem:[#allocation63_spill] sm:$0xff] %v27616_v5 }
  0xbe   : > { %32514 = vst [vmem:[#allocation62_spill] sm:$0xff] %v27614_v7 }
  0xbf   : > { %23277 = vmatmul.mubr.msk.f32.gmra.mrb[14].mxu0 %vm527_vm1, %v27602_v0 }
  0xc0   : > { %23118 = vmatmul.mubr.msk.f32.gmra.mrb[8].mxu1 %vm527_vm1, %v27557_v10  ;;  %23279 = vmatprep.mubr.msk.f32.mxu0 %vm527_vm1, %v27604_v29  ;;  %v27628_v10 = vld [vmem:[#allocation2 + $0x10a] sm:$0xff] }
  0xc1   : > { %23120 = vmatprep.mubr.msk.f32.mxu1 %vm527_vm1, %v27559_v9  ;;  %v27626_v9 = vld [vmem:[#allocation2 + $0xfa] sm:$0xff]  ;;  %32516 = vst [vmem:[#allocation64_spill] sm:$0xff] %v27628_v10 }
  0xc3   : > { %23280 = vmatmul.mubr.msk.f32.gmra.mrb[16].mxu0 %vm527_vm1, %v27614_v7 }
  0xc4   : > { %23121 = vmatmul.mubr.msk.f32.gmra.mrb[10].mxu1 %vm527_vm1, %v27567_v6  ;;  %23282 = vmatprep.mubr.msk.f32.mxu0 %vm527_vm1, %v27616_v5  ;;  %v27640_v6 = vld [vmem:[#allocation2 + $0x122] sm:$0xff] }
  0xc5   : > { %23123 = vmatprep.mubr.msk.f32.mxu1 %vm527_vm1, %v27569_v12  ;;  %v27638_v12 = vld [vmem:[#allocation2 + $0x112] sm:$0xff] }
  0xc7   : > { %23283 = vmatmul.mubr.msk.f32.gmra.mrb[18].mxu0 %vm527_vm1, %v27626_v9 }
  0xc8   : > { %23124 = vmatmul.mubr.msk.f32.gmra.mrb[12].mxu1 %vm527_vm1, %v27578_v31  ;;  %23285 = vmatprep.mubr.msk.f32.mxu0 %vm527_vm1, %v27628_v10  ;;  %v27652_v31 = vld [vmem:[#allocation2 + $0x13a] sm:$0xff] }
  0xc9   : > { %23126 = vmatprep.mubr.msk.f32.mxu1 %vm527_vm1, %v27580_v49  ;;  %v27650_v49 = vld [vmem:[#allocation2 + $0x12a] sm:$0xff]  ;;  %32517 = vst [vmem:[#allocation65_spill] sm:$0xff] %v27652_v31 }
  0xcb   : > { %23286 = vmatmul.mubr.msk.f32.gmra.mrb[20].mxu0 %vm527_vm1, %v27638_v12 }
  0xcc   : > { %23127 = vmatmul.mubr.msk.f32.gmra.mrb[14].mxu1 %vm527_vm1, %v27590_v3  ;;  %23288 = vmatprep.mubr.msk.f32.mxu0 %vm527_vm1, %v27640_v6  ;;  %v27664_v3 = vld [vmem:[#allocation2 + $0x152] sm:$0xff] }
  0xcd   : > { %23129 = vmatprep.mubr.msk.f32.mxu1 %vm527_vm1, %v27592_v51  ;;  %v27662_v51 = vld [vmem:[#allocation2 + $0x142] sm:$0xff] }
  0xcf   : > { %23289 = vmatmul.mubr.msk.f32.gmra.mrb[22].mxu0 %vm527_vm1, %v27650_v49 }
  0xd0   : > { %23130 = vmatmul.mubr.msk.f32.gmra.mrb[16].mxu1 %vm527_vm1, %v27602_v0  ;;  %23291 = vmatprep.mubr.msk.f32.mxu0 %vm527_vm1, %v27652_v31  ;;  %v27676_v0 = vld [vmem:[#allocation2 + $0x16a] sm:$0xff] }
  0xd1   : > { %23132 = vmatprep.mubr.msk.f32.mxu1 %vm527_vm1, %v27604_v29  ;;  %v27674_v29 = vld [vmem:[#allocation2 + $0x15a] sm:$0xff] }
  0xd3   : > { %23292 = vmatmul.mubr.msk.f32.gmra.mrb[24].mxu0 %vm527_vm1, %v27662_v51 }
  0xd4   : > { %23133 = vmatmul.mubr.msk.f32.gmra.mrb[18].mxu1 %vm527_vm1, %v27614_v7  ;;  %23294 = vmatprep.mubr.msk.f32.mxu0 %vm527_vm1, %v27664_v3  ;;  %v27688_v7 = vld [vmem:[#allocation2 + $0x182] sm:$0xff] }
  0xd5   : > { %23135 = vmatprep.mubr.msk.f32.mxu1 %vm527_vm1, %v27616_v5  ;;  %v27686_v5 = vld [vmem:[#allocation2 + $0x172] sm:$0xff]  ;;  %32518 = vst [vmem:[#allocation66_spill] sm:$0xff] %v27688_v7 }
  0xd7   : > { %23295 = vmatmul.mubr.msk.f32.gmra.mrb[26].mxu0 %vm527_vm1, %v27674_v29 }
  0xd8   : > { %23136 = vmatmul.mubr.msk.f32.gmra.mrb[20].mxu1 %vm527_vm1, %v27626_v9  ;;  %23297 = vmatprep.mubr.msk.f32.mxu0 %vm527_vm1, %v27676_v0 }
  0xd9   : > { %23138 = vmatprep.mubr.msk.f32.mxu1 %vm527_vm1, %v27628_v10  ;;  %v27698_v10 = vld [vmem:[#allocation2 + $0x18a] sm:$0xff] }
  0xdb   : > { %23298 = vmatmul.mubr.msk.f32.gmra.mrb[28].mxu0 %vm527_vm1, %v27686_v5 }
  0xdc   : > { %23139 = vmatmul.mubr.msk.f32.gmra.mrb[22].mxu1 %vm527_vm1, %v27638_v12  ;;  %23300 = vmatprep.mubr.msk.f32.mxu0 %vm527_vm1, %v27688_v7  ;;  %v606_v7 = vld [vmem:[%s32158_s1 + $0x20] sm:$0xf] }
  0xdd   : > { %23141 = vmatprep.mubr.msk.f32.mxu1 %vm527_vm1, %v27640_v6 }
  0xdf   : > { %23301 = vmatmul.mubr.msk.f32.gmra.mrb[30].mxu0 %vm527_vm1, %v27698_v10 }
  0xe0   : > { %23142 = vmatmul.mubr.msk.f32.gmra.mrb[24].mxu1 %vm527_vm1, %v27650_v49  ;;  %23305 = vmatprep.mubr.msk.f32.mxu0 %vm527_vm1, %v27055_v32  ;;  %v32534_v32 = vld [vmem:[#allocation52_spill] sm:$0xff] }
  0xe1   : > { %23144 = vmatprep.mubr.msk.f32.mxu1 %vm527_vm1, %v27652_v31  ;;  %v32519_v31 = vrot.slane %v27379_v8, 4  ;;  %v2904_v8 = vld [vmem:[#allocation2 + $0x198] sm:$0xff] }
  0xe3   : > { %23306 = vmatmul.mubr.msk.f32.vlgmr.msra.gmra.mrb[0].mxu0 %vm527_vm1, %v27077_v33  ;;  %v32535_v33 = vld [vmem:[#allocation53_spill] sm:$0xff] }
  0xe4   : > { %23145 = vmatmul.mubr.msk.f32.gmra.mrb[26].mxu1 %vm527_vm1, %v27662_v51  ;;  %23354 = vmatpush3.msk.msra.mxu0 %vm769_vm0, %v32519_v31 }
  0xe5   : > { %23147 = vmatprep.mubr.msk.f32.mxu1 %vm527_vm1, %v27664_v3  ;;  %23308 = vmatprep.mubr.msk.f32.mxu0 %vm527_vm1, %v27079_v34  ;;  %v32536_v34 = vld [vmem:[#allocation54_spill] sm:$0xff] }
  0xe6   : > { %23403 = vmatprep.subr.msk.mxu0 %vm769_vm0, %v606_v7 }
  0xe7   : > { %23309 = vmatmul.mubr.msk.f32.gmra.mrb[2].mxu0 %vm527_vm1, %v27088_v35  ;;  %v32537_v35 = vld [vmem:[#allocation55_spill] sm:$0xff] }
  0xe8   : > { %23148 = vmatmul.mubr.msk.f32.gmra.mrb[28].mxu1 %vm527_vm1, %v27674_v29  ;;  %23311 = vmatprep.mubr.msk.f32.mxu0 %vm527_vm1, %v27090_v36  ;;  %v32538_v36 = vld [vmem:[#allocation56_spill] sm:$0xff] }
  0xe9   : > { %23150 = vmatprep.mubr.msk.f32.mxu1 %vm527_vm1, %v27676_v0 }
  0xeb   : > { %23312 = vmatmul.mubr.msk.f32.gmra.mrb[4].mxu0 %vm527_vm1, %v27152_v46 }
  0xec   : > { %23151 = vmatmul.mubr.msk.f32.gmra.mrb[30].mxu1 %vm527_vm1, %v27686_v5  ;;  %23314 = vmatprep.mubr.msk.f32.mxu0 %vm527_vm1, %v27163_v48  ;;  %v32546_v48 = vld [vmem:[#allocation64_spill] sm:$0xff] }
  0xef   : > { %23315 = vmatmul.mubr.msk.f32.gmra.mrb[6].mxu0 %vm527_vm1, %v27178_v50 }
  0xf0   : > { %23317 = vmatprep.mubr.msk.f32.mxu0 %vm527_vm1, %v27182_v52 }
  0xf3   : > { %23318 = vmatmul.mubr.msk.f32.gmra.mrb[8].mxu0 %vm527_vm1, %v27194_v54 }
  0xf4   : > { %23320 = vmatprep.mubr.msk.f32.mxu0 %vm527_vm1, %v27198_v56 }
  0xf7   : > { %23321 = vmatmul.mubr.msk.f32.gmra.mrb[10].mxu0 %vm527_vm1, %v27210_v58 }
  0xf8   : > { %23323 = vmatprep.mubr.msk.f32.mxu0 %vm527_vm1, %v27214_v60  ;;  %v32548_v60 = vld [vmem:[#allocation66_spill] sm:$0xff] }
  0xfb   : > { %23324 = vmatmul.mubr.msk.f32.gmra.mrb[12].mxu0 %vm527_vm1, %v27226_v62  ;;  %v3680_v62 = vld [vmem:[#allocation2 + $0x19a] sm:$0xff] }
  0xfc   : > { %23326 = vmatprep.mubr.msk.f32.mxu0 %vm527_vm1, %v27230_v1  ;;  %v3681_v1 = vld [vmem:[#allocation2 + $0x1a2] sm:$0xff] }
  0xff   : > { %23327 = vmatmul.mubr.msk.f32.gmra.mrb[14].mxu0 %vm527_vm1, %v27242_v4 }
 0x100   : > { %23329 = vmatprep.mubr.msk.f32.mxu0 %vm527_vm1, %v27246_v47 }
 0x103   : > { %23330 = vmatmul.mubr.msk.f32.gmra.mrb[16].mxu0 %vm527_vm1, %v27258_v43  ;;  %v32545_v43 = vld [vmem:[#allocation63_spill] sm:$0xff] }
 0x104   : > { %23332 = vmatprep.mubr.msk.f32.mxu0 %vm527_vm1, %v27262_v41  ;;  %v32543_v41 = vld [vmem:[#allocation61_spill] sm:$0xff] }
 0x107   : > { %23333 = vmatmul.mubr.msk.f32.gmra.mrb[18].mxu0 %vm527_vm1, %v27274_v39  ;;  %v32541_v39 = vld [vmem:[#allocation59_spill] sm:$0xff] }
 0x108   : > { %23335 = vmatprep.mubr.msk.f32.mxu0 %vm527_vm1, %v27278_v37  ;;  %v32539_v37 = vld [vmem:[#allocation57_spill] sm:$0xff] }
 0x10b   : > { %23336 = vmatmul.mubr.msk.f32.gmra.mrb[20].mxu0 %vm527_vm1, %v27290_v27  ;;  %v32531_v27 = vld [vmem:[#allocation49_spill] sm:$0xff] }
 0x10c   : > { %23338 = vmatprep.mubr.msk.f32.mxu0 %vm527_vm1, %v27294_v25  ;;  %v32529_v25 = vld [vmem:[#allocation47_spill] sm:$0xff] }
 0x10f   : > { %23339 = vmatmul.mubr.msk.f32.gmra.mrb[22].mxu0 %vm527_vm1, %v27306_v23  ;;  %v2905_v23 = vld [vmem:[#allocation2 + $0x1a0] sm:$0xff] }
 0x110   : > { %23341 = vmatprep.mubr.msk.f32.mxu0 %vm527_vm1, %v27310_v21  ;;  %v3292_v21 = vld [vmem:[#allocation2 + $0x199] sm:$0xff] }
 0x113   : > { %23342 = vmatmul.mubr.msk.f32.gmra.mrb[24].mxu0 %vm527_vm1, %v27322_v19  ;;  %v32523_v19 = vld [vmem:[#allocation41_spill] sm:$0xff] }
 0x114   : > { %23344 = vmatprep.mubr.msk.f32.mxu0 %vm527_vm1, %v27326_v17  ;;  %v32522_v17 = vld [vmem:[#allocation40_spill] sm:$0xff] }
 0x117   : > { %23345 = vmatmul.mubr.msk.f32.gmra.mrb[26].mxu0 %vm527_vm1, %v27338_v15  ;;  %v32521_v15 = vld [vmem:[#allocation39_spill] sm:$0xff] }
 0x118   : > { %23347 = vmatprep.mubr.msk.f32.mxu0 %vm527_vm1, %v27342_v13  ;;  %v32520_v13 = vld [vmem:[#allocation38_spill] sm:$0xff] }
 0x11b   : > { %23348 = vmatmul.mubr.msk.f32.gmra.mrb[28].mxu0 %vm527_vm1, %v27354_v11 }
 0x11c   : > { %23350 = vmatprep.mubr.msk.f32.mxu0 %vm527_vm1, %v2904_v8 }
 0x11f   : > { %23351 = vmatmul.mubr.msk.f32.gmra.mrb[30].mxu0 %vm527_vm1, %v2905_v23 }
 0x120   : > { %23355 = vmatprep.mubr.msk.f32.mxu0 %vm527_vm1, %v27186_v53 }
 0x123   : > { %23356 = vmatmul.mubr.msk.f32.vlgmr.msra.gmra.mrb[0].mxu0 %vm527_vm1, %v27196_v55 }
 0x124   : > { %23404 = vmatpush3.msk.msra.mxu0 %vm769_vm0, %v606_v7  ;;  %23358 = vmatprep.mubr.msk.f32.mxu0 %vm527_vm1, %v27202_v57  ;;  %v27819_v7 = vld [vmem:[%s32160_s3] sm:$0xff] }
 0x125   : > { %v4424_v11 = vrot.slane %v27819_v7, 4 }
 0x127   : > { %23359 = vmatmul.mubr.msk.f32.gmra.mrb[2].mxu0 %vm527_vm1, %v27212_v59  ;;  %23453 = vmatprep.subr.msk.mxu1 %vm769_vm0, %v4424_v11 }
 0x128   : > { %23361 = vmatprep.mubr.msk.f32.mxu0 %vm527_vm1, %v27218_v61  ;;  %23454 = vmatpush3.msk.msra.mxu1 %vm769_vm0, %v4424_v11 }
 0x129   : > { %23503 = vmatprep.subr.msk.mxu1 %vm769_vm0, %v27819_v7 }
 0x12b   : > { %23362 = vmatmul.mubr.msk.f32.gmra.mrb[4].mxu0 %vm527_vm1, %v27228_v63 }
 0x12c   : > { %23364 = vmatprep.mubr.msk.f32.mxu0 %vm527_vm1, %v27234_v2 }
 0x12f   : > { %23365 = vmatmul.mubr.msk.f32.gmra.mrb[6].mxu0 %vm527_vm1, %v27244_v45 }
 0x130   : > { %23367 = vmatprep.mubr.msk.f32.mxu0 %vm527_vm1, %v27250_v30  ;;  %v32533_v30 = vld [vmem:[#allocation51_spill] sm:$0xff] }
 0x133   : > { %23368 = vmatmul.mubr.msk.f32.gmra.mrb[8].mxu0 %vm527_vm1, %v27260_v44 }
 0x134   : > { %23370 = vmatprep.mubr.msk.f32.mxu0 %vm527_vm1, %v27266_v42  ;;  %v32544_v42 = vld [vmem:[#allocation62_spill] sm:$0xff] }
 0x137   : > { %23371 = vmatmul.mubr.msk.f32.gmra.mrb[10].mxu0 %vm527_vm1, %v27276_v40  ;;  %v32542_v40 = vld [vmem:[#allocation60_spill] sm:$0xff] }
 0x138   : > { %23373 = vmatprep.mubr.msk.f32.mxu0 %vm527_vm1, %v27282_v38  ;;  %v32540_v38 = vld [vmem:[#allocation58_spill] sm:$0xff] }
 0x13b   : > { %23374 = vmatmul.mubr.msk.f32.gmra.mrb[12].mxu0 %vm527_vm1, %v27292_v28  ;;  %v32532_v28 = vld [vmem:[#allocation50_spill] sm:$0xff] }
 0x13c   : > { %23376 = vmatprep.mubr.msk.f32.mxu0 %vm527_vm1, %v27298_v26  ;;  %v32530_v26 = vld [vmem:[#allocation48_spill] sm:$0xff] }
 0x13f   : > { %23377 = vmatmul.mubr.msk.f32.gmra.mrb[14].mxu0 %vm527_vm1, %v27308_v24  ;;  %v3293_v24 = vld [vmem:[#allocation2 + $0x1a1] sm:$0xff] }
 0x140   : > { %23379 = vmatprep.mubr.msk.f32.mxu0 %vm527_vm1, %v27314_v22  ;;  %v32528_v22 = vld [vmem:[#allocation46_spill] sm:$0xff] }
 0x143   : > { %23380 = vmatmul.mubr.msk.f32.gmra.mrb[16].mxu0 %vm527_vm1, %v27324_v20  ;;  %v32524_v20 = vld [vmem:[#allocation42_spill] sm:$0xff] }
 0x144   : > { %23382 = vmatprep.mubr.msk.f32.mxu0 %vm527_vm1, %v27330_v18  ;;  %v32525_v18 = vld [vmem:[#allocation43_spill] sm:$0xff] }
 0x147   : > { %23383 = vmatmul.mubr.msk.f32.gmra.mrb[18].mxu0 %vm527_vm1, %v27340_v16  ;;  %v32526_v16 = vld [vmem:[#allocation44_spill] sm:$0xff] }
 0x148   : > { %23385 = vmatprep.mubr.msk.f32.mxu0 %vm527_vm1, %v27346_v14  ;;  %v32527_v14 = vld [vmem:[#allocation45_spill] sm:$0xff] }
 0x14b   : > { %23386 = vmatmul.mubr.msk.f32.gmra.mrb[20].mxu0 %vm527_vm1, %v32520_v13 }
 0x14c   : > { %23388 = vmatprep.mubr.msk.f32.mxu0 %vm527_vm1, %v32521_v15 }
 0x14f   : > { %23389 = vmatmul.mubr.msk.f32.gmra.mrb[22].mxu0 %vm527_vm1, %v32522_v17  ;;  %v27983_v17 = vld [vmem:[%s32162_s5] sm:$0xff] }
 0x150   : > { %23391 = vmatprep.mubr.msk.f32.mxu0 %vm527_vm1, %v32523_v19  ;;  %v7994_v19 = vrot.slane %v27983_v17, 4 }
 0x152   : > { %23903 = vmatprep.subr.msk.mxu0 %vm769_vm0, %v7994_v19 }
 0x153   : > { %23392 = vmatmul.mubr.msk.f32.gmra.mrb[24].mxu0 %vm527_vm1, %v32524_v20 }
 0x154   : > { %23394 = vmatprep.mubr.msk.f32.mxu0 %vm527_vm1, %v32525_v18  ;;  %v27993_v18 = vld [vmem:[%s32159_s2] ss:$0 sm:$0xff] }
 0x157   : > { %23395 = vmatmul.mubr.msk.f32.gmra.mrb[26].mxu0 %vm527_vm1, %v32526_v16 }
 0x158   : > { %23397 = vmatprep.mubr.msk.f32.mxu0 %vm527_vm1, %v32527_v14 }
 0x15b   : > { %23398 = vmatmul.mubr.msk.f32.gmra.mrb[28].mxu0 %vm527_vm1, %v32528_v22 }
 0x15c   : > { %23400 = vmatprep.mubr.msk.f32.mxu0 %vm527_vm1, %v3292_v21 }
 0x15f   : > { %23401 = vmatmul.mubr.msk.f32.gmra.mrb[30].mxu0 %vm527_vm1, %v3293_v24 }
 0x160   : > { %23405 = vmatprep.mubr.msk.f32.mxu0 %vm527_vm1, %v32529_v25 }
 0x163   : > { %23406 = vmatmul.mubr.msk.f32.vlgmr.msra.gmra.mrb[0].mxu0 %vm527_vm1, %v32530_v26 }
 0x164   : > { %23408 = vmatprep.mubr.msk.f32.mxu0 %vm527_vm1, %v32531_v27  ;;  %23904 = vmatpush3.msk.msra.mxu0 %vm769_vm0, %v7994_v19 }
 0x165   : > { %23953 = vmatprep.subr.msk.mxu0 %vm769_vm0, %v27983_v17 }
 0x167   : > { %23409 = vmatmul.mubr.msk.f32.gmra.mrb[2].mxu0 %vm527_vm1, %v32532_v28 }
 0x168   : > { %23411 = vmatprep.mubr.msk.f32.mxu0 %vm527_vm1, %v32533_v30 }
 0x16b   : > { %23412 = vmatmul.mubr.msk.f32.gmra.mrb[4].mxu0 %vm527_vm1, %v32534_v32 }
 0x16c   : > { %23414 = vmatprep.mubr.msk.f32.mxu0 %vm527_vm1, %v32535_v33 }
 0x16f   : > { %23415 = vmatmul.mubr.msk.f32.gmra.mrb[6].mxu0 %vm527_vm1, %v32536_v34 }
 0x170   : > { %23417 = vmatprep.mubr.msk.f32.mxu0 %vm527_vm1, %v32537_v35 }
 0x173   : > { %23418 = vmatmul.mubr.msk.f32.gmra.mrb[8].mxu0 %vm527_vm1, %v32538_v36 }
 0x174   : > { %23420 = vmatprep.mubr.msk.f32.mxu0 %vm527_vm1, %v32539_v37 }
 0x177   : > { %23421 = vmatmul.mubr.msk.f32.gmra.mrb[10].mxu0 %vm527_vm1, %v32540_v38 }
 0x178   : > { %23423 = vmatprep.mubr.msk.f32.mxu0 %vm527_vm1, %v32541_v39 }
 0x17b   : > { %23424 = vmatmul.mubr.msk.f32.gmra.mrb[12].mxu0 %vm527_vm1, %v32542_v40 }
 0x17c   : > { %23426 = vmatprep.mubr.msk.f32.mxu0 %vm527_vm1, %v32543_v41 }
 0x17f   : > { %23427 = vmatmul.mubr.msk.f32.gmra.mrb[14].mxu0 %vm527_vm1, %v32544_v42 }
 0x180   : > { %23429 = vmatprep.mubr.msk.f32.mxu0 %vm527_vm1, %v32545_v43 }
 0x183   : > { %v23107_v44 = vpop.f32.mrb[0].mxu1  ;;  %23430 = vmatmul.mubr.msk.f32.gmra.mrb[16].mxu0 %vm527_vm1, %v27626_v9  ;;  %v32547_v9 = vld [vmem:[#allocation65_spill] sm:$0xff] }
 0x184   : > { %v1517_v46 = vpop.f32.mrb[1].mxu1  ;;  %23432 = vmatprep.mubr.msk.f32.mxu0 %vm527_vm1, %v32546_v48 }
 0x187   : > { %v27896_v50 = vpop.f32.mrb[2].mxu1  ;;  %23433 = vmatmul.mubr.msk.f32.gmra.mrb[18].mxu0 %vm527_vm1, %v27638_v12 }
 0x188   : > { %v27898_v52 = vpop.f32.mrb[3].mxu1  ;;  %23435 = vmatprep.mubr.msk.f32.mxu0 %vm527_vm1, %v27640_v6 }
 0x18b   : > { %v27904_v53 = vpop.f32.mrb[4].mxu1  ;;  %23436 = vmatmul.mubr.msk.f32.gmra.mrb[20].mxu0 %vm527_vm1, %v27650_v49 }
 0x18c   : > { %v27906_v54 = vpop.f32.mrb[5].mxu1  ;;  %23438 = vmatprep.mubr.msk.f32.mxu0 %vm527_vm1, %v32547_v9 }
 0x18f   : > { %v27912_v55 = vpop.f32.mrb[6].mxu1  ;;  %23439 = vmatmul.mubr.msk.f32.gmra.mrb[22].mxu0 %vm527_vm1, %v27662_v51 }
 0x190   : > { %v27914_v56 = vpop.f32.mrb[7].mxu1  ;;  %23441 = vmatprep.mubr.msk.f32.mxu0 %vm527_vm1, %v27664_v3 }
 0x193   : > { %v27920_v12 = vpop.f32.mrb[8].mxu1  ;;  %23442 = vmatmul.mubr.msk.f32.gmra.mrb[24].mxu0 %vm527_vm1, %v27674_v29 }
 0x194   : > { %v27922_v57 = vpop.f32.mrb[9].mxu1  ;;  %23444 = vmatprep.mubr.msk.f32.mxu0 %vm527_vm1, %v27676_v0 }
 0x197   : > { %v27928_v58 = vpop.f32.mrb[10].mxu1  ;;  %23445 = vmatmul.mubr.msk.f32.gmra.mrb[26].mxu0 %vm527_vm1, %v27686_v5 }
 0x198   : > { %v27930_v59 = vpop.f32.mrb[11].mxu1  ;;  %23447 = vmatprep.mubr.msk.f32.mxu0 %vm527_vm1, %v32548_v60 }
 0x19b   : > { %v27936_v61 = vpop.f32.mrb[12].mxu1  ;;  %23448 = vmatmul.mubr.msk.f32.gmra.mrb[28].mxu0 %vm527_vm1, %v27698_v10 }
 0x19c   : > { %v27938_v63 = vpop.f32.mrb[13].mxu1  ;;  %23450 = vmatprep.mubr.msk.f32.mxu0 %vm527_vm1, %v3680_v62 }
 0x19f   : > { %v27943_v2 = vpop.f32.mrb[14].mxu1  ;;  %23451 = vmatmul.mubr.msk.f32.gmra.mrb[30].mxu0 %vm527_vm1, %v3681_v1 }
 0x1a0   : > { %v27945_v4 = vpop.f32.mrb[15].mxu1 }
 0x1a3   : > { %v27948_v5 = vpop.f32.mrb[16].mxu1 }
 0x1a4   : > { %v27950_v45 = vpop.f32.mrb[17].mxu1 }
 0x1a7   : > { %v27952_v47 = vpop.f32.mrb[18].mxu1 }
 0x1a8   : > { %v27954_v51 = vpop.f32.mrb[19].mxu1 }
 0x1ab   : > { %v27956_v0 = vpop.f32.mrb[20].mxu1 }
 0x1ac   : > { %v27958_v10 = vpop.f32.mrb[21].mxu1 }
 0x1af   : > { %v27960_v29 = vpop.f32.mrb[22].mxu1 }
 0x1b0   : > { %v27962_v6 = vpop.f32.mrb[23].mxu1 }
 0x1b3   : > { %v27964_v31 = vpop.f32.mrb[24].mxu1 }
 0x1b4   : > { %v27966_v49 = vpop.f32.mrb[25].mxu1 }
 0x1b7   : > { %v27968_v3 = vpop.f32.mrb[26].mxu1 }
 0x1b8   : > { %v27970_v8 = vpop.f32.mrb[27].mxu1 }
 0x1bb   : > { %v27972_v23 = vpop.f32.mrb[28].mxu1 }
 0x1bc   : > { %v27974_v11 = vpop.f32.mrb[29].mxu1 }
 0x1bf   : > { %v27976_v13 = vpop.f32.mrb[30].mxu1 }
 0x1c0   : > { %v27978_v15 = vpop.f32.mrb[31].mxu1 }
 0x236   : > { %v23407_v20 = vpop.f32.mrb[0].mxu0 }
 0x237   : > { %v25403_v16 = vadd.f32 %v23407_v20, %v23107_v44  ;;  %v3847_v14 = vpop.f32.mrb[1].mxu0 }
 0x238   : > { %v25404_v21 = vadd.f32 %v3847_v14, %v1517_v46 }
 0x239   : > { %v4046_v22 = vadd.f32 %v25403_v16, %v27993_v18 }
 0x23a   : > { %v4045_v24 = vadd.f32 %v25404_v21, %v27993_v18  ;;  %v23410_v25 = vpop.f32.mrb[2].mxu0 }
 0x23b   : > { %vm4078_vm6 = vcmp.ge.f32.partialorder %v4046_v22, 0.0  ;;  %v4110_v26 = vmul.f32 0.2, %v4046_v22  ;;  %v25405_v27 = vadd.f32 %v23410_v25, %v27896_v50  ;;  %v3857_v28 = vpop.f32.mrb[3].mxu0 }
 0x23c   : > { %vm4077_vm8 = vcmp.ge.f32.partialorder %v4045_v24, 0.0  ;;  %v4109_v30 = vmul.f32 0.2, %v4045_v24  ;;  %v25406_v32 = vadd.f32 %v3857_v28, %v27898_v52 }
 0x23d   : > { %v27999_v33 = vsel %vm4078_vm6, %v4046_v22, %v4110_v26  ;;  %v4048_v34 = vadd.f32 %v25405_v27, %v27993_v18 }
 0x23e   : > { %32549 = vst [vmem:[#allocation38_spill] sm:$0xff] %v27999_v33  ;;  %4180 = vst.msk [vmem:[#allocation3 + $0x53] sm:$0xff] %vm527_vm1, %v27999_v33  ;;  %v28010_v35 = vsel %vm4077_vm8, %v4045_v24, %v4109_v30  ;;  %v4047_v36 = vadd.f32 %v25406_v32, %v27993_v18  ;;  %v23413_v37 = vpop.f32.mrb[4].mxu0 }
 0x23f   : > { %4242 = vst.msk [vmem:[#allocation3 + $0x55] sm:$0x40] %vm583_vm3, %v27999_v33  ;;  %32550 = vst [vmem:[#allocation39_spill] sm:$0xff] %v28010_v35  ;;  %vm4080_vm10 = vcmp.ge.f32.partialorder %v4048_v34, 0.0  ;;  %v4112_v38 = vmul.f32 0.2, %v4048_v34  ;;  %v25407_v39 = vadd.f32 %v23413_v37, %v27904_v53 }
 0x240   : > { %4288 = vst.msk [vmem:[#allocation3 + $0x57] sm:$0x20] %vm4284_vm4, %v27999_v33  ;;  %v3867_v40 = vpop.f32.mrb[5].mxu0  ;;  %vm4079_vm11 = vcmp.ge.f32.partialorder %v4047_v36, 0.0  ;;  %v4111_v41 = vmul.f32 0.2, %v4047_v36 }
 0x241   : > { %4334 = vst.msk [vmem:[#allocation3 + $0x59] sm:$0x10] %vm4330_vm5, %v27999_v33  ;;  %v25408_v42 = vadd.f32 %v3867_v40, %v27906_v54  ;;  %v28023_v43 = vsel %vm4080_vm10, %v4048_v34, %v4112_v38  ;;  %v4050_v44 = vadd.f32 %v25407_v39, %v27993_v18 }
 0x242   : > { %4179 = vst.msk [vmem:[#allocation3 + $0x4b] sm:$0xff] %vm527_vm1, %v28010_v35  ;;  %32551 = vst [vmem:[#allocation40_spill] sm:$0xff] %v28023_v43  ;;  %v28042_v46 = vsel %vm4079_vm11, %v4047_v36, %v4111_v41  ;;  %v23416_v50 = vpop.f32.mrb[6].mxu0 }
 0x243   : > { %4220 = vst.msk [vmem:[#allocation3 + $0x49] sm:$0x2] %vm564_vm2, %v28010_v35  ;;  %32552 = vst [vmem:[#allocation41_spill] sm:$0xff] %v28042_v46  ;;  %v4049_v48 = vadd.f32 %v25408_v42, %v27993_v18  ;;  %vm4082_vm12 = vcmp.ge.f32.partialorder %v4050_v44, 0.0  ;;  %v4114_v52 = vmul.f32 0.2, %v4050_v44  ;;  %v25409_v53 = vadd.f32 %v23416_v50, %v27912_v55 }
 0x244   : > { %4265 = vst.msk [vmem:[#allocation3 + $0x47] sm:$0x4] %vm4261_vm7, %v28010_v35  ;;  %4264 = vst.msk [vmem:[#allocation3 + $0x2f] sm:$0x4] %vm4261_vm7, %v28042_v46  ;;  %v3877_v54 = vpop.f32.mrb[7].mxu0 }
 0x245   : > { %4311 = vst.msk [vmem:[#allocation3 + $0x45] sm:$0x8] %vm4307_vm9, %v28010_v35  ;;  %4310 = vst.msk [vmem:[#allocation3 + $0x2d] sm:$0x8] %vm4307_vm9, %v28042_v46  ;;  %vm4081_vm13 = vcmp.ge.f32.partialorder %v4049_v48, 0.0  ;;  %v25410_v60 = vadd.f32 %v3877_v54, %v27914_v56  ;;  %v28063_v62 = vsel %vm4082_vm12, %v4050_v44, %v4114_v52  ;;  %v4052_v1 = vadd.f32 %v25409_v53, %v27993_v18 }
 0x246   : > { %4178 = vst.msk [vmem:[#allocation3 + $0x3b] sm:$0xff] %vm527_vm1, %v28023_v43  ;;  %4182 = vst.msk [vmem:[#allocation3 + $0x6b] sm:$0xff] %vm527_vm1, %v28023_v43  ;;  %v4113_v9 = vmul.f32 0.2, %v4049_v48  ;;  %v23419_v19 = vpop.f32.mrb[8].mxu0 }
 0x247   : > { %4241 = vst.msk [vmem:[#allocation3 + $0x3d] sm:$0x40] %vm583_vm3, %v28023_v43  ;;  %4243 = vst.msk [vmem:[#allocation3 + $0x6d] sm:$0x40] %vm583_vm3, %v28023_v43  ;;  %v4051_v56 = vadd.f32 %v25410_v60, %v27993_v18  ;;  %vm4084_vm14 = vcmp.ge.f32.partialorder %v4052_v1, 0.0  ;;  %v25411_v16 = vadd.f32 %v23419_v19, %v27920_v12  ;;  %v3887_v14 = vpop.f32.mrb[9].mxu0 }
 0x248   : > { %4287 = vst.msk [vmem:[#allocation3 + $0x3f] sm:$0x20] %vm4284_vm4, %v28023_v43  ;;  %4289 = vst.msk [vmem:[#allocation3 + $0x6f] sm:$0x20] %vm4284_vm4, %v28023_v43  ;;  %v28082_v55 = vsel %vm4081_vm13, %v4049_v48, %v4113_v9  ;;  %v4116_v20 = vmul.f32 0.2, %v4052_v1  ;;  %v25412_v22 = vadd.f32 %v3887_v14, %v27922_v57 }
 0x249   : > { %4333 = vst.msk [vmem:[#allocation3 + $0x41] sm:$0x10] %vm4330_vm5, %v28023_v43  ;;  %4335 = vst.msk [vmem:[#allocation3 + $0x71] sm:$0x10] %vm4330_vm5, %v28023_v43  ;;  %vm4083_vm15 = vcmp.ge.f32.partialorder %v4051_v56, 0.0  ;;  %v4054_v25 = vadd.f32 %v25411_v16, %v27993_v18  ;;  %v28170_v48 = vld [vmem:[%s32160_s3 + $0x8] sm:$0xff] }
 0x24a   : > { %4177 = vst.msk [vmem:[#allocation3 + $0x33] sm:$0xff] %vm527_vm1, %v28042_v46  ;;  %4181 = vst.msk [vmem:[#allocation3 + $0x63] sm:$0xff] %vm527_vm1, %v28042_v46  ;;  %v4115_v21 = vmul.f32 0.2, %v4051_v56  ;;  %v28103_v24 = vsel %vm4084_vm14, %v4052_v1, %v4116_v20  ;;  %v4053_v57 = vadd.f32 %v25412_v22, %v27993_v18  ;;  %v23422_v26 = vpop.f32.mrb[10].mxu0  ;;  %v4395_v22 = vld [vmem:[#allocation3 + $0x4b] sm:$0xff] }
 0x24b   : > { %4219 = vst.msk [vmem:[#allocation3 + $0x31] sm:$0x2] %vm564_vm2, %v28042_v46  ;;  %4221 = vst.msk [vmem:[#allocation3 + $0x61] sm:$0x2] %vm564_vm2, %v28042_v46  ;;  %vm4086_vm6 = vcmp.ge.f32.partialorder %v4054_v25, 0.0  ;;  %v25413_v28 = vadd.f32 %v23422_v26, %v27928_v58  ;;  %v3897_v30 = vpop.f32.mrb[11].mxu0 }
 0x24c   : > { %4266 = vst.msk [vmem:[#allocation3 + $0x5f] sm:$0x4] %vm4261_vm7, %v28042_v46  ;;  %32553 = vst [vmem:[#allocation42_spill] sm:$0xff] %v28063_v62  ;;  %v28122_v12 = vsel %vm4083_vm15, %v4051_v56, %v4115_v21  ;;  %v4118_v27 = vmul.f32 0.2, %v4054_v25  ;;  %vm4085_vm8 = vcmp.ge.f32.partialorder %v4053_v57, 0.0  ;;  %v25414_v34 = vadd.f32 %v3897_v30, %v27930_v59 }
 0x24d   : > { %4312 = vst.msk [vmem:[#allocation3 + $0x5d] sm:$0x8] %vm4307_vm9, %v28042_v46  ;;  %32554 = vst [vmem:[#allocation43_spill] sm:$0xff] %v28082_v55  ;;  %v4117_v32 = vmul.f32 0.2, %v4053_v57  ;;  %v4056_v37 = vadd.f32 %v25413_v28, %v27993_v18  ;;  %v4394_v20 = vld [vmem:[#allocation3 + $0x3b] sm:$0xff] }
 0x24e   : > { %4176 = vst.msk [vmem:[#allocation3 + $0x23] sm:$0xff] %vm527_vm1, %v28063_v62  ;;  %4184 = vst.msk [vmem:[#allocation3 + $0x83] sm:$0xff] %vm527_vm1, %v28063_v62  ;;  %v28143_v36 = vsel %vm4086_vm6, %v4054_v25, %v4118_v27  ;;  %v4055_v59 = vadd.f32 %v25414_v34, %v27993_v18  ;;  %v23425_v38 = vpop.f32.mrb[12].mxu0 }
 0x24f   : > { %4240 = vst.msk [vmem:[#allocation3 + $0x25] sm:$0x40] %vm583_vm3, %v28063_v62  ;;  %4244 = vst.msk [vmem:[#allocation3 + $0x85] sm:$0x40] %vm583_vm3, %v28063_v62  ;;  %v28154_v58 = vsel %vm4085_vm8, %v4053_v57, %v4117_v32  ;;  %vm4088_vm10 = vcmp.ge.f32.partialorder %v4056_v37, 0.0  ;;  %v25415_v41 = vadd.f32 %v23425_v38, %v27936_v61  ;;  %v3907_v42 = vpop.f32.mrb[13].mxu0 }
 0x250   : > { %4286 = vst.msk [vmem:[#allocation3 + $0x27] sm:$0x20] %vm4284_vm4, %v28063_v62  ;;  %4290 = vst.msk [vmem:[#allocation3 + $0x87] sm:$0x20] %vm4284_vm4, %v28063_v62  ;;  %v4120_v40 = vmul.f32 0.2, %v4056_v37  ;;  %v25416_v52 = vadd.f32 %v3907_v42, %v27938_v63 }
 0x251   : > { %4332 = vst.msk [vmem:[#allocation3 + $0x29] sm:$0x10] %vm4330_vm5, %v28063_v62  ;;  %4336 = vst.msk [vmem:[#allocation3 + $0x89] sm:$0x10] %vm4330_vm5, %v28063_v62  ;;  %vm4087_vm11 = vcmp.ge.f32.partialorder %v4055_v59, 0.0  ;;  %v4393_v53 = vld [vmem:[#allocation3 + $0x33] sm:$0xff]  ;;  %v4058_v61 = vadd.f32 %v25415_v41, %v27993_v18 }
 0x252   : > { %4175 = vst.msk [vmem:[#allocation3 + $0x1b] sm:$0xff] %vm527_vm1, %v28082_v55  ;;  %4183 = vst.msk [vmem:[#allocation3 + $0x7b] sm:$0xff] %vm527_vm1, %v28082_v55  ;;  %v4119_v50 = vmul.f32 0.2, %v4055_v59  ;;  %v28174_v54 = vsel %vm4088_vm10, %v4056_v37, %v4120_v40  ;;  %v4057_v9 = vadd.f32 %v25416_v52, %v27993_v18  ;;  %v23428_v60 = vpop.f32.mrb[14].mxu0  ;;  %v4396_v32 = vld [vmem:[#allocation3 + $0x53] sm:$0xff] }
 0x253   : > { %4218 = vst.msk [vmem:[#allocation3 + $0x19] sm:$0x2] %vm564_vm2, %v28082_v55  ;;  %4222 = vst.msk [vmem:[#allocation3 + $0x79] sm:$0x2] %vm564_vm2, %v28082_v55  ;;  %vm4090_vm12 = vcmp.ge.f32.partialorder %v4058_v61, 0.0  ;;  %v25417_v56 = vadd.f32 %v23428_v60, %v27943_v2  ;;  %v3917_v19 = vpop.f32.mrb[15].mxu0 }
 0x254   : > { %4263 = vst.msk [vmem:[#allocation3 + $0x17] sm:$0x4] %vm4261_vm7, %v28082_v55  ;;  %4267 = vst.msk [vmem:[#allocation3 + $0x77] sm:$0x4] %vm4261_vm7, %v28082_v55  ;;  %v28188_v63 = vsel %vm4087_vm11, %v4055_v59, %v4119_v50  ;;  %v4122_v1 = vmul.f32 0.2, %v4058_v61  ;;  %v25418_v21 = vadd.f32 %v3917_v19, %v27945_v4 }
 0x255   : > { %4309 = vst.msk [vmem:[#allocation3 + $0x15] sm:$0x8] %vm4307_vm9, %v28082_v55  ;;  %4313 = vst.msk [vmem:[#allocation3 + $0x75] sm:$0x8] %vm4307_vm9, %v28082_v55  ;;  %v4392_v44 = vld [vmem:[#allocation3 + $0x23] sm:$0xff]  ;;  %vm4089_vm13 = vcmp.ge.f32.partialorder %v4057_v9, 0.0  ;;  %v4060_v57 = vadd.f32 %v25417_v56, %v27993_v18 }
 0x256   : > { %32555 = vst [vmem:[#allocation44_spill] sm:$0xff] %v28103_v24  ;;  %4174 = vst.msk [vmem:[#allocation3 + $0xb] sm:$0xff] %vm527_vm1, %v28103_v24  ;;  %v4121_v14 = vmul.f32 0.2, %v4057_v9  ;;  %v28206_v25 = vsel %vm4090_vm12, %v4058_v61, %v4122_v1  ;;  %v4059_v4 = vadd.f32 %v25418_v21, %v27993_v18  ;;  %v23431_v26 = vpop.f32.mrb[16].mxu0  ;;  %v4397_v37 = vld [vmem:[#allocation3 + $0x63] sm:$0xff] }
 0x257   : > { %4186 = vst.msk [vmem:[#allocation3 + $0x9b] sm:$0xff] %vm527_vm1, %v28103_v24  ;;  %32556 = vst [vmem:[#allocation45_spill] sm:$0xff] %v28122_v12  ;;  %vm4092_vm14 = vcmp.ge.f32.partialorder %v4060_v57, 0.0  ;;  %v4124_v27 = vmul.f32 0.2, %v4060_v57  ;;  %v25419_v28 = vadd.f32 %v23431_v26, %v27948_v5  ;;  %v3927_v30 = vpop.f32.mrb[17].mxu0 }
 0x258   : > { %4239 = vst.msk [vmem:[#allocation3 + $0xd] sm:$0x40] %vm583_vm3, %v28103_v24  ;;  %4245 = vst.msk [vmem:[#allocation3 + $0x9d] sm:$0x40] %vm583_vm3, %v28103_v24  ;;  %v28219_v2 = vsel %vm4089_vm13, %v4057_v9, %v4121_v14  ;;  %vm4091_vm15 = vcmp.ge.f32.partialorder %v4059_v4, 0.0  ;;  %v25420_v34 = vadd.f32 %v3927_v30, %v27950_v45  ;;  %v28244_v5 = vld [vmem:[%s32162_s5 + $0x8] sm:$0xff] }
 0x259   : > { %4285 = vst.msk [vmem:[#allocation3 + $0xf] sm:$0x20] %vm4284_vm4, %v28103_v24  ;;  %4291 = vst.msk [vmem:[#allocation3 + $0x9f] sm:$0x20] %vm4284_vm4, %v28103_v24  ;;  %v4391_v39 = vld [vmem:[#allocation3 + $0x1b] sm:$0xff]  ;;  %v28236_v59 = vsel %vm4092_vm14, %v4060_v57, %v4124_v27  ;;  %v4062_v38 = vadd.f32 %v25419_v28, %v27993_v18  ;;  %v4398_v50 = vld [vmem:[#allocation3 + $0x6b] sm:$0xff] }
 0x25a   : > { %4331 = vst.msk [vmem:[#allocation3 + $0x11] sm:$0x10] %vm4330_vm5, %v28103_v24  ;;  %4337 = vst.msk [vmem:[#allocation3 + $0xa1] sm:$0x10] %vm4330_vm5, %v28103_v24  ;;  %23455 = vmatprep.mubr.msk.f32.mxu1 %vm527_vm1, %v4391_v39  ;;  %v23434_v40 = vpop.f32.mrb[18].mxu0  ;;  %v4399_v61 = vld [vmem:[#allocation3 + $0x7b] sm:$0xff] }
 0x25b   : > { %4173 = vst.msk [vmem:[#allocation3 + $0x3] sm:$0xff] %vm527_vm1, %v28122_v12  ;;  %4185 = vst.msk [vmem:[#allocation3 + $0x93] sm:$0xff] %vm527_vm1, %v28122_v12  ;;  %23456 = vmatmul.mubr.msk.f32.vlgmr.msra.gmra.mrb[32].mxu1 %vm527_vm1, %v4392_v44  ;;  %vm4094_vm6 = vcmp.ge.f32.partialorder %v4062_v38, 0.0  ;;  %v4126_v41 = vmul.f32 0.2, %v4062_v38  ;;  %v25421_v42 = vadd.f32 %v23434_v40, %v27952_v47 }
 0x25c   : > { %4217 = vst.msk [vmem:[#allocation3 + $0x1] sm:$0x2] %vm564_vm2, %v28122_v12  ;;  %4223 = vst.msk [vmem:[#allocation3 + $0x91] sm:$0x2] %vm564_vm2, %v28122_v12  ;;  %23504 = vmatpush3.msk.msra.mxu1 %vm769_vm0, %v27819_v7  ;;  %23458 = vmatprep.mubr.msk.f32.mxu1 %vm527_vm1, %v4393_v53 }
 0x25d   : > { %4262 = vst.msk [vmem:[#allocation3 - $0x1] sm:$0x4] %vm4261_vm7, %v28122_v12  ;;  %4268 = vst.msk [vmem:[#allocation3 + $0x8f] sm:$0x4] %vm4261_vm7, %v28122_v12  ;;  %23553 = vmatprep.subr.msk.mxu1 %vm769_vm0, %v28170_v48  ;;  %v7962_v16 = vld [vmem:[#allocation3 + $0xb] sm:$0xff]  ;;  %v28271_v9 = vsel %vm4094_vm6, %v4062_v38, %v4126_v41  ;;  %v4064_v60 = vadd.f32 %v25421_v42, %v27993_v18 }
 0x25e   : > { %4308 = vst.msk [vmem:[#allocation3 - $0x3] sm:$0x8] %vm4307_vm9, %v28122_v12  ;;  %4314 = vst.msk [vmem:[#allocation3 + $0x8d] sm:$0x8] %vm4307_vm9, %v28122_v12  ;;  %v4402_v30 = vld [vmem:[#allocation3 + $0x9b] sm:$0xff] }
 0x25f   : > { %32557 = vst [vmem:[#allocation46_spill] sm:$0xff] %v28143_v36  ;;  %4188 = vst.msk [vmem:[#allocation3 + $0xb3] sm:$0xff] %vm527_vm1, %v28143_v36  ;;  %23459 = vmatmul.mubr.msk.f32.gmra.mrb[34].mxu1 %vm527_vm1, %v4394_v20  ;;  %vm4096_vm10 = vcmp.ge.f32.partialorder %v4064_v60, 0.0  ;;  %v4128_v1 = vmul.f32 0.2, %v4064_v60 }
 0x260   : > { %4246 = vst.msk [vmem:[#allocation3 + $0xb5] sm:$0x40] %vm583_vm3, %v28143_v36  ;;  %32558 = vst [vmem:[#allocation47_spill] sm:$0xff] %v28154_v58  ;;  %23461 = vmatprep.mubr.msk.f32.mxu1 %vm527_vm1, %v4395_v22 }
 0x261   : > { %4292 = vst.msk [vmem:[#allocation3 + $0xb7] sm:$0x20] %vm4284_vm4, %v28143_v36  ;;  %32559 = vst [vmem:[#allocation48_spill] sm:$0xff] %v28174_v54 }
 0x262   : > { %4338 = vst.msk [vmem:[#allocation3 + $0xb9] sm:$0x10] %vm4330_vm5, %v28143_v36  ;;  %4339 = vst.msk [vmem:[#allocation3 + $0xd1] sm:$0x10] %vm4330_vm5, %v28174_v54  ;;  %v7961_v7 = vld [vmem:[#allocation3 + $0x3] sm:$0xff]  ;;  %v4401_v21 = vld [vmem:[#allocation3 + $0x93] sm:$0xff] }
 0x263   : > { %4187 = vst.msk [vmem:[#allocation3 + $0xab] sm:$0xff] %vm527_vm1, %v28154_v58  ;;  %4190 = vst.msk [vmem:[#allocation3 + $0xcb] sm:$0xff] %vm527_vm1, %v28174_v54  ;;  %23905 = vmatprep.mubr.msk.f32.mxu0 %vm527_vm1, %v7961_v7  ;;  %23462 = vmatmul.mubr.msk.f32.gmra.mrb[36].mxu1 %vm527_vm1, %v4396_v32 }
 0x264   : > { %4224 = vst.msk [vmem:[#allocation3 + $0xa9] sm:$0x2] %vm564_vm2, %v28154_v58  ;;  %32560 = vst [vmem:[#allocation49_spill] sm:$0xff] %v28188_v63  ;;  %23906 = vmatmul.mubr.msk.f32.vlgmr.msra.gmra.mrb[32].mxu0 %vm527_vm1, %v7962_v16  ;;  %23464 = vmatprep.mubr.msk.f32.mxu1 %vm527_vm1, %v4397_v37 }
 0x265   : > { %4269 = vst.msk [vmem:[#allocation3 + $0xa7] sm:$0x4] %vm4261_vm7, %v28154_v58  ;;  %4270 = vst.msk [vmem:[#allocation3 + $0xbf] sm:$0x4] %vm4261_vm7, %v28188_v63  ;;  %23908 = vmatprep.mubr.msk.f32.mxu0 %vm527_vm1, %v4391_v39  ;;  %23954 = vmatpush3.msk.msra.mxu0 %vm769_vm0, %v27983_v17  ;;  %v4123_v17 = vmul.f32 0.2, %v4059_v4  ;;  %v4061_v39 = vadd.f32 %v25420_v34, %v27993_v18 }
 0x266   : > { %4315 = vst.msk [vmem:[#allocation3 + $0xa5] sm:$0x8] %vm4307_vm9, %v28154_v58  ;;  %4316 = vst.msk [vmem:[#allocation3 + $0xbd] sm:$0x8] %vm4307_vm9, %v28188_v63  ;;  %24003 = vmatprep.subr.msk.mxu0 %vm769_vm0, %v28244_v5 }
 0x267   : > { %4247 = vst.msk [vmem:[#allocation3 + $0xcd] sm:$0x40] %vm583_vm3, %v28174_v54  ;;  %32561 = vst [vmem:[#allocation50_spill] sm:$0xff] %v28206_v25  ;;  %v28254_v45 = vsel %vm4091_vm15, %v4059_v4, %v4123_v17  ;;  %vm4093_vm8 = vcmp.ge.f32.partialorder %v4061_v39, 0.0  ;;  %v4125_v52 = vmul.f32 0.2, %v4061_v39  ;;  %23465 = vmatmul.mubr.msk.f32.gmra.mrb[38].mxu1 %vm527_vm1, %v4398_v50 }
 0x268   : > { %4293 = vst.msk [vmem:[#allocation3 + $0xcf] sm:$0x20] %vm4284_vm4, %v28174_v54  ;;  %4294 = vst.msk [vmem:[#allocation3 + $0xe7] sm:$0x20] %vm4284_vm4, %v28206_v25  ;;  %23909 = vmatmul.mubr.msk.f32.gmra.mrb[34].mxu0 %vm527_vm1, %v4392_v44  ;;  %v3937_v44 = vpop.f32.mrb[19].mxu0  ;;  %23467 = vmatprep.mubr.msk.f32.mxu1 %vm527_vm1, %v4399_v61 }
 0x269   : > { %4189 = vst.msk [vmem:[#allocation3 + $0xc3] sm:$0xff] %vm527_vm1, %v28188_v63  ;;  %4192 = vst.msk [vmem:[#allocation3 + $0xe3] sm:$0xff] %vm527_vm1, %v28206_v25  ;;  %23911 = vmatprep.mubr.msk.f32.mxu0 %vm527_vm1, %v4393_v53  ;;  %v25422_v53 = vadd.f32 %v3937_v44, %v27954_v51  ;;  %v28284_v47 = vsel %vm4093_vm8, %v4061_v39, %v4125_v52  ;;  %v23437_v7 = vpop.f32.mrb[20].mxu0  ;;  %v28352_v44 = vld [vmem:[#allocation3 + $0xb3] sm:$0xff] }
 0x26a   : > { %4225 = vst.msk [vmem:[#allocation3 + $0xc1] sm:$0x2] %vm564_vm2, %v28188_v63  ;;  %32562 = vst [vmem:[#allocation51_spill] sm:$0xff] %v28219_v2  ;;  %v25423_v56 = vadd.f32 %v23437_v7, %v27956_v0  ;;  %v3947_v19 = vpop.f32.mrb[21].mxu0  ;;  %v4403_v34 = vld [vmem:[#allocation3 + $0xab] sm:$0xff] }
 0x26b   : > { %4248 = vst.msk [vmem:[#allocation3 + $0xe5] sm:$0x40] %vm583_vm3, %v28206_v25  ;;  %32563 = vst [vmem:[#allocation52_spill] sm:$0xff] %v28236_v59  ;;  %v4063_v51 = vadd.f32 %v25422_v53, %v27993_v18  ;;  %v25424_v14 = vadd.f32 %v3947_v19, %v27958_v10  ;;  %v23440_v4 = vpop.f32.mrb[22].mxu0  ;;  %v28386_v19 = vld [vmem:[#allocation3 + $0xcb] sm:$0xff] }
 0x26c   : > { %4340 = vst.msk [vmem:[#allocation3 + $0xe9] sm:$0x10] %vm4330_vm5, %v28206_v25  ;;  %4341 = vst.msk [vmem:[#allocation3 + $0x101] sm:$0x10] %vm4330_vm5, %v28236_v59  ;;  %23912 = vmatmul.mubr.msk.f32.gmra.mrb[36].mxu0 %vm527_vm1, %v4394_v20  ;;  %v4400_v20 = vld [vmem:[#allocation3 + $0x83] sm:$0xff]  ;;  %v4066_v57 = vadd.f32 %v25423_v56, %v27993_v18  ;;  %v25425_v27 = vadd.f32 %v23440_v4, %v27960_v29  ;;  %v3957_v28 = vpop.f32.mrb[23].mxu0 }
 0x26d   : > { %4191 = vst.msk [vmem:[#allocation3 + $0xdb] sm:$0xff] %vm527_vm1, %v28219_v2  ;;  %4194 = vst.msk [vmem:[#allocation3 + $0xfb] sm:$0xff] %vm527_vm1, %v28236_v59  ;;  %23914 = vmatprep.mubr.msk.f32.mxu0 %vm527_vm1, %v4395_v22  ;;  %vm4095_vm11 = vcmp.ge.f32.partialorder %v4063_v51, 0.0  ;;  %v4127_v16 = vmul.f32 0.2, %v4063_v51  ;;  %23468 = vmatmul.mubr.msk.f32.gmra.mrb[40].mxu1 %vm527_vm1, %v4400_v20  ;;  %v28299_v22 = vsel %vm4096_vm10, %v4064_v60, %v4128_v1  ;;  %v23443_v39 = vpop.f32.mrb[24].mxu0 }
 0x26e   : > { %4226 = vst.msk [vmem:[#allocation3 + $0xd9] sm:$0x2] %vm564_vm2, %v28219_v2  ;;  %32564 = vst [vmem:[#allocation53_spill] sm:$0xff] %v28254_v45  ;;  %23470 = vmatprep.mubr.msk.f32.mxu1 %vm527_vm1, %v4401_v21  ;;  %v4065_v10 = vadd.f32 %v25424_v14, %v27993_v18  ;;  %vm4098_vm12 = vcmp.ge.f32.partialorder %v4066_v57, 0.0  ;;  %v4130_v26 = vmul.f32 0.2, %v4066_v57  ;;  %v25426_v17 = vadd.f32 %v3957_v28, %v27962_v6 }
 0x26f   : > { %4271 = vst.msk [vmem:[#allocation3 + $0xd7] sm:$0x4] %vm4261_vm7, %v28219_v2  ;;  %4272 = vst.msk [vmem:[#allocation3 + $0xef] sm:$0x4] %vm4261_vm7, %v28254_v45  ;;  %v28312_v0 = vsel %vm4095_vm11, %v4063_v51, %v4127_v16  ;;  %v4068_v38 = vadd.f32 %v25425_v27, %v27993_v18  ;;  %v25427_v41 = vadd.f32 %v23443_v39, %v27964_v31  ;;  %v3967_v42 = vpop.f32.mrb[25].mxu0 }
 0x270   : > { %4317 = vst.msk [vmem:[#allocation3 + $0xd5] sm:$0x8] %vm4307_vm9, %v28219_v2  ;;  %4318 = vst.msk [vmem:[#allocation3 + $0xed] sm:$0x8] %vm4307_vm9, %v28254_v45  ;;  %23915 = vmatmul.mubr.msk.f32.gmra.mrb[38].mxu0 %vm527_vm1, %v4396_v32  ;;  %vm4097_vm13 = vcmp.ge.f32.partialorder %v4065_v10, 0.0  ;;  %v4067_v6 = vadd.f32 %v25426_v17, %v27993_v18  ;;  %v25428_v52 = vadd.f32 %v3967_v42, %v27966_v49  ;;  %v28358_v53 = vld [vmem:[#allocation3 + $0xc3] sm:$0xff] }
 0x271   : > { %4249 = vst.msk [vmem:[#allocation3 + $0xfd] sm:$0x40] %vm583_vm3, %v28236_v59  ;;  %32565 = vst [vmem:[#allocation54_spill] sm:$0xff] %v28271_v9  ;;  %23917 = vmatprep.mubr.msk.f32.mxu0 %vm527_vm1, %v4397_v37  ;;  %v4129_v32 = vmul.f32 0.2, %v4065_v10  ;;  %23471 = vmatmul.mubr.msk.f32.gmra.mrb[42].mxu1 %vm527_vm1, %v4402_v30  ;;  %v28327_v37 = vsel %vm4098_vm12, %v4066_v57, %v4130_v26  ;;  %vm4100_vm14 = vcmp.ge.f32.partialorder %v4068_v38, 0.0 }
 0x272   : > { %4295 = vst.msk [vmem:[#allocation3 + $0xff] sm:$0x20] %vm4284_vm4, %v28236_v59  ;;  %4296 = vst.msk [vmem:[#allocation3 + $0x117] sm:$0x20] %vm4284_vm4, %v28271_v9  ;;  %23473 = vmatprep.mubr.msk.f32.mxu1 %vm527_vm1, %v4403_v34  ;;  %v4132_v40 = vmul.f32 0.2, %v4068_v38  ;;  %v4070_v60 = vadd.f32 %v25427_v41, %v27993_v18  ;;  %v4069_v49 = vadd.f32 %v25428_v52, %v27993_v18 }
 0x273   : > { %4193 = vst.msk [vmem:[#allocation3 + $0xf3] sm:$0xff] %vm527_vm1, %v28254_v45  ;;  %4196 = vst.msk [vmem:[#allocation3 + $0x113] sm:$0xff] %vm527_vm1, %v28271_v9  ;;  %v28340_v29 = vsel %vm4097_vm13, %v4065_v10, %v4129_v32  ;;  %vm4099_vm15 = vcmp.ge.f32.partialorder %v4067_v6, 0.0  ;;  %v23446_v51 = vpop.f32.mrb[26].mxu0  ;;  %v28437_v28 = vld [vmem:[#allocation3 + $0xe3] sm:$0xff] }
 0x274   : > { %4227 = vst.msk [vmem:[#allocation3 + $0xf1] sm:$0x2] %vm564_vm2, %v28254_v45  ;;  %32566 = vst [vmem:[#allocation55_spill] sm:$0xff] %v28284_v47  ;;  %23918 = vmatmul.mubr.msk.f32.gmra.mrb[40].mxu0 %vm527_vm1, %v4398_v50  ;;  %v4131_v50 = vmul.f32 0.2, %v4067_v6  ;;  %vm4102_vm6 = vcmp.ge.f32.partialorder %v4070_v60, 0.0  ;;  %v25429_v1 = vadd.f32 %v23446_v51, %v27968_v3 }
 0x275   : > { %4250 = vst.msk [vmem:[#allocation3 + $0x115] sm:$0x40] %vm583_vm3, %v28271_v9  ;;  %32567 = vst [vmem:[#allocation56_spill] sm:$0xff] %v28299_v22  ;;  %23920 = vmatprep.mubr.msk.f32.mxu0 %vm527_vm1, %v4399_v61  ;;  %23474 = vmatmul.mubr.msk.f32.gmra.mrb[44].mxu1 %vm527_vm1, %v28352_v44  ;;  %v28360_v61 = vsel %vm4100_vm14, %v4068_v38, %v4132_v40  ;;  %v4134_v7 = vmul.f32 0.2, %v4070_v60  ;;  %v3977_v56 = vpop.f32.mrb[27].mxu0 }
 0x276   : > { %4342 = vst.msk [vmem:[#allocation3 + $0x119] sm:$0x10] %vm4330_vm5, %v28271_v9  ;;  %4343 = vst.msk [vmem:[#allocation3 + $0x131] sm:$0x10] %vm4330_vm5, %v28299_v22  ;;  %23476 = vmatprep.mubr.msk.f32.mxu1 %vm527_vm1, %v28358_v53  ;;  %v28374_v31 = vsel %vm4099_vm15, %v4067_v6, %v4131_v50  ;;  %vm4101_vm8 = vcmp.ge.f32.partialorder %v4069_v49, 0.0  ;;  %v25430_v16 = vadd.f32 %v3977_v56, %v27970_v8  ;;  %v28392_v14 = vld [vmem:[#allocation3 + $0xdb] sm:$0xff] }
 0x277   : > { %4195 = vst.msk [vmem:[#allocation3 + $0x10b] sm:$0xff] %vm527_vm1, %v28284_v47  ;;  %4198 = vst.msk [vmem:[#allocation3 + $0x12b] sm:$0xff] %vm527_vm1, %v28299_v22  ;;  %v4072_v57 = vadd.f32 %v25429_v1, %v27993_v18  ;;  %v23449_v10 = vpop.f32.mrb[28].mxu0  ;;  %v28490_v42 = vld [vmem:[#allocation3 + $0xfb] sm:$0xff] }
 0x278   : > { %4228 = vst.msk [vmem:[#allocation3 + $0x109] sm:$0x2] %vm564_vm2, %v28284_v47  ;;  %32568 = vst [vmem:[#allocation57_spill] sm:$0xff] %v28312_v0  ;;  %23921 = vmatmul.mubr.msk.f32.gmra.mrb[42].mxu0 %vm527_vm1, %v4400_v20  ;;  %v4133_v20 = vmul.f32 0.2, %v4069_v49  ;;  %v4071_v8 = vadd.f32 %v25430_v16, %v27993_v18  ;;  %v25431_v26 = vadd.f32 %v23449_v10, %v27972_v23  ;;  %v3987_v27 = vpop.f32.mrb[29].mxu0 }
 0x279   : > { %4273 = vst.msk [vmem:[#allocation3 + $0x107] sm:$0x4] %vm4261_vm7, %v28284_v47  ;;  %4274 = vst.msk [vmem:[#allocation3 + $0x11f] sm:$0x4] %vm4261_vm7, %v28312_v0  ;;  %23923 = vmatprep.mubr.msk.f32.mxu0 %vm527_vm1, %v4401_v21  ;;  %23477 = vmatmul.mubr.msk.f32.gmra.mrb[46].mxu1 %vm527_vm1, %v28386_v19  ;;  %v28394_v21 = vsel %vm4102_vm6, %v4070_v60, %v4134_v7  ;;  %vm4104_vm10 = vcmp.ge.f32.partialorder %v4072_v57, 0.0  ;;  %v25432_v32 = vadd.f32 %v3987_v27, %v27974_v11  ;;  %v23452_v6 = vpop.f32.mrb[30].mxu0 }
 0x27a   : > { %4319 = vst.msk [vmem:[#allocation3 + $0x105] sm:$0x8] %vm4307_vm9, %v28284_v47  ;;  %4320 = vst.msk [vmem:[#allocation3 + $0x11d] sm:$0x8] %vm4307_vm9, %v28312_v0  ;;  %23479 = vmatprep.mubr.msk.f32.mxu1 %vm527_vm1, %v28392_v14  ;;  %v28417_v3 = vsel %vm4101_vm8, %v4069_v49, %v4133_v20  ;;  %v4136_v4 = vmul.f32 0.2, %v4072_v57  ;;  %v4074_v38 = vadd.f32 %v25431_v26, %v27993_v18 }
 0x27b   : > { %4251 = vst.msk [vmem:[#allocation3 + $0x12d] sm:$0x40] %vm583_vm3, %v28299_v22  ;;  %32569 = vst [vmem:[#allocation58_spill] sm:$0xff] %v28327_v37  ;;  %vm4103_vm11 = vcmp.ge.f32.partialorder %v4071_v8, 0.0  ;;  %v28444_v17 = vld [vmem:[#allocation3 + $0xf3] sm:$0xff]  ;;  %v4073_v11 = vadd.f32 %v25432_v32, %v27993_v18  ;;  %v25433_v40 = vadd.f32 %v23452_v6, %v27976_v13  ;;  %v3997_v41 = vpop.f32.mrb[31].mxu0 }
 0x27c   : > { %4297 = vst.msk [vmem:[#allocation3 + $0x12f] sm:$0x20] %vm4284_vm4, %v28299_v22  ;;  %4298 = vst.msk [vmem:[#allocation3 + $0x147] sm:$0x20] %vm4284_vm4, %v28327_v37  ;;  %23924 = vmatmul.mubr.msk.f32.gmra.mrb[44].mxu0 %vm527_vm1, %v4402_v30  ;;  %v4135_v30 = vmul.f32 0.2, %v4071_v8  ;;  %v25434_v50 = vadd.f32 %v3997_v41, %v27978_v15 }
 0x27d   : > { %4197 = vst.msk [vmem:[#allocation3 + $0x123] sm:$0xff] %vm527_vm1, %v28312_v0  ;;  %4200 = vst.msk [vmem:[#allocation3 + $0x143] sm:$0xff] %vm527_vm1, %v28327_v37  ;;  %23926 = vmatprep.mubr.msk.f32.mxu0 %vm527_vm1, %v4403_v34  ;;  %23480 = vmatmul.mubr.msk.f32.gmra.mrb[48].mxu1 %vm527_vm1, %v28437_v28  ;;  %v28446_v34 = vsel %vm4104_vm10, %v4072_v57, %v4136_v4  ;;  %vm4106_vm12 = vcmp.ge.f32.partialorder %v4074_v38, 0.0  ;;  %v4138_v39 = vmul.f32 0.2, %v4074_v38  ;;  %vm4105_vm13 = vcmp.ge.f32.partialorder %v4073_v11, 0.0 }
 0x27e   : > { %4229 = vst.msk [vmem:[#allocation3 + $0x121] sm:$0x2] %vm564_vm2, %v28312_v0  ;;  %32570 = vst [vmem:[#allocation59_spill] sm:$0xff] %v28340_v29  ;;  %23482 = vmatprep.mubr.msk.f32.mxu1 %vm527_vm1, %v28444_v17  ;;  %v28470_v23 = vsel %vm4103_vm11, %v4071_v8, %v4135_v30  ;;  %v28497_v52 = vld [vmem:[#allocation3 + $0x10b] sm:$0xff]  ;;  %v4076_v60 = vadd.f32 %v25433_v40, %v27993_v18  ;;  %v4075_v15 = vadd.f32 %v25434_v50, %v27993_v18  ;;  %v28542_v49 = vld [vmem:[#allocation3 + $0x113] sm:$0xff] }
 0x27f   : > { %4252 = vst.msk [vmem:[#allocation3 + $0x145] sm:$0x40] %vm583_vm3, %v28327_v37  ;;  %32571 = vst [vmem:[#allocation60_spill] sm:$0xff] %v28360_v61  ;;  %v4359_v27 = vld [vmem:[#allocation3 + $0x19] sm:$0xff]  ;;  %v4360_v30 = vld [vmem:[#allocation3 + $0x21] sm:$0xff]  ;;  %v32236_v6 = vrot.slane %v28244_v5, 4 }
 0x280   : > { %4344 = vst.msk [vmem:[#allocation3 + $0x149] sm:$0x10] %vm4330_vm5, %v28327_v37  ;;  %4345 = vst.msk [vmem:[#allocation3 + $0x161] sm:$0x10] %vm4330_vm5, %v28360_v61  ;;  %23927 = vmatmul.mubr.msk.f32.gmra.mrb[46].mxu0 %vm527_vm1, %v28352_v44  ;;  %v4137_v44 = vmul.f32 0.2, %v4073_v11 }
 0x281   : > { %4199 = vst.msk [vmem:[#allocation3 + $0x13b] sm:$0xff] %vm527_vm1, %v28340_v29  ;;  %4202 = vst.msk [vmem:[#allocation3 + $0x15b] sm:$0xff] %vm527_vm1, %v28360_v61  ;;  %23929 = vmatprep.mubr.msk.f32.mxu0 %vm527_vm1, %v28358_v53  ;;  %23483 = vmatmul.mubr.msk.f32.gmra.mrb[50].mxu1 %vm527_vm1, %v28490_v42  ;;  %v28499_v53 = vsel %vm4106_vm12, %v4074_v38, %v4138_v39  ;;  %vm4108_vm14 = vcmp.ge.f32.partialorder %v4076_v60, 0.0  ;;  %v4140_v18 = vmul.f32 0.2, %v4076_v60  ;;  %vm4107_vm15 = vcmp.ge.f32.partialorder %v4075_v15, 0.0 }
 0x282   : > { %4230 = vst.msk [vmem:[#allocation3 + $0x139] sm:$0x2] %vm564_vm2, %v28340_v29  ;;  %32572 = vst [vmem:[#allocation61_spill] sm:$0xff] %v28374_v31  ;;  %23485 = vmatprep.mubr.msk.f32.mxu1 %vm527_vm1, %v28497_v52  ;;  %v28523_v13 = vsel %vm4105_vm13, %v4073_v11, %v4137_v44  ;;  %v4139_v51 = vmul.f32 0.2, %v4075_v15  ;;  %v4361_v32 = vld [vmem:[#allocation3 + $0x31] sm:$0xff] }
 0x283   : > { %4275 = vst.msk [vmem:[#allocation3 + $0x137] sm:$0x4] %vm4261_vm7, %v28340_v29  ;;  %4276 = vst.msk [vmem:[#allocation3 + $0x14f] sm:$0x4] %vm4261_vm7, %v28374_v31  ;;  %v28550_v1 = vsel %vm4108_vm14, %v4076_v60, %v4140_v18  ;;  %v4362_v38 = vld [vmem:[#allocation3 + $0x39] sm:$0xff]  ;;  %v7930_v11 = vld [vmem:[#allocation3 + $0x8] sm:$0xff] }
 0x284   : > { %4321 = vst.msk [vmem:[#allocation3 + $0x135] sm:$0x8] %vm4307_vm9, %v28340_v29  ;;  %4322 = vst.msk [vmem:[#allocation3 + $0x14d] sm:$0x8] %vm4307_vm9, %v28374_v31  ;;  %23930 = vmatmul.mubr.msk.f32.gmra.mrb[48].mxu0 %vm527_vm1, %v28386_v19  ;;  %v28548_v7 = vld [vmem:[#allocation3 + $0x123] sm:$0xff]  ;;  %v28564_v56 = vsel %vm4107_vm15, %v4075_v15, %v4139_v51  ;;  %v28574_v19 = vld [vmem:[#allocation3 + $0x12b] sm:$0xff] }
 0x285   : > { %4253 = vst.msk [vmem:[#allocation3 + $0x15d] sm:$0x40] %vm583_vm3, %v28360_v61  ;;  %32573 = vst [vmem:[#allocation62_spill] sm:$0xff] %v28394_v21  ;;  %23932 = vmatprep.mubr.msk.f32.mxu0 %vm527_vm1, %v28392_v14  ;;  %23486 = vmatmul.mubr.msk.f32.gmra.mrb[52].mxu1 %vm527_vm1, %v28542_v49  ;;  %v28586_v16 = vld [vmem:[#allocation3 + $0x143] sm:$0xff]  ;;  %v7931_v40 = vld [vmem:[#allocation3 + $0x18] sm:$0xff] }
 0x286   : > { %4299 = vst.msk [vmem:[#allocation3 + $0x15f] sm:$0x20] %vm4284_vm4, %v28360_v61  ;;  %4300 = vst.msk [vmem:[#allocation3 + $0x177] sm:$0x20] %vm4284_vm4, %v28394_v21  ;;  %23488 = vmatprep.mubr.msk.f32.mxu1 %vm527_vm1, %v28548_v7  ;;  %v28645_v39 = vld [vmem:[#allocation3 + $0x49] sm:$0xff]  ;;  %v28652_v41 = vld [vmem:[#allocation3 + $0x51] sm:$0xff] }
 0x287   : > { %4201 = vst.msk [vmem:[#allocation3 + $0x153] sm:$0xff] %vm527_vm1, %v28374_v31  ;;  %4204 = vst.msk [vmem:[#allocation3 + $0x173] sm:$0xff] %vm527_vm1, %v28394_v21  ;;  %v7932_v44 = vld [vmem:[#allocation3 + $0x20] sm:$0xff]  ;;  %v7933_v60 = vld [vmem:[#allocation3 + $0x30] sm:$0xff] }
 0x288   : > { %4231 = vst.msk [vmem:[#allocation3 + $0x151] sm:$0x2] %vm564_vm2, %v28374_v31  ;;  %32574 = vst [vmem:[#allocation63_spill] sm:$0xff] %v28417_v3  ;;  %23933 = vmatmul.mubr.msk.f32.gmra.mrb[50].mxu0 %vm527_vm1, %v28437_v28  ;;  %v28580_v20 = vld [vmem:[#allocation3 + $0x13b] sm:$0xff]  ;;  %v32237_v28 = vrot.slane %v28170_v48, 4  ;;  %v28665_v15 = vld [vmem:[#allocation3 + $0x69] sm:$0xff] }
 0x289   : > { %4216 = vst.msk [vmem:[#allocation3 + $0x203] sm:$0xff] %vm527_vm1, %v28394_v21  ;;  %4203 = vst.msk [vmem:[#allocation3 + $0x16b] sm:$0xff] %vm527_vm1, %v28417_v3  ;;  %23935 = vmatprep.mubr.msk.f32.mxu0 %vm527_vm1, %v28444_v17  ;;  %23489 = vmatmul.mubr.msk.f32.gmra.mrb[54].mxu1 %vm527_vm1, %v28574_v19  ;;  %v28598_v57 = vld [vmem:[#allocation3 + $0x15b] sm:$0xff]  ;;  %v28760_v37 = vld [vmem:[#allocation3 + $0xc8] sm:$0xff] }
 0x28a   : > { %4254 = vst.msk [vmem:[#allocation3 + $0x175] sm:$0x40] %vm583_vm3, %v28394_v21  ;;  %4260 = vst.msk [vmem:[#allocation3 + $0x205] sm:$0x40] %vm583_vm3, %v28394_v21  ;;  %23491 = vmatprep.mubr.msk.f32.mxu1 %vm527_vm1, %v28580_v20  ;;  %v7929_v17 = vld [vmem:[#allocation3] sm:$0xff]  ;;  %v7934_v18 = vld [vmem:[#allocation3 + $0x38] sm:$0xff] }
 0x28b   : > { %4306 = vst.msk [vmem:[#allocation3 + $0x207] sm:$0x20] %vm4284_vm4, %v28394_v21  ;;  %32575 = vst [vmem:[#allocation64_spill] sm:$0xff] %v28446_v34  ;;  %v28660_v50 = vld [vmem:[#allocation3 + $0x61] sm:$0xff]  ;;  %v28670_v51 = vld [vmem:[#allocation3 + $0x79] sm:$0xff] }
 0x28c   : > { %4346 = vst.msk [vmem:[#allocation3 + $0x179] sm:$0x10] %vm4330_vm5, %v28394_v21  ;;  %4352 = vst.msk [vmem:[#allocation3 + $0x209] sm:$0x10] %vm4330_vm5, %v28394_v21  ;;  %23936 = vmatmul.mubr.msk.f32.gmra.mrb[52].mxu0 %vm527_vm1, %v28490_v42  ;;  %v28744_v21 = vld [vmem:[#allocation3 + $0xb0] sm:$0xff]  ;;  %v28752_v61 = vld [vmem:[#allocation3 + $0xc0] sm:$0xff] }
 0x28d   : > { %4215 = vst.msk [vmem:[#allocation3 + $0x1fb] sm:$0xff] %vm527_vm1, %v28417_v3  ;;  %4206 = vst.msk [vmem:[#allocation3 + $0x18b] sm:$0xff] %vm527_vm1, %v28446_v34  ;;  %23938 = vmatprep.mubr.msk.f32.mxu0 %vm527_vm1, %v28497_v52  ;;  %23492 = vmatmul.mubr.msk.f32.gmra.mrb[56].mxu1 %vm527_vm1, %v28586_v16  ;;  %v28758_v31 = vld [vmem:[#allocation3 + $0xf9] sm:$0xff]  ;;  %v28766_v29 = vld [vmem:[#allocation3 + $0x109] sm:$0xff] }
 0x28e   : > { %4232 = vst.msk [vmem:[#allocation3 + $0x169] sm:$0x2] %vm564_vm2, %v28417_v3  ;;  %4238 = vst.msk [vmem:[#allocation3 + $0x1f9] sm:$0x2] %vm564_vm2, %v28417_v3  ;;  %v28592_v14 = vld [vmem:[#allocation3 + $0x153] sm:$0xff]  ;;  %v28776_v9 = vld [vmem:[#allocation3 + $0xe0] sm:$0xff] }
 0x28f   : > { %4277 = vst.msk [vmem:[#allocation3 + $0x167] sm:$0x4] %vm4261_vm7, %v28417_v3  ;;  %4283 = vst.msk [vmem:[#allocation3 + $0x1f7] sm:$0x4] %vm4261_vm7, %v28417_v3  ;;  %23494 = vmatprep.mubr.msk.f32.mxu1 %vm527_vm1, %v28592_v14  ;;  %v28610_v10 = vld [vmem:[#allocation3 + $0x173] sm:$0xff]  ;;  %v28782_v47 = vld [vmem:[#allocation3 + $0x121] sm:$0xff] }
 0x290   : > { %4323 = vst.msk [vmem:[#allocation3 + $0x165] sm:$0x8] %vm4307_vm9, %v28417_v3  ;;  %4329 = vst.msk [vmem:[#allocation3 + $0x1f5] sm:$0x8] %vm4307_vm9, %v28417_v3  ;;  %23939 = vmatmul.mubr.msk.f32.gmra.mrb[54].mxu0 %vm527_vm1, %v28542_v49  ;;  %v28604_v8 = vld [vmem:[#allocation3 + $0x16b] sm:$0xff]  ;;  %v28768_v22 = vld [vmem:[#allocation3 + $0xd8] sm:$0xff] }
 0x291   : > { %4214 = vst.msk [vmem:[#allocation3 + $0x1eb] sm:$0xff] %vm527_vm1, %v28446_v34  ;;  %32576 = vst [vmem:[#allocation65_spill] sm:$0xff] %v28470_v23  ;;  %23941 = vmatprep.mubr.msk.f32.mxu0 %vm527_vm1, %v28548_v7  ;;  %23495 = vmatmul.mubr.msk.f32.gmra.mrb[58].mxu1 %vm527_vm1, %v28598_v57  ;;  %v28750_v3 = vld [vmem:[#allocation3 + $0xf1] sm:$0xff]  ;;  %v28790_v45 = vld [vmem:[#allocation3 + $0x129] sm:$0xff] }
 0x292   : > { %4255 = vst.msk [vmem:[#allocation3 + $0x18d] sm:$0x40] %vm583_vm3, %v28446_v34  ;;  %4259 = vst.msk [vmem:[#allocation3 + $0x1ed] sm:$0x40] %vm583_vm3, %v28446_v34  ;;  %23497 = vmatprep.mubr.msk.f32.mxu1 %vm527_vm1, %v28604_v8  ;;  %v28774_v0 = vld [vmem:[#allocation3 + $0x111] sm:$0xff]  ;;  %v28798_v2 = vld [vmem:[#allocation3 + $0x139] sm:$0xff] }
 0x293   : > { %4301 = vst.msk [vmem:[#allocation3 + $0x18f] sm:$0x20] %vm4284_vm4, %v28446_v34  ;;  %4305 = vst.msk [vmem:[#allocation3 + $0x1ef] sm:$0x20] %vm4284_vm4, %v28446_v34  ;;  %v28784_v59 = vld [vmem:[#allocation3 + $0xf0] sm:$0xff]  ;;  %v28792_v25 = vld [vmem:[#allocation3 + $0xf8] sm:$0xff] }
 0x294   : > { %4347 = vst.msk [vmem:[#allocation3 + $0x191] sm:$0x10] %vm4330_vm5, %v28446_v34  ;;  %4351 = vst.msk [vmem:[#allocation3 + $0x1f1] sm:$0x10] %vm4330_vm5, %v28446_v34  ;;  %23942 = vmatmul.mubr.msk.f32.gmra.mrb[56].mxu0 %vm527_vm1, %v28574_v19  ;;  %v28622_v26 = vld [vmem:[#allocation3 + $0x18b] sm:$0xff]  ;;  %v28806_v63 = vld [vmem:[#allocation3 + $0x141] sm:$0xff] }
 0x295   : > { %4205 = vst.msk [vmem:[#allocation3 + $0x183] sm:$0xff] %vm527_vm1, %v28470_v23  ;;  %4213 = vst.msk [vmem:[#allocation3 + $0x1e3] sm:$0xff] %vm527_vm1, %v28470_v23  ;;  %23944 = vmatprep.mubr.msk.f32.mxu0 %vm527_vm1, %v28580_v20  ;;  %23498 = vmatmul.mubr.msk.f32.gmra.mrb[60].mxu1 %vm527_vm1, %v28610_v10  ;;  %v28736_v34 = vld [vmem:[#allocation3 + $0xa8] sm:$0xff]  ;;  %v28808_v36 = vld [vmem:[#allocation3 + $0x110] sm:$0xff] }
 0x296   : > { %4233 = vst.msk [vmem:[#allocation3 + $0x181] sm:$0x2] %vm564_vm2, %v28470_v23  ;;  %4237 = vst.msk [vmem:[#allocation3 + $0x1e1] sm:$0x2] %vm564_vm2, %v28470_v23  ;;  %v28800_v54 = vld [vmem:[#allocation3 + $0x108] sm:$0xff]  ;;  %v28814_v58 = vld [vmem:[#allocation3 + $0x151] sm:$0xff] }
 0x297   : > { %4278 = vst.msk [vmem:[#allocation3 + $0x17f] sm:$0x4] %vm4261_vm7, %v28470_v23  ;;  %4282 = vst.msk [vmem:[#allocation3 + $0x1df] sm:$0x4] %vm4261_vm7, %v28470_v23  ;;  %v28816_v24 = vld [vmem:[#allocation3 + $0x120] sm:$0xff]  ;;  %v28824_v62 = vld [vmem:[#allocation3 + $0x128] sm:$0xff] }
 0x298   : > { %4324 = vst.msk [vmem:[#allocation3 + $0x17d] sm:$0x8] %vm4307_vm9, %v28470_v23  ;;  %4328 = vst.msk [vmem:[#allocation3 + $0x1dd] sm:$0x8] %vm4307_vm9, %v28470_v23  ;;  %23945 = vmatmul.mubr.msk.f32.gmra.mrb[58].mxu0 %vm527_vm1, %v28586_v16  ;;  %v28742_v23 = vld [vmem:[#allocation3 + $0xe1] sm:$0xff]  ;;  %v28822_v12 = vld [vmem:[#allocation3 + $0x159] sm:$0xff] }
 0x299   : > { %32577 = vst [vmem:[#allocation66_spill] sm:$0xff] %v28490_v42  ;;  %32578 = vst [vmem:[#allocation67_spill] sm:$0xff] %v28497_v52  ;;  %23947 = vmatprep.mubr.msk.f32.mxu0 %vm527_vm1, %v28592_v14  ;;  %v28830_v55 = vld [vmem:[#allocation3 + $0x169] sm:$0xff]  ;;  %v28832_v43 = vld [vmem:[#allocation3 + $0x138] sm:$0xff] }
 0x29a   : > { %32579 = vst [vmem:[#allocation68_spill] sm:$0xff] %v28499_v53  ;;  %4208 = vst.msk [vmem:[#allocation3 + $0x1a3] sm:$0xff] %vm527_vm1, %v28499_v53  ;;  %v28838_v46 = vld [vmem:[#allocation3 + $0x171] sm:$0xff]  ;;  %v28840_v33 = vld [vmem:[#allocation3 + $0x140] sm:$0xff] }
 0x29b   : > { %4212 = vst.msk [vmem:[#allocation3 + $0x1d3] sm:$0xff] %vm527_vm1, %v28499_v53  ;;  %32580 = vst [vmem:[#allocation69_spill] sm:$0xff] %v28523_v13  ;;  %v8642_v52 = vld [vmem:[#allocation3 + $0xe] sm:$0xff]  ;;  %v8643_v42 = vld [vmem:[#allocation3 + $0x1e] sm:$0xff] }
 0x29c   : > { %4256 = vst.msk [vmem:[#allocation3 + $0x1a5] sm:$0x40] %vm583_vm3, %v28499_v53  ;;  %4258 = vst.msk [vmem:[#allocation3 + $0x1d5] sm:$0x40] %vm583_vm3, %v28499_v53  ;;  %v28616_v4 = vld [vmem:[#allocation3 + $0x183] sm:$0xff]  ;;  %23948 = vmatmul.mubr.msk.f32.gmra.mrb[60].mxu0 %vm527_vm1, %v28598_v57 }
 0x29d   : > { %4302 = vst.msk [vmem:[#allocation3 + $0x1a7] sm:$0x20] %vm4284_vm4, %v28499_v53  ;;  %4304 = vst.msk [vmem:[#allocation3 + $0x1d7] sm:$0x20] %vm4284_vm4, %v28499_v53  ;;  %23500 = vmatprep.mubr.msk.f32.mxu1 %vm527_vm1, %v28616_v4  ;;  %23950 = vmatprep.mubr.msk.f32.mxu0 %vm527_vm1, %v28604_v8 }
 0x29e   : > { %4348 = vst.msk [vmem:[#allocation3 + $0x1a9] sm:$0x10] %vm4330_vm5, %v28499_v53  ;;  %4350 = vst.msk [vmem:[#allocation3 + $0x1d9] sm:$0x10] %vm4330_vm5, %v28499_v53  ;;  %23501 = vmatmul.mubr.msk.f32.gmra.mrb[62].mxu1 %vm527_vm1, %v28622_v26  ;;  %v28728_v53 = vld [vmem:[#allocation3 + $0x98] sm:$0xff]  ;;  %v28846_v35 = vld [vmem:[#allocation3 + $0x181] sm:$0xff] }
 0x29f   : > { %4207 = vst.msk [vmem:[#allocation3 + $0x19b] sm:$0xff] %vm527_vm1, %v28523_v13  ;;  %4211 = vst.msk [vmem:[#allocation3 + $0x1cb] sm:$0xff] %vm527_vm1, %v28523_v13  ;;  %23505 = vmatprep.mubr.msk.f32.mxu1 %vm527_vm1, %v4359_v27  ;;  %v28672_v27 = vld [vmem:[#allocation3 + $0x48] sm:$0xff] }
 0x2a0   : > { %4234 = vst.msk [vmem:[#allocation3 + $0x199] sm:$0x2] %vm564_vm2, %v28523_v13  ;;  %4236 = vst.msk [vmem:[#allocation3 + $0x1c9] sm:$0x2] %vm564_vm2, %v28523_v13  ;;  %23951 = vmatmul.mubr.msk.f32.gmra.mrb[62].mxu0 %vm527_vm1, %v28610_v10 }
 0x2a1   : > { %4279 = vst.msk [vmem:[#allocation3 + $0x197] sm:$0x4] %vm4261_vm7, %v28523_v13  ;;  %4281 = vst.msk [vmem:[#allocation3 + $0x1c7] sm:$0x4] %vm4261_vm7, %v28523_v13  ;;  %23955 = vmatprep.mubr.msk.f32.mxu0 %vm527_vm1, %v7929_v17  ;;  %v28686_v17 = vld [vmem:[#allocation3 + $0x91] sm:$0xff] }
 0x2a2   : > { %4325 = vst.msk [vmem:[#allocation3 + $0x195] sm:$0x8] %vm4307_vm9, %v28523_v13  ;;  %4327 = vst.msk [vmem:[#allocation3 + $0x1c5] sm:$0x8] %vm4307_vm9, %v28523_v13  ;;  %23506 = vmatmul.mubr.msk.f32.vlgmr.msra.gmra.mrb[32].mxu1 %vm527_vm1, %v4360_v30  ;;  %v28678_v30 = vld [vmem:[#allocation3 + $0x81] sm:$0xff]  ;;  %v28734_v13 = vld [vmem:[#allocation3 + $0xd9] sm:$0xff] }
 0x2a3   : > { %32581 = vst [vmem:[#allocation70_spill] sm:$0xff] %v28542_v49  ;;  %32582 = vst [vmem:[#allocation71_spill] sm:$0xff] %v28548_v7  ;;  %23554 = vmatpush3.msk.msra.mxu1 %vm769_vm0, %v28170_v48  ;;  %23508 = vmatprep.mubr.msk.f32.mxu1 %vm527_vm1, %v4361_v32  ;;  %v28680_v32 = vld [vmem:[#allocation3 + $0x50] sm:$0xff]  ;;  %v32594_v7 = vrot.slane %v28170_v48, 4  ;;  %v5074_v49 = vld [vmem:[#allocation3 + $0x3d] sm:$0xff] }
 0x2a4   : > { %32583 = vst [vmem:[#allocation72_spill] sm:$0xff] %v28550_v1  ;;  %4210 = vst.msk [vmem:[#allocation3 + $0x1bb] sm:$0xff] %vm527_vm1, %v28550_v1  ;;  %23603 = vmatprep.subr.msk.mxu1 %vm769_vm0, %v32237_v28  ;;  %23956 = vmatmul.mubr.msk.f32.vlgmr.msra.gmra.mrb[32].mxu0 %vm527_vm1, %v7930_v11  ;;  %v28694_v11 = vld [vmem:[#allocation3 + $0x99] sm:$0xff]  ;;  %v28718_v28 = vld [vmem:[#allocation3 + $0xc1] sm:$0xff] }
 0x2a5   : > { %4257 = vst.msk [vmem:[#allocation3 + $0x1bd] sm:$0x40] %vm583_vm3, %v28550_v1  ;;  %32584 = vst [vmem:[#allocation73_spill] sm:$0xff] %v28564_v56  ;;  %23958 = vmatprep.mubr.msk.f32.mxu0 %vm527_vm1, %v7931_v40  ;;  %24004 = vmatpush3.msk.msra.mxu0 %vm769_vm0, %v28244_v5  ;;  %v28696_v40 = vld [vmem:[#allocation3 + $0x68] sm:$0xff]  ;;  %v28891_v48 = vld [vmem:[%s32162_s5 + $0x10] sm:$0xff] }
 0x2a6   : > { %4303 = vst.msk [vmem:[#allocation3 + $0x1bf] sm:$0x20] %vm4284_vm4, %v28550_v1  ;;  %32585 = vst [vmem:[#allocation74_spill] sm:$0xff] %v28574_v19  ;;  %23509 = vmatmul.mubr.msk.f32.gmra.mrb[34].mxu1 %vm527_vm1, %v4362_v38  ;;  %24053 = vmatprep.subr.msk.mxu0 %vm769_vm0, %v32236_v6  ;;  %v28688_v38 = vld [vmem:[#allocation3 + $0x60] sm:$0xff]  ;;  %v5073_v19 = vld [vmem:[#allocation3 + $0x35] sm:$0xff]  ;;  %vm11464_vm4 = vcmask 1041408  }
 0x2a7   : > { %4349 = vst.msk [vmem:[#allocation3 + $0x1c1] sm:$0x10] %vm4330_vm5, %v28550_v1  ;;  %32586 = vst [vmem:[#allocation75_spill] sm:$0xff] %v28580_v20  ;;  %23511 = vmatprep.mubr.msk.f32.mxu1 %vm527_vm1, %v28645_v39  ;;  %v28712_v6 = vld [vmem:[#allocation3 + $0x80] sm:$0xff]  ;;  %v28720_v1 = vld [vmem:[#allocation3 + $0x90] sm:$0xff]  ;;  %vm11367_vm5 = vcmask 15360  }
 0x2a8   : > { %4209 = vst.msk [vmem:[#allocation3 + $0x1b3] sm:$0xff] %vm527_vm1, %v28564_v56  ;;  %32587 = vst [vmem:[#allocation76_spill] sm:$0xff] %v28586_v16  ;;  %23959 = vmatmul.mubr.msk.f32.gmra.mrb[34].mxu0 %vm527_vm1, %v7932_v44  ;;  %v28702_v44 = vld [vmem:[#allocation3 + $0xa9] sm:$0xff]  ;;  %v28872_v20 = vld [vmem:[%s32160_s3 + $0x10] sm:$0xff] }
 0x2a9   : > { %4235 = vst.msk [vmem:[#allocation3 + $0x1b1] sm:$0x2] %vm564_vm2, %v28564_v56  ;;  %32588 = vst [vmem:[#allocation77_spill] sm:$0xff] %v28592_v14  ;;  %23961 = vmatprep.mubr.msk.f32.mxu0 %vm527_vm1, %v7933_v60  ;;  %v28704_v60 = vld [vmem:[#allocation3 + $0x78] sm:$0xff]  ;;  %v5072_v14 = vld [vmem:[#allocation3 + $0x25] sm:$0xff] }
 0x2aa   : > { %4280 = vst.msk [vmem:[#allocation3 + $0x1af] sm:$0x4] %vm4261_vm7, %v28564_v56  ;;  %32589 = vst [vmem:[#allocation78_spill] sm:$0xff] %v28598_v57  ;;  %23512 = vmatmul.mubr.msk.f32.gmra.mrb[36].mxu1 %vm527_vm1, %v28652_v41  ;;  %v28862_v57 = vld [vmem:[#allocation3 + $0x168] sm:$0xff]  ;;  %v28867_v16 = vld [vmem:[#allocation3 + $0x170] sm:$0xff] }
 0x2ab   : > { %4326 = vst.msk [vmem:[#allocation3 + $0x1ad] sm:$0x8] %vm4307_vm9, %v28564_v56  ;;  %32590 = vst [vmem:[#allocation79_spill] sm:$0xff] %v28604_v8  ;;  %23514 = vmatprep.mubr.msk.f32.mxu1 %vm527_vm1, %v28660_v50  ;;  %v28726_v56 = vld [vmem:[#allocation3 + $0xc9] sm:$0xff]  ;;  %v5071_v8 = vld [vmem:[#allocation3 + $0x1d] sm:$0xff] }
 0x2ac   : > { %32591 = vst [vmem:[#allocation80_spill] sm:$0xff] %v28610_v10  ;;  %32592 = vst [vmem:[#allocation81_spill] sm:$0xff] %v28616_v4  ;;  %23962 = vmatmul.mubr.msk.f32.gmra.mrb[36].mxu0 %vm527_vm1, %v7934_v18  ;;  %v28710_v18 = vld [vmem:[#allocation3 + $0xb1] sm:$0xff]  ;;  %v28854_v4 = vld [vmem:[#allocation3 + $0x189] sm:$0xff] }
 0x2ad   : > { %32593 = vst [vmem:[#allocation82_spill] sm:$0xff] %v28622_v26  ;;  %23964 = vmatprep.mubr.msk.f32.mxu0 %vm527_vm1, %v28672_v27  ;;  %v28848_v26 = vld [vmem:[#allocation3 + $0x150] sm:$0xff]  ;;  %v28856_v10 = vld [vmem:[#allocation3 + $0x158] sm:$0xff] }
 0x2ae   : > { %23515 = vmatmul.mubr.msk.f32.gmra.mrb[38].mxu1 %vm527_vm1, %v28665_v15 }
 0x2af   : > { %23517 = vmatprep.mubr.msk.f32.mxu1 %vm527_vm1, %v28670_v51 }
 0x2b0   : > { %23965 = vmatmul.mubr.msk.f32.gmra.mrb[38].mxu0 %vm527_vm1, %v28680_v32 }
 0x2b1   : > { %23967 = vmatprep.mubr.msk.f32.mxu0 %vm527_vm1, %v28688_v38 }
 0x2b2   : > { %23518 = vmatmul.mubr.msk.f32.gmra.mrb[40].mxu1 %vm527_vm1, %v28678_v30 }
 0x2b3   : > { %23520 = vmatprep.mubr.msk.f32.mxu1 %vm527_vm1, %v28686_v17 }
 0x2b4   : > { %23968 = vmatmul.mubr.msk.f32.gmra.mrb[40].mxu0 %vm527_vm1, %v28696_v40 }
 0x2b5   : > { %23970 = vmatprep.mubr.msk.f32.mxu0 %vm527_vm1, %v28704_v60 }
 0x2b6   : > { %23521 = vmatmul.mubr.msk.f32.gmra.mrb[42].mxu1 %vm527_vm1, %v28694_v11 }
 0x2b7   : > { %23523 = vmatprep.mubr.msk.f32.mxu1 %vm527_vm1, %v28702_v44 }
 0x2b8   : > { %23971 = vmatmul.mubr.msk.f32.gmra.mrb[42].mxu0 %vm527_vm1, %v28712_v6 }
 0x2b9   : > { %23973 = vmatprep.mubr.msk.f32.mxu0 %vm527_vm1, %v28720_v1 }
 0x2ba   : > { %23524 = vmatmul.mubr.msk.f32.gmra.mrb[44].mxu1 %vm527_vm1, %v28710_v18 }
 0x2bb   : > { %23526 = vmatprep.mubr.msk.f32.mxu1 %vm527_vm1, %v28718_v28 }
 0x2bc   : > { %23974 = vmatmul.mubr.msk.f32.gmra.mrb[44].mxu0 %vm527_vm1, %v28728_v53 }
 0x2bd   : > { %23976 = vmatprep.mubr.msk.f32.mxu0 %vm527_vm1, %v28736_v34 }
 0x2be   : > { %23527 = vmatmul.mubr.msk.f32.gmra.mrb[46].mxu1 %vm527_vm1, %v28726_v56 }
 0x2bf   : > { %23529 = vmatprep.mubr.msk.f32.mxu1 %vm527_vm1, %v28734_v13 }
 0x2c0   : > { %23977 = vmatmul.mubr.msk.f32.gmra.mrb[46].mxu0 %vm527_vm1, %v28744_v21 }
 0x2c1   : > { %23979 = vmatprep.mubr.msk.f32.mxu0 %vm527_vm1, %v28752_v61 }
 0x2c2   : > { %23530 = vmatmul.mubr.msk.f32.gmra.mrb[48].mxu1 %vm527_vm1, %v28742_v23 }
 0x2c3   : > { %23532 = vmatprep.mubr.msk.f32.mxu1 %vm527_vm1, %v28750_v3 }
 0x2c4   : > { %23980 = vmatmul.mubr.msk.f32.gmra.mrb[48].mxu0 %vm527_vm1, %v28760_v37 }
 0x2c5   : > { %23982 = vmatprep.mubr.msk.f32.mxu0 %vm527_vm1, %v28768_v22 }
 0x2c6   : > { %23533 = vmatmul.mubr.msk.f32.gmra.mrb[50].mxu1 %vm527_vm1, %v28758_v31 }
 0x2c7   : > { %23535 = vmatprep.mubr.msk.f32.mxu1 %vm527_vm1, %v28766_v29 }
 0x2c8   : > { %23983 = vmatmul.mubr.msk.f32.gmra.mrb[50].mxu0 %vm527_vm1, %v28776_v9 }
 0x2c9   : > { %23985 = vmatprep.mubr.msk.f32.mxu0 %vm527_vm1, %v28784_v59 }
 0x2ca   : > { %23536 = vmatmul.mubr.msk.f32.gmra.mrb[52].mxu1 %vm527_vm1, %v28774_v0 }
 0x2cb   : > { %23538 = vmatprep.mubr.msk.f32.mxu1 %vm527_vm1, %v28782_v47 }
 0x2cc   : > { %23986 = vmatmul.mubr.msk.f32.gmra.mrb[52].mxu0 %vm527_vm1, %v28792_v25 }
 0x2cd   : > { %23988 = vmatprep.mubr.msk.f32.mxu0 %vm527_vm1, %v28800_v54 }
 0x2ce   : > { %23539 = vmatmul.mubr.msk.f32.gmra.mrb[54].mxu1 %vm527_vm1, %v28790_v45 }
 0x2cf   : > { %23541 = vmatprep.mubr.msk.f32.mxu1 %vm527_vm1, %v28798_v2 }
 0x2d0   : > { %23989 = vmatmul.mubr.msk.f32.gmra.mrb[54].mxu0 %vm527_vm1, %v28808_v36 }
 0x2d1   : > { %23991 = vmatprep.mubr.msk.f32.mxu0 %vm527_vm1, %v28816_v24 }
 0x2d2   : > { %23542 = vmatmul.mubr.msk.f32.gmra.mrb[56].mxu1 %vm527_vm1, %v28806_v63 }
 0x2d3   : > { %23544 = vmatprep.mubr.msk.f32.mxu1 %vm527_vm1, %v28814_v58 }
 0x2d4   : > { %23992 = vmatmul.mubr.msk.f32.gmra.mrb[56].mxu0 %vm527_vm1, %v28824_v62 }
 0x2d5   : > { %23994 = vmatprep.mubr.msk.f32.mxu0 %vm527_vm1, %v28832_v43 }
 0x2d6   : > { %23545 = vmatmul.mubr.msk.f32.gmra.mrb[58].mxu1 %vm527_vm1, %v28822_v12 }
 0x2d7   : > { %23547 = vmatprep.mubr.msk.f32.mxu1 %vm527_vm1, %v28830_v55 }
 0x2d8   : > { %23995 = vmatmul.mubr.msk.f32.gmra.mrb[58].mxu0 %vm527_vm1, %v28840_v33 }
 0x2d9   : > { %23997 = vmatprep.mubr.msk.f32.mxu0 %vm527_vm1, %v28848_v26 }
 0x2da   : > { %23548 = vmatmul.mubr.msk.f32.gmra.mrb[60].mxu1 %vm527_vm1, %v28838_v46 }
 0x2db   : > { %23550 = vmatprep.mubr.msk.f32.mxu1 %vm527_vm1, %v28846_v35 }
 0x2dc   : > { %23998 = vmatmul.mubr.msk.f32.gmra.mrb[60].mxu0 %vm527_vm1, %v28856_v10 }
 0x2dd   : > { %24000 = vmatprep.mubr.msk.f32.mxu0 %vm527_vm1, %v28862_v57 }
 0x2de   : > { %23551 = vmatmul.mubr.msk.f32.gmra.mrb[62].mxu1 %vm527_vm1, %v28854_v4 }
 0x2df   : > { %23555 = vmatprep.mubr.msk.f32.mxu1 %vm527_vm1, %v5071_v8  ;;  %v8641_v8 = vld [vmem:[#allocation3 + $0x6] sm:$0xff] }
 0x2e0   : > { %24001 = vmatmul.mubr.msk.f32.gmra.mrb[62].mxu0 %vm527_vm1, %v28867_v16 }
 0x2e1   : > { %24005 = vmatprep.mubr.msk.f32.mxu0 %vm527_vm1, %v8641_v8  ;;  %v8645_v8 = vld [vmem:[#allocation3 + $0x36] sm:$0xff] }
 0x2e2   : > { %23556 = vmatmul.mubr.msk.f32.vlgmr.msra.gmra.mrb[32].mxu1 %vm527_vm1, %v5072_v14  ;;  %v28886_v14 = vld [vmem:[#allocation3 + $0x4d] sm:$0xff] }
 0x2e3   : > { %23604 = vmatpush3.msk.msra.mxu1 %vm769_vm0, %v32594_v7  ;;  %23558 = vmatprep.mubr.msk.f32.mxu1 %vm527_vm1, %v5073_v19  ;;  %v32595_v7 = vrot.slane %v28244_v5, 4  ;;  %v28906_v19 = vld [vmem:[#allocation3 + $0x65] sm:$0xff]  ;;  %v28911_v5 = vld [vmem:[#allocation3 + $0x6d] sm:$0xff] }
 0x2e4   : > { %23653 = vmatprep.subr.msk.mxu1 %vm769_vm0, %v28872_v20  ;;  %24006 = vmatmul.mubr.msk.f32.vlgmr.msra.gmra.mrb[32].mxu0 %vm527_vm1, %v8642_v52  ;;  %v8644_v52 = vld [vmem:[#allocation3 + $0x26] sm:$0xff]  ;;  %32597 = vst [vmem:[#allocation84_spill] sm:$0xff] %v28911_v5 }
 0x2e5   : > { %24008 = vmatprep.mubr.msk.f32.mxu0 %vm527_vm1, %v8643_v42  ;;  %24054 = vmatpush3.msk.msra.mxu0 %vm769_vm0, %v32595_v7  ;;  %v8646_v42 = vld [vmem:[#allocation3 + $0x3e] sm:$0xff] }
 0x2e6   : > { %23559 = vmatmul.mubr.msk.f32.gmra.mrb[34].mxu1 %vm527_vm1, %v5074_v49  ;;  %v28899_v49 = vld [vmem:[#allocation3 + $0x55] sm:$0xff]  ;;  %24103 = vmatprep.subr.msk.mxu0 %vm769_vm0, %v28891_v48  ;;  %v28916_v7 = vld [vmem:[#allocation3 + $0x7d] sm:$0xff] }
 0x2e7   : > { %23561 = vmatprep.mubr.msk.f32.mxu1 %vm527_vm1, %v28886_v14  ;;  %32596 = vst [vmem:[#allocation83_spill] sm:$0xff] %v28899_v49  ;;  %32598 = vst [vmem:[#allocation85_spill] sm:$0xff] %v28916_v7 }
 0x2e8   : > { %24009 = vmatmul.mubr.msk.f32.gmra.mrb[34].mxu0 %vm527_vm1, %v8644_v52  ;;  %v28924_v52 = vld [vmem:[#allocation3 + $0x85] sm:$0xff] }
 0x2e9   : > { %24011 = vmatprep.mubr.msk.f32.mxu0 %vm527_vm1, %v8645_v8  ;;  %32600 = vst [vmem:[#allocation87_spill] sm:$0xff] %v28924_v52  ;;  %v28926_v8 = vld [vmem:[#allocation3 + $0x56] sm:$0xff] }
 0x2ea   : > { %23562 = vmatmul.mubr.msk.f32.gmra.mrb[36].mxu1 %vm527_vm1, %v28899_v49  ;;  %v28918_v49 = vld [vmem:[#allocation3 + $0x4e] sm:$0xff]  ;;  %32601 = vst [vmem:[#allocation88_spill] sm:$0xff] %v28926_v8 }
 0x2eb   : > { %23564 = vmatprep.mubr.msk.f32.mxu1 %vm527_vm1, %v28906_v19  ;;  %32599 = vst [vmem:[#allocation86_spill] sm:$0xff] %v28918_v49 }
 0x2ec   : > { %24012 = vmatmul.mubr.msk.f32.gmra.mrb[36].mxu0 %vm527_vm1, %v8646_v42  ;;  %v28932_v42 = vld [vmem:[#allocation3 + $0x95] sm:$0xff] }
 0x2ed   : > { %24014 = vmatprep.mubr.msk.f32.mxu0 %vm527_vm1, %v28918_v49  ;;  %32602 = vst [vmem:[#allocation89_spill] sm:$0xff] %v28932_v42  ;;  %v28942_v49 = vld [vmem:[#allocation3 + $0x6e] sm:$0xff] }
 0x2ee   : > { %23565 = vmatmul.mubr.msk.f32.gmra.mrb[38].mxu1 %vm527_vm1, %v28911_v5  ;;  %v28934_v5 = vld [vmem:[#allocation3 + $0x66] sm:$0xff]  ;;  %32605 = vst [vmem:[#allocation92_spill] sm:$0xff] %v28942_v49 }
 0x2ef   : > { %23567 = vmatprep.mubr.msk.f32.mxu1 %vm527_vm1, %v28916_v7  ;;  %32603 = vst [vmem:[#allocation90_spill] sm:$0xff] %v28934_v5  ;;  %v28940_v7 = vld [vmem:[#allocation3 + $0x9d] sm:$0xff] }
 0x2f0   : > { %24015 = vmatmul.mubr.msk.f32.gmra.mrb[38].mxu0 %vm527_vm1, %v28926_v8  ;;  %32604 = vst [vmem:[#allocation91_spill] sm:$0xff] %v28940_v7  ;;  %v28950_v8 = vld [vmem:[#allocation3 + $0x7e] sm:$0xff] }
 0x2f1   : > { %24017 = vmatprep.mubr.msk.f32.mxu0 %vm527_vm1, %v28934_v5  ;;  %32607 = vst [vmem:[#allocation94_spill] sm:$0xff] %v28950_v8  ;;  %v28958_v5 = vld [vmem:[#allocation3 + $0x86] sm:$0xff] }
 0x2f2   : > { %23568 = vmatmul.mubr.msk.f32.gmra.mrb[40].mxu1 %vm527_vm1, %v28924_v52  ;;  %v28948_v52 = vld [vmem:[#allocation3 + $0xad] sm:$0xff]  ;;  %32609 = vst [vmem:[#allocation96_spill] sm:$0xff] %v28958_v5 }
 0x2f3   : > { %23570 = vmatprep.mubr.msk.f32.mxu1 %vm527_vm1, %v28932_v42  ;;  %32606 = vst [vmem:[#allocation93_spill] sm:$0xff] %v28948_v52  ;;  %v28956_v42 = vld [vmem:[#allocation3 + $0xb5] sm:$0xff] }
 0x2f4   : > { %24018 = vmatmul.mubr.msk.f32.gmra.mrb[40].mxu0 %vm527_vm1, %v28942_v49  ;;  %32608 = vst [vmem:[#allocation95_spill] sm:$0xff] %v28956_v42  ;;  %v28966_v49 = vld [vmem:[#allocation3 + $0x96] sm:$0xff] }
 0x2f5   : > { %24020 = vmatprep.mubr.msk.f32.mxu0 %vm527_vm1, %v28950_v8  ;;  %32611 = vst [vmem:[#allocation98_spill] sm:$0xff] %v28966_v49  ;;  %v28974_v8 = vld [vmem:[#allocation3 + $0x9e] sm:$0xff] }
 0x2f6   : > { %23571 = vmatmul.mubr.msk.f32.gmra.mrb[42].mxu1 %vm527_vm1, %v28940_v7  ;;  %v28964_v7 = vld [vmem:[#allocation3 + $0xc5] sm:$0xff]  ;;  %32613 = vst [vmem:[#allocation100_spill] sm:$0xff] %v28974_v8 }
 0x2f7   : > { %23573 = vmatprep.mubr.msk.f32.mxu1 %vm527_vm1, %v28948_v52  ;;  %32610 = vst [vmem:[#allocation97_spill] sm:$0xff] %v28964_v7  ;;  %v28972_v52 = vld [vmem:[#allocation3 + $0xcd] sm:$0xff] }
 0x2f8   : > { %24021 = vmatmul.mubr.msk.f32.gmra.mrb[42].mxu0 %vm527_vm1, %v28958_v5  ;;  %32612 = vst [vmem:[#allocation99_spill] sm:$0xff] %v28972_v52  ;;  %v28982_v5 = vld [vmem:[#allocation3 + $0xae] sm:$0xff] }
 0x2f9   : > { %24023 = vmatprep.mubr.msk.f32.mxu0 %vm527_vm1, %v28966_v49  ;;  %32615 = vst [vmem:[#allocation102_spill] sm:$0xff] %v28982_v5  ;;  %v28990_v49 = vld [vmem:[#allocation3 + $0xb6] sm:$0xff] }
 0x2fa   : > { %23574 = vmatmul.mubr.msk.f32.gmra.mrb[44].mxu1 %vm527_vm1, %v28956_v42  ;;  %v28980_v42 = vld [vmem:[#allocation3 + $0xdd] sm:$0xff]  ;;  %32617 = vst [vmem:[#allocation104_spill] sm:$0xff] %v28990_v49 }
 0x2fb   : > { %23576 = vmatprep.mubr.msk.f32.mxu1 %vm527_vm1, %v28964_v7  ;;  %32614 = vst [vmem:[#allocation101_spill] sm:$0xff] %v28980_v42  ;;  %v28988_v7 = vld [vmem:[#allocation3 + $0xe5] sm:$0xff] }
 0x2fc   : > { %24024 = vmatmul.mubr.msk.f32.gmra.mrb[44].mxu0 %vm527_vm1, %v28974_v8  ;;  %32616 = vst [vmem:[#allocation103_spill] sm:$0xff] %v28988_v7  ;;  %v28998_v8 = vld [vmem:[#allocation3 + $0xc6] sm:$0xff] }
 0x2fd   : > { %24026 = vmatprep.mubr.msk.f32.mxu0 %vm527_vm1, %v28982_v5  ;;  %32619 = vst [vmem:[#allocation106_spill] sm:$0xff] %v28998_v8  ;;  %v29006_v5 = vld [vmem:[#allocation3 + $0xce] sm:$0xff] }
 0x2fe   : > { %23577 = vmatmul.mubr.msk.f32.gmra.mrb[46].mxu1 %vm527_vm1, %v28972_v52  ;;  %v28996_v52 = vld [vmem:[#allocation3 + $0xf5] sm:$0xff]  ;;  %32621 = vst [vmem:[#allocation108_spill] sm:$0xff] %v29006_v5 }
 0x2ff   : > { %23579 = vmatprep.mubr.msk.f32.mxu1 %vm527_vm1, %v28980_v42  ;;  %32618 = vst [vmem:[#allocation105_spill] sm:$0xff] %v28996_v52  ;;  %v29004_v42 = vld [vmem:[#allocation3 + $0xfd] sm:$0xff] }
 0x300   : > { %24027 = vmatmul.mubr.msk.f32.gmra.mrb[46].mxu0 %vm527_vm1, %v28990_v49  ;;  %32620 = vst [vmem:[#allocation107_spill] sm:$0xff] %v29004_v42  ;;  %v29014_v49 = vld [vmem:[#allocation3 + $0xde] sm:$0xff] }
 0x301   : > { %24029 = vmatprep.mubr.msk.f32.mxu0 %vm527_vm1, %v28998_v8  ;;  %32623 = vst [vmem:[#allocation110_spill] sm:$0xff] %v29014_v49  ;;  %v29022_v8 = vld [vmem:[#allocation3 + $0xe6] sm:$0xff] }
 0x302   : > { %23580 = vmatmul.mubr.msk.f32.gmra.mrb[48].mxu1 %vm527_vm1, %v28988_v7  ;;  %v29012_v7 = vld [vmem:[#allocation3 + $0x10d] sm:$0xff]  ;;  %32625 = vst [vmem:[#allocation112_spill] sm:$0xff] %v29022_v8 }
 0x303   : > { %23582 = vmatprep.mubr.msk.f32.mxu1 %vm527_vm1, %v28996_v52  ;;  %32622 = vst [vmem:[#allocation109_spill] sm:$0xff] %v29012_v7  ;;  %v29020_v52 = vld [vmem:[#allocation3 + $0x115] sm:$0xff] }
 0x304   : > { %24030 = vmatmul.mubr.msk.f32.gmra.mrb[48].mxu0 %vm527_vm1, %v29006_v5  ;;  %32624 = vst [vmem:[#allocation111_spill] sm:$0xff] %v29020_v52  ;;  %v29030_v5 = vld [vmem:[#allocation3 + $0xf6] sm:$0xff] }
 0x305   : > { %24032 = vmatprep.mubr.msk.f32.mxu0 %vm527_vm1, %v29014_v49  ;;  %32627 = vst [vmem:[#allocation114_spill] sm:$0xff] %v29030_v5  ;;  %v29038_v49 = vld [vmem:[#allocation3 + $0xfe] sm:$0xff] }
 0x306   : > { %23583 = vmatmul.mubr.msk.f32.gmra.mrb[50].mxu1 %vm527_vm1, %v29004_v42  ;;  %v29028_v42 = vld [vmem:[#allocation3 + $0x125] sm:$0xff]  ;;  %32629 = vst [vmem:[#allocation116_spill] sm:$0xff] %v29038_v49 }
 0x307   : > { %23585 = vmatprep.mubr.msk.f32.mxu1 %vm527_vm1, %v29012_v7  ;;  %32626 = vst [vmem:[#allocation113_spill] sm:$0xff] %v29028_v42  ;;  %v29036_v7 = vld [vmem:[#allocation3 + $0x12d] sm:$0xff] }
 0x308   : > { %24033 = vmatmul.mubr.msk.f32.gmra.mrb[50].mxu0 %vm527_vm1, %v29022_v8  ;;  %32628 = vst [vmem:[#allocation115_spill] sm:$0xff] %v29036_v7  ;;  %v29046_v8 = vld [vmem:[#allocation3 + $0x10e] sm:$0xff] }
 0x309   : > { %24035 = vmatprep.mubr.msk.f32.mxu0 %vm527_vm1, %v29030_v5  ;;  %32631 = vst [vmem:[#allocation118_spill] sm:$0xff] %v29046_v8  ;;  %v29054_v5 = vld [vmem:[#allocation3 + $0x116] sm:$0xff] }
 0x30a   : > { %23586 = vmatmul.mubr.msk.f32.gmra.mrb[52].mxu1 %vm527_vm1, %v29020_v52  ;;  %v29044_v52 = vld [vmem:[#allocation3 + $0x13d] sm:$0xff]  ;;  %32633 = vst [vmem:[#allocation120_spill] sm:$0xff] %v29054_v5 }
 0x30b   : > { %23588 = vmatprep.mubr.msk.f32.mxu1 %vm527_vm1, %v29028_v42  ;;  %32630 = vst [vmem:[#allocation117_spill] sm:$0xff] %v29044_v52  ;;  %v29052_v42 = vld [vmem:[#allocation3 + $0x145] sm:$0xff] }
 0x30c   : > { %24036 = vmatmul.mubr.msk.f32.gmra.mrb[52].mxu0 %vm527_vm1, %v29038_v49  ;;  %32632 = vst [vmem:[#allocation119_spill] sm:$0xff] %v29052_v42  ;;  %v29062_v49 = vld [vmem:[#allocation3 + $0x126] sm:$0xff] }
 0x30d   : > { %24038 = vmatprep.mubr.msk.f32.mxu0 %vm527_vm1, %v29046_v8  ;;  %32635 = vst [vmem:[#allocation122_spill] sm:$0xff] %v29062_v49  ;;  %v29070_v8 = vld [vmem:[#allocation3 + $0x12e] sm:$0xff] }
 0x30e   : > { %23589 = vmatmul.mubr.msk.f32.gmra.mrb[54].mxu1 %vm527_vm1, %v29036_v7  ;;  %v29060_v7 = vld [vmem:[#allocation3 + $0x155] sm:$0xff]  ;;  %32637 = vst [vmem:[#allocation124_spill] sm:$0xff] %v29070_v8 }
 0x30f   : > { %23591 = vmatprep.mubr.msk.f32.mxu1 %vm527_vm1, %v29044_v52  ;;  %32634 = vst [vmem:[#allocation121_spill] sm:$0xff] %v29060_v7  ;;  %v29068_v52 = vld [vmem:[#allocation3 + $0x15d] sm:$0xff] }
 0x310   : > { %24039 = vmatmul.mubr.msk.f32.gmra.mrb[54].mxu0 %vm527_vm1, %v29054_v5  ;;  %32636 = vst [vmem:[#allocation123_spill] sm:$0xff] %v29068_v52  ;;  %v29078_v5 = vld [vmem:[#allocation3 + $0x13e] sm:$0xff] }
 0x311   : > { %24041 = vmatprep.mubr.msk.f32.mxu0 %vm527_vm1, %v29062_v49  ;;  %32639 = vst [vmem:[#allocation126_spill] sm:$0xff] %v29078_v5  ;;  %v29086_v49 = vld [vmem:[#allocation3 + $0x146] sm:$0xff] }
 0x312   : > { %23592 = vmatmul.mubr.msk.f32.gmra.mrb[56].mxu1 %vm527_vm1, %v29052_v42  ;;  %v29076_v42 = vld [vmem:[#allocation3 + $0x16d] sm:$0xff] }
 0x313   : > { %23594 = vmatprep.mubr.msk.f32.mxu1 %vm527_vm1, %v29060_v7  ;;  %32638 = vst [vmem:[#allocation125_spill] sm:$0xff] %v29076_v42  ;;  %v29084_v7 = vld [vmem:[#allocation3 + $0x175] sm:$0xff] }
 0x314   : > { %24042 = vmatmul.mubr.msk.f32.gmra.mrb[56].mxu0 %vm527_vm1, %v29070_v8  ;;  %32640 = vst [vmem:[#allocation127_spill] sm:$0xff] %v29084_v7  ;;  %v29094_v8 = vld [vmem:[#allocation3 + $0x156] sm:$0xff] }
 0x315   : > { %24044 = vmatprep.mubr.msk.f32.mxu0 %vm527_vm1, %v29078_v5  ;;  %32642 = vst [vmem:[#allocation129_spill] sm:$0xff] %v29094_v8  ;;  %v29102_v5 = vld [vmem:[#allocation3 + $0x15e] sm:$0xff] }
 0x316   : > { %23595 = vmatmul.mubr.msk.f32.gmra.mrb[58].mxu1 %vm527_vm1, %v29068_v52  ;;  %v29092_v52 = vld [vmem:[#allocation3 + $0x185] sm:$0xff] }
 0x317   : > { %23597 = vmatprep.mubr.msk.f32.mxu1 %vm527_vm1, %v29076_v42  ;;  %32641 = vst [vmem:[#allocation128_spill] sm:$0xff] %v29092_v52  ;;  %v29100_v42 = vld [vmem:[#allocation3 + $0x18d] sm:$0xff] }
 0x318   : > { %24045 = vmatmul.mubr.msk.f32.gmra.mrb[58].mxu0 %vm527_vm1, %v29086_v49 }
 0x319   : > { %24047 = vmatprep.mubr.msk.f32.mxu0 %vm527_vm1, %v29094_v8  ;;  %v29115_v8 = vld [vmem:[#allocation3 + $0x176] sm:$0xff] }
 0x31a   : > { %23598 = vmatmul.mubr.msk.f32.gmra.mrb[60].mxu1 %vm527_vm1, %v29084_v7  ;;  %v29108_v7 = vld [vmem:[#allocation3 + $0x16e] sm:$0xff] }
 0x31b   : > { %23600 = vmatprep.mubr.msk.f32.mxu1 %vm527_vm1, %v29092_v52  ;;  %v6268_v52 = vrot.slane %v28872_v20, 4 }
 0x31c   : > { %24048 = vmatmul.mubr.msk.f32.gmra.mrb[60].mxu0 %vm527_vm1, %v29102_v5 }
 0x31d   : > { %24050 = vmatprep.mubr.msk.f32.mxu0 %vm527_vm1, %v29108_v7 }
 0x31e   : > { %23601 = vmatmul.mubr.msk.f32.gmra.mrb[62].mxu1 %vm527_vm1, %v29100_v42 }
 0x31f   : > { %23605 = vmatprep.mubr.msk.f32.mxu1 %vm527_vm1, %v28645_v39  ;;  %v9709_v39 = vrot.slane %v28891_v48, 4 }
 0x320   : > { %24051 = vmatmul.mubr.msk.f32.gmra.mrb[62].mxu0 %vm527_vm1, %v29115_v8 }
 0x321   : > { %24055 = vmatprep.mubr.msk.f32.mxu0 %vm527_vm1, %v28672_v27 }
 0x322   : > { %23606 = vmatmul.mubr.msk.f32.vlgmr.msra.gmra.mrb[32].mxu1 %vm527_vm1, %v28652_v41  ;;  %v29418_v41 = vld [vmem:[#allocation3 + $0x19b] sm:$0xff] }
 0x323   : > { %23654 = vmatpush3.msk.msra.mxu1 %vm769_vm0, %v28872_v20  ;;  %23608 = vmatprep.mubr.msk.f32.mxu1 %vm527_vm1, %v28660_v50  ;;  %v32648_v20 = vld [vmem:[#allocation75_spill] sm:$0xff]  ;;  %v29424_v50 = vld [vmem:[#allocation3 + $0x1a3] sm:$0xff] }
 0x324   : > { %23703 = vmatprep.subr.msk.mxu1 %vm769_vm0, %v6268_v52  ;;  %24056 = vmatmul.mubr.msk.f32.vlgmr.msra.gmra.mrb[32].mxu0 %vm527_vm1, %v28680_v32  ;;  %v32657_v32 = vld [vmem:[#allocation86_spill] sm:$0xff] }
 0x325   : > { %24058 = vmatprep.mubr.msk.f32.mxu0 %vm527_vm1, %v28688_v38  ;;  %24104 = vmatpush3.msk.msra.mxu0 %vm769_vm0, %v28891_v48  ;;  %v32658_v38 = vld [vmem:[#allocation84_spill] sm:$0xff]  ;;  %v32665_v48 = vld [vmem:[#allocation94_spill] sm:$0xff] }
 0x326   : > { %23609 = vmatmul.mubr.msk.f32.gmra.mrb[34].mxu1 %vm527_vm1, %v28665_v15  ;;  %24153 = vmatprep.subr.msk.mxu0 %vm769_vm0, %v9709_v39  ;;  %v29430_v15 = vld [vmem:[#allocation3 + $0x1b3] sm:$0xff] }
 0x327   : > { %23611 = vmatprep.mubr.msk.f32.mxu1 %vm527_vm1, %v28670_v51  ;;  %v29436_v51 = vld [vmem:[#allocation3 + $0x1bb] sm:$0xff] }
 0x328   : > { %24059 = vmatmul.mubr.msk.f32.gmra.mrb[34].mxu0 %vm527_vm1, %v28696_v40  ;;  %v32660_v40 = vld [vmem:[#allocation85_spill] sm:$0xff] }
 0x329   : > { %24061 = vmatprep.mubr.msk.f32.mxu0 %vm527_vm1, %v28704_v60  ;;  %v32662_v60 = vld [vmem:[#allocation87_spill] sm:$0xff] }
 0x32a   : > { %23612 = vmatmul.mubr.msk.f32.gmra.mrb[36].mxu1 %vm527_vm1, %v28678_v30  ;;  %v32656_v30 = vld [vmem:[#allocation83_spill] sm:$0xff] }
 0x32b   : > { %23614 = vmatprep.mubr.msk.f32.mxu1 %vm527_vm1, %v28686_v17 }
 0x32c   : > { %24062 = vmatmul.mubr.msk.f32.gmra.mrb[36].mxu0 %vm527_vm1, %v28712_v6  ;;  %v32655_v6 = vld [vmem:[#allocation82_spill] sm:$0xff] }
 0x32d   : > { %24064 = vmatprep.mubr.msk.f32.mxu0 %vm527_vm1, %v28720_v1  ;;  %v32646_v1 = vld [vmem:[#allocation71_spill] sm:$0xff] }
 0x32e   : > { %23615 = vmatmul.mubr.msk.f32.gmra.mrb[38].mxu1 %vm527_vm1, %v28694_v11  ;;  %v32659_v11 = vld [vmem:[#allocation88_spill] sm:$0xff] }
 0x32f   : > { %23617 = vmatprep.mubr.msk.f32.mxu1 %vm527_vm1, %v28702_v44  ;;  %v32661_v44 = vld [vmem:[#allocation90_spill] sm:$0xff] }
 0x330   : > { %24065 = vmatmul.mubr.msk.f32.gmra.mrb[38].mxu0 %vm527_vm1, %v28728_v53  ;;  %v32644_v53 = vld [vmem:[#allocation67_spill] sm:$0xff] }
 0x331   : > { %24067 = vmatprep.mubr.msk.f32.mxu0 %vm527_vm1, %v28736_v34  ;;  %v29360_v34 = vld [vmem:[#allocation3 + $0xf3] sm:$0xff] }
 0x332   : > { %23618 = vmatmul.mubr.msk.f32.gmra.mrb[40].mxu1 %vm527_vm1, %v28710_v18  ;;  %v32663_v18 = vld [vmem:[#allocation92_spill] sm:$0xff] }
 0x333   : > { %23620 = vmatprep.mubr.msk.f32.mxu1 %vm527_vm1, %v28718_v28  ;;  %v32654_v28 = vld [vmem:[#allocation81_spill] sm:$0xff] }
 0x334   : > { %24068 = vmatmul.mubr.msk.f32.gmra.mrb[40].mxu0 %vm527_vm1, %v28744_v21  ;;  %v29348_v21 = vld [vmem:[#allocation3 + $0xdb] sm:$0xff] }
 0x335   : > { %24070 = vmatprep.mubr.msk.f32.mxu0 %vm527_vm1, %v28752_v61  ;;  %v29336_v61 = vld [vmem:[#allocation3 + $0xc3] sm:$0xff] }
 0x336   : > { %23621 = vmatmul.mubr.msk.f32.gmra.mrb[42].mxu1 %vm527_vm1, %v28726_v56  ;;  %v32647_v56 = vld [vmem:[#allocation74_spill] sm:$0xff] }
 0x337   : > { %23623 = vmatprep.mubr.msk.f32.mxu1 %vm527_vm1, %v28734_v13  ;;  %v32645_v13 = vld [vmem:[#allocation70_spill] sm:$0xff] }
 0x338   : > { %24071 = vmatmul.mubr.msk.f32.gmra.mrb[42].mxu0 %vm527_vm1, %v28760_v37  ;;  %v29324_v37 = vld [vmem:[#allocation3 + $0xab] sm:$0xff] }
 0x339   : > { %24073 = vmatprep.mubr.msk.f32.mxu0 %vm527_vm1, %v28768_v22  ;;  %v29312_v22 = vld [vmem:[#allocation3 + $0x93] sm:$0xff] }
 0x33a   : > { %23624 = vmatmul.mubr.msk.f32.gmra.mrb[44].mxu1 %vm527_vm1, %v28742_v23  ;;  %v32643_v23 = vld [vmem:[#allocation66_spill] sm:$0xff] }
 0x33b   : > { %23626 = vmatprep.mubr.msk.f32.mxu1 %vm527_vm1, %v28750_v3  ;;  %v29354_v3 = vld [vmem:[#allocation3 + $0xe3] sm:$0xff] }
 0x33c   : > { %24074 = vmatmul.mubr.msk.f32.gmra.mrb[44].mxu0 %vm527_vm1, %v28776_v9  ;;  %v29297_v9 = vld [vmem:[%s32162_s5 + $0x18] sm:$0xff] }
 0x33d   : > { %24076 = vmatprep.mubr.msk.f32.mxu0 %vm527_vm1, %v28784_v59  ;;  %v5851_v59 = vld [vmem:[#allocation3 + $0x6b] sm:$0xff]  ;;  %v10486_v17 = vrot.slane %v29297_v9, 4 }
 0x33e   : > { %23627 = vmatmul.mubr.msk.f32.gmra.mrb[46].mxu1 %vm527_vm1, %v28758_v31  ;;  %v29342_v31 = vld [vmem:[#allocation3 + $0xcb] sm:$0xff] }
 0x33f   : > { %23629 = vmatprep.mubr.msk.f32.mxu1 %vm527_vm1, %v28766_v29  ;;  %v29330_v29 = vld [vmem:[#allocation3 + $0xb3] sm:$0xff] }
 0x340   : > { %24077 = vmatmul.mubr.msk.f32.gmra.mrb[46].mxu0 %vm527_vm1, %v28792_v25  ;;  %v29278_v25 = vld [vmem:[%s32160_s3 + $0x18] sm:$0xff] }
 0x341   : > { %24079 = vmatprep.mubr.msk.f32.mxu0 %vm527_vm1, %v28800_v54  ;;  %v5849_v54 = vld [vmem:[#allocation3 + $0x53] sm:$0xff]  ;;  %v7045_v27 = vrot.slane %v29278_v25, 4 }
 0x342   : > { %23630 = vmatmul.mubr.msk.f32.gmra.mrb[48].mxu1 %vm527_vm1, %v28774_v0  ;;  %v29318_v0 = vld [vmem:[#allocation3 + $0x9b] sm:$0xff] }
 0x343   : > { %23632 = vmatprep.mubr.msk.f32.mxu1 %vm527_vm1, %v28782_v47  ;;  %v29305_v47 = vld [vmem:[#allocation3 + $0x83] sm:$0xff] }
 0x344   : > { %24080 = vmatmul.mubr.msk.f32.gmra.mrb[48].mxu0 %vm527_vm1, %v28808_v36  ;;  %v5848_v36 = vld [vmem:[#allocation3 + $0x4b] sm:$0xff] }
 0x345   : > { %24082 = vmatprep.mubr.msk.f32.mxu0 %vm527_vm1, %v28816_v24  ;;  %v29260_v24 = vld [vmem:[#allocation3 + $0x1b9] sm:$0xff] }
 0x346   : > { %23633 = vmatmul.mubr.msk.f32.gmra.mrb[50].mxu1 %vm527_vm1, %v28790_v45  ;;  %v29292_v45 = vld [vmem:[#allocation3 + $0x7b] sm:$0xff] }
 0x347   : > { %23635 = vmatprep.mubr.msk.f32.mxu1 %vm527_vm1, %v28798_v2  ;;  %v5850_v2 = vld [vmem:[#allocation3 + $0x63] sm:$0xff] }
 0x348   : > { %24083 = vmatmul.mubr.msk.f32.gmra.mrb[50].mxu0 %vm527_vm1, %v28824_v62  ;;  %v29252_v62 = vld [vmem:[#allocation3 + $0x1b1] sm:$0xff] }
 0x349   : > { %24085 = vmatprep.mubr.msk.f32.mxu0 %vm527_vm1, %v28832_v43  ;;  %v29238_v43 = vld [vmem:[#allocation3 + $0x180] sm:$0xff] }
 0x34a   : > { %23636 = vmatmul.mubr.msk.f32.gmra.mrb[52].mxu1 %vm527_vm1, %v28806_v63  ;;  %v29273_v63 = vld [vmem:[#allocation3 + $0x1b8] sm:$0xff] }
 0x34b   : > { %23638 = vmatprep.mubr.msk.f32.mxu1 %vm527_vm1, %v28814_v58  ;;  %v29268_v58 = vld [vmem:[#allocation3 + $0x1b0] sm:$0xff] }
 0x34c   : > { %24086 = vmatmul.mubr.msk.f32.gmra.mrb[52].mxu0 %vm527_vm1, %v28840_v33  ;;  %v29236_v33 = vld [vmem:[#allocation3 + $0x199] sm:$0xff] }
 0x34d   : > { %24088 = vmatprep.mubr.msk.f32.mxu0 %vm527_vm1, %v28848_v26  ;;  %v32653_v26 = vld [vmem:[#allocation80_spill] sm:$0xff] }
 0x34e   : > { %23639 = vmatmul.mubr.msk.f32.gmra.mrb[54].mxu1 %vm527_vm1, %v28822_v12  ;;  %v29262_v12 = vld [vmem:[#allocation3 + $0x1a0] sm:$0xff] }
 0x34f   : > { %23641 = vmatprep.mubr.msk.f32.mxu1 %vm527_vm1, %v28830_v55  ;;  %v29254_v55 = vld [vmem:[#allocation3 + $0x198] sm:$0xff] }
 0x350   : > { %24089 = vmatmul.mubr.msk.f32.gmra.mrb[54].mxu0 %vm527_vm1, %v28856_v10  ;;  %v32651_v10 = vld [vmem:[#allocation78_spill] sm:$0xff] }
 0x351   : > { %24091 = vmatprep.mubr.msk.f32.mxu0 %vm527_vm1, %v28862_v57  ;;  %v32650_v57 = vld [vmem:[#allocation77_spill] sm:$0xff] }
 0x352   : > { %23642 = vmatmul.mubr.msk.f32.gmra.mrb[56].mxu1 %vm527_vm1, %v28838_v46  ;;  %v29246_v46 = vld [vmem:[#allocation3 + $0x188] sm:$0xff] }
 0x353   : > { %23644 = vmatprep.mubr.msk.f32.mxu1 %vm527_vm1, %v28846_v35  ;;  %v29244_v35 = vld [vmem:[#allocation3 + $0x1a1] sm:$0xff] }
 0x354   : > { %24092 = vmatmul.mubr.msk.f32.gmra.mrb[56].mxu0 %vm527_vm1, %v28867_v16  ;;  %v32649_v16 = vld [vmem:[#allocation76_spill] sm:$0xff] }
 0x355   : > { %24094 = vmatprep.mubr.msk.f32.mxu0 %vm527_vm1, %v29238_v43 }
 0x356   : > { %23645 = vmatmul.mubr.msk.f32.gmra.mrb[58].mxu1 %vm527_vm1, %v28854_v4  ;;  %v32652_v4 = vld [vmem:[#allocation79_spill] sm:$0xff] }
 0x357   : > { %23647 = vmatprep.mubr.msk.f32.mxu1 %vm527_vm1, %v29236_v33 }
 0x358   : > { %24095 = vmatmul.mubr.msk.f32.gmra.mrb[58].mxu0 %vm527_vm1, %v29246_v46 }
 0x359   : > { %24097 = vmatprep.mubr.msk.f32.mxu0 %vm527_vm1, %v29254_v55 }
 0x35a   : > { %23648 = vmatmul.mubr.msk.f32.gmra.mrb[60].mxu1 %vm527_vm1, %v29244_v35 }
 0x35b   : > { %23650 = vmatprep.mubr.msk.f32.mxu1 %vm527_vm1, %v29252_v62 }
 0x35c   : > { %24098 = vmatmul.mubr.msk.f32.gmra.mrb[60].mxu0 %vm527_vm1, %v29262_v12 }
 0x35d   : > { %24100 = vmatprep.mubr.msk.f32.mxu0 %vm527_vm1, %v29268_v58 }
 0x35e   : > { %23651 = vmatmul.mubr.msk.f32.gmra.mrb[62].mxu1 %vm527_vm1, %v29260_v24 }
 0x35f   : > { %23655 = vmatprep.mubr.msk.f32.mxu1 %vm527_vm1, %v5848_v36 }
 0x360   : > { %24101 = vmatmul.mubr.msk.f32.gmra.mrb[62].mxu0 %vm527_vm1, %v29273_v63 }
 0x361   : > { %24105 = vmatprep.mubr.msk.f32.mxu0 %vm527_vm1, %v5848_v36  ;;  %v32669_v36 = vld [vmem:[#allocation98_spill] sm:$0xff] }
 0x362   : > { %23656 = vmatmul.mubr.msk.f32.vlgmr.msra.gmra.mrb[32].mxu1 %vm527_vm1, %v5849_v54 }
 0x363   : > { %23704 = vmatpush3.msk.msra.mxu1 %vm769_vm0, %v6268_v52  ;;  %23658 = vmatprep.mubr.msk.f32.mxu1 %vm527_vm1, %v5850_v2  ;;  %v32667_v52 = vld [vmem:[#allocation96_spill] sm:$0xff] }
 0x364   : > { %23753 = vmatprep.subr.msk.mxu1 %vm769_vm0, %v29278_v25  ;;  %24106 = vmatmul.mubr.msk.f32.vlgmr.msra.gmra.mrb[32].mxu0 %vm527_vm1, %v5849_v54  ;;  %v32670_v54 = vld [vmem:[#allocation95_spill] sm:$0xff] }
 0x365   : > { %24108 = vmatprep.mubr.msk.f32.mxu0 %vm527_vm1, %v5850_v2  ;;  %24154 = vmatpush3.msk.msra.mxu0 %vm769_vm0, %v9709_v39  ;;  %v32668_v39 = vld [vmem:[#allocation93_spill] sm:$0xff]  ;;  %v32671_v2 = vld [vmem:[#allocation100_spill] sm:$0xff] }
 0x366   : > { %23659 = vmatmul.mubr.msk.f32.gmra.mrb[34].mxu1 %vm527_vm1, %v5851_v59  ;;  %24203 = vmatprep.subr.msk.mxu0 %vm769_vm0, %v29297_v9 }
 0x367   : > { %23661 = vmatprep.mubr.msk.f32.mxu1 %vm527_vm1, %v29292_v45 }
 0x368   : > { %24109 = vmatmul.mubr.msk.f32.gmra.mrb[34].mxu0 %vm527_vm1, %v5851_v59  ;;  %v32672_v59 = vld [vmem:[#allocation97_spill] sm:$0xff] }
 0x369   : > { %24111 = vmatprep.mubr.msk.f32.mxu0 %vm527_vm1, %v29292_v45 }
 0x36a   : > { %23662 = vmatmul.mubr.msk.f32.gmra.mrb[36].mxu1 %vm527_vm1, %v29305_v47 }
 0x36b   : > { %23664 = vmatprep.mubr.msk.f32.mxu1 %vm527_vm1, %v29312_v22 }
 0x36c   : > { %24112 = vmatmul.mubr.msk.f32.gmra.mrb[36].mxu0 %vm527_vm1, %v29305_v47 }
 0x36d   : > { %24114 = vmatprep.mubr.msk.f32.mxu0 %vm527_vm1, %v29312_v22 }
 0x36e   : > { %23665 = vmatmul.mubr.msk.f32.gmra.mrb[38].mxu1 %vm527_vm1, %v29318_v0 }
 0x36f   : > { %23667 = vmatprep.mubr.msk.f32.mxu1 %vm527_vm1, %v29324_v37 }
 0x370   : > { %24115 = vmatmul.mubr.msk.f32.gmra.mrb[38].mxu0 %vm527_vm1, %v29318_v0 }
 0x371   : > { %24117 = vmatprep.mubr.msk.f32.mxu0 %vm527_vm1, %v29324_v37 }
 0x372   : > { %23668 = vmatmul.mubr.msk.f32.gmra.mrb[40].mxu1 %vm527_vm1, %v29330_v29 }
 0x373   : > { %23670 = vmatprep.mubr.msk.f32.mxu1 %vm527_vm1, %v29336_v61 }
 0x374   : > { %24118 = vmatmul.mubr.msk.f32.gmra.mrb[40].mxu0 %vm527_vm1, %v29330_v29 }
 0x375   : > { %24120 = vmatprep.mubr.msk.f32.mxu0 %vm527_vm1, %v29336_v61 }
 0x376   : > { %23671 = vmatmul.mubr.msk.f32.gmra.mrb[42].mxu1 %vm527_vm1, %v29342_v31 }
 0x377   : > { %23673 = vmatprep.mubr.msk.f32.mxu1 %vm527_vm1, %v29348_v21 }
 0x378   : > { %24121 = vmatmul.mubr.msk.f32.gmra.mrb[42].mxu0 %vm527_vm1, %v29342_v31 }
 0x379   : > { %24123 = vmatprep.mubr.msk.f32.mxu0 %vm527_vm1, %v29348_v21 }
 0x37a   : > { %23674 = vmatmul.mubr.msk.f32.gmra.mrb[44].mxu1 %vm527_vm1, %v29354_v3 }
 0x37b   : > { %23676 = vmatprep.mubr.msk.f32.mxu1 %vm527_vm1, %v29360_v34 }
 0x37c   : > { %24124 = vmatmul.mubr.msk.f32.gmra.mrb[44].mxu0 %vm527_vm1, %v29354_v3 }
 0x37d   : > { %24126 = vmatprep.mubr.msk.f32.mxu0 %vm527_vm1, %v29360_v34 }
 0x37e   : > { %23677 = vmatmul.mubr.msk.f32.gmra.mrb[46].mxu1 %vm527_vm1, %v32643_v23 }
 0x37f   : > { %23679 = vmatprep.mubr.msk.f32.mxu1 %vm527_vm1, %v32644_v53 }
 0x380   : > { %24127 = vmatmul.mubr.msk.f32.gmra.mrb[46].mxu0 %vm527_vm1, %v32643_v23  ;;  %v32673_v23 = vld [vmem:[#allocation102_spill] sm:$0xff] }
 0x381   : > { %24129 = vmatprep.mubr.msk.f32.mxu0 %vm527_vm1, %v32644_v53  ;;  %v32674_v53 = vld [vmem:[#allocation99_spill] sm:$0xff] }
 0x382   : > { %23680 = vmatmul.mubr.msk.f32.gmra.mrb[48].mxu1 %vm527_vm1, %v32645_v13 }
 0x383   : > { %23682 = vmatprep.mubr.msk.f32.mxu1 %vm527_vm1, %v32646_v1 }
 0x384   : > { %24130 = vmatmul.mubr.msk.f32.gmra.mrb[48].mxu0 %vm527_vm1, %v32645_v13  ;;  %v32675_v13 = vld [vmem:[#allocation104_spill] sm:$0xff] }
 0x385   : > { %24132 = vmatprep.mubr.msk.f32.mxu0 %vm527_vm1, %v32646_v1  ;;  %v32676_v1 = vld [vmem:[#allocation101_spill] sm:$0xff] }
 0x386   : > { %23683 = vmatmul.mubr.msk.f32.gmra.mrb[50].mxu1 %vm527_vm1, %v32647_v56 }
 0x387   : > { %23685 = vmatprep.mubr.msk.f32.mxu1 %vm527_vm1, %v32648_v20 }
 0x388   : > { %24133 = vmatmul.mubr.msk.f32.gmra.mrb[50].mxu0 %vm527_vm1, %v32647_v56  ;;  %v32677_v56 = vld [vmem:[#allocation106_spill] sm:$0xff] }
 0x389   : > { %24135 = vmatprep.mubr.msk.f32.mxu0 %vm527_vm1, %v32648_v20  ;;  %v32678_v20 = vld [vmem:[#allocation103_spill] sm:$0xff] }
 0x38a   : > { %23686 = vmatmul.mubr.msk.f32.gmra.mrb[52].mxu1 %vm527_vm1, %v32649_v16 }
 0x38b   : > { %23688 = vmatprep.mubr.msk.f32.mxu1 %vm527_vm1, %v32650_v57 }
 0x38c   : > { %24136 = vmatmul.mubr.msk.f32.gmra.mrb[52].mxu0 %vm527_vm1, %v32649_v16  ;;  %v32679_v16 = vld [vmem:[#allocation108_spill] sm:$0xff] }
 0x38d   : > { %24138 = vmatprep.mubr.msk.f32.mxu0 %vm527_vm1, %v32650_v57  ;;  %v32680_v57 = vld [vmem:[#allocation105_spill] sm:$0xff] }
 0x38e   : > { %23689 = vmatmul.mubr.msk.f32.gmra.mrb[54].mxu1 %vm527_vm1, %v32651_v10 }
 0x38f   : > { %23691 = vmatprep.mubr.msk.f32.mxu1 %vm527_vm1, %v32652_v4 }
 0x390   : > { %24139 = vmatmul.mubr.msk.f32.gmra.mrb[54].mxu0 %vm527_vm1, %v32651_v10  ;;  %v32681_v10 = vld [vmem:[#allocation110_spill] sm:$0xff] }
 0x391   : > { %24141 = vmatprep.mubr.msk.f32.mxu0 %vm527_vm1, %v32652_v4  ;;  %v32682_v4 = vld [vmem:[#allocation107_spill] sm:$0xff] }
 0x392   : > { %23692 = vmatmul.mubr.msk.f32.gmra.mrb[56].mxu1 %vm527_vm1, %v32653_v26 }
 0x393   : > { %23694 = vmatprep.mubr.msk.f32.mxu1 %vm527_vm1, %v32654_v28 }
 0x394   : > { %24142 = vmatmul.mubr.msk.f32.gmra.mrb[56].mxu0 %vm527_vm1, %v32653_v26  ;;  %v32683_v26 = vld [vmem:[#allocation112_spill] sm:$0xff] }
 0x395   : > { %24144 = vmatprep.mubr.msk.f32.mxu0 %vm527_vm1, %v32654_v28  ;;  %v32684_v28 = vld [vmem:[#allocation109_spill] sm:$0xff] }
 0x396   : > { %23695 = vmatmul.mubr.msk.f32.gmra.mrb[58].mxu1 %vm527_vm1, %v32655_v6 }
 0x397   : > { %23697 = vmatprep.mubr.msk.f32.mxu1 %vm527_vm1, %v29418_v41 }
 0x398   : > { %24145 = vmatmul.mubr.msk.f32.gmra.mrb[58].mxu0 %vm527_vm1, %v32655_v6  ;;  %v32685_v6 = vld [vmem:[#allocation114_spill] sm:$0xff] }
 0x399   : > { %24147 = vmatprep.mubr.msk.f32.mxu0 %vm527_vm1, %v29418_v41 }
 0x39a   : > { %23698 = vmatmul.mubr.msk.f32.gmra.mrb[60].mxu1 %vm527_vm1, %v29424_v50 }
 0x39b   : > { %23700 = vmatprep.mubr.msk.f32.mxu1 %vm527_vm1, %v29430_v15 }
 0x39c   : > { %24148 = vmatmul.mubr.msk.f32.gmra.mrb[60].mxu0 %vm527_vm1, %v29424_v50 }
 0x39d   : > { %24150 = vmatprep.mubr.msk.f32.mxu0 %vm527_vm1, %v29430_v15 }
 0x39e   : > { %23701 = vmatmul.mubr.msk.f32.gmra.mrb[62].mxu1 %vm527_vm1, %v29436_v51 }
 0x39f   : > { %23705 = vmatprep.mubr.msk.f32.mxu1 %vm527_vm1, %v28886_v14  ;;  %v32664_v14 = vld [vmem:[#allocation89_spill] sm:$0xff] }
 0x3a0   : > { %24151 = vmatmul.mubr.msk.f32.gmra.mrb[62].mxu0 %vm527_vm1, %v29436_v51 }
 0x3a1   : > { %24155 = vmatprep.mubr.msk.f32.mxu0 %vm527_vm1, %v32657_v32  ;;  %v32687_v32 = vld [vmem:[#allocation116_spill] sm:$0xff] }
 0x3a2   : > { %23706 = vmatmul.mubr.msk.f32.vlgmr.msra.gmra.mrb[32].mxu1 %vm527_vm1, %v32656_v30  ;;  %v32686_v30 = vld [vmem:[#allocation111_spill] sm:$0xff] }
 0x3a3   : > { %23754 = vmatpush3.msk.msra.mxu1 %vm769_vm0, %v29278_v25  ;;  %23708 = vmatprep.mubr.msk.f32.mxu1 %vm527_vm1, %v28906_v19  ;;  %v32666_v19 = vld [vmem:[#allocation91_spill] sm:$0xff]  ;;  %v29625_v25 = vld [vmem:[%s32162_s5 + $0x20] sm:$0xf] }
 0x3a4   : > { %23803 = vmatprep.subr.msk.mxu1 %vm769_vm0, %v7045_v27  ;;  %24156 = vmatmul.mubr.msk.f32.vlgmr.msra.gmra.mrb[32].mxu0 %vm527_vm1, %v32659_v11  ;;  %v32689_v11 = vld [vmem:[#allocation118_spill] sm:$0xff] }
 0x3a5   : > { %24158 = vmatprep.mubr.msk.f32.mxu0 %vm527_vm1, %v32661_v44  ;;  %24204 = vmatpush3.msk.msra.mxu0 %vm769_vm0, %v29297_v9  ;;  %v32691_v44 = vld [vmem:[#allocation120_spill] sm:$0xff] }
 0x3a6   : > { %23709 = vmatmul.mubr.msk.f32.gmra.mrb[34].mxu1 %vm527_vm1, %v32658_v38  ;;  %24253 = vmatprep.subr.msk.mxu0 %vm769_vm0, %v10486_v17  ;;  %v32688_v38 = vld [vmem:[#allocation113_spill] sm:$0xff]  ;;  %v6633_v9 = vld [vmem:[#allocation3 + $0xd9] sm:$0xff] }
 0x3a7   : > { %23711 = vmatprep.mubr.msk.f32.mxu1 %vm527_vm1, %v32660_v40  ;;  %v32690_v40 = vld [vmem:[#allocation115_spill] sm:$0xff] }
 0x3a8   : > { %24159 = vmatmul.mubr.msk.f32.gmra.mrb[34].mxu0 %vm527_vm1, %v32663_v18  ;;  %v32693_v18 = vld [vmem:[#allocation122_spill] sm:$0xff] }
 0x3a9   : > { %24161 = vmatprep.mubr.msk.f32.mxu0 %vm527_vm1, %v32665_v48  ;;  %v32695_v48 = vld [vmem:[#allocation124_spill] sm:$0xff] }
 0x3aa   : > { %23712 = vmatmul.mubr.msk.f32.gmra.mrb[36].mxu1 %vm527_vm1, %v32662_v60  ;;  %v32692_v60 = vld [vmem:[#allocation117_spill] sm:$0xff] }
 0x3ab   : > { %23714 = vmatprep.mubr.msk.f32.mxu1 %vm527_vm1, %v32664_v14  ;;  %v32694_v14 = vld [vmem:[#allocation119_spill] sm:$0xff] }
 0x3ac   : > { %24162 = vmatmul.mubr.msk.f32.gmra.mrb[36].mxu0 %vm527_vm1, %v32667_v52  ;;  %v32697_v52 = vld [vmem:[#allocation126_spill] sm:$0xff] }
 0x3ad   : > { %24164 = vmatprep.mubr.msk.f32.mxu0 %vm527_vm1, %v32669_v36  ;;  %v32699_v36 = vld [vmem:[#allocation125_spill] sm:$0xff] }
 0x3ae   : > { %23715 = vmatmul.mubr.msk.f32.gmra.mrb[38].mxu1 %vm527_vm1, %v32666_v19  ;;  %v32696_v19 = vld [vmem:[#allocation121_spill] sm:$0xff] }
 0x3af   : > { %23717 = vmatprep.mubr.msk.f32.mxu1 %vm527_vm1, %v32668_v39  ;;  %v32698_v39 = vld [vmem:[#allocation123_spill] sm:$0xff] }
 0x3b0   : > { %24165 = vmatmul.mubr.msk.f32.gmra.mrb[38].mxu0 %vm527_vm1, %v32671_v2  ;;  %v32701_v2 = vld [vmem:[#allocation127_spill] sm:$0xff] }
 0x3b1   : > { %24167 = vmatprep.mubr.msk.f32.mxu0 %vm527_vm1, %v32673_v23  ;;  %v29568_v23 = vld [vmem:[#allocation3 + $0x186] sm:$0xff] }
 0x3b2   : > { %23718 = vmatmul.mubr.msk.f32.gmra.mrb[40].mxu1 %vm527_vm1, %v32670_v54  ;;  %v32700_v54 = vld [vmem:[#allocation129_spill] sm:$0xff] }
 0x3b3   : > { %23720 = vmatprep.mubr.msk.f32.mxu1 %vm527_vm1, %v32672_v59  ;;  %v32702_v59 = vld [vmem:[#allocation128_spill] sm:$0xff] }
 0x3b4   : > { %24168 = vmatmul.mubr.msk.f32.gmra.mrb[40].mxu0 %vm527_vm1, %v32675_v13  ;;  %v29592_v13 = vld [vmem:[#allocation3 + $0x1a6] sm:$0xff] }
 0x3b5   : > { %24170 = vmatprep.mubr.msk.f32.mxu0 %vm527_vm1, %v32677_v56  ;;  %v29598_v56 = vld [vmem:[#allocation3 + $0x1b6] sm:$0xff] }
 0x3b6   : > { %23721 = vmatmul.mubr.msk.f32.gmra.mrb[42].mxu1 %vm527_vm1, %v32674_v53  ;;  %v29576_v53 = vld [vmem:[#allocation3 + $0x18e] sm:$0xff] }
 0x3b7   : > { %23723 = vmatprep.mubr.msk.f32.mxu1 %vm527_vm1, %v32676_v1  ;;  %v6625_v1 = vld [vmem:[#allocation3 + $0x79] sm:$0xff] }
 0x3b8   : > { %24171 = vmatmul.mubr.msk.f32.gmra.mrb[42].mxu0 %vm527_vm1, %v32679_v16  ;;  %v29603_v16 = vld [vmem:[#allocation3 + $0x1be] sm:$0xff] }
 0x3b9   : > { %24173 = vmatprep.mubr.msk.f32.mxu0 %vm527_vm1, %v32681_v10  ;;  %v6627_v10 = vld [vmem:[#allocation3 + $0x91] sm:$0xff] }
 0x3ba   : > { %23724 = vmatmul.mubr.msk.f32.gmra.mrb[44].mxu1 %vm527_vm1, %v32678_v20  ;;  %v6626_v20 = vld [vmem:[#allocation3 + $0x81] sm:$0xff] }
 0x3bb   : > { %23726 = vmatprep.mubr.msk.f32.mxu1 %vm527_vm1, %v32680_v57  ;;  %v29608_v57 = vld [vmem:[%s32160_s3 + $0x20] sm:$0xf] }
 0x3bc   : > { %24174 = vmatmul.mubr.msk.f32.gmra.mrb[44].mxu0 %vm527_vm1, %v32683_v26  ;;  %v6628_v26 = vld [vmem:[#allocation3 + $0x99] sm:$0xff] }
 0x3bd   : > { %24176 = vmatprep.mubr.msk.f32.mxu0 %vm527_vm1, %v32685_v6  ;;  %v6629_v6 = vld [vmem:[#allocation3 + $0xa9] sm:$0xff] }
 0x3be   : > { %23727 = vmatmul.mubr.msk.f32.gmra.mrb[46].mxu1 %vm527_vm1, %v32682_v4  ;;  %v10066_v4 = vld [vmem:[#allocation3 + $0x90] sm:$0xff] }
 0x3bf   : > { %23729 = vmatprep.mubr.msk.f32.mxu1 %vm527_vm1, %v32684_v28  ;;  %v10067_v28 = vld [vmem:[#allocation3 + $0x98] sm:$0xff] }
 0x3c0   : > { %24177 = vmatmul.mubr.msk.f32.gmra.mrb[46].mxu0 %vm527_vm1, %v32687_v32  ;;  %v10069_v32 = vld [vmem:[#allocation3 + $0xb0] sm:$0xff] }
 0x3c1   : > { %24179 = vmatprep.mubr.msk.f32.mxu0 %vm527_vm1, %v32689_v11  ;;  %v10070_v11 = vld [vmem:[#allocation3 + $0xc0] sm:$0xff] }
 0x3c2   : > { %23730 = vmatmul.mubr.msk.f32.gmra.mrb[48].mxu1 %vm527_vm1, %v32686_v30  ;;  %v10068_v30 = vld [vmem:[#allocation3 + $0xa8] sm:$0xff] }
 0x3c3   : > { %23732 = vmatprep.mubr.msk.f32.mxu1 %vm527_vm1, %v32688_v38  ;;  %v6631_v38 = vld [vmem:[#allocation3 + $0xc1] sm:$0xff] }
 0x3c4   : > { %24180 = vmatmul.mubr.msk.f32.gmra.mrb[48].mxu0 %vm527_vm1, %v32691_v44  ;;  %v10071_v44 = vld [vmem:[#allocation3 + $0xc8] sm:$0xff] }
 0x3c5   : > { %24182 = vmatprep.mubr.msk.f32.mxu0 %vm527_vm1, %v32693_v18  ;;  %v10073_v18 = vld [vmem:[#allocation3 + $0xe0] sm:$0xff] }
 0x3c6   : > { %23733 = vmatmul.mubr.msk.f32.gmra.mrb[50].mxu1 %vm527_vm1, %v32690_v40  ;;  %v6632_v40 = vld [vmem:[#allocation3 + $0xc9] sm:$0xff] }
 0x3c7   : > { %23735 = vmatprep.mubr.msk.f32.mxu1 %vm527_vm1, %v32692_v60  ;;  %v6634_v60 = vld [vmem:[#allocation3 + $0xe1] sm:$0xff] }
 0x3c8   : > { %24183 = vmatmul.mubr.msk.f32.gmra.mrb[50].mxu0 %vm527_vm1, %v32695_v48  ;;  %v10074_v48 = vld [vmem:[#allocation3 + $0xf0] sm:$0xff] }
 0x3c9   : > { %24185 = vmatprep.mubr.msk.f32.mxu0 %vm527_vm1, %v32697_v52  ;;  %v10075_v52 = vld [vmem:[#allocation3 + $0xf8] sm:$0xff] }
 0x3ca   : > { %23736 = vmatmul.mubr.msk.f32.gmra.mrb[52].mxu1 %vm527_vm1, %v32694_v14  ;;  %v6635_v14 = vld [vmem:[#allocation3 + $0xf1] sm:$0xff] }
 0x3cb   : > { %23738 = vmatprep.mubr.msk.f32.mxu1 %vm527_vm1, %v32696_v19  ;;  %v6636_v19 = vld [vmem:[#allocation3 + $0xf9] sm:$0xff] }
 0x3cc   : > { %24186 = vmatmul.mubr.msk.f32.gmra.mrb[52].mxu0 %vm527_vm1, %v29086_v49  ;;  %v29566_v49 = vld [vmem:[#allocation3 + $0x19d] sm:$0xff] }
 0x3cd   : > { %24188 = vmatprep.mubr.msk.f32.mxu0 %vm527_vm1, %v32700_v54  ;;  %v6638_v54 = vld [vmem:[#allocation3 + $0x111] sm:$0xff] }
 0x3ce   : > { %23739 = vmatmul.mubr.msk.f32.gmra.mrb[54].mxu1 %vm527_vm1, %v32698_v39  ;;  %v6637_v39 = vld [vmem:[#allocation3 + $0x109] sm:$0xff] }
 0x3cf   : > { %23741 = vmatprep.mubr.msk.f32.mxu1 %vm527_vm1, %v32699_v36  ;;  %v10076_v36 = vld [vmem:[#allocation3 + $0x108] sm:$0xff] }
 0x3d0   : > { %24189 = vmatmul.mubr.msk.f32.gmra.mrb[54].mxu0 %vm527_vm1, %v29102_v5  ;;  %v29574_v5 = vld [vmem:[#allocation3 + $0x1a5] sm:$0xff] }
 0x3d1   : > { %24191 = vmatprep.mubr.msk.f32.mxu0 %vm527_vm1, %v29108_v7  ;;  %v29582_v7 = vld [vmem:[#allocation3 + $0x1b5] sm:$0xff] }
 0x3d2   : > { %23742 = vmatmul.mubr.msk.f32.gmra.mrb[56].mxu1 %vm527_vm1, %v32701_v2  ;;  %v10077_v2 = vld [vmem:[#allocation3 + $0x110] sm:$0xff] }
 0x3d3   : > { %23744 = vmatprep.mubr.msk.f32.mxu1 %vm527_vm1, %v32702_v59  ;;  %v6639_v59 = vld [vmem:[#allocation3 + $0x121] sm:$0xff] }
 0x3d4   : > { %24192 = vmatmul.mubr.msk.f32.gmra.mrb[56].mxu0 %vm527_vm1, %v29115_v8  ;;  %v29584_v8 = vld [vmem:[#allocation3 + $0x19e] sm:$0xff] }
 0x3d5   : > { %24194 = vmatprep.mubr.msk.f32.mxu0 %vm527_vm1, %v29568_v23 }
 0x3d6   : > { %23745 = vmatmul.mubr.msk.f32.gmra.mrb[58].mxu1 %vm527_vm1, %v29100_v42  ;;  %v29590_v42 = vld [vmem:[#allocation3 + $0x1bd] sm:$0xff] }
 0x3d7   : > { %23747 = vmatprep.mubr.msk.f32.mxu1 %vm527_vm1, %v29566_v49 }
 0x3d8   : > { %24195 = vmatmul.mubr.msk.f32.gmra.mrb[58].mxu0 %vm527_vm1, %v29576_v53 }
 0x3d9   : > { %24197 = vmatprep.mubr.msk.f32.mxu0 %vm527_vm1, %v29584_v8 }
 0x3da   : > { %23748 = vmatmul.mubr.msk.f32.gmra.mrb[60].mxu1 %vm527_vm1, %v29574_v5 }
 0x3db   : > { %23750 = vmatprep.mubr.msk.f32.mxu1 %vm527_vm1, %v29582_v7 }
 0x3dc   : > { %24198 = vmatmul.mubr.msk.f32.gmra.mrb[60].mxu0 %vm527_vm1, %v29592_v13 }
 0x3dd   : > { %24200 = vmatprep.mubr.msk.f32.mxu0 %vm527_vm1, %v29598_v56 }
 0x3de   : > { %23751 = vmatmul.mubr.msk.f32.gmra.mrb[62].mxu1 %vm527_vm1, %v29590_v42 }
 0x3df   : > { %23755 = vmatprep.mubr.msk.f32.mxu1 %vm527_vm1, %v6625_v1  ;;  %v10078_v1 = vld [vmem:[#allocation3 + $0x120] sm:$0xff] }
 0x3e0   : > { %24201 = vmatmul.mubr.msk.f32.gmra.mrb[62].mxu0 %vm527_vm1, %v29603_v16 }
 0x3e1   : > { %24205 = vmatprep.mubr.msk.f32.mxu0 %vm527_vm1, %v10066_v4  ;;  %v6641_v4 = vld [vmem:[#allocation3 + $0x139] sm:$0xff] }
 0x3e2   : > { %23756 = vmatmul.mubr.msk.f32.vlgmr.msra.gmra.mrb[32].mxu1 %vm527_vm1, %v6626_v20  ;;  %v6640_v20 = vld [vmem:[#allocation3 + $0x129] sm:$0xff] }
 0x3e3   : > { %23804 = vmatpush3.msk.msra.mxu1 %vm769_vm0, %v7045_v27  ;;  %23758 = vmatprep.mubr.msk.f32.mxu1 %vm527_vm1, %v6627_v10  ;;  %v6630_v27 = vld [vmem:[#allocation3 + $0xb1] sm:$0xff]  ;;  %v10079_v10 = vld [vmem:[#allocation3 + $0x128] sm:$0xff] }
 0x3e4   : > { %23853 = vmatprep.subr.msk.mxu1 %vm769_vm0, %v29608_v57  ;;  %24206 = vmatmul.mubr.msk.f32.vlgmr.msra.gmra.mrb[32].mxu0 %vm527_vm1, %v10067_v28  ;;  %v6642_v28 = vld [vmem:[#allocation3 + $0x141] sm:$0xff] }
 0x3e5   : > { %24208 = vmatprep.mubr.msk.f32.mxu0 %vm527_vm1, %v10068_v30  ;;  %24254 = vmatpush3.msk.msra.mxu0 %vm769_vm0, %v10486_v17  ;;  %v10072_v17 = vld [vmem:[#allocation3 + $0xd8] sm:$0xff] }
 0x3e6   : > { %23759 = vmatmul.mubr.msk.f32.gmra.mrb[34].mxu1 %vm527_vm1, %v6628_v26  ;;  %24303 = vmatprep.subr.msk.mxu0 %vm769_vm0, %v29625_v25  ;;  %v10080_v26 = vld [vmem:[#allocation3 + $0x138] sm:$0xff] }
 0x3e7   : > { %23761 = vmatprep.mubr.msk.f32.mxu1 %vm527_vm1, %v6629_v6  ;;  %v10081_v6 = vld [vmem:[#allocation3 + $0x140] sm:$0xff]  ;;  %v6643_v30 = vld [vmem:[#allocation3 + $0x151] sm:$0xff] }
 0x3e8   : > { %24209 = vmatmul.mubr.msk.f32.gmra.mrb[34].mxu0 %vm527_vm1, %v10069_v32  ;;  %v6644_v32 = vld [vmem:[#allocation3 + $0x159] sm:$0xff] }
 0x3e9   : > { %24211 = vmatprep.mubr.msk.f32.mxu0 %vm527_vm1, %v10070_v11  ;;  %v6645_v11 = vld [vmem:[#allocation3 + $0x169] sm:$0xff] }
 0x3ea   : > { %23762 = vmatmul.mubr.msk.f32.gmra.mrb[36].mxu1 %vm527_vm1, %v6630_v27  ;;  %v10082_v27 = vld [vmem:[#allocation3 + $0x150] sm:$0xff] }
 0x3eb   : > { %23764 = vmatprep.mubr.msk.f32.mxu1 %vm527_vm1, %v6631_v38  ;;  %v10083_v38 = vld [vmem:[#allocation3 + $0x158] sm:$0xff] }
 0x3ec   : > { %24212 = vmatmul.mubr.msk.f32.gmra.mrb[36].mxu0 %vm527_vm1, %v10071_v44  ;;  %v6646_v44 = vld [vmem:[#allocation3 + $0x171] sm:$0xff] }
 0x3ed   : > { %24214 = vmatprep.mubr.msk.f32.mxu0 %vm527_vm1, %v10072_v17  ;;  %v6647_v17 = vld [vmem:[#allocation3 + $0x181] sm:$0xff] }
 0x3ee   : > { %23765 = vmatmul.mubr.msk.f32.gmra.mrb[38].mxu1 %vm527_vm1, %v6632_v40  ;;  %v10084_v40 = vld [vmem:[#allocation3 + $0x168] sm:$0xff] }
 0x3ef   : > { %23767 = vmatprep.mubr.msk.f32.mxu1 %vm527_vm1, %v6633_v9  ;;  %v10085_v9 = vld [vmem:[#allocation3 + $0x170] sm:$0xff] }
 0x3f0   : > { %24215 = vmatmul.mubr.msk.f32.gmra.mrb[38].mxu0 %vm527_vm1, %v10073_v18  ;;  %v29707_v18 = vld [vmem:[%s32165_s8] sm:$0x3] }
 0x3f1   : > { %24217 = vmatprep.mubr.msk.f32.mxu0 %vm527_vm1, %v10074_v48  ;;  %v10484_v48 = vld [vmem:[#allocation3 + $0x1fb] sm:$0xff] }
 0x3f2   : > { %23768 = vmatmul.mubr.msk.f32.gmra.mrb[40].mxu1 %vm527_vm1, %v6634_v60  ;;  %v6648_v60 = vld [vmem:[#allocation3 + $0x189] sm:$0xff] }
 0x3f3   : > { %23770 = vmatprep.mubr.msk.f32.mxu1 %vm527_vm1, %v6635_v14  ;;  %v7041_v14 = vld [vmem:[#allocation3 + $0x1cb] sm:$0xff] }
 0x3f4   : > { %24218 = vmatmul.mubr.msk.f32.gmra.mrb[40].mxu0 %vm527_vm1, %v10075_v52  ;;  %v10485_v52 = vld [vmem:[#allocation3 + $0x203] sm:$0xff] }
 0x3f5   : > { %24220 = vmatprep.mubr.msk.f32.mxu0 %vm527_vm1, %v10076_v36  ;;  %v10842_v36 = vld [vmem:[#allocation3 + $0x96] sm:$0xff] }
 0x3f6   : > { %23771 = vmatmul.mubr.msk.f32.gmra.mrb[42].mxu1 %vm527_vm1, %v6636_v19  ;;  %v7402_v19 = vld [vmem:[#allocation3 + $0x85] sm:$0xff] }
 0x3f7   : > { %23773 = vmatprep.mubr.msk.f32.mxu1 %vm527_vm1, %v6637_v39  ;;  %v7403_v39 = vld [vmem:[#allocation3 + $0x95] sm:$0xff] }
 0x3f8   : > { %24221 = vmatmul.mubr.msk.f32.gmra.mrb[42].mxu0 %vm527_vm1, %v10077_v2  ;;  %v10843_v2 = vld [vmem:[#allocation3 + $0x9e] sm:$0xff] }
 0x3f9   : > { %24223 = vmatprep.mubr.msk.f32.mxu0 %vm527_vm1, %v10078_v1  ;;  %v10844_v1 = vld [vmem:[#allocation3 + $0xae] sm:$0xff] }
 0x3fa   : > { %23774 = vmatmul.mubr.msk.f32.gmra.mrb[44].mxu1 %vm527_vm1, %v6638_v54  ;;  %v7404_v54 = vld [vmem:[#allocation3 + $0x9d] sm:$0xff] }
 0x3fb   : > { %23776 = vmatprep.mubr.msk.f32.mxu1 %vm527_vm1, %v6639_v59  ;;  %v7405_v59 = vld [vmem:[#allocation3 + $0xad] sm:$0xff] }
 0x3fc   : > { %24224 = vmatmul.mubr.msk.f32.gmra.mrb[44].mxu0 %vm527_vm1, %v10079_v10  ;;  %v10845_v10 = vld [vmem:[#allocation3 + $0xb6] sm:$0xff] }
 0x3fd   : > { %24226 = vmatprep.mubr.msk.f32.mxu0 %vm527_vm1, %v10080_v26  ;;  %v10846_v26 = vld [vmem:[#allocation3 + $0xc6] sm:$0xff] }
 0x3fe   : > { %23777 = vmatmul.mubr.msk.f32.gmra.mrb[46].mxu1 %vm527_vm1, %v6640_v20  ;;  %v7406_v20 = vld [vmem:[#allocation3 + $0xb5] sm:$0xff] }
 0x3ff   : > { %23779 = vmatprep.mubr.msk.f32.mxu1 %vm527_vm1, %v6641_v4  ;;  %v7407_v4 = vld [vmem:[#allocation3 + $0xc5] sm:$0xff] }
 0x400   : > { %24227 = vmatmul.mubr.msk.f32.gmra.mrb[46].mxu0 %vm527_vm1, %v10081_v6  ;;  %v10847_v6 = vld [vmem:[#allocation3 + $0xce] sm:$0xff] }
 0x401   : > { %24229 = vmatprep.mubr.msk.f32.mxu0 %vm527_vm1, %v10082_v27  ;;  %v10848_v27 = vld [vmem:[#allocation3 + $0xde] sm:$0xff] }
 0x402   : > { %23780 = vmatmul.mubr.msk.f32.gmra.mrb[48].mxu1 %vm527_vm1, %v6642_v28  ;;  %v7408_v28 = vld [vmem:[#allocation3 + $0xcd] sm:$0xff] }
 0x403   : > { %23782 = vmatprep.mubr.msk.f32.mxu1 %vm527_vm1, %v6643_v30  ;;  %v7409_v30 = vld [vmem:[#allocation3 + $0xdd] sm:$0xff] }
 0x404   : > { %24230 = vmatmul.mubr.msk.f32.gmra.mrb[48].mxu0 %vm527_vm1, %v10083_v38  ;;  %v10849_v38 = vld [vmem:[#allocation3 + $0xe6] sm:$0xff] }
 0x405   : > { %24232 = vmatprep.mubr.msk.f32.mxu0 %vm527_vm1, %v10084_v40  ;;  %v10850_v40 = vld [vmem:[#allocation3 + $0xf6] sm:$0xff] }
 0x406   : > { %23783 = vmatmul.mubr.msk.f32.gmra.mrb[50].mxu1 %vm527_vm1, %v6644_v32  ;;  %v7410_v32 = vld [vmem:[#allocation3 + $0xe5] sm:$0xff] }
 0x407   : > { %23785 = vmatprep.mubr.msk.f32.mxu1 %vm527_vm1, %v6645_v11  ;;  %v7411_v11 = vld [vmem:[#allocation3 + $0xf5] sm:$0xff] }
 0x408   : > { %24233 = vmatmul.mubr.msk.f32.gmra.mrb[50].mxu0 %vm527_vm1, %v10085_v9  ;;  %v10851_v9 = vld [vmem:[#allocation3 + $0xfe] sm:$0xff] }
 0x409   : > { %24235 = vmatprep.mubr.msk.f32.mxu0 %vm527_vm1, %v29238_v43  ;;  %v10092_v43 = vld [vmem:[#allocation3 + $0x1c8] sm:$0xff] }
 0x40a   : > { %23786 = vmatmul.mubr.msk.f32.gmra.mrb[52].mxu1 %vm527_vm1, %v6646_v44  ;;  %v7412_v44 = vld [vmem:[#allocation3 + $0xfd] sm:$0xff] }
 0x40b   : > { %23788 = vmatprep.mubr.msk.f32.mxu1 %vm527_vm1, %v6647_v17  ;;  %v7413_v17 = vld [vmem:[#allocation3 + $0x10d] sm:$0xff] }
 0x40c   : > { %24236 = vmatmul.mubr.msk.f32.gmra.mrb[52].mxu0 %vm527_vm1, %v29246_v46  ;;  %v10093_v46 = vld [vmem:[#allocation3 + $0x1d0] sm:$0xff] }
 0x40d   : > { %24238 = vmatprep.mubr.msk.f32.mxu0 %vm527_vm1, %v29254_v55  ;;  %v10094_v55 = vld [vmem:[#allocation3 + $0x1e0] sm:$0xff] }
 0x40e   : > { %23789 = vmatmul.mubr.msk.f32.gmra.mrb[54].mxu1 %vm527_vm1, %v6648_v60  ;;  %v10852_v60 = vld [vmem:[#allocation3 + $0x10e] sm:$0xff] }
 0x40f   : > { %23791 = vmatprep.mubr.msk.f32.mxu1 %vm527_vm1, %v29236_v33  ;;  %v6653_v33 = vld [vmem:[#allocation3 + $0x1c9] sm:$0xff] }
 0x410   : > { %24239 = vmatmul.mubr.msk.f32.gmra.mrb[54].mxu0 %vm527_vm1, %v29262_v12  ;;  %v10095_v12 = vld [vmem:[#allocation3 + $0x1e8] sm:$0xff] }
 0x411   : > { %24241 = vmatprep.mubr.msk.f32.mxu0 %vm527_vm1, %v29268_v58  ;;  %v10096_v58 = vld [vmem:[#allocation3 + $0x1f8] sm:$0xff] }
 0x412   : > { %23792 = vmatmul.mubr.msk.f32.gmra.mrb[56].mxu1 %vm527_vm1, %v29244_v35  ;;  %v6654_v35 = vld [vmem:[#allocation3 + $0x1d1] sm:$0xff] }
 0x413   : > { %23794 = vmatprep.mubr.msk.f32.mxu1 %vm527_vm1, %v29252_v62  ;;  %v6655_v62 = vld [vmem:[#allocation3 + $0x1e1] sm:$0xff] }
 0x414   : > { %24242 = vmatmul.mubr.msk.f32.gmra.mrb[56].mxu0 %vm527_vm1, %v29273_v63  ;;  %v10097_v63 = vld [vmem:[#allocation3 + $0x200] sm:$0xff] }
 0x415   : > { %24244 = vmatprep.mubr.msk.f32.mxu0 %vm527_vm1, %v10092_v43  ;;  %v10853_v43 = vld [vmem:[#allocation3 + $0x116] sm:$0xff] }
 0x416   : > { %23795 = vmatmul.mubr.msk.f32.gmra.mrb[58].mxu1 %vm527_vm1, %v29260_v24  ;;  %v6656_v24 = vld [vmem:[#allocation3 + $0x1e9] sm:$0xff] }
 0x417   : > { %23797 = vmatprep.mubr.msk.f32.mxu1 %vm527_vm1, %v6653_v33  ;;  %v7414_v33 = vld [vmem:[#allocation3 + $0x115] sm:$0xff] }
 0x418   : > { %24245 = vmatmul.mubr.msk.f32.gmra.mrb[58].mxu0 %vm527_vm1, %v10093_v46  ;;  %v10854_v46 = vld [vmem:[#allocation3 + $0x126] sm:$0xff] }
 0x419   : > { %24247 = vmatprep.mubr.msk.f32.mxu0 %vm527_vm1, %v10094_v55  ;;  %v10855_v55 = vld [vmem:[#allocation3 + $0x12e] sm:$0xff] }
 0x41a   : > { %23798 = vmatmul.mubr.msk.f32.gmra.mrb[60].mxu1 %vm527_vm1, %v6654_v35  ;;  %v7415_v35 = vld [vmem:[#allocation3 + $0x125] sm:$0xff] }
 0x41b   : > { %23800 = vmatprep.mubr.msk.f32.mxu1 %vm527_vm1, %v6655_v62  ;;  %v7416_v62 = vld [vmem:[#allocation3 + $0x12d] sm:$0xff] }
 0x41c   : > { %24248 = vmatmul.mubr.msk.f32.gmra.mrb[60].mxu0 %vm527_vm1, %v10095_v12  ;;  %v10856_v12 = vld [vmem:[#allocation3 + $0x13e] sm:$0xff] }
 0x41d   : > { %24250 = vmatprep.mubr.msk.f32.mxu0 %vm527_vm1, %v10096_v58  ;;  %v7418_v58 = vld [vmem:[#allocation3 + $0x145] sm:$0xff] }
 0x41e   : > { %23801 = vmatmul.mubr.msk.f32.gmra.mrb[62].mxu1 %vm527_vm1, %v6656_v24  ;;  %v7417_v24 = vld [vmem:[#allocation3 + $0x13d] sm:$0xff] }
 0x41f   : > { %23805 = vmatprep.mubr.msk.f32.mxu1 %vm527_vm1, %v29292_v45  ;;  %v7024_v45 = vld [vmem:[#allocation3 + $0xfb] sm:$0xff] }
 0x420   : > { %24251 = vmatmul.mubr.msk.f32.gmra.mrb[62].mxu0 %vm527_vm1, %v10097_v63  ;;  %v10857_v63 = vld [vmem:[#allocation3 + $0x146] sm:$0xff] }
 0x421   : > { %24255 = vmatprep.mubr.msk.f32.mxu0 %vm527_vm1, %v29312_v22 }
 0x422   : > { %23806 = vmatmul.mubr.msk.f32.vlgmr.msra.gmra.mrb[32].mxu1 %vm527_vm1, %v29305_v47  ;;  %v7025_v47 = vld [vmem:[#allocation3 + $0x10b] sm:$0xff] }
 0x423   : > { %23854 = vmatpush3.msk.msra.mxu1 %vm769_vm0, %v29608_v57  ;;  %23808 = vmatprep.mubr.msk.f32.mxu1 %vm527_vm1, %v29312_v22  ;;  %v7026_v22 = vld [vmem:[#allocation3 + $0x113] sm:$0xff]  ;;  %v7035_v57 = vld [vmem:[#allocation3 + $0x183] sm:$0xff] }
 0x424   : > { %24353 = vmatprep.subr.msk.mxu1 %vm11464_vm4, %v29707_v18  ;;  %24256 = vmatmul.mubr.msk.f32.vlgmr.msra.gmra.mrb[32].mxu0 %vm527_vm1, %v29318_v0 }
 0x425   : > { %24258 = vmatprep.mubr.msk.f32.mxu0 %vm527_vm1, %v29324_v37  ;;  %24304 = vmatpush3.msk.msra.mxu0 %vm769_vm0, %v29625_v25  ;;  %v7036_v25 = vld [vmem:[#allocation3 + $0x18b] sm:$0xff] }
 0x426   : > { %23809 = vmatmul.mubr.msk.f32.gmra.mrb[34].mxu1 %vm527_vm1, %v29318_v0  ;;  %v7027_v0 = vld [vmem:[#allocation3 + $0x123] sm:$0xff] }
 0x427   : > { %23811 = vmatprep.mubr.msk.f32.mxu1 %vm527_vm1, %v29324_v37  ;;  %v7028_v37 = vld [vmem:[#allocation3 + $0x12b] sm:$0xff] }
 0x428   : > { %24259 = vmatmul.mubr.msk.f32.gmra.mrb[34].mxu0 %vm527_vm1, %v29330_v29 }
 0x429   : > { %24261 = vmatprep.mubr.msk.f32.mxu0 %vm527_vm1, %v29336_v61 }
 0x42a   : > { %23812 = vmatmul.mubr.msk.f32.gmra.mrb[36].mxu1 %vm527_vm1, %v29330_v29  ;;  %v7029_v29 = vld [vmem:[#allocation3 + $0x13b] sm:$0xff] }
 0x42b   : > { %23814 = vmatprep.mubr.msk.f32.mxu1 %vm527_vm1, %v29336_v61  ;;  %v7030_v61 = vld [vmem:[#allocation3 + $0x143] sm:$0xff] }
 0x42c   : > { %24262 = vmatmul.mubr.msk.f32.gmra.mrb[36].mxu0 %vm527_vm1, %v29342_v31 }
 0x42d   : > { %24264 = vmatprep.mubr.msk.f32.mxu0 %vm527_vm1, %v29348_v21 }
 0x42e   : > { %23815 = vmatmul.mubr.msk.f32.gmra.mrb[38].mxu1 %vm527_vm1, %v29342_v31  ;;  %v7031_v31 = vld [vmem:[#allocation3 + $0x153] sm:$0xff] }
 0x42f   : > { %23817 = vmatprep.mubr.msk.f32.mxu1 %vm527_vm1, %v29348_v21  ;;  %v7032_v21 = vld [vmem:[#allocation3 + $0x15b] sm:$0xff] }
 0x430   : > { %24265 = vmatmul.mubr.msk.f32.gmra.mrb[38].mxu0 %vm527_vm1, %v29354_v3 }
 0x431   : > { %24267 = vmatprep.mubr.msk.f32.mxu0 %vm527_vm1, %v29360_v34 }
 0x432   : > { %23818 = vmatmul.mubr.msk.f32.gmra.mrb[40].mxu1 %vm527_vm1, %v29354_v3  ;;  %v7033_v3 = vld [vmem:[#allocation3 + $0x16b] sm:$0xff] }
 0x433   : > { %23820 = vmatprep.mubr.msk.f32.mxu1 %vm527_vm1, %v29360_v34  ;;  %v7034_v34 = vld [vmem:[#allocation3 + $0x173] sm:$0xff] }
 0x434   : > { %24268 = vmatmul.mubr.msk.f32.gmra.mrb[40].mxu0 %vm527_vm1, %v7024_v45 }
 0x435   : > { %24270 = vmatprep.mubr.msk.f32.mxu0 %vm527_vm1, %v7025_v47 }
 0x436   : > { %23821 = vmatmul.mubr.msk.f32.gmra.mrb[42].mxu1 %vm527_vm1, %v7024_v45  ;;  %v10858_v45 = vld [vmem:[#allocation3 + $0x156] sm:$0xff] }
 0x437   : > { %23823 = vmatprep.mubr.msk.f32.mxu1 %vm527_vm1, %v7025_v47  ;;  %v7420_v47 = vld [vmem:[#allocation3 + $0x15d] sm:$0xff] }
 0x438   : > { %24271 = vmatmul.mubr.msk.f32.gmra.mrb[42].mxu0 %vm527_vm1, %v7026_v22 }
 0x439   : > { %24273 = vmatprep.mubr.msk.f32.mxu0 %vm527_vm1, %v7027_v0 }
 0x43a   : > { %23824 = vmatmul.mubr.msk.f32.gmra.mrb[44].mxu1 %vm527_vm1, %v7026_v22  ;;  %v10859_v22 = vld [vmem:[#allocation3 + $0x15e] sm:$0xff] }
 0x43b   : > { %23826 = vmatprep.mubr.msk.f32.mxu1 %vm527_vm1, %v7027_v0  ;;  %v7421_v0 = vld [vmem:[#allocation3 + $0x16d] sm:$0xff] }
 0x43c   : > { %24274 = vmatmul.mubr.msk.f32.gmra.mrb[44].mxu0 %vm527_vm1, %v7028_v37 }
 0x43d   : > { %24276 = vmatprep.mubr.msk.f32.mxu0 %vm527_vm1, %v7029_v29 }
 0x43e   : > { %23827 = vmatmul.mubr.msk.f32.gmra.mrb[46].mxu1 %vm527_vm1, %v7028_v37  ;;  %v10860_v37 = vld [vmem:[#allocation3 + $0x16e] sm:$0xff] }
 0x43f   : > { %23829 = vmatprep.mubr.msk.f32.mxu1 %vm527_vm1, %v7029_v29  ;;  %v7422_v29 = vld [vmem:[#allocation3 + $0x175] sm:$0xff] }
 0x440   : > { %24277 = vmatmul.mubr.msk.f32.gmra.mrb[46].mxu0 %vm527_vm1, %v7030_v61 }
 0x441   : > { %24279 = vmatprep.mubr.msk.f32.mxu0 %vm527_vm1, %v7031_v31 }
 0x442   : > { %23830 = vmatmul.mubr.msk.f32.gmra.mrb[48].mxu1 %vm527_vm1, %v7030_v61  ;;  %v10861_v61 = vld [vmem:[#allocation3 + $0x176] sm:$0xff] }
 0x443   : > { %23832 = vmatprep.mubr.msk.f32.mxu1 %vm527_vm1, %v7031_v31  ;;  %v7423_v31 = vld [vmem:[#allocation3 + $0x185] sm:$0xff] }
 0x444   : > { %24280 = vmatmul.mubr.msk.f32.gmra.mrb[48].mxu0 %vm527_vm1, %v7032_v21 }
 0x445   : > { %24282 = vmatprep.mubr.msk.f32.mxu0 %vm527_vm1, %v7033_v3 }
 0x446   : > { %23833 = vmatmul.mubr.msk.f32.gmra.mrb[50].mxu1 %vm527_vm1, %v7032_v21  ;;  %v7424_v21 = vld [vmem:[#allocation3 + $0x18d] sm:$0xff] }
 0x447   : > { %23835 = vmatprep.mubr.msk.f32.mxu1 %vm527_vm1, %v7033_v3  ;;  %v11365_v3 = vld [vmem:[%s32164_s7] sm:$0xf] }
 0x448   : > { %24283 = vmatmul.mubr.msk.f32.gmra.mrb[50].mxu0 %vm527_vm1, %v7034_v34 }
 0x449   : > { %24285 = vmatprep.mubr.msk.f32.mxu0 %vm527_vm1, %v7035_v57 }
 0x44a   : > { %23836 = vmatmul.mubr.msk.f32.gmra.mrb[52].mxu1 %vm527_vm1, %v7034_v34  ;;  %v29886_v34 = vld [vmem:[%s32161_s4] ss:$0 sm:$0xff] }
 0x44b   : > { %23838 = vmatprep.mubr.msk.f32.mxu1 %vm527_vm1, %v7035_v57 }
 0x44c   : > { %24286 = vmatmul.mubr.msk.f32.gmra.mrb[52].mxu0 %vm527_vm1, %v7036_v25 }
 0x44d   : > { %24288 = vmatprep.mubr.msk.f32.mxu0 %vm527_vm1, %v29418_v41 }
 0x44e   : > { %23839 = vmatmul.mubr.msk.f32.gmra.mrb[54].mxu1 %vm527_vm1, %v7036_v25 }
 0x44f   : > { %23841 = vmatprep.mubr.msk.f32.mxu1 %vm527_vm1, %v29418_v41  ;;  %v7042_v41 = vld [vmem:[#allocation3 + $0x1d3] sm:$0xff] }
 0x450   : > { %24289 = vmatmul.mubr.msk.f32.gmra.mrb[54].mxu0 %vm527_vm1, %v29424_v50 }
 0x451   : > { %24291 = vmatprep.mubr.msk.f32.mxu0 %vm527_vm1, %v29430_v15 }
 0x452   : > { %23842 = vmatmul.mubr.msk.f32.gmra.mrb[56].mxu1 %vm527_vm1, %v29424_v50  ;;  %v7043_v50 = vld [vmem:[#allocation3 + $0x1e3] sm:$0xff] }
 0x453   : > { %23844 = vmatprep.mubr.msk.f32.mxu1 %vm527_vm1, %v29430_v15  ;;  %v7044_v15 = vld [vmem:[#allocation3 + $0x1eb] sm:$0xff] }
 0x454   : > { %24292 = vmatmul.mubr.msk.f32.gmra.mrb[56].mxu0 %vm527_vm1, %v29436_v51 }
 0x455   : > { %24294 = vmatprep.mubr.msk.f32.mxu0 %vm527_vm1, %v7041_v14 }
 0x456   : > { %23845 = vmatmul.mubr.msk.f32.gmra.mrb[58].mxu1 %vm527_vm1, %v29436_v51  ;;  %v7401_v51 = vld [vmem:[#allocation3 + $0x7d] sm:$0xff] }
 0x457   : > { %23847 = vmatprep.mubr.msk.f32.mxu1 %vm527_vm1, %v7041_v14 }
 0x458   : > { %24295 = vmatmul.mubr.msk.f32.gmra.mrb[58].mxu0 %vm527_vm1, %v7042_v41 }
 0x459   : > { %24297 = vmatprep.mubr.msk.f32.mxu0 %vm527_vm1, %v7043_v50 }
 0x45a   : > { %23848 = vmatmul.mubr.msk.f32.gmra.mrb[60].mxu1 %vm527_vm1, %v7042_v41 }
 0x45b   : > { %23850 = vmatprep.mubr.msk.f32.mxu1 %vm527_vm1, %v7043_v50 }
 0x45c   : > { %24298 = vmatmul.mubr.msk.f32.gmra.mrb[60].mxu0 %vm527_vm1, %v7044_v15 }
 0x45d   : > { %24300 = vmatprep.mubr.msk.f32.mxu0 %vm527_vm1, %v10484_v48 }
 0x45e   : > { %23851 = vmatmul.mubr.msk.f32.gmra.mrb[62].mxu1 %vm527_vm1, %v7044_v15 }
 0x45f   : > { %23855 = vmatprep.mubr.msk.f32.mxu1 %vm527_vm1, %v7401_v51 }
 0x460   : > { %24301 = vmatmul.mubr.msk.f32.gmra.mrb[62].mxu0 %vm527_vm1, %v10485_v52 }
 0x461   : > { %24305 = vmatprep.mubr.msk.f32.mxu0 %vm527_vm1, %v10842_v36 }
 0x462   : > { %23856 = vmatmul.mubr.msk.f32.vlgmr.msra.gmra.mrb[32].mxu1 %vm527_vm1, %v7402_v19 }
 0x463   : > { %23858 = vmatprep.mubr.msk.f32.mxu1 %vm527_vm1, %v7403_v39  ;;  %24354 = vmatpush3.msk.msra.mxu1 %vm11464_vm4, %v29707_v18  ;;  %v7419_v18 = vld [vmem:[#allocation3 + $0x155] sm:$0xff] }
 0x464   : > { %24306 = vmatmul.mubr.msk.f32.vlgmr.msra.gmra.mrb[32].mxu0 %vm527_vm1, %v10843_v2  ;;  %24403 = vmatprep.subr.msk.mxu1 %vm769_vm0, %v11365_v3 }
 0x465   : > { %24308 = vmatprep.mubr.msk.f32.mxu0 %vm527_vm1, %v10844_v1  ;;  %v29900_v1 = vld [vmem:[%s32166_s9] sm:$0x3] }
 0x466   : > { %23859 = vmatmul.mubr.msk.f32.gmra.mrb[34].mxu1 %vm527_vm1, %v7404_v54 }
 0x467   : > { %23861 = vmatprep.mubr.msk.f32.mxu1 %vm527_vm1, %v7405_v59 }
 0x468   : > { %24309 = vmatmul.mubr.msk.f32.gmra.mrb[34].mxu0 %vm527_vm1, %v10845_v10 }
 0x469   : > { %24311 = vmatprep.mubr.msk.f32.mxu0 %vm527_vm1, %v10846_v26 }
 0x46a   : > { %23862 = vmatmul.mubr.msk.f32.gmra.mrb[36].mxu1 %vm527_vm1, %v7406_v20 }
 0x46b   : > { %23864 = vmatprep.mubr.msk.f32.mxu1 %vm527_vm1, %v7407_v4 }
 0x46c   : > { %24312 = vmatmul.mubr.msk.f32.gmra.mrb[36].mxu0 %vm527_vm1, %v10847_v6 }
 0x46d   : > { %24314 = vmatprep.mubr.msk.f32.mxu0 %vm527_vm1, %v10848_v27 }
 0x46e   : > { %23865 = vmatmul.mubr.msk.f32.gmra.mrb[38].mxu1 %vm527_vm1, %v7408_v28 }
 0x46f   : > { %23867 = vmatprep.mubr.msk.f32.mxu1 %vm527_vm1, %v7409_v30 }
 0x470   : > { %24315 = vmatmul.mubr.msk.f32.gmra.mrb[38].mxu0 %vm527_vm1, %v10849_v38 }
 0x471   : > { %24317 = vmatprep.mubr.msk.f32.mxu0 %vm527_vm1, %v10850_v40 }
 0x472   : > { %23868 = vmatmul.mubr.msk.f32.gmra.mrb[40].mxu1 %vm527_vm1, %v7410_v32 }
 0x473   : > { %23870 = vmatprep.mubr.msk.f32.mxu1 %vm527_vm1, %v7411_v11 }
 0x474   : > { %24318 = vmatmul.mubr.msk.f32.gmra.mrb[40].mxu0 %vm527_vm1, %v10851_v9 }
 0x475   : > { %24320 = vmatprep.mubr.msk.f32.mxu0 %vm527_vm1, %v10852_v60 }
 0x476   : > { %23871 = vmatmul.mubr.msk.f32.gmra.mrb[42].mxu1 %vm527_vm1, %v7412_v44 }
 0x477   : > { %23873 = vmatprep.mubr.msk.f32.mxu1 %vm527_vm1, %v7413_v17 }
 0x478   : > { %24321 = vmatmul.mubr.msk.f32.gmra.mrb[42].mxu0 %vm527_vm1, %v10853_v43 }
 0x479   : > { %24323 = vmatprep.mubr.msk.f32.mxu0 %vm527_vm1, %v10854_v46 }
 0x47a   : > { %23874 = vmatmul.mubr.msk.f32.gmra.mrb[44].mxu1 %vm527_vm1, %v7414_v33 }
 0x47b   : > { %23876 = vmatprep.mubr.msk.f32.mxu1 %vm527_vm1, %v7415_v35 }
 0x47c   : > { %24324 = vmatmul.mubr.msk.f32.gmra.mrb[44].mxu0 %vm527_vm1, %v10855_v55 }
 0x47d   : > { %24326 = vmatprep.mubr.msk.f32.mxu0 %vm527_vm1, %v10856_v12 }
 0x47e   : > { %23877 = vmatmul.mubr.msk.f32.gmra.mrb[46].mxu1 %vm527_vm1, %v7416_v62 }
 0x47f   : > { %23879 = vmatprep.mubr.msk.f32.mxu1 %vm527_vm1, %v7417_v24 }
 0x480   : > { %24327 = vmatmul.mubr.msk.f32.gmra.mrb[46].mxu0 %vm527_vm1, %v10857_v63 }
 0x481   : > { %24329 = vmatprep.mubr.msk.f32.mxu0 %vm527_vm1, %v10858_v45 }
 0x482   : > { %23880 = vmatmul.mubr.msk.f32.gmra.mrb[48].mxu1 %vm527_vm1, %v7418_v58 }
 0x483   : > { %23882 = vmatprep.mubr.msk.f32.mxu1 %vm527_vm1, %v7419_v18 }
 0x484   : > { %24330 = vmatmul.mubr.msk.f32.gmra.mrb[48].mxu0 %vm527_vm1, %v10859_v22 }
 0x485   : > { %24332 = vmatprep.mubr.msk.f32.mxu0 %vm527_vm1, %v10860_v37 }
 0x486   : > { %23883 = vmatmul.mubr.msk.f32.gmra.mrb[50].mxu1 %vm527_vm1, %v7420_v47 }
 0x487   : > { %23885 = vmatprep.mubr.msk.f32.mxu1 %vm527_vm1, %v7421_v0 }
 0x488   : > { %24333 = vmatmul.mubr.msk.f32.gmra.mrb[50].mxu0 %vm527_vm1, %v10861_v61 }
 0x489   : > { %24335 = vmatprep.mubr.msk.f32.mxu0 %vm527_vm1, %v29568_v23  ;;  %v10868_v23 = vld [vmem:[#allocation3 + $0x1ce] sm:$0xff] }
 0x48a   : > { %23886 = vmatmul.mubr.msk.f32.gmra.mrb[52].mxu1 %vm527_vm1, %v7422_v29 }
 0x48b   : > { %23888 = vmatprep.mubr.msk.f32.mxu1 %vm527_vm1, %v7423_v31 }
 0x48c   : > { %24336 = vmatmul.mubr.msk.f32.gmra.mrb[52].mxu0 %vm527_vm1, %v29576_v53  ;;  %v10869_v53 = vld [vmem:[#allocation3 + $0x1d6] sm:$0xff] }
 0x48d   : > { %24338 = vmatprep.mubr.msk.f32.mxu0 %vm527_vm1, %v29584_v8  ;;  %v10870_v8 = vld [vmem:[#allocation3 + $0x1e6] sm:$0xff] }
 0x48e   : > { %23889 = vmatmul.mubr.msk.f32.gmra.mrb[54].mxu1 %vm527_vm1, %v7424_v21 }
 0x48f   : > { %23891 = vmatprep.mubr.msk.f32.mxu1 %vm527_vm1, %v29566_v49  ;;  %v7429_v49 = vld [vmem:[#allocation3 + $0x1cd] sm:$0xff] }
 0x490   : > { %24339 = vmatmul.mubr.msk.f32.gmra.mrb[54].mxu0 %vm527_vm1, %v29592_v13  ;;  %v10871_v13 = vld [vmem:[#allocation3 + $0x1ee] sm:$0xff] }
 0x491   : > { %24341 = vmatprep.mubr.msk.f32.mxu0 %vm527_vm1, %v29598_v56  ;;  %v10872_v56 = vld [vmem:[#allocation3 + $0x1fe] sm:$0xff] }
 0x492   : > { %23892 = vmatmul.mubr.msk.f32.gmra.mrb[56].mxu1 %vm527_vm1, %v29574_v5  ;;  %v7430_v5 = vld [vmem:[#allocation3 + $0x1d5] sm:$0xff] }
 0x493   : > { %23894 = vmatprep.mubr.msk.f32.mxu1 %vm527_vm1, %v29582_v7  ;;  %v7431_v7 = vld [vmem:[#allocation3 + $0x1e5] sm:$0xff] }
 0x494   : > { %24342 = vmatmul.mubr.msk.f32.gmra.mrb[56].mxu0 %vm527_vm1, %v29603_v16  ;;  %v10873_v16 = vld [vmem:[#allocation3 + $0x206] sm:$0xff] }
 0x495   : > { %24344 = vmatprep.mubr.msk.f32.mxu0 %vm527_vm1, %v10868_v23 }
 0x496   : > { %23895 = vmatmul.mubr.msk.f32.gmra.mrb[58].mxu1 %vm527_vm1, %v29590_v42  ;;  %v7432_v42 = vld [vmem:[#allocation3 + $0x1ed] sm:$0xff] }
 0x497   : > { %23897 = vmatprep.mubr.msk.f32.mxu1 %vm527_vm1, %v7429_v49 }
 0x498   : > { %24345 = vmatmul.mubr.msk.f32.gmra.mrb[58].mxu0 %vm527_vm1, %v10869_v53 }
 0x499   : > { %24347 = vmatprep.mubr.msk.f32.mxu0 %vm527_vm1, %v10870_v8 }
 0x49a   : > { %23898 = vmatmul.mubr.msk.f32.gmra.mrb[60].mxu1 %vm527_vm1, %v7430_v5 }
 0x49b   : > { %23900 = vmatprep.mubr.msk.f32.mxu1 %vm527_vm1, %v7431_v7 }
 0x49c   : > { %24348 = vmatmul.mubr.msk.f32.gmra.mrb[60].mxu0 %vm527_vm1, %v10871_v13 }
 0x49d   : > { %24350 = vmatprep.mubr.msk.f32.mxu0 %vm527_vm1, %v10872_v56 }
 0x49e   : > { %23901 = vmatmul.mubr.msk.f32.gmra.mrb[62].mxu1 %vm527_vm1, %v7432_v42 }
 0x4a0   : > { %24351 = vmatmul.mubr.msk.f32.gmra.mrb[62].mxu0 %vm527_vm1, %v10873_v16 }
 0x535   : > { %v23857_v57 = vpop.f32.mrb[32].mxu1 }
 0x536   : > { %v7797_v25 = vadd.f32 %v23857_v57, %v29886_v34  ;;  %v7598_v14 = vpop.f32.mrb[33].mxu1 }
 0x537   : > { %v7796_v41 = vadd.f32 %v29886_v34, %v7598_v14  ;;  %v29890_v48 = vpop.f32.mrb[32].mxu0 }
 0x538   : > { %v7861_v50 = vmul.f32 0.2, %v7797_v25  ;;  %vm7829_vm7 = vcmp.ge.f32.partialorder %v7797_v25, 0.0  ;;  %v29893_v39 = vpop.f32.mrb[33].mxu0 }
 0x539   : > { %vm7828_vm9 = vcmp.ge.f32.partialorder %v7796_v41, 0.0  ;;  %v7860_v15 = vmul.f32 0.2, %v7796_v41  ;;  %v23860_v51 = vpop.f32.mrb[34].mxu1 }
 0x53a   : > { %v7799_v19 = vadd.f32 %v23860_v51, %v29886_v34  ;;  %v7608_v52 = vpop.f32.mrb[35].mxu1  ;;  %v7893_v2 = vsel %vm7829_vm7, %v7797_v25, %v7861_v50 }
 0x53b   : > { %v7798_v36 = vadd.f32 %v29886_v34, %v7608_v52  ;;  %v7892_v54 = vsel %vm7828_vm9, %v7796_v41, %v7860_v15  ;;  %v29903_v4 = vpop.f32.mrb[34].mxu0 }
 0x53c   : > { %v7863_v59 = vmul.f32 0.2, %v7799_v19  ;;  %24355 = vmatprep.mubr.msk.f32.mxu1 %vm11367_vm5, %v7892_v54  ;;  %vm7831_vm6 = vcmp.ge.f32.partialorder %v7799_v19, 0.0  ;;  %v29907_v6 = vpop.f32.mrb[35].mxu0 }
 0x53d   : > { %vm7830_vm8 = vcmp.ge.f32.partialorder %v7798_v36, 0.0  ;;  %v7862_v20 = vmul.f32 0.2, %v7798_v36  ;;  %24356 = vmatmul.mubr.msk.f32.vlgmr.msra.gmra.mrb[64].mxu1 %vm11367_vm5, %v7893_v2  ;;  %v23863_v10 = vpop.f32.mrb[36].mxu1 }
 0x53e   : > { %24404 = vmatpush3.msk.msra.mxu1 %vm769_vm0, %v11365_v3  ;;  %v7801_v26 = vadd.f32 %v23863_v10, %v29886_v34  ;;  %v7618_v28 = vpop.f32.mrb[37].mxu1  ;;  %v7895_v32 = vsel %vm7831_vm6, %v7799_v19, %v7863_v59 }
 0x53f   : > { %v7894_v30 = vsel %vm7830_vm8, %v7798_v36, %v7862_v20  ;;  %24453 = vmatprep.subr.msk.mxu1 %vm11464_vm4, %v29900_v1  ;;  %v7800_v27 = vadd.f32 %v29886_v34, %v7618_v28  ;;  %v29914_v44 = vpop.f32.mrb[36].mxu0 }
 0x540   : > { %24358 = vmatprep.mubr.msk.f32.mxu1 %vm11367_vm5, %v7894_v30  ;;  %v7865_v38 = vmul.f32 0.2, %v7801_v26  ;;  %vm7833_vm10 = vcmp.ge.f32.partialorder %v7801_v26, 0.0  ;;  %v29917_v60 = vpop.f32.mrb[37].mxu0 }
 0x541   : > { %24359 = vmatmul.mubr.msk.f32.gmra.mrb[66].mxu1 %vm11367_vm5, %v7895_v32  ;;  %vm7832_vm11 = vcmp.ge.f32.partialorder %v7800_v27, 0.0  ;;  %v7864_v11 = vmul.f32 0.2, %v7800_v27  ;;  %v23866_v40 = vpop.f32.mrb[38].mxu1 }
 0x542   : > { %v7803_v9 = vadd.f32 %v23866_v40, %v29886_v34  ;;  %v7628_v17 = vpop.f32.mrb[39].mxu1  ;;  %v7897_v62 = vsel %vm7833_vm10, %v7801_v26, %v7865_v38 }
 0x543   : > { %v7896_v33 = vsel %vm7832_vm11, %v7800_v27, %v7864_v11  ;;  %v7802_v43 = vadd.f32 %v29886_v34, %v7628_v17  ;;  %v29921_v46 = vpop.f32.mrb[38].mxu0 }
 0x544   : > { %24361 = vmatprep.mubr.msk.f32.mxu1 %vm11367_vm5, %v7896_v33  ;;  %v7867_v55 = vmul.f32 0.2, %v7803_v9  ;;  %vm7835_vm12 = vcmp.ge.f32.partialorder %v7803_v9, 0.0  ;;  %v29925_v63 = vpop.f32.mrb[39].mxu0 }
 0x545   : > { %v23869_v35 = vpop.f32.mrb[40].mxu1  ;;  %24362 = vmatmul.mubr.msk.f32.gmra.mrb[68].mxu1 %vm11367_vm5, %v7897_v62  ;;  %vm7834_vm13 = vcmp.ge.f32.partialorder %v7802_v43, 0.0  ;;  %v7866_v24 = vmul.f32 0.2, %v7802_v43 }
 0x546   : > { %v7805_v12 = vadd.f32 %v23869_v35, %v29886_v34  ;;  %v7638_v58 = vpop.f32.mrb[41].mxu1  ;;  %v7899_v37 = vsel %vm7835_vm12, %v7803_v9, %v7867_v55 }
 0x547   : > { %v7804_v18 = vadd.f32 %v29886_v34, %v7638_v58  ;;  %v7898_v45 = vsel %vm7834_vm13, %v7802_v43, %v7866_v24  ;;  %v29928_v22 = vpop.f32.mrb[40].mxu0 }
 0x548   : > { %v7869_v0 = vmul.f32 0.2, %v7805_v12  ;;  %24364 = vmatprep.mubr.msk.f32.mxu1 %vm11367_vm5, %v7898_v45  ;;  %vm7837_vm14 = vcmp.ge.f32.partialorder %v7805_v12, 0.0  ;;  %v29933_v21 = vpop.f32.mrb[41].mxu0 }
 0x549   : > { %v23872_v47 = vpop.f32.mrb[42].mxu1  ;;  %vm7836_vm15 = vcmp.ge.f32.partialorder %v7804_v18, 0.0  ;;  %v7868_v29 = vmul.f32 0.2, %v7804_v18  ;;  %24365 = vmatmul.mubr.msk.f32.gmra.mrb[70].mxu1 %vm11367_vm5, %v7899_v37 }
 0x54a   : > { %v7807_v61 = vadd.f32 %v23872_v47, %v29886_v34  ;;  %v7648_v31 = vpop.f32.mrb[43].mxu1  ;;  %v7901_v8 = vsel %vm7837_vm14, %v7805_v12, %v7869_v0 }
 0x54b   : > { %v7806_v49 = vadd.f32 %v29886_v34, %v7648_v31  ;;  %v7900_v23 = vsel %vm7836_vm15, %v7804_v18, %v7868_v29  ;;  %v29936_v53 = vpop.f32.mrb[42].mxu0 }
 0x54c   : > { %v7871_v7 = vmul.f32 0.2, %v7807_v61  ;;  %24367 = vmatprep.mubr.msk.f32.mxu1 %vm11367_vm5, %v7900_v23  ;;  %vm7839_vm7 = vcmp.ge.f32.partialorder %v7807_v61, 0.0  ;;  %v29941_v16 = vpop.f32.mrb[43].mxu0 }
 0x54d   : > { %v23875_v5 = vpop.f32.mrb[44].mxu1  ;;  %vm7838_vm9 = vcmp.ge.f32.partialorder %v7806_v49, 0.0  ;;  %v7870_v42 = vmul.f32 0.2, %v7806_v49  ;;  %24368 = vmatmul.mubr.msk.f32.gmra.mrb[72].mxu1 %vm11367_vm5, %v7901_v8 }
 0x54e   : > { %v7809_v13 = vadd.f32 %v23875_v5, %v29886_v34  ;;  %v7658_v56 = vpop.f32.mrb[45].mxu1  ;;  %v7903_v50 = vsel %vm7839_vm7, %v7807_v61, %v7871_v7 }
 0x54f   : > { %v7808_v3 = vadd.f32 %v29886_v34, %v7658_v56  ;;  %v7902_v57 = vsel %vm7838_vm9, %v7806_v49, %v7870_v42  ;;  %v29944_v14 = vpop.f32.mrb[44].mxu0 }
 0x550   : > { %v7873_v41 = vmul.f32 0.2, %v7809_v13  ;;  %24370 = vmatprep.mubr.msk.f32.mxu1 %vm11367_vm5, %v7902_v57  ;;  %vm7841_vm6 = vcmp.ge.f32.partialorder %v7809_v13, 0.0  ;;  %v29949_v52 = vpop.f32.mrb[45].mxu0 }
 0x551   : > { %v23878_v25 = vpop.f32.mrb[46].mxu1  ;;  %vm7840_vm8 = vcmp.ge.f32.partialorder %v7808_v3, 0.0  ;;  %v7872_v15 = vmul.f32 0.2, %v7808_v3  ;;  %24371 = vmatmul.mubr.msk.f32.gmra.mrb[74].mxu1 %vm11367_vm5, %v7903_v50 }
 0x552   : > { %v7811_v51 = vadd.f32 %v23878_v25, %v29886_v34  ;;  %v7668_v19 = vpop.f32.mrb[47].mxu1  ;;  %v7905_v10 = vsel %vm7841_vm6, %v7809_v13, %v7873_v41 }
 0x553   : > { %v7810_v36 = vadd.f32 %v29886_v34, %v7668_v19  ;;  %v7904_v54 = vsel %vm7840_vm8, %v7808_v3, %v7872_v15  ;;  %v29952_v59 = vpop.f32.mrb[46].mxu0 }
 0x554   : > { %v7875_v20 = vmul.f32 0.2, %v7811_v51  ;;  %24373 = vmatprep.mubr.msk.f32.mxu1 %vm11367_vm5, %v7904_v54  ;;  %vm7843_vm10 = vcmp.ge.f32.partialorder %v7811_v51, 0.0  ;;  %v29957_v27 = vpop.f32.mrb[47].mxu0 }
 0x555   : > { %v23881_v2 = vpop.f32.mrb[48].mxu1  ;;  %vm7842_vm11 = vcmp.ge.f32.partialorder %v7810_v36, 0.0  ;;  %v7874_v26 = vmul.f32 0.2, %v7810_v36  ;;  %24374 = vmatmul.mubr.msk.f32.gmra.mrb[76].mxu1 %vm11367_vm5, %v7905_v10 }
 0x556   : > { %v7813_v28 = vadd.f32 %v23881_v2, %v29886_v34  ;;  %v7678_v30 = vpop.f32.mrb[49].mxu1  ;;  %v7907_v17 = vsel %vm7843_vm10, %v7811_v51, %v7875_v20 }
 0x557   : > { %v7812_v32 = vadd.f32 %v29886_v34, %v7678_v30  ;;  %v7906_v38 = vsel %vm7842_vm11, %v7810_v36, %v7874_v26  ;;  %v29960_v40 = vpop.f32.mrb[48].mxu0 }
 0x558   : > { %v7877_v9 = vmul.f32 0.2, %v7813_v28  ;;  %24376 = vmatprep.mubr.msk.f32.mxu1 %vm11367_vm5, %v7906_v38  ;;  %vm7845_vm12 = vcmp.ge.f32.partialorder %v7813_v28, 0.0  ;;  %v29965_v62 = vpop.f32.mrb[49].mxu0 }
 0x559   : > { %v23884_v11 = vpop.f32.mrb[50].mxu1  ;;  %vm7844_vm13 = vcmp.ge.f32.partialorder %v7812_v32, 0.0  ;;  %v7876_v33 = vmul.f32 0.2, %v7812_v32  ;;  %24377 = vmatmul.mubr.msk.f32.gmra.mrb[78].mxu1 %vm11367_vm5, %v7907_v17 }
 0x55a   : > { %v7815_v43 = vadd.f32 %v23884_v11, %v29886_v34  ;;  %v7688_v35 = vpop.f32.mrb[51].mxu1  ;;  %v7909_v45 = vsel %vm7845_vm12, %v7813_v28, %v7877_v9 }
 0x55b   : > { %v7814_v55 = vadd.f32 %v29886_v34, %v7688_v35  ;;  %v7908_v24 = vsel %vm7844_vm13, %v7812_v32, %v7876_v33  ;;  %v29968_v58 = vpop.f32.mrb[50].mxu0 }
 0x55c   : > { %v7879_v18 = vmul.f32 0.2, %v7815_v43  ;;  %24379 = vmatprep.mubr.msk.f32.mxu1 %vm11367_vm5, %v7908_v24  ;;  %vm7847_vm14 = vcmp.ge.f32.partialorder %v7815_v43, 0.0  ;;  %v29973_v29 = vpop.f32.mrb[51].mxu0 }
 0x55d   : > { %v23887_v12 = vpop.f32.mrb[52].mxu1  ;;  %vm7846_vm15 = vcmp.ge.f32.partialorder %v7814_v55, 0.0  ;;  %v7878_v47 = vmul.f32 0.2, %v7814_v55  ;;  %24380 = vmatmul.mubr.msk.f32.gmra.mrb[80].mxu1 %vm11367_vm5, %v7909_v45 }
 0x55e   : > { %v7817_v0 = vadd.f32 %v23887_v12, %v29886_v34  ;;  %v7698_v37 = vpop.f32.mrb[53].mxu1  ;;  %v7911_v7 = vsel %vm7847_vm14, %v7815_v43, %v7879_v18 }
 0x55f   : > { %v7816_v61 = vadd.f32 %v29886_v34, %v7698_v37  ;;  %v7910_v31 = vsel %vm7846_vm15, %v7814_v55, %v7878_v47  ;;  %v29976_v23 = vpop.f32.mrb[52].mxu0 }
 0x560   : > { %v7881_v5 = vmul.f32 0.2, %v7817_v0  ;;  %24382 = vmatprep.mubr.msk.f32.mxu1 %vm11367_vm5, %v7910_v31  ;;  %vm7849_vm7 = vcmp.ge.f32.partialorder %v7817_v0, 0.0  ;;  %v29981_v56 = vpop.f32.mrb[53].mxu0 }
 0x561   : > { %v23890_v49 = vpop.f32.mrb[54].mxu1  ;;  %vm7848_vm9 = vcmp.ge.f32.partialorder %v7816_v61, 0.0  ;;  %v7880_v8 = vmul.f32 0.2, %v7816_v61  ;;  %24383 = vmatmul.mubr.msk.f32.gmra.mrb[82].mxu1 %vm11367_vm5, %v7911_v7 }
 0x562   : > { %v7819_v42 = vadd.f32 %v23890_v49, %v29886_v34  ;;  %v7708_v13 = vpop.f32.mrb[55].mxu1  ;;  %v7913_v15 = vsel %vm7849_vm7, %v7817_v0, %v7881_v5 }
 0x563   : > { %v7818_v3 = vadd.f32 %v29886_v34, %v7708_v13  ;;  %v7912_v57 = vsel %vm7848_vm9, %v7816_v61, %v7880_v8  ;;  %v29984_v41 = vpop.f32.mrb[54].mxu0 }
 0x564   : > { %v7883_v50 = vmul.f32 0.2, %v7819_v42  ;;  %24385 = vmatprep.mubr.msk.f32.mxu1 %vm11367_vm5, %v7912_v57  ;;  %vm7851_vm6 = vcmp.ge.f32.partialorder %v7819_v42, 0.0  ;;  %v29989_v54 = vpop.f32.mrb[55].mxu0 }
 0x565   : > { %v23893_v25 = vpop.f32.mrb[56].mxu1  ;;  %vm7850_vm8 = vcmp.ge.f32.partialorder %v7818_v3, 0.0  ;;  %v7882_v51 = vmul.f32 0.2, %v7818_v3  ;;  %24386 = vmatmul.mubr.msk.f32.gmra.mrb[84].mxu1 %vm11367_vm5, %v7913_v15 }
 0x566   : > { %v7821_v19 = vadd.f32 %v23893_v25, %v29886_v34  ;;  %v7718_v36 = vpop.f32.mrb[57].mxu1  ;;  %v7915_v30 = vsel %vm7851_vm6, %v7819_v42, %v7883_v50 }
 0x567   : > { %v7820_v2 = vadd.f32 %v29886_v34, %v7718_v36  ;;  %v7914_v20 = vsel %vm7850_vm8, %v7818_v3, %v7882_v51  ;;  %v29992_v26 = vpop.f32.mrb[56].mxu0 }
 0x568   : > { %v7885_v28 = vmul.f32 0.2, %v7821_v19  ;;  %24388 = vmatprep.mubr.msk.f32.mxu1 %vm11367_vm5, %v7914_v20  ;;  %vm7853_vm10 = vcmp.ge.f32.partialorder %v7821_v19, 0.0  ;;  %v29997_v9 = vpop.f32.mrb[57].mxu0  ;;  %v32703_v20 = vld [vmem:[#allocation39_spill] sm:$0xff] }
 0x569   : > { %v23896_v10 = vpop.f32.mrb[58].mxu1  ;;  %vm7852_vm11 = vcmp.ge.f32.partialorder %v7820_v2, 0.0  ;;  %v7884_v32 = vmul.f32 0.2, %v7820_v2  ;;  %24389 = vmatmul.mubr.msk.f32.gmra.mrb[86].mxu1 %vm11367_vm5, %v7915_v30  ;;  %v32705_v30 = vld [vmem:[#allocation41_spill] sm:$0xff] }
 0x56a   : > { %v7823_v38 = vadd.f32 %v23896_v10, %v29886_v34  ;;  %v7728_v11 = vpop.f32.mrb[59].mxu1  ;;  %v7917_v24 = vsel %vm7853_vm10, %v7821_v19, %v7885_v28  ;;  %v32704_v28 = vld [vmem:[#allocation38_spill] sm:$0xff] }
 0x56b   : > { %v7822_v17 = vadd.f32 %v29886_v34, %v7728_v11  ;;  %v7916_v33 = vsel %vm7852_vm11, %v7820_v2, %v7884_v32  ;;  %v30000_v35 = vpop.f32.mrb[58].mxu0  ;;  %v32706_v32 = vld [vmem:[#allocation40_spill] sm:$0xff]  ;;  %v32708_v11 = vld [vmem:[#allocation42_spill] sm:$0xff] }
 0x56c   : > { %v7887_v55 = vmul.f32 0.2, %v7823_v38  ;;  %24391 = vmatprep.mubr.msk.f32.mxu1 %vm11367_vm5, %v7916_v33  ;;  %vm7855_vm12 = vcmp.ge.f32.partialorder %v7823_v38, 0.0  ;;  %v30005_v47 = vpop.f32.mrb[59].mxu0  ;;  %v32710_v33 = vld [vmem:[#allocation44_spill] sm:$0xff] }
 0x56d   : > { %v23899_v43 = vpop.f32.mrb[60].mxu1  ;;  %vm7854_vm13 = vcmp.ge.f32.partialorder %v7822_v17, 0.0  ;;  %v7886_v12 = vmul.f32 0.2, %v7822_v17  ;;  %24392 = vmatmul.mubr.msk.f32.gmra.mrb[88].mxu1 %vm11367_vm5, %v7917_v24  ;;  %v32714_v24 = vld [vmem:[#allocation48_spill] sm:$0xff] }
 0x56e   : > { %v7825_v18 = vadd.f32 %v23899_v43, %v29886_v34  ;;  %v7738_v45 = vpop.f32.mrb[61].mxu1  ;;  %v7919_v5 = vsel %vm7855_vm12, %v7823_v38, %v7887_v55  ;;  %v32707_v38 = vld [vmem:[#allocation43_spill] sm:$0xff]  ;;  %v32712_v43 = vld [vmem:[#allocation46_spill] sm:$0xff]  ;;  %v32713_v55 = vld [vmem:[#allocation49_spill] sm:$0xff] }
 0x56f   : > { %v7824_v0 = vadd.f32 %v29886_v34, %v7738_v45  ;;  %v7918_v37 = vsel %vm7854_vm13, %v7822_v17, %v7886_v12  ;;  %v30008_v31 = vpop.f32.mrb[60].mxu0  ;;  %v32709_v17 = vld [vmem:[#allocation45_spill] sm:$0xff]  ;;  %v32715_v12 = vld [vmem:[#allocation51_spill] sm:$0xff] }
 0x570   : > { %v7889_v49 = vmul.f32 0.2, %v7825_v18  ;;  %24394 = vmatprep.mubr.msk.f32.mxu1 %vm11367_vm5, %v7918_v37  ;;  %vm7857_vm14 = vcmp.ge.f32.partialorder %v7825_v18, 0.0  ;;  %v30013_v13 = vpop.f32.mrb[61].mxu0  ;;  %v32717_v45 = vld [vmem:[#allocation53_spill] sm:$0xff]  ;;  %v32719_v37 = vld [vmem:[#allocation55_spill] sm:$0xff] }
 0x571   : > { %v23902_v61 = vpop.f32.mrb[62].mxu1  ;;  %vm7856_vm15 = vcmp.ge.f32.partialorder %v7824_v0, 0.0  ;;  %v7888_v7 = vmul.f32 0.2, %v7824_v0  ;;  %24395 = vmatmul.mubr.msk.f32.gmra.mrb[90].mxu1 %vm11367_vm5, %v7919_v5  ;;  %v32722_v5 = vld [vmem:[#allocation56_spill] sm:$0xff] }
 0x572   : > { %v7827_v8 = vadd.f32 %v23902_v61, %v29886_v34  ;;  %v7748_v42 = vpop.f32.mrb[63].mxu1  ;;  %v7921_v15 = vsel %vm7857_vm14, %v7825_v18, %v7889_v49  ;;  %v32716_v18 = vld [vmem:[#allocation50_spill] sm:$0xff]  ;;  %v32721_v49 = vld [vmem:[#allocation57_spill] sm:$0xff] }
 0x573   : > { %v7826_v3 = vadd.f32 %v29886_v34, %v7748_v42  ;;  %v7920_v57 = vsel %vm7856_vm15, %v7824_v0, %v7888_v7  ;;  %v30016_v25 = vpop.f32.mrb[62].mxu0  ;;  %v30027_v34 = vld [vmem:[%s32168_s11] sm:$0xff]  ;;  %v32718_v0 = vld [vmem:[#allocation52_spill] sm:$0xff]  ;;  %v32723_v7 = vld [vmem:[#allocation59_spill] sm:$0xff] }
 0x574   : > { %v7891_v50 = vmul.f32 0.2, %v7827_v8  ;;  %24397 = vmatprep.mubr.msk.f32.mxu1 %vm11367_vm5, %v7920_v57  ;;  %vm7859_vm7 = vcmp.ge.f32.partialorder %v7827_v8, 0.0  ;;  %v30020_v19 = vpop.f32.mrb[63].mxu0  ;;  %v12555_v10 = vrot.slane %v30027_v34, 4  ;;  %v32720_v61 = vld [vmem:[#allocation54_spill] sm:$0xff] }
 0x575   : > { %vm7858_vm9 = vcmp.ge.f32.partialorder %v7826_v3, 0.0  ;;  %v7890_v51 = vmul.f32 0.2, %v7826_v3  ;;  %24398 = vmatmul.mubr.msk.f32.gmra.mrb[92].mxu1 %vm11367_vm5, %v7921_v15  ;;  %v32725_v42 = vld [vmem:[#allocation61_spill] sm:$0xff]  ;;  %v32727_v57 = vld [vmem:[#allocation63_spill] sm:$0xff] }
 0x576   : > { %v7923_v2 = vsel %vm7859_vm7, %v7827_v8, %v7891_v50  ;;  %v32724_v8 = vld [vmem:[#allocation58_spill] sm:$0xff] }
 0x577   : > { %v7922_v36 = vsel %vm7858_vm9, %v7826_v3, %v7890_v51  ;;  %v32726_v3 = vld [vmem:[#allocation60_spill] sm:$0xff]  ;;  %v32728_v50 = vld [vmem:[#allocation62_spill] sm:$0xff]  ;;  %v32729_v51 = vld [vmem:[#allocation65_spill] sm:$0xff] }
 0x578   : > { %24400 = vmatprep.mubr.msk.f32.mxu1 %vm11367_vm5, %v7922_v36  ;;  %v30088_v15 = vld [vmem:[%s32163_s6] ss:$0 sm:$0xff] }
 0x579   : > { %24401 = vmatmul.mubr.msk.f32.gmra.mrb[94].mxu1 %vm11367_vm5, %v7923_v2  ;;  %v11237_v36 = vadd.f32 %v30088_v15, %v29893_v39  ;;  %v32730_v2 = vld [vmem:[#allocation64_spill] sm:$0xff] }
 0x57a   : > { %24405 = vmatprep.mubr.msk.f32.mxu1 %vm527_vm1, %v32703_v20  ;;  %v32731_v20 = vld [vmem:[#allocation69_spill] sm:$0xff] }
 0x57d   : > { %24406 = vmatmul.mubr.msk.f32.vlgmr.msra.gmra.mrb[64].mxu1 %vm527_vm1, %v32704_v28  ;;  %v11238_v28 = vadd.f32 %v29890_v48, %v30088_v15  ;;  %v11241_v48 = vadd.f32 %v30088_v15, %v29917_v60 }
 0x57e   : > { %24454 = vmatpush3.msk.msra.mxu1 %vm11464_vm4, %v29900_v1  ;;  %24408 = vmatprep.mubr.msk.f32.mxu1 %vm527_vm1, %v32705_v30  ;;  %v32711_v1 = vld [vmem:[#allocation47_spill] sm:$0xff]  ;;  %v11301_v30 = vmul.f32 0.2, %v11237_v36  ;;  %vm11269_vm4 = vcmp.ge.f32.partialorder %v11237_v36, 0.0 }
 0x57f   : > { %24503 = vmatprep.subr.msk.mxu1 %vm769_vm0, %v12555_v10  ;;  %v11302_v39 = vmul.f32 0.2, %v11238_v28  ;;  %vm11270_vm6 = vcmp.ge.f32.partialorder %v11238_v28, 0.0  ;;  %vm11273_vm11 = vcmp.ge.f32.partialorder %v11241_v48, 0.0 }
 0x581   : > { %24409 = vmatmul.mubr.msk.f32.gmra.mrb[66].mxu1 %vm527_vm1, %v32706_v32  ;;  %v11239_v32 = vadd.f32 %v30088_v15, %v29907_v6  ;;  %v11333_v6 = vsel %vm11269_vm4, %v11237_v36, %v11301_v30 }
 0x582   : > { %24411 = vmatprep.mubr.msk.f32.mxu1 %vm527_vm1, %v32707_v38  ;;  %v32732_v38 = vld [vmem:[#allocation68_spill] sm:$0xff] }
 0x583   : > { %vm11271_vm8 = vcmp.ge.f32.partialorder %v11239_v32, 0.0 }
 0x585   : > { %24412 = vmatmul.mubr.msk.f32.gmra.mrb[68].mxu1 %vm527_vm1, %v32708_v11  ;;  %v32733_v11 = vld [vmem:[#allocation73_spill] sm:$0xff] }
 0x586   : > { %24414 = vmatprep.mubr.msk.f32.mxu1 %vm527_vm1, %v32709_v17  ;;  %v11240_v17 = vadd.f32 %v29903_v4, %v30088_v15  ;;  %v11243_v4 = vadd.f32 %v30088_v15, %v29925_v63  ;;  %v11245_v63 = vadd.f32 %v30088_v15, %v29933_v21 }
 0x588   : > { %vm11272_vm10 = vcmp.ge.f32.partialorder %v11240_v17, 0.0  ;;  %vm11275_vm13 = vcmp.ge.f32.partialorder %v11243_v4, 0.0  ;;  %vm11277_vm15 = vcmp.ge.f32.partialorder %v11245_v63, 0.0 }
 0x589   : > { %24415 = vmatmul.mubr.msk.f32.gmra.mrb[70].mxu1 %vm527_vm1, %v32710_v33  ;;  %v11303_v33 = vmul.f32 0.2, %v11239_v32 }
 0x58a   : > { %24417 = vmatprep.mubr.msk.f32.mxu1 %vm527_vm1, %v32711_v1  ;;  %v32734_v1 = vld [vmem:[#allocation72_spill] sm:$0xff] }
 0x58b   : > { %v11335_v60 = vsel %vm11271_vm8, %v11239_v32, %v11303_v33  ;;  %v11256_v33 = vadd.f32 %v29968_v58, %v30088_v15  ;;  %v11259_v58 = vadd.f32 %v30088_v15, %v29989_v54 }
 0x58d   : > { %24418 = vmatmul.mubr.msk.f32.gmra.mrb[72].mxu1 %vm527_vm1, %v32712_v43  ;;  %v11334_v43 = vsel %vm11270_vm6, %v11238_v28, %v11302_v39 }
 0x58e   : > { %24420 = vmatprep.mubr.msk.f32.mxu1 %vm527_vm1, %v32713_v55  ;;  %v11304_v55 = vmul.f32 0.2, %v11240_v17 }
 0x591   : > { %24421 = vmatmul.mubr.msk.f32.gmra.mrb[74].mxu1 %vm527_vm1, %v32714_v24  ;;  %v11242_v24 = vadd.f32 %v29914_v44, %v30088_v15  ;;  %v11244_v44 = vadd.f32 %v29921_v46, %v30088_v15  ;;  %v11247_v46 = vadd.f32 %v30088_v15, %v29941_v16 }
 0x592   : > { %24423 = vmatprep.mubr.msk.f32.mxu1 %vm527_vm1, %v32715_v12  ;;  %v11305_v12 = vmul.f32 0.2, %v11241_v48 }
 0x593   : > { %vm11274_vm12 = vcmp.ge.f32.partialorder %v11242_v24, 0.0  ;;  %vm11276_vm14 = vcmp.ge.f32.partialorder %v11244_v44, 0.0  ;;  %vm11279_vm9 = vcmp.ge.f32.partialorder %v11247_v46, 0.0 }
 0x595   : > { %24424 = vmatmul.mubr.msk.f32.gmra.mrb[76].mxu1 %vm527_vm1, %v32716_v18  ;;  %v11306_v18 = vmul.f32 0.2, %v11242_v24 }
 0x596   : > { %24426 = vmatprep.mubr.msk.f32.mxu1 %vm527_vm1, %v32717_v45  ;;  %v11336_v45 = vsel %vm11272_vm10, %v11240_v17, %v11304_v55 }
 0x599   : > { %24427 = vmatmul.mubr.msk.f32.gmra.mrb[78].mxu1 %vm527_vm1, %v32718_v0  ;;  %v11307_v0 = vmul.f32 0.2, %v11243_v4 }
 0x59a   : > { %24429 = vmatprep.mubr.msk.f32.mxu1 %vm527_vm1, %v32719_v37  ;;  %v11337_v37 = vsel %vm11273_vm11, %v11241_v48, %v11305_v12 }
 0x59d   : > { %24430 = vmatmul.mubr.msk.f32.gmra.mrb[80].mxu1 %vm527_vm1, %v32720_v61  ;;  %v11246_v61 = vadd.f32 %v29928_v22, %v30088_v15  ;;  %v11249_v22 = vadd.f32 %v30088_v15, %v29949_v52 }
 0x59e   : > { %24432 = vmatprep.mubr.msk.f32.mxu1 %vm527_vm1, %v32721_v49  ;;  %v11338_v49 = vsel %vm11274_vm12, %v11242_v24, %v11306_v18  ;;  %v11323_v18 = vmul.f32 0.2, %v11259_v58 }
 0x59f   : > { %v11310_v21 = vmul.f32 0.2, %v11246_v61  ;;  %vm11278_vm7 = vcmp.ge.f32.partialorder %v11246_v61, 0.0  ;;  %v11313_v36 = vmul.f32 0.2, %v11249_v22  ;;  %vm11281_vm6 = vcmp.ge.f32.partialorder %v11249_v22, 0.0 }
 0x5a1   : > { %24433 = vmatmul.mubr.msk.f32.gmra.mrb[82].mxu1 %vm527_vm1, %v32722_v5  ;;  %v11309_v5 = vmul.f32 0.2, %v11245_v63  ;;  %v11345_v32 = vsel %vm11281_vm6, %v11249_v22, %v11313_v36 }
 0x5a2   : > { %24435 = vmatprep.mubr.msk.f32.mxu1 %vm527_vm1, %v32723_v7  ;;  %v11339_v7 = vsel %vm11275_vm13, %v11243_v4, %v11307_v0  ;;  %v11260_v4 = vadd.f32 %v29984_v41, %v30088_v15  ;;  %v11263_v41 = vadd.f32 %v30088_v15, %v30005_v47 }
 0x5a4   : > { %v11324_v54 = vmul.f32 0.2, %v11260_v4  ;;  %vm11292_vm6 = vcmp.ge.f32.partialorder %v11260_v4, 0.0 }
 0x5a5   : > { %24436 = vmatmul.mubr.msk.f32.gmra.mrb[84].mxu1 %vm527_vm1, %v32724_v8  ;;  %v11248_v8 = vadd.f32 %v29936_v53, %v30088_v15  ;;  %v11251_v53 = vadd.f32 %v30088_v15, %v29957_v27 }
 0x5a6   : > { %24438 = vmatprep.mubr.msk.f32.mxu1 %vm527_vm1, %v32725_v42 }
 0x5a7   : > { %v11312_v16 = vmul.f32 0.2, %v11248_v8  ;;  %vm11280_vm4 = vcmp.ge.f32.partialorder %v11248_v8, 0.0  ;;  %v11315_v30 = vmul.f32 0.2, %v11251_v53  ;;  %vm11283_vm10 = vcmp.ge.f32.partialorder %v11251_v53, 0.0 }
 0x5a9   : > { %24439 = vmatmul.mubr.msk.f32.gmra.mrb[86].mxu1 %vm527_vm1, %v32726_v3  ;;  %v11311_v3 = vmul.f32 0.2, %v11247_v46  ;;  %v11344_v28 = vsel %vm11280_vm4, %v11248_v8, %v11312_v16  ;;  %v11347_v17 = vsel %vm11283_vm10, %v11251_v53, %v11315_v30  ;;  %vm11291_vm4 = vcmp.ge.f32.partialorder %v11259_v58, 0.0 }
 0x5aa   : > { %24441 = vmatprep.mubr.msk.f32.mxu1 %vm527_vm1, %v32727_v57  ;;  %v11341_v57 = vsel %vm11277_vm15, %v11245_v63, %v11309_v5  ;;  %vm11288_vm15 = vcmp.ge.f32.partialorder %v11256_v33, 0.0 }
 0x5ad   : > { %24442 = vmatmul.mubr.msk.f32.gmra.mrb[88].mxu1 %vm527_vm1, %v32728_v50  ;;  %v11250_v50 = vadd.f32 %v29944_v14, %v30088_v15  ;;  %v11253_v14 = vadd.f32 %v30088_v15, %v29965_v62 }
 0x5ae   : > { %24444 = vmatprep.mubr.msk.f32.mxu1 %vm527_vm1, %v32729_v51  ;;  %v11342_v51 = vsel %vm11278_vm7, %v11246_v61, %v11310_v21  ;;  %v11356_v61 = vsel %vm11292_vm6, %v11260_v4, %v11324_v54 }
 0x5af   : > { %v11314_v52 = vmul.f32 0.2, %v11250_v50  ;;  %vm11282_vm8 = vcmp.ge.f32.partialorder %v11250_v50, 0.0  ;;  %v11317_v39 = vmul.f32 0.2, %v11253_v14  ;;  %vm11285_vm12 = vcmp.ge.f32.partialorder %v11253_v14, 0.0 }
 0x5b1   : > { %24445 = vmatmul.mubr.msk.f32.gmra.mrb[90].mxu1 %vm527_vm1, %v32730_v2  ;;  %v11343_v2 = vsel %vm11279_vm9, %v11247_v46, %v11311_v3  ;;  %v11266_v46 = vadd.f32 %v30008_v31, %v30088_v15 }
 0x5b2   : > { %24447 = vmatprep.mubr.msk.f32.mxu1 %vm527_vm1, %v32731_v20  ;;  %v11252_v20 = vadd.f32 %v29952_v59, %v30088_v15  ;;  %v11255_v59 = vadd.f32 %v30088_v15, %v29973_v29  ;;  %v11320_v29 = vmul.f32 0.2, %v11256_v33 }
 0x5b4   : > { %v11316_v27 = vmul.f32 0.2, %v11252_v20  ;;  %vm11284_vm11 = vcmp.ge.f32.partialorder %v11252_v20, 0.0 }
 0x5b5   : > { %24448 = vmatmul.mubr.msk.f32.gmra.mrb[92].mxu1 %vm527_vm1, %v32732_v38  ;;  %v11254_v38 = vadd.f32 %v29960_v40, %v30088_v15  ;;  %v11257_v40 = vadd.f32 %v30088_v15, %v29981_v56 }
 0x5b6   : > { %24450 = vmatprep.mubr.msk.f32.mxu1 %vm527_vm1, %v32733_v11  ;;  %v11346_v11 = vsel %vm11282_vm8, %v11250_v50, %v11314_v52  ;;  %v11348_v48 = vsel %vm11284_vm11, %v11252_v20, %v11316_v27  ;;  %vm11295_vm11 = vcmp.ge.f32.partialorder %v11263_v41, 0.0 }
 0x5b7   : > { %v11318_v62 = vmul.f32 0.2, %v11254_v38  ;;  %vm11286_vm13 = vcmp.ge.f32.partialorder %v11254_v38, 0.0  ;;  %v11321_v24 = vmul.f32 0.2, %v11257_v40  ;;  %vm11289_vm7 = vcmp.ge.f32.partialorder %v11257_v40, 0.0 }
 0x5b9   : > { %24451 = vmatmul.mubr.msk.f32.gmra.mrb[94].mxu1 %vm527_vm1, %v32734_v1  ;;  %v11319_v1 = vmul.f32 0.2, %v11255_v59  ;;  %v11350_v55 = vsel %vm11286_vm13, %v11254_v38, %v11318_v62 }
 0x5ba   : > { %24455 = vmatprep.mubr.msk.f32.mxu1 %vm11367_vm5, %v11333_v6  ;;  %v11349_v6 = vsel %vm11285_vm12, %v11253_v14, %v11317_v39 }
 0x5bd   : > { %24456 = vmatmul.mubr.msk.f32.vlgmr.msra.gmra.mrb[64].mxu1 %vm11367_vm5, %v11334_v43  ;;  %v11258_v43 = vadd.f32 %v29976_v23, %v30088_v15  ;;  %v11261_v23 = vadd.f32 %v30088_v15, %v29997_v9 }
 0x5be   : > { %24458 = vmatprep.mubr.msk.f32.mxu1 %vm11367_vm5, %v11335_v60  ;;  %24504 = vmatpush3.msk.msra.mxu1 %vm769_vm0, %v12555_v10  ;;  %v11308_v10 = vmul.f32 0.2, %v11244_v44  ;;  %v11352_v60 = vsel %vm11288_vm15, %v11256_v33, %v11320_v29 }
 0x5bf   : > { %24553 = vmatprep.subr.msk.mxu1 %vm769_vm0, %v30027_v34  ;;  %v11322_v56 = vmul.f32 0.2, %v11258_v43  ;;  %vm11290_vm9 = vcmp.ge.f32.partialorder %v11258_v43, 0.0  ;;  %v11325_v63 = vmul.f32 0.2, %v11261_v23  ;;  %vm11293_vm8 = vcmp.ge.f32.partialorder %v11261_v23, 0.0 }
 0x5c0   : > { %v11340_v42 = vsel %vm11276_vm14, %v11244_v44, %v11308_v10  ;;  %vm11287_vm14 = vcmp.ge.f32.partialorder %v11255_v59, 0.0  ;;  %v11353_v44 = vsel %vm11289_vm7, %v11257_v40, %v11321_v24  ;;  %v11264_v10 = vadd.f32 %v30000_v35, %v30088_v15 }
 0x5c1   : > { %24459 = vmatmul.mubr.msk.f32.gmra.mrb[66].mxu1 %vm11367_vm5, %v11336_v45  ;;  %v11351_v12 = vsel %vm11287_vm14, %v11255_v59, %v11319_v1  ;;  %v11262_v45 = vadd.f32 %v29992_v26, %v30088_v15  ;;  %v11354_v0 = vsel %vm11290_vm9, %v11258_v43, %v11322_v56  ;;  %v11265_v26 = vadd.f32 %v30088_v15, %v30013_v13 }
 0x5c2   : > { %24461 = vmatprep.mubr.msk.f32.mxu1 %vm11367_vm5, %v11337_v37  ;;  %v11355_v37 = vsel %vm11291_vm4, %v11259_v58, %v11323_v18  ;;  %v11357_v5 = vsel %vm11293_vm8, %v11261_v23, %v11325_v63  ;;  %v11328_v47 = vmul.f32 0.2, %v11264_v10  ;;  %vm11296_vm12 = vcmp.ge.f32.partialorder %v11264_v10, 0.0 }
 0x5c3   : > { %v11326_v9 = vmul.f32 0.2, %v11262_v45  ;;  %vm11294_vm10 = vcmp.ge.f32.partialorder %v11262_v45, 0.0  ;;  %v11329_v21 = vmul.f32 0.2, %v11265_v26  ;;  %v11267_v35 = vadd.f32 %v30088_v15, %v30020_v19 }
 0x5c4   : > { %vm11297_vm13 = vcmp.ge.f32.partialorder %v11265_v26, 0.0  ;;  %v11330_v13 = vmul.f32 0.2, %v11266_v46  ;;  %v11360_v3 = vsel %vm11296_vm12, %v11264_v10, %v11328_v47  ;;  %vm11298_vm14 = vcmp.ge.f32.partialorder %v11266_v46, 0.0 }
 0x5c5   : > { %24462 = vmatmul.mubr.msk.f32.gmra.mrb[68].mxu1 %vm11367_vm5, %v11338_v49  ;;  %v11327_v49 = vmul.f32 0.2, %v11263_v41  ;;  %v11331_v22 = vmul.f32 0.2, %v11267_v35  ;;  %v11361_v31 = vsel %vm11297_vm13, %v11265_v26, %v11329_v21  ;;  %vm11299_vm15 = vcmp.ge.f32.partialorder %v11267_v35, 0.0 }
 0x5c6   : > { %24464 = vmatprep.mubr.msk.f32.mxu1 %vm11367_vm5, %v11339_v7  ;;  %v11358_v7 = vsel %vm11294_vm10, %v11262_v45, %v11326_v9 }
 0x5c7   : > { %v11359_v8 = vsel %vm11295_vm11, %v11263_v41, %v11327_v49  ;;  %v11363_v16 = vsel %vm11299_vm15, %v11267_v35, %v11331_v22 }
 0x5c9   : > { %24465 = vmatmul.mubr.msk.f32.gmra.mrb[70].mxu1 %vm11367_vm5, %v11340_v42  ;;  %v11268_v42 = vadd.f32 %v30016_v25, %v30088_v15  ;;  %v30204_v25 = vld [vmem:[%s32167_s10] ss:$0 sm:$0xff] }
 0x5ca   : > { %24467 = vmatprep.mubr.msk.f32.mxu1 %vm11367_vm5, %v11341_v57  ;;  %v11362_v57 = vsel %vm11298_vm14, %v11266_v46, %v11330_v13 }
 0x5cb   : > { %v11332_v19 = vmul.f32 0.2, %v11268_v42  ;;  %vm11300_vm7 = vcmp.ge.f32.partialorder %v11268_v42, 0.0 }
 0x5cd   : > { %24468 = vmatmul.mubr.msk.f32.gmra.mrb[72].mxu1 %vm11367_vm5, %v11342_v51  ;;  %v11364_v50 = vsel %vm11300_vm7, %v11268_v42, %v11332_v19 }
 0x5ce   : > { %24470 = vmatprep.mubr.msk.f32.mxu1 %vm11367_vm5, %v11343_v2 }
 0x5d1   : > { %24471 = vmatmul.mubr.msk.f32.gmra.mrb[74].mxu1 %vm11367_vm5, %v11344_v28 }
 0x5d2   : > { %24473 = vmatprep.mubr.msk.f32.mxu1 %vm11367_vm5, %v11345_v32 }
 0x5d5   : > { %24474 = vmatmul.mubr.msk.f32.gmra.mrb[76].mxu1 %vm11367_vm5, %v11346_v11 }
 0x5d6   : > { %24476 = vmatprep.mubr.msk.f32.mxu1 %vm11367_vm5, %v11347_v17 }
 0x5d9   : > { %24477 = vmatmul.mubr.msk.f32.gmra.mrb[78].mxu1 %vm11367_vm5, %v11348_v48  ;;  %v30238_v48 = vld [vmem:[%s32168_s11 + $0x8] sm:$0xff] }
 0x5da   : > { %24479 = vmatprep.mubr.msk.f32.mxu1 %vm11367_vm5, %v11349_v6 }
 0x5dd   : > { %24480 = vmatmul.mubr.msk.f32.gmra.mrb[80].mxu1 %vm11367_vm5, %v11350_v55 }
 0x5de   : > { %24482 = vmatprep.mubr.msk.f32.mxu1 %vm11367_vm5, %v11351_v12 }
 0x5e1   : > { %24483 = vmatmul.mubr.msk.f32.gmra.mrb[82].mxu1 %vm11367_vm5, %v11352_v60 }
 0x5e2   : > { %24485 = vmatprep.mubr.msk.f32.mxu1 %vm11367_vm5, %v11353_v44 }
 0x5e5   : > { %24486 = vmatmul.mubr.msk.f32.gmra.mrb[84].mxu1 %vm11367_vm5, %v11354_v0 }
 0x5e6   : > { %24488 = vmatprep.mubr.msk.f32.mxu1 %vm11367_vm5, %v11355_v37 }
 0x5e9   : > { %24489 = vmatmul.mubr.msk.f32.gmra.mrb[86].mxu1 %vm11367_vm5, %v11356_v61 }
 0x5ea   : > { %24491 = vmatprep.mubr.msk.f32.mxu1 %vm11367_vm5, %v11357_v5 }
 0x5ed   : > { %24492 = vmatmul.mubr.msk.f32.gmra.mrb[88].mxu1 %vm11367_vm5, %v11358_v7 }
 0x5ee   : > { %24494 = vmatprep.mubr.msk.f32.mxu1 %vm11367_vm5, %v11359_v8 }
 0x5f1   : > { %24495 = vmatmul.mubr.msk.f32.gmra.mrb[90].mxu1 %vm11367_vm5, %v11360_v3 }
 0x5f2   : > { %24497 = vmatprep.mubr.msk.f32.mxu1 %vm11367_vm5, %v11361_v31 }
 0x5f5   : > { %24498 = vmatmul.mubr.msk.f32.gmra.mrb[92].mxu1 %vm11367_vm5, %v11362_v57 }
 0x5f6   : > { %24500 = vmatprep.mubr.msk.f32.mxu1 %vm11367_vm5, %v11363_v16 }
 0x5f9   : > { %24501 = vmatmul.mubr.msk.f32.gmra.mrb[94].mxu1 %vm11367_vm5, %v11364_v50 }
 0x690   : > { %v24457_v15 = vpop.f32.mrb[64].mxu1 }
 0x691   : > { %v12382_v51 = vadd.f32 %v24457_v15, %v30204_v25  ;;  %v12183_v36 = vpop.f32.mrb[65].mxu1 }
 0x692   : > { %v12381_v53 = vadd.f32 %v30204_v25, %v12183_v36 }
 0x693   : > { %12416 = vst.msk [vmem:[#allocation4 + $0x21] sm:$0xff] %vm527_vm1, %v12382_v51 }
 0x694   : > { %12468 = vst.msk [vmem:[#allocation4 + $0x23] sm:$0x40] %vm583_vm3, %v12382_v51  ;;  %v24460_v2 = vpop.f32.mrb[66].mxu1 }
 0x695   : > { %12415 = vst.msk [vmem:[#allocation4 + $0x19] sm:$0xff] %vm527_vm1, %v12381_v53  ;;  %v12384_v52 = vadd.f32 %v24460_v2, %v30204_v25  ;;  %v12193_v20 = vpop.f32.mrb[67].mxu1 }
 0x696   : > { %12450 = vst.msk [vmem:[#allocation4 + $0x17] sm:$0x2] %vm564_vm2, %v12381_v53  ;;  %v12383_v28 = vadd.f32 %v30204_v25, %v12193_v20 }
 0x697   : > { %12414 = vst.msk [vmem:[#allocation4 + $0x9] sm:$0xff] %vm527_vm1, %v12384_v52  ;;  %12418 = vst.msk [vmem:[#allocation4 + $0x39] sm:$0xff] %vm527_vm1, %v12384_v52 }
 0x698   : > { %12467 = vst.msk [vmem:[#allocation4 + $0xb] sm:$0x40] %vm583_vm3, %v12384_v52  ;;  %12469 = vst.msk [vmem:[#allocation4 + $0x3b] sm:$0x40] %vm583_vm3, %v12384_v52  ;;  %v24463_v30 = vpop.f32.mrb[68].mxu1 }
 0x699   : > { %12413 = vst.msk [vmem:[#allocation4 + $0x1] sm:$0xff] %vm527_vm1, %v12383_v28  ;;  %12417 = vst.msk [vmem:[#allocation4 + $0x31] sm:$0xff] %vm527_vm1, %v12383_v28  ;;  %v12386_v14 = vadd.f32 %v24463_v30, %v30204_v25  ;;  %v12203_v32 = vpop.f32.mrb[69].mxu1 }
 0x69a   : > { %12449 = vst.msk [vmem:[#allocation4 - $0x1] sm:$0x2] %vm564_vm2, %v12383_v28  ;;  %12451 = vst.msk [vmem:[#allocation4 + $0x2f] sm:$0x2] %vm564_vm2, %v12383_v28  ;;  %v12385_v27 = vadd.f32 %v30204_v25, %v12203_v32  ;;  %v30255_v55 = vld [vmem:[#allocation4 + $0x21] sm:$0xff] }
 0x69b   : > { %12420 = vst.msk [vmem:[#allocation4 + $0x51] sm:$0xff] %vm527_vm1, %v12386_v14 }
 0x69c   : > { %12470 = vst.msk [vmem:[#allocation4 + $0x53] sm:$0x40] %vm583_vm3, %v12386_v14  ;;  %v24466_v38 = vpop.f32.mrb[70].mxu1  ;;  %v30242_v6 = vld [vmem:[#allocation4 + $0x19] sm:$0xff] }
 0x69d   : > { %12419 = vst.msk [vmem:[#allocation4 + $0x49] sm:$0xff] %vm527_vm1, %v12385_v27  ;;  %v12388_v11 = vadd.f32 %v24466_v38, %v30204_v25  ;;  %v12213_v39 = vpop.f32.mrb[71].mxu1 }
 0x69e   : > { %12452 = vst.msk [vmem:[#allocation4 + $0x47] sm:$0x2] %vm564_vm2, %v12385_v27  ;;  %v12387_v59 = vadd.f32 %v30204_v25, %v12213_v39  ;;  %v12523_v33 = vld [vmem:[#allocation4 + $0x9] sm:$0xff]  ;;  %v30269_v4 = vld [vmem:[#allocation4 + $0x39] sm:$0xff] }
 0x69f   : > { %12422 = vst.msk [vmem:[#allocation4 + $0x69] sm:$0xff] %vm527_vm1, %v12388_v11 }
 0x6a0   : > { %12471 = vst.msk [vmem:[#allocation4 + $0x6b] sm:$0x40] %vm583_vm3, %v12388_v11  ;;  %v12522_v17 = vld [vmem:[#allocation4 + $0x1] sm:$0xff]  ;;  %v24469_v62 = vpop.f32.mrb[72].mxu1  ;;  %v30260_v58 = vld [vmem:[#allocation4 + $0x31] sm:$0xff] }
 0x6a1   : > { %12421 = vst.msk [vmem:[#allocation4 + $0x61] sm:$0xff] %vm527_vm1, %v12387_v59  ;;  %24505 = vmatprep.mubr.msk.f32.mxu1 %vm527_vm1, %v12522_v17  ;;  %v12390_v1 = vadd.f32 %v24469_v62, %v30204_v25  ;;  %v12223_v40 = vpop.f32.mrb[73].mxu1 }
 0x6a2   : > { %12453 = vst.msk [vmem:[#allocation4 + $0x5f] sm:$0x2] %vm564_vm2, %v12387_v59  ;;  %24506 = vmatmul.mubr.msk.f32.vlgmr.msra.gmra.mrb[96].mxu1 %vm527_vm1, %v12523_v33  ;;  %v12389_v29 = vadd.f32 %v30204_v25, %v12223_v40  ;;  %v30283_v45 = vld [vmem:[#allocation4 + $0x51] sm:$0xff] }
 0x6a3   : > { %24554 = vmatpush3.msk.msra.mxu1 %vm769_vm0, %v30027_v34  ;;  %24508 = vmatprep.mubr.msk.f32.mxu1 %vm527_vm1, %v30242_v6  ;;  %12424 = vst.msk [vmem:[#allocation4 + $0x81] sm:$0xff] %vm527_vm1, %v12390_v1 }
 0x6a4   : > { %12472 = vst.msk [vmem:[#allocation4 + $0x83] sm:$0x40] %vm583_vm3, %v12390_v1  ;;  %24603 = vmatprep.subr.msk.mxu1 %vm769_vm0, %v30238_v48  ;;  %v24472_v43 = vpop.f32.mrb[74].mxu1  ;;  %v30274_v23 = vld [vmem:[#allocation4 + $0x49] sm:$0xff] }
 0x6a5   : > { %12423 = vst.msk [vmem:[#allocation4 + $0x79] sm:$0xff] %vm527_vm1, %v12389_v29  ;;  %v12392_v24 = vadd.f32 %v24472_v43, %v30204_v25  ;;  %v12233_v34 = vpop.f32.mrb[75].mxu1 }
 0x6a6   : > { %12454 = vst.msk [vmem:[#allocation4 + $0x77] sm:$0x2] %vm564_vm2, %v12389_v29  ;;  %24509 = vmatmul.mubr.msk.f32.gmra.mrb[98].mxu1 %vm527_vm1, %v30255_v55  ;;  %v12391_v12 = vadd.f32 %v30204_v25, %v12233_v34  ;;  %v30297_v10 = vld [vmem:[#allocation4 + $0x69] sm:$0xff] }
 0x6a7   : > { %24511 = vmatprep.mubr.msk.f32.mxu1 %vm527_vm1, %v30260_v58  ;;  %12426 = vst.msk [vmem:[#allocation4 + $0x99] sm:$0xff] %vm527_vm1, %v12392_v24 }
 0x6a8   : > { %12473 = vst.msk [vmem:[#allocation4 + $0x9b] sm:$0x40] %vm583_vm3, %v12392_v24  ;;  %v24475_v56 = vpop.f32.mrb[76].mxu1  ;;  %v30288_v41 = vld [vmem:[#allocation4 + $0x61] sm:$0xff] }
 0x6a9   : > { %12425 = vst.msk [vmem:[#allocation4 + $0x91] sm:$0xff] %vm527_vm1, %v12391_v12  ;;  %v12394_v60 = vadd.f32 %v24475_v56, %v30204_v25  ;;  %v12243_v18 = vpop.f32.mrb[77].mxu1 }
 0x6aa   : > { %12455 = vst.msk [vmem:[#allocation4 + $0x8f] sm:$0x2] %vm564_vm2, %v12391_v12  ;;  %24512 = vmatmul.mubr.msk.f32.gmra.mrb[100].mxu1 %vm527_vm1, %v30269_v4  ;;  %v12393_v44 = vadd.f32 %v30204_v25, %v12243_v18  ;;  %v30311_v46 = vld [vmem:[#allocation4 + $0x81] sm:$0xff] }
 0x6ab   : > { %24514 = vmatprep.mubr.msk.f32.mxu1 %vm527_vm1, %v30274_v23  ;;  %12428 = vst.msk [vmem:[#allocation4 + $0xb1] sm:$0xff] %vm527_vm1, %v12394_v60 }
 0x6ac   : > { %12474 = vst.msk [vmem:[#allocation4 + $0xb3] sm:$0x40] %vm583_vm3, %v12394_v60  ;;  %v24478_v54 = vpop.f32.mrb[78].mxu1  ;;  %v30302_v26 = vld [vmem:[#allocation4 + $0x79] sm:$0xff] }
 0x6ad   : > { %12427 = vst.msk [vmem:[#allocation4 + $0xa9] sm:$0xff] %vm527_vm1, %v12393_v44  ;;  %v12396_v0 = vadd.f32 %v24478_v54, %v30204_v25  ;;  %v12253_v63 = vpop.f32.mrb[79].mxu1 }
 0x6ae   : > { %12456 = vst.msk [vmem:[#allocation4 + $0xa7] sm:$0x2] %vm564_vm2, %v12393_v44  ;;  %24515 = vmatmul.mubr.msk.f32.gmra.mrb[102].mxu1 %vm527_vm1, %v30283_v45  ;;  %v12395_v37 = vadd.f32 %v30204_v25, %v12253_v63  ;;  %v30325_v42 = vld [vmem:[#allocation4 + $0x99] sm:$0xff] }
 0x6af   : > { %24517 = vmatprep.mubr.msk.f32.mxu1 %vm527_vm1, %v30288_v41  ;;  %12430 = vst.msk [vmem:[#allocation4 + $0xc9] sm:$0xff] %vm527_vm1, %v12396_v0 }
 0x6b0   : > { %12475 = vst.msk [vmem:[#allocation4 + $0xcb] sm:$0x40] %vm583_vm3, %v12396_v0  ;;  %v24481_v9 = vpop.f32.mrb[80].mxu1  ;;  %v30316_v35 = vld [vmem:[#allocation4 + $0x91] sm:$0xff] }
 0x6b1   : > { %12429 = vst.msk [vmem:[#allocation4 + $0xc1] sm:$0xff] %vm527_vm1, %v12395_v37  ;;  %v12398_v61 = vadd.f32 %v24481_v9, %v30204_v25  ;;  %v12263_v49 = vpop.f32.mrb[81].mxu1  ;;  %v32343_v9 = vrot.slane %v30238_v48, 4 }
 0x6b2   : > { %12457 = vst.msk [vmem:[#allocation4 + $0xbf] sm:$0x2] %vm564_vm2, %v12395_v37  ;;  %24518 = vmatmul.mubr.msk.f32.gmra.mrb[104].mxu1 %vm527_vm1, %v30297_v10  ;;  %v12397_v5 = vadd.f32 %v30204_v25, %v12263_v49  ;;  %v30339_v16 = vld [vmem:[#allocation4 + $0xb1] sm:$0xff]  ;;  %v12490_v37 = vld [vmem:[#allocation4] sm:$0xff] }
 0x6b3   : > { %24520 = vmatprep.mubr.msk.f32.mxu1 %vm527_vm1, %v30302_v26  ;;  %12432 = vst.msk [vmem:[#allocation4 + $0xe1] sm:$0xff] %vm527_vm1, %v12398_v61  ;;  %v30444_v49 = vld [vmem:[#allocation4 + $0x18] sm:$0xff] }
 0x6b4   : > { %12476 = vst.msk [vmem:[#allocation4 + $0xe3] sm:$0x40] %vm583_vm3, %v12398_v61  ;;  %v24484_v47 = vpop.f32.mrb[82].mxu1  ;;  %v30330_v31 = vld [vmem:[#allocation4 + $0xa9] sm:$0xff] }
 0x6b5   : > { %12431 = vst.msk [vmem:[#allocation4 + $0xd9] sm:$0xff] %vm527_vm1, %v12397_v5  ;;  %v12400_v7 = vadd.f32 %v24484_v47, %v30204_v25  ;;  %v12273_v21 = vpop.f32.mrb[83].mxu1  ;;  %v12491_v61 = vld [vmem:[#allocation4 + $0x8] sm:$0xff]  ;;  %v30457_v47 = vld [vmem:[#allocation4 + $0x30] sm:$0xff] }
 0x6b6   : > { %12458 = vst.msk [vmem:[#allocation4 + $0xd7] sm:$0x2] %vm564_vm2, %v12397_v5  ;;  %24521 = vmatmul.mubr.msk.f32.gmra.mrb[106].mxu1 %vm527_vm1, %v30311_v46  ;;  %v12399_v8 = vadd.f32 %v30204_v25, %v12273_v21  ;;  %v30353_v2 = vld [vmem:[#allocation4 + $0xc9] sm:$0xff]  ;;  %v30453_v5 = vld [vmem:[#allocation4 + $0x20] sm:$0xff] }
 0x6b7   : > { %24523 = vmatprep.mubr.msk.f32.mxu1 %vm527_vm1, %v30316_v35  ;;  %12434 = vst.msk [vmem:[#allocation4 + $0xf9] sm:$0xff] %vm527_vm1, %v12400_v7  ;;  %v30465_v21 = vld [vmem:[#allocation4 + $0x48] sm:$0xff] }
 0x6b8   : > { %12477 = vst.msk [vmem:[#allocation4 + $0xfb] sm:$0x40] %vm583_vm3, %v12400_v7  ;;  %v24487_v13 = vpop.f32.mrb[84].mxu1  ;;  %v30344_v51 = vld [vmem:[#allocation4 + $0xc1] sm:$0xff]  ;;  %v30461_v7 = vld [vmem:[#allocation4 + $0x38] sm:$0xff] }
 0x6b9   : > { %12433 = vst.msk [vmem:[#allocation4 + $0xf1] sm:$0xff] %vm527_vm1, %v12399_v8  ;;  %v12402_v3 = vadd.f32 %v24487_v13, %v30204_v25  ;;  %v12283_v22 = vpop.f32.mrb[85].mxu1  ;;  %v30473_v13 = vld [vmem:[#allocation4 + $0x60] sm:$0xff] }
 0x6ba   : > { %12459 = vst.msk [vmem:[#allocation4 + $0xef] sm:$0x2] %vm564_vm2, %v12399_v8  ;;  %24524 = vmatmul.mubr.msk.f32.gmra.mrb[108].mxu1 %vm527_vm1, %v30325_v42  ;;  %v12401_v19 = vadd.f32 %v30204_v25, %v12283_v22  ;;  %v30367_v32 = vld [vmem:[#allocation4 + $0xe1] sm:$0xff]  ;;  %v30469_v8 = vld [vmem:[#allocation4 + $0x50] sm:$0xff]  ;;  %v30481_v22 = vld [vmem:[#allocation4 + $0x78] sm:$0xff] }
 0x6bb   : > { %24526 = vmatprep.mubr.msk.f32.mxu1 %vm527_vm1, %v30330_v31  ;;  %12436 = vst.msk [vmem:[#allocation4 + $0x111] sm:$0xff] %vm527_vm1, %v12402_v3 }
 0x6bc   : > { %12478 = vst.msk [vmem:[#allocation4 + $0x113] sm:$0x40] %vm583_vm3, %v12402_v3  ;;  %v24490_v57 = vpop.f32.mrb[86].mxu1  ;;  %v30358_v28 = vld [vmem:[#allocation4 + $0xd9] sm:$0xff]  ;;  %v30477_v3 = vld [vmem:[#allocation4 + $0x68] sm:$0xff] }
 0x6bd   : > { %12435 = vst.msk [vmem:[#allocation4 + $0x109] sm:$0xff] %vm527_vm1, %v12401_v19  ;;  %v12404_v50 = vadd.f32 %v24490_v57, %v30204_v25  ;;  %v12293_v15 = vpop.f32.mrb[87].mxu1  ;;  %v30489_v57 = vld [vmem:[#allocation4 + $0x90] sm:$0xff] }
 0x6be   : > { %12460 = vst.msk [vmem:[#allocation4 + $0x107] sm:$0x2] %vm564_vm2, %v12401_v19  ;;  %24527 = vmatmul.mubr.msk.f32.gmra.mrb[110].mxu1 %vm527_vm1, %v30339_v16  ;;  %v12403_v36 = vadd.f32 %v30204_v25, %v12293_v15  ;;  %v30381_v17 = vld [vmem:[#allocation4 + $0xf9] sm:$0xff]  ;;  %v30497_v15 = vld [vmem:[#allocation4 + $0xa8] sm:$0xff] }
 0x6bf   : > { %24529 = vmatprep.mubr.msk.f32.mxu1 %vm527_vm1, %v30344_v51  ;;  %12438 = vst.msk [vmem:[#allocation4 + $0x129] sm:$0xff] %vm527_vm1, %v12404_v50  ;;  %v30485_v19 = vld [vmem:[#allocation4 + $0x80] sm:$0xff] }
 0x6c0   : > { %12479 = vst.msk [vmem:[#allocation4 + $0x12b] sm:$0x40] %vm583_vm3, %v12404_v50  ;;  %v24493_v53 = vpop.f32.mrb[88].mxu1  ;;  %v30372_v11 = vld [vmem:[#allocation4 + $0xf1] sm:$0xff] }
 0x6c1   : > { %12437 = vst.msk [vmem:[#allocation4 + $0x121] sm:$0xff] %vm527_vm1, %v12403_v36  ;;  %v12406_v52 = vadd.f32 %v24493_v53, %v30204_v25  ;;  %v12303_v20 = vpop.f32.mrb[89].mxu1  ;;  %v30493_v50 = vld [vmem:[#allocation4 + $0x98] sm:$0xff]  ;;  %v30505_v53 = vld [vmem:[#allocation4 + $0xc0] sm:$0xff] }
 0x6c2   : > { %12461 = vst.msk [vmem:[#allocation4 + $0x11f] sm:$0x2] %vm564_vm2, %v12403_v36  ;;  %24530 = vmatmul.mubr.msk.f32.gmra.mrb[112].mxu1 %vm527_vm1, %v30353_v2  ;;  %v12405_v30 = vadd.f32 %v30204_v25, %v12303_v20  ;;  %v30399_v43 = vld [vmem:[#allocation4 + $0x111] sm:$0xff] }
 0x6c3   : > { %24532 = vmatprep.mubr.msk.f32.mxu1 %vm527_vm1, %v30358_v28  ;;  %12440 = vst.msk [vmem:[#allocation4 + $0x141] sm:$0xff] %vm527_vm1, %v12406_v52  ;;  %v30501_v36 = vld [vmem:[#allocation4 + $0xb0] sm:$0xff]  ;;  %v30513_v20 = vld [vmem:[#allocation4 + $0xd8] sm:$0xff] }
 0x6c4   : > { %12480 = vst.msk [vmem:[#allocation4 + $0x143] sm:$0x40] %vm583_vm3, %v12406_v52  ;;  %v24496_v14 = vpop.f32.mrb[90].mxu1  ;;  %v30386_v1 = vld [vmem:[#allocation4 + $0x109] sm:$0xff] }
 0x6c5   : > { %12439 = vst.msk [vmem:[#allocation4 + $0x139] sm:$0xff] %vm527_vm1, %v12405_v30  ;;  %v12408_v27 = vadd.f32 %v24496_v14, %v30204_v25  ;;  %v12313_v38 = vpop.f32.mrb[91].mxu1  ;;  %v30509_v52 = vld [vmem:[#allocation4 + $0xc8] sm:$0xff]  ;;  %v30521_v14 = vld [vmem:[#allocation4 + $0xf0] sm:$0xff] }
 0x6c6   : > { %12462 = vst.msk [vmem:[#allocation4 + $0x137] sm:$0x2] %vm564_vm2, %v12405_v30  ;;  %24533 = vmatmul.mubr.msk.f32.gmra.mrb[114].mxu1 %vm527_vm1, %v30367_v32  ;;  %v12407_v39 = vadd.f32 %v30204_v25, %v12313_v38  ;;  %v30413_v60 = vld [vmem:[#allocation4 + $0x129] sm:$0xff]  ;;  %v30517_v30 = vld [vmem:[#allocation4 + $0xe0] sm:$0xff] }
 0x6c7   : > { %24535 = vmatprep.mubr.msk.f32.mxu1 %vm527_vm1, %v30372_v11  ;;  %12442 = vst.msk [vmem:[#allocation4 + $0x159] sm:$0xff] %vm527_vm1, %v12408_v27  ;;  %v30529_v38 = vld [vmem:[#allocation4 + $0x108] sm:$0xff] }
 0x6c8   : > { %12481 = vst.msk [vmem:[#allocation4 + $0x15b] sm:$0x40] %vm583_vm3, %v12408_v27  ;;  %v24499_v59 = vpop.f32.mrb[92].mxu1  ;;  %v30404_v12 = vld [vmem:[#allocation4 + $0x121] sm:$0xff]  ;;  %v30525_v27 = vld [vmem:[#allocation4 + $0xf8] sm:$0xff] }
 0x6c9   : > { %12441 = vst.msk [vmem:[#allocation4 + $0x151] sm:$0xff] %vm527_vm1, %v12407_v39  ;;  %v12410_v62 = vadd.f32 %v24499_v59, %v30204_v25  ;;  %v12323_v33 = vpop.f32.mrb[93].mxu1  ;;  %v30537_v59 = vld [vmem:[#allocation4 + $0x120] sm:$0xff] }
 0x6ca   : > { %12463 = vst.msk [vmem:[#allocation4 + $0x14f] sm:$0x2] %vm564_vm2, %v12407_v39  ;;  %24536 = vmatmul.mubr.msk.f32.gmra.mrb[116].mxu1 %vm527_vm1, %v30381_v17  ;;  %v12409_v40 = vadd.f32 %v30204_v25, %v12323_v33  ;;  %v30533_v39 = vld [vmem:[#allocation4 + $0x110] sm:$0xff] }
 0x6cb   : > { %24538 = vmatprep.mubr.msk.f32.mxu1 %vm527_vm1, %v30386_v1  ;;  %12444 = vst.msk [vmem:[#allocation4 + $0x171] sm:$0xff] %vm527_vm1, %v12410_v62  ;;  %12448 = vst.msk [vmem:[#allocation4 + $0x1a1] sm:$0xff] %vm527_vm1, %v12410_v62 }
 0x6cc   : > { %12482 = vst.msk [vmem:[#allocation4 + $0x173] sm:$0x40] %vm583_vm3, %v12410_v62  ;;  %12484 = vst.msk [vmem:[#allocation4 + $0x1a3] sm:$0x40] %vm583_vm3, %v12410_v62  ;;  %v24502_v29 = vpop.f32.mrb[94].mxu1  ;;  %v30417_v18 = vld [vmem:[#allocation4 + $0x139] sm:$0xff] }
 0x6cd   : > { %12443 = vst.msk [vmem:[#allocation4 + $0x169] sm:$0xff] %vm527_vm1, %v12409_v40  ;;  %12447 = vst.msk [vmem:[#allocation4 + $0x199] sm:$0xff] %vm527_vm1, %v12409_v40  ;;  %v12412_v24 = vadd.f32 %v24502_v29, %v30204_v25  ;;  %v12333_v34 = vpop.f32.mrb[95].mxu1  ;;  %v30541_v62 = vld [vmem:[#allocation4 + $0x128] sm:$0xff]  ;;  %v30545_v33 = vld [vmem:[#allocation4 + $0x138] sm:$0xff] }
 0x6ce   : > { %12464 = vst.msk [vmem:[#allocation4 + $0x167] sm:$0x2] %vm564_vm2, %v12409_v40  ;;  %12466 = vst.msk [vmem:[#allocation4 + $0x197] sm:$0x2] %vm564_vm2, %v12409_v40  ;;  %24539 = vmatmul.mubr.msk.f32.gmra.mrb[118].mxu1 %vm527_vm1, %v30399_v43  ;;  %v12411_v56 = vadd.f32 %v30204_v25, %v12333_v34  ;;  %v30421_v25 = vld [vmem:[#allocation4 + $0x141] sm:$0xff]  ;;  %v30429_v54 = vld [vmem:[#allocation4 + $0x159] sm:$0xff] }
 0x6cf   : > { %24541 = vmatprep.mubr.msk.f32.mxu1 %vm527_vm1, %v30404_v12  ;;  %12446 = vst.msk [vmem:[#allocation4 + $0x189] sm:$0xff] %vm527_vm1, %v12412_v24  ;;  %32735 = vst [vmem:[#allocation66_spill] sm:$0xff] %v30429_v54  ;;  %v30549_v40 = vld [vmem:[#allocation4 + $0x140] sm:$0xff] }
 0x6d0   : > { %12483 = vst.msk [vmem:[#allocation4 + $0x18b] sm:$0x40] %vm583_vm3, %v12412_v24  ;;  %v30425_v44 = vld [vmem:[#allocation4 + $0x151] sm:$0xff] }
 0x6d1   : > { %12445 = vst.msk [vmem:[#allocation4 + $0x181] sm:$0xff] %vm527_vm1, %v12411_v56  ;;  %v30553_v29 = vld [vmem:[#allocation4 + $0x150] sm:$0xff]  ;;  %v30557_v24 = vld [vmem:[#allocation4 + $0x158] sm:$0xff] }
 0x6d2   : > { %12465 = vst.msk [vmem:[#allocation4 + $0x17f] sm:$0x2] %vm564_vm2, %v12411_v56  ;;  %24542 = vmatmul.mubr.msk.f32.gmra.mrb[120].mxu1 %vm527_vm1, %v30413_v60  ;;  %v30437_v63 = vld [vmem:[#allocation4 + $0x171] sm:$0xff] }
 0x6d3   : > { %24544 = vmatprep.mubr.msk.f32.mxu1 %vm527_vm1, %v30417_v18  ;;  %32737 = vst [vmem:[#allocation70_spill] sm:$0xff] %v30437_v63 }
 0x6d4   : > { %v30433_v0 = vld [vmem:[#allocation4 + $0x169] sm:$0xff] }
 0x6d5   : > { %32736 = vst [vmem:[#allocation67_spill] sm:$0xff] %v30433_v0  ;;  %v30561_v34 = vld [vmem:[#allocation4 + $0x168] sm:$0xff]  ;;  %v30565_v56 = vld [vmem:[#allocation4 + $0x170] sm:$0xff] }
 0x6d6   : > { %24545 = vmatmul.mubr.msk.f32.gmra.mrb[122].mxu1 %vm527_vm1, %v30421_v25 }
 0x6d7   : > { %24547 = vmatprep.mubr.msk.f32.mxu1 %vm527_vm1, %v30425_v44 }
 0x6da   : > { %24548 = vmatmul.mubr.msk.f32.gmra.mrb[124].mxu1 %vm527_vm1, %v30429_v54  ;;  %v30589_v54 = vld [vmem:[#allocation4 + $0x32] sm:$0xff] }
 0x6db   : > { %24550 = vmatprep.mubr.msk.f32.mxu1 %vm527_vm1, %v30433_v0  ;;  %v32738_v0 = vrot.slane %v30238_v48, 4  ;;  %32740 = vst [vmem:[#allocation74_spill] sm:$0xff] %v30589_v54 }
 0x6de   : > { %24551 = vmatmul.mubr.msk.f32.gmra.mrb[126].mxu1 %vm527_vm1, %v30437_v63  ;;  %v30576_v63 = vld [vmem:[#allocation4 + $0x1a] sm:$0xff] }
 0x6df   : > { %24555 = vmatprep.mubr.msk.f32.mxu1 %vm527_vm1, %v12490_v37  ;;  %v13202_v37 = vld [vmem:[#allocation4 + $0x2] sm:$0xff] }
 0x6e2   : > { %24556 = vmatmul.mubr.msk.f32.vlgmr.msra.gmra.mrb[96].mxu1 %vm527_vm1, %v12491_v61  ;;  %v13203_v61 = vld [vmem:[#allocation4 + $0xa] sm:$0xff] }
 0x6e3   : > { %24604 = vmatpush3.msk.msra.mxu1 %vm769_vm0, %v30238_v48  ;;  %24558 = vmatprep.mubr.msk.f32.mxu1 %vm527_vm1, %v30444_v49  ;;  %v30597_v48 = vld [vmem:[#allocation4 + $0x4a] sm:$0xff] }
 0x6e4   : > { %24653 = vmatprep.subr.msk.mxu1 %vm769_vm0, %v32343_v9  ;;  %v30573_v9 = vld [vmem:[%s32168_s11 + $0x10] sm:$0xff]  ;;  %32742 = vst [vmem:[#allocation76_spill] sm:$0xff] %v30597_v48 }
 0x6e6   : > { %24559 = vmatmul.mubr.msk.f32.gmra.mrb[98].mxu1 %vm527_vm1, %v30453_v5 }
 0x6e7   : > { %24561 = vmatprep.mubr.msk.f32.mxu1 %vm527_vm1, %v30457_v47 }
 0x6ea   : > { %24562 = vmatmul.mubr.msk.f32.gmra.mrb[100].mxu1 %vm527_vm1, %v30461_v7 }
 0x6eb   : > { %24564 = vmatprep.mubr.msk.f32.mxu1 %vm527_vm1, %v30465_v21 }
 0x6ee   : > { %24565 = vmatmul.mubr.msk.f32.gmra.mrb[102].mxu1 %vm527_vm1, %v30469_v8 }
 0x6ef   : > { %24567 = vmatprep.mubr.msk.f32.mxu1 %vm527_vm1, %v30473_v13 }
 0x6f2   : > { %24568 = vmatmul.mubr.msk.f32.gmra.mrb[104].mxu1 %vm527_vm1, %v30477_v3 }
 0x6f3   : > { %24570 = vmatprep.mubr.msk.f32.mxu1 %vm527_vm1, %v30481_v22 }
 0x6f6   : > { %24571 = vmatmul.mubr.msk.f32.gmra.mrb[106].mxu1 %vm527_vm1, %v30485_v19 }
 0x6f7   : > { %24573 = vmatprep.mubr.msk.f32.mxu1 %vm527_vm1, %v30489_v57 }
 0x6fa   : > { %24574 = vmatmul.mubr.msk.f32.gmra.mrb[108].mxu1 %vm527_vm1, %v30493_v50 }
 0x6fb   : > { %24576 = vmatprep.mubr.msk.f32.mxu1 %vm527_vm1, %v30497_v15 }
 0x6fe   : > { %24577 = vmatmul.mubr.msk.f32.gmra.mrb[110].mxu1 %vm527_vm1, %v30501_v36 }
 0x6ff   : > { %24579 = vmatprep.mubr.msk.f32.mxu1 %vm527_vm1, %v30505_v53 }
 0x702   : > { %24580 = vmatmul.mubr.msk.f32.gmra.mrb[112].mxu1 %vm527_vm1, %v30509_v52 }
 0x703   : > { %24582 = vmatprep.mubr.msk.f32.mxu1 %vm527_vm1, %v30513_v20 }
 0x706   : > { %24583 = vmatmul.mubr.msk.f32.gmra.mrb[114].mxu1 %vm527_vm1, %v30517_v30 }
 0x707   : > { %24585 = vmatprep.mubr.msk.f32.mxu1 %vm527_vm1, %v30521_v14 }
 0x70a   : > { %24586 = vmatmul.mubr.msk.f32.gmra.mrb[116].mxu1 %vm527_vm1, %v30525_v27 }
 0x70b   : > { %24588 = vmatprep.mubr.msk.f32.mxu1 %vm527_vm1, %v30529_v38 }
 0x70e   : > { %24589 = vmatmul.mubr.msk.f32.gmra.mrb[118].mxu1 %vm527_vm1, %v30533_v39 }
 0x70f   : > { %24591 = vmatprep.mubr.msk.f32.mxu1 %vm527_vm1, %v30537_v59 }
 0x712   : > { %24592 = vmatmul.mubr.msk.f32.gmra.mrb[120].mxu1 %vm527_vm1, %v30541_v62 }
 0x713   : > { %24594 = vmatprep.mubr.msk.f32.mxu1 %vm527_vm1, %v30545_v33 }
 0x716   : > { %24595 = vmatmul.mubr.msk.f32.gmra.mrb[122].mxu1 %vm527_vm1, %v30549_v40 }
 0x717   : > { %24597 = vmatprep.mubr.msk.f32.mxu1 %vm527_vm1, %v30553_v29 }
 0x71a   : > { %24598 = vmatmul.mubr.msk.f32.gmra.mrb[124].mxu1 %vm527_vm1, %v30557_v24 }
 0x71b   : > { %24600 = vmatprep.mubr.msk.f32.mxu1 %vm527_vm1, %v30561_v34 }
 0x71e   : > { %24601 = vmatmul.mubr.msk.f32.gmra.mrb[126].mxu1 %vm527_vm1, %v30565_v56 }
 0x71f   : > { %24605 = vmatprep.mubr.msk.f32.mxu1 %vm527_vm1, %v13202_v37  ;;  %v30585_v37 = vld [vmem:[#allocation4 + $0x22] sm:$0xff] }
 0x720   : > { %32739 = vst [vmem:[#allocation71_spill] sm:$0xff] %v30585_v37 }
 0x722   : > { %24606 = vmatmul.mubr.msk.f32.vlgmr.msra.gmra.mrb[96].mxu1 %vm527_vm1, %v13203_v61  ;;  %v30593_v61 = vld [vmem:[#allocation4 + $0x3a] sm:$0xff] }
 0x723   : > { %24654 = vmatpush3.msk.msra.mxu1 %vm769_vm0, %v32738_v0  ;;  %24608 = vmatprep.mubr.msk.f32.mxu1 %vm527_vm1, %v30576_v63  ;;  %32741 = vst [vmem:[#allocation75_spill] sm:$0xff] %v30593_v61  ;;  %v30601_v0 = vld [vmem:[#allocation4 + $0x52] sm:$0xff] }
 0x724   : > { %24703 = vmatprep.subr.msk.mxu1 %vm769_vm0, %v30573_v9  ;;  %32743 = vst [vmem:[#allocation77_spill] sm:$0xff] %v30601_v0 }
 0x726   : > { %24609 = vmatmul.mubr.msk.f32.gmra.mrb[98].mxu1 %vm527_vm1, %v30585_v37  ;;  %v30605_v37 = vld [vmem:[#allocation4 + $0x62] sm:$0xff] }
 0x727   : > { %24611 = vmatprep.mubr.msk.f32.mxu1 %vm527_vm1, %v30589_v54  ;;  %32744 = vst [vmem:[#allocation78_spill] sm:$0xff] %v30605_v37  ;;  %v30609_v54 = vld [vmem:[#allocation4 + $0x6a] sm:$0xff] }
 0x728   : > { %32745 = vst [vmem:[#allocation79_spill] sm:$0xff] %v30609_v54 }
 0x72a   : > { %24612 = vmatmul.mubr.msk.f32.gmra.mrb[100].mxu1 %vm527_vm1, %v30593_v61  ;;  %v30613_v61 = vld [vmem:[#allocation4 + $0x7a] sm:$0xff] }
 0x72b   : > { %24614 = vmatprep.mubr.msk.f32.mxu1 %vm527_vm1, %v30597_v48  ;;  %32746 = vst [vmem:[#allocation80_spill] sm:$0xff] %v30613_v61  ;;  %v30617_v48 = vld [vmem:[#allocation4 + $0x82] sm:$0xff] }
 0x72c   : > { %32747 = vst [vmem:[#allocation81_spill] sm:$0xff] %v30617_v48 }
 0x72e   : > { %24615 = vmatmul.mubr.msk.f32.gmra.mrb[102].mxu1 %vm527_vm1, %v30601_v0  ;;  %v30621_v0 = vld [vmem:[#allocation4 + $0x92] sm:$0xff] }
 0x72f   : > { %24617 = vmatprep.mubr.msk.f32.mxu1 %vm527_vm1, %v30605_v37  ;;  %32748 = vst [vmem:[#allocation82_spill] sm:$0xff] %v30621_v0  ;;  %v30625_v37 = vld [vmem:[#allocation4 + $0x9a] sm:$0xff] }
 0x730   : > { %32749 = vst [vmem:[#allocation83_spill] sm:$0xff] %v30625_v37 }
 0x732   : > { %24618 = vmatmul.mubr.msk.f32.gmra.mrb[104].mxu1 %vm527_vm1, %v30609_v54  ;;  %v30629_v54 = vld [vmem:[#allocation4 + $0xaa] sm:$0xff] }
 0x733   : > { %24620 = vmatprep.mubr.msk.f32.mxu1 %vm527_vm1, %v30613_v61  ;;  %32750 = vst [vmem:[#allocation86_spill] sm:$0xff] %v30629_v54  ;;  %v30633_v61 = vld [vmem:[#allocation4 + $0xb2] sm:$0xff] }
 0x734   : > { %32751 = vst [vmem:[#allocation84_spill] sm:$0xff] %v30633_v61 }
 0x736   : > { %24621 = vmatmul.mubr.msk.f32.gmra.mrb[106].mxu1 %vm527_vm1, %v30617_v48  ;;  %v30637_v48 = vld [vmem:[#allocation4 + $0xc2] sm:$0xff] }
 0x737   : > { %24623 = vmatprep.mubr.msk.f32.mxu1 %vm527_vm1, %v30621_v0  ;;  %32752 = vst [vmem:[#allocation88_spill] sm:$0xff] %v30637_v48  ;;  %v30641_v0 = vld [vmem:[#allocation4 + $0xca] sm:$0xff] }
 0x738   : > { %32753 = vst [vmem:[#allocation85_spill] sm:$0xff] %v30641_v0 }
 0x73a   : > { %24624 = vmatmul.mubr.msk.f32.gmra.mrb[108].mxu1 %vm527_vm1, %v30625_v37  ;;  %v30645_v37 = vld [vmem:[#allocation4 + $0xda] sm:$0xff] }
 0x73b   : > { %24626 = vmatprep.mubr.msk.f32.mxu1 %vm527_vm1, %v30629_v54  ;;  %32754 = vst [vmem:[#allocation90_spill] sm:$0xff] %v30645_v37  ;;  %v30649_v54 = vld [vmem:[#allocation4 + $0xe2] sm:$0xff] }
 0x73c   : > { %32755 = vst [vmem:[#allocation87_spill] sm:$0xff] %v30649_v54 }
 0x73e   : > { %24627 = vmatmul.mubr.msk.f32.gmra.mrb[110].mxu1 %vm527_vm1, %v30633_v61  ;;  %v30653_v61 = vld [vmem:[#allocation4 + $0xf2] sm:$0xff] }
 0x73f   : > { %24629 = vmatprep.mubr.msk.f32.mxu1 %vm527_vm1, %v30637_v48  ;;  %32756 = vst [vmem:[#allocation92_spill] sm:$0xff] %v30653_v61  ;;  %v30657_v48 = vld [vmem:[#allocation4 + $0xfa] sm:$0xff] }
 0x740   : > { %32757 = vst [vmem:[#allocation89_spill] sm:$0xff] %v30657_v48 }
 0x742   : > { %24630 = vmatmul.mubr.msk.f32.gmra.mrb[112].mxu1 %vm527_vm1, %v30641_v0  ;;  %v30661_v0 = vld [vmem:[#allocation4 + $0x10a] sm:$0xff] }
 0x743   : > { %24632 = vmatprep.mubr.msk.f32.mxu1 %vm527_vm1, %v30645_v37  ;;  %32758 = vst [vmem:[#allocation94_spill] sm:$0xff] %v30661_v0  ;;  %v30665_v37 = vld [vmem:[#allocation4 + $0x112] sm:$0xff] }
 0x744   : > { %32759 = vst [vmem:[#allocation91_spill] sm:$0xff] %v30665_v37 }
 0x746   : > { %24633 = vmatmul.mubr.msk.f32.gmra.mrb[114].mxu1 %vm527_vm1, %v30649_v54  ;;  %v30669_v54 = vld [vmem:[#allocation4 + $0x122] sm:$0xff] }
 0x747   : > { %24635 = vmatprep.mubr.msk.f32.mxu1 %vm527_vm1, %v30653_v61  ;;  %32760 = vst [vmem:[#allocation96_spill] sm:$0xff] %v30669_v54  ;;  %v30673_v61 = vld [vmem:[#allocation4 + $0x12a] sm:$0xff] }
 0x748   : > { %32761 = vst [vmem:[#allocation93_spill] sm:$0xff] %v30673_v61 }
 0x74a   : > { %24636 = vmatmul.mubr.msk.f32.gmra.mrb[116].mxu1 %vm527_vm1, %v30657_v48  ;;  %v30677_v48 = vld [vmem:[#allocation4 + $0x13a] sm:$0xff] }
 0x74b   : > { %24638 = vmatprep.mubr.msk.f32.mxu1 %vm527_vm1, %v30661_v0  ;;  %32762 = vst [vmem:[#allocation98_spill] sm:$0xff] %v30677_v48  ;;  %v30681_v0 = vld [vmem:[#allocation4 + $0x142] sm:$0xff] }
 0x74e   : > { %24639 = vmatmul.mubr.msk.f32.gmra.mrb[118].mxu1 %vm527_vm1, %v30665_v37  ;;  %v30685_v37 = vld [vmem:[#allocation4 + $0x152] sm:$0xff] }
 0x74f   : > { %24641 = vmatprep.mubr.msk.f32.mxu1 %vm527_vm1, %v30669_v54  ;;  %32763 = vst [vmem:[#allocation95_spill] sm:$0xff] %v30685_v37  ;;  %v30689_v54 = vld [vmem:[#allocation4 + $0x15a] sm:$0xff] }
 0x752   : > { %24642 = vmatmul.mubr.msk.f32.gmra.mrb[120].mxu1 %vm527_vm1, %v30673_v61  ;;  %v30693_v61 = vld [vmem:[#allocation4 + $0x16a] sm:$0xff] }
 0x753   : > { %24644 = vmatprep.mubr.msk.f32.mxu1 %vm527_vm1, %v30677_v48  ;;  %32764 = vst [vmem:[#allocation100_spill] sm:$0xff] %v30693_v61  ;;  %v30697_v48 = vld [vmem:[#allocation4 + $0x172] sm:$0xff] }
 0x756   : > { %24645 = vmatmul.mubr.msk.f32.gmra.mrb[122].mxu1 %vm527_vm1, %v30681_v0 }
 0x757   : > { %24647 = vmatprep.mubr.msk.f32.mxu1 %vm527_vm1, %v30685_v37  ;;  %v14399_v37 = vrot.slane %v30573_v9, 4 }
 0x75a   : > { %24648 = vmatmul.mubr.msk.f32.gmra.mrb[124].mxu1 %vm527_vm1, %v30689_v54 }
 0x75b   : > { %24650 = vmatprep.mubr.msk.f32.mxu1 %vm527_vm1, %v30693_v61 }
 0x75e   : > { %24651 = vmatmul.mubr.msk.f32.gmra.mrb[126].mxu1 %vm527_vm1, %v30697_v48 }
 0x75f   : > { %24655 = vmatprep.mubr.msk.f32.mxu1 %vm527_vm1, %v30444_v49  ;;  %v30769_v49 = vld [vmem:[#allocation4 + $0x188] sm:$0xff] }
 0x762   : > { %24656 = vmatmul.mubr.msk.f32.vlgmr.msra.gmra.mrb[96].mxu1 %vm527_vm1, %v30453_v5  ;;  %v30778_v5 = vld [vmem:[%s32168_s11 + $0x18] sm:$0xff] }
 0x763   : > { %24704 = vmatpush3.msk.msra.mxu1 %vm769_vm0, %v30573_v9  ;;  %24658 = vmatprep.mubr.msk.f32.mxu1 %vm527_vm1, %v30457_v47  ;;  %v30765_v9 = vld [vmem:[#allocation4 + $0x180] sm:$0xff] }
 0x764   : > { %24753 = vmatprep.subr.msk.mxu1 %vm769_vm0, %v14399_v37 }
 0x766   : > { %24659 = vmatmul.mubr.msk.f32.gmra.mrb[98].mxu1 %vm527_vm1, %v30461_v7 }
 0x767   : > { %24661 = vmatprep.mubr.msk.f32.mxu1 %vm527_vm1, %v30465_v21 }
 0x76a   : > { %24662 = vmatmul.mubr.msk.f32.gmra.mrb[100].mxu1 %vm527_vm1, %v30469_v8 }
 0x76b   : > { %24664 = vmatprep.mubr.msk.f32.mxu1 %vm527_vm1, %v30473_v13 }
 0x76e   : > { %24665 = vmatmul.mubr.msk.f32.gmra.mrb[102].mxu1 %vm527_vm1, %v30477_v3 }
 0x76f   : > { %24667 = vmatprep.mubr.msk.f32.mxu1 %vm527_vm1, %v30481_v22 }
 0x772   : > { %24668 = vmatmul.mubr.msk.f32.gmra.mrb[104].mxu1 %vm527_vm1, %v30485_v19 }
 0x773   : > { %24670 = vmatprep.mubr.msk.f32.mxu1 %vm527_vm1, %v30489_v57 }
 0x776   : > { %24671 = vmatmul.mubr.msk.f32.gmra.mrb[106].mxu1 %vm527_vm1, %v30493_v50 }
 0x777   : > { %24673 = vmatprep.mubr.msk.f32.mxu1 %vm527_vm1, %v30497_v15 }
 0x77a   : > { %24674 = vmatmul.mubr.msk.f32.gmra.mrb[108].mxu1 %vm527_vm1, %v30501_v36 }
 0x77b   : > { %24676 = vmatprep.mubr.msk.f32.mxu1 %vm527_vm1, %v30505_v53 }
 0x77e   : > { %24677 = vmatmul.mubr.msk.f32.gmra.mrb[110].mxu1 %vm527_vm1, %v30509_v52 }
 0x77f   : > { %24679 = vmatprep.mubr.msk.f32.mxu1 %vm527_vm1, %v30513_v20 }
 0x782   : > { %24680 = vmatmul.mubr.msk.f32.gmra.mrb[112].mxu1 %vm527_vm1, %v30517_v30 }
 0x783   : > { %24682 = vmatprep.mubr.msk.f32.mxu1 %vm527_vm1, %v30521_v14 }
 0x786   : > { %24683 = vmatmul.mubr.msk.f32.gmra.mrb[114].mxu1 %vm527_vm1, %v30525_v27 }
 0x787   : > { %24685 = vmatprep.mubr.msk.f32.mxu1 %vm527_vm1, %v30529_v38 }
 0x78a   : > { %24686 = vmatmul.mubr.msk.f32.gmra.mrb[116].mxu1 %vm527_vm1, %v30533_v39 }
 0x78b   : > { %24688 = vmatprep.mubr.msk.f32.mxu1 %vm527_vm1, %v30537_v59 }
 0x78e   : > { %24689 = vmatmul.mubr.msk.f32.gmra.mrb[118].mxu1 %vm527_vm1, %v30541_v62 }
 0x78f   : > { %24691 = vmatprep.mubr.msk.f32.mxu1 %vm527_vm1, %v30545_v33 }
 0x792   : > { %24692 = vmatmul.mubr.msk.f32.gmra.mrb[120].mxu1 %vm527_vm1, %v30549_v40 }
 0x793   : > { %24694 = vmatprep.mubr.msk.f32.mxu1 %vm527_vm1, %v30553_v29 }
 0x796   : > { %24695 = vmatmul.mubr.msk.f32.gmra.mrb[122].mxu1 %vm527_vm1, %v30557_v24 }
 0x797   : > { %24697 = vmatprep.mubr.msk.f32.mxu1 %vm527_vm1, %v30561_v34 }
 0x79a   : > { %24698 = vmatmul.mubr.msk.f32.gmra.mrb[124].mxu1 %vm527_vm1, %v30565_v56 }
 0x79b   : > { %24700 = vmatprep.mubr.msk.f32.mxu1 %vm527_vm1, %v30765_v9 }
 0x79e   : > { %24701 = vmatmul.mubr.msk.f32.gmra.mrb[126].mxu1 %vm527_vm1, %v30769_v49 }
 0x79f   : > { %24705 = vmatprep.mubr.msk.f32.mxu1 %vm527_vm1, %v30242_v6  ;;  %v32765_v6 = vld [vmem:[#allocation66_spill] sm:$0xff] }
 0x7a2   : > { %24706 = vmatmul.mubr.msk.f32.vlgmr.msra.gmra.mrb[96].mxu1 %vm527_vm1, %v30255_v55  ;;  %v32766_v55 = vld [vmem:[#allocation67_spill] sm:$0xff] }
 0x7a3   : > { %24754 = vmatpush3.msk.msra.mxu1 %vm769_vm0, %v14399_v37  ;;  %24708 = vmatprep.mubr.msk.f32.mxu1 %vm527_vm1, %v30260_v58  ;;  %v32767_v58 = vld [vmem:[#allocation70_spill] sm:$0xff]  ;;  %v32774_v37 = vld [vmem:[#allocation79_spill] sm:$0xff] }
 0x7a4   : > { %24803 = vmatprep.subr.msk.mxu1 %vm769_vm0, %v30778_v5 }
 0x7a6   : > { %24709 = vmatmul.mubr.msk.f32.gmra.mrb[98].mxu1 %vm527_vm1, %v30269_v4  ;;  %v30841_v4 = vld [vmem:[#allocation4 + $0x181] sm:$0xff] }
 0x7a7   : > { %24711 = vmatprep.mubr.msk.f32.mxu1 %vm527_vm1, %v30274_v23  ;;  %v30845_v23 = vld [vmem:[#allocation4 + $0x189] sm:$0xff] }
 0x7aa   : > { %24712 = vmatmul.mubr.msk.f32.gmra.mrb[100].mxu1 %vm527_vm1, %v30283_v45  ;;  %v15176_v45 = vrot.slane %v30778_v5, 4 }
 0x7ab   : > { %24714 = vmatprep.mubr.msk.f32.mxu1 %vm527_vm1, %v30288_v41  ;;  %v32768_v41 = vld [vmem:[#allocation71_spill] sm:$0xff] }
 0x7ae   : > { %24715 = vmatmul.mubr.msk.f32.gmra.mrb[102].mxu1 %vm527_vm1, %v30297_v10  ;;  %v32769_v10 = vld [vmem:[#allocation74_spill] sm:$0xff] }
 0x7af   : > { %24717 = vmatprep.mubr.msk.f32.mxu1 %vm527_vm1, %v30302_v26  ;;  %v32770_v26 = vld [vmem:[#allocation75_spill] sm:$0xff] }
 0x7b2   : > { %24718 = vmatmul.mubr.msk.f32.gmra.mrb[104].mxu1 %vm527_vm1, %v30311_v46  ;;  %v32771_v46 = vld [vmem:[#allocation76_spill] sm:$0xff] }
 0x7b3   : > { %24720 = vmatprep.mubr.msk.f32.mxu1 %vm527_vm1, %v30316_v35  ;;  %v32772_v35 = vld [vmem:[#allocation77_spill] sm:$0xff] }
 0x7b6   : > { %24721 = vmatmul.mubr.msk.f32.gmra.mrb[106].mxu1 %vm527_vm1, %v30325_v42 }
 0x7b7   : > { %24723 = vmatprep.mubr.msk.f32.mxu1 %vm527_vm1, %v30330_v31 }
 0x7ba   : > { %24724 = vmatmul.mubr.msk.f32.gmra.mrb[108].mxu1 %vm527_vm1, %v30339_v16 }
 0x7bb   : > { %24726 = vmatprep.mubr.msk.f32.mxu1 %vm527_vm1, %v30344_v51 }
 0x7be   : > { %24727 = vmatmul.mubr.msk.f32.gmra.mrb[110].mxu1 %vm527_vm1, %v30353_v2 }
 0x7bf   : > { %24729 = vmatprep.mubr.msk.f32.mxu1 %vm527_vm1, %v30358_v28 }
 0x7c2   : > { %24730 = vmatmul.mubr.msk.f32.gmra.mrb[112].mxu1 %vm527_vm1, %v30367_v32 }
 0x7c3   : > { %24732 = vmatprep.mubr.msk.f32.mxu1 %vm527_vm1, %v30372_v11 }
 0x7c6   : > { %24733 = vmatmul.mubr.msk.f32.gmra.mrb[114].mxu1 %vm527_vm1, %v30381_v17 }
 0x7c7   : > { %24735 = vmatprep.mubr.msk.f32.mxu1 %vm527_vm1, %v30386_v1 }
 0x7ca   : > { %24736 = vmatmul.mubr.msk.f32.gmra.mrb[116].mxu1 %vm527_vm1, %v30399_v43 }
 0x7cb   : > { %24738 = vmatprep.mubr.msk.f32.mxu1 %vm527_vm1, %v30404_v12 }
 0x7ce   : > { %24739 = vmatmul.mubr.msk.f32.gmra.mrb[118].mxu1 %vm527_vm1, %v30413_v60 }
 0x7cf   : > { %24741 = vmatprep.mubr.msk.f32.mxu1 %vm527_vm1, %v30417_v18 }
 0x7d2   : > { %24742 = vmatmul.mubr.msk.f32.gmra.mrb[120].mxu1 %vm527_vm1, %v30421_v25 }
 0x7d3   : > { %24744 = vmatprep.mubr.msk.f32.mxu1 %vm527_vm1, %v30425_v44 }
 0x7d6   : > { %24745 = vmatmul.mubr.msk.f32.gmra.mrb[122].mxu1 %vm527_vm1, %v32765_v6 }
 0x7d7   : > { %24747 = vmatprep.mubr.msk.f32.mxu1 %vm527_vm1, %v32766_v55 }
 0x7da   : > { %24748 = vmatmul.mubr.msk.f32.gmra.mrb[124].mxu1 %vm527_vm1, %v32767_v58 }
 0x7db   : > { %24750 = vmatprep.mubr.msk.f32.mxu1 %vm527_vm1, %v30841_v4 }
 0x7de   : > { %24751 = vmatmul.mubr.msk.f32.gmra.mrb[126].mxu1 %vm527_vm1, %v30845_v23 }
 0x7df   : > { %24755 = vmatprep.mubr.msk.f32.mxu1 %vm527_vm1, %v30576_v63  ;;  %v32773_v63 = vld [vmem:[#allocation78_spill] sm:$0xff] }
 0x7e2   : > { %24756 = vmatmul.mubr.msk.f32.vlgmr.msra.gmra.mrb[96].mxu1 %vm527_vm1, %v32768_v41  ;;  %v32776_v41 = vld [vmem:[#allocation81_spill] sm:$0xff] }
 0x7e3   : > { %24804 = vmatpush3.msk.msra.mxu1 %vm769_vm0, %v30778_v5  ;;  %24758 = vmatprep.mubr.msk.f32.mxu1 %vm527_vm1, %v32769_v10  ;;  %v32775_v5 = vld [vmem:[#allocation80_spill] sm:$0xff]  ;;  %v32777_v10 = vld [vmem:[#allocation82_spill] sm:$0xff] }
 0x7e4   : > { %24853 = vmatprep.subr.msk.mxu1 %vm769_vm0, %v15176_v45 }
 0x7e6   : > { %24759 = vmatmul.mubr.msk.f32.gmra.mrb[98].mxu1 %vm527_vm1, %v32770_v26  ;;  %v32778_v26 = vld [vmem:[#allocation83_spill] sm:$0xff] }
 0x7e7   : > { %24761 = vmatprep.mubr.msk.f32.mxu1 %vm527_vm1, %v32771_v46  ;;  %v32779_v46 = vld [vmem:[#allocation86_spill] sm:$0xff] }
 0x7ea   : > { %24762 = vmatmul.mubr.msk.f32.gmra.mrb[100].mxu1 %vm527_vm1, %v32772_v35  ;;  %v32780_v35 = vld [vmem:[#allocation84_spill] sm:$0xff] }
 0x7eb   : > { %24764 = vmatprep.mubr.msk.f32.mxu1 %vm527_vm1, %v32773_v63  ;;  %v32781_v63 = vld [vmem:[#allocation88_spill] sm:$0xff] }
 0x7ee   : > { %24765 = vmatmul.mubr.msk.f32.gmra.mrb[102].mxu1 %vm527_vm1, %v32774_v37  ;;  %v32782_v37 = vld [vmem:[#allocation85_spill] sm:$0xff] }
 0x7ef   : > { %24767 = vmatprep.mubr.msk.f32.mxu1 %vm527_vm1, %v32775_v5  ;;  %v32783_v5 = vld [vmem:[#allocation90_spill] sm:$0xff] }
 0x7f2   : > { %24768 = vmatmul.mubr.msk.f32.gmra.mrb[104].mxu1 %vm527_vm1, %v32776_v41  ;;  %v32784_v41 = vld [vmem:[#allocation87_spill] sm:$0xff] }
 0x7f3   : > { %24770 = vmatprep.mubr.msk.f32.mxu1 %vm527_vm1, %v32777_v10  ;;  %v32785_v10 = vld [vmem:[#allocation92_spill] sm:$0xff] }
 0x7f6   : > { %24771 = vmatmul.mubr.msk.f32.gmra.mrb[106].mxu1 %vm527_vm1, %v32778_v26  ;;  %v32786_v26 = vld [vmem:[#allocation89_spill] sm:$0xff] }
 0x7f7   : > { %24773 = vmatprep.mubr.msk.f32.mxu1 %vm527_vm1, %v32779_v46  ;;  %v32787_v46 = vld [vmem:[#allocation94_spill] sm:$0xff] }
 0x7fa   : > { %24774 = vmatmul.mubr.msk.f32.gmra.mrb[108].mxu1 %vm527_vm1, %v32780_v35  ;;  %v32788_v35 = vld [vmem:[#allocation91_spill] sm:$0xff] }
 0x7fb   : > { %24776 = vmatprep.mubr.msk.f32.mxu1 %vm527_vm1, %v32781_v63  ;;  %v32789_v63 = vld [vmem:[#allocation96_spill] sm:$0xff] }
 0x7fe   : > { %24777 = vmatmul.mubr.msk.f32.gmra.mrb[110].mxu1 %vm527_vm1, %v32782_v37  ;;  %v32790_v37 = vld [vmem:[#allocation93_spill] sm:$0xff] }
 0x7ff   : > { %24779 = vmatprep.mubr.msk.f32.mxu1 %vm527_vm1, %v32783_v5  ;;  %v32791_v5 = vld [vmem:[#allocation98_spill] sm:$0xff] }
 0x802   : > { %24780 = vmatmul.mubr.msk.f32.gmra.mrb[112].mxu1 %vm527_vm1, %v32784_v41 }
 0x803   : > { %24782 = vmatprep.mubr.msk.f32.mxu1 %vm527_vm1, %v32785_v10  ;;  %v32792_v10 = vld [vmem:[#allocation95_spill] sm:$0xff] }
 0x806   : > { %24783 = vmatmul.mubr.msk.f32.gmra.mrb[114].mxu1 %vm527_vm1, %v32786_v26 }
 0x807   : > { %24785 = vmatprep.mubr.msk.f32.mxu1 %vm527_vm1, %v32787_v46 }
 0x80a   : > { %24786 = vmatmul.mubr.msk.f32.gmra.mrb[116].mxu1 %vm527_vm1, %v32788_v35 }
 0x80b   : > { %24788 = vmatprep.mubr.msk.f32.mxu1 %vm527_vm1, %v32789_v63  ;;  %v30913_v63 = vld [vmem:[#allocation4 + $0x182] sm:$0xff] }
 0x80e   : > { %24789 = vmatmul.mubr.msk.f32.gmra.mrb[118].mxu1 %vm527_vm1, %v32790_v37 }
 0x80f   : > { %24791 = vmatprep.mubr.msk.f32.mxu1 %vm527_vm1, %v32791_v5  ;;  %v30917_v5 = vld [vmem:[#allocation4 + $0x18a] sm:$0xff] }
 0x812   : > { %24792 = vmatmul.mubr.msk.f32.gmra.mrb[120].mxu1 %vm527_vm1, %v30681_v0 }
 0x813   : > { %24794 = vmatprep.mubr.msk.f32.mxu1 %vm527_vm1, %v32792_v10 }
 0x816   : > { %24795 = vmatmul.mubr.msk.f32.gmra.mrb[122].mxu1 %vm527_vm1, %v30689_v54 }
 0x817   : > { %24797 = vmatprep.mubr.msk.f32.mxu1 %vm527_vm1, %v30693_v61  ;;  %v12489_v61 = vld [vmem:[%s32168_s11 + $0x20] sm:$0xf] }
 0x81a   : > { %24798 = vmatmul.mubr.msk.f32.gmra.mrb[124].mxu1 %vm527_vm1, %v30697_v48 }
 0x81b   : > { %24800 = vmatprep.mubr.msk.f32.mxu1 %vm527_vm1, %v30913_v63 }
 0x81e   : > { %24801 = vmatmul.mubr.msk.f32.gmra.mrb[126].mxu1 %vm527_vm1, %v30917_v5 }
 0x81f   : > { %24805 = vmatprep.mubr.msk.f32.mxu1 %vm527_vm1, %v30457_v47  ;;  %v14786_v47 = vld [vmem:[#allocation4 + $0x198] sm:$0xff] }
 0x822   : > { %24806 = vmatmul.mubr.msk.f32.vlgmr.msra.gmra.mrb[96].mxu1 %vm527_vm1, %v30461_v7  ;;  %v14787_v7 = vld [vmem:[#allocation4 + $0x1a0] sm:$0xff] }
 0x823   : > { %24854 = vmatpush3.msk.msra.mxu1 %vm769_vm0, %v15176_v45  ;;  %24808 = vmatprep.mubr.msk.f32.mxu1 %vm527_vm1, %v30465_v21  ;;  %v15144_v21 = vld [vmem:[#allocation4 + $0x31] sm:$0xff] }
 0x824   : > { %24903 = vmatprep.subr.msk.mxu1 %vm769_vm0, %v12489_v61 }
 0x826   : > { %24809 = vmatmul.mubr.msk.f32.gmra.mrb[98].mxu1 %vm527_vm1, %v30469_v8  ;;  %v30991_v8 = vld [vmem:[%s32170_s13] sm:$0xff] }
 0x827   : > { %24811 = vmatprep.mubr.msk.f32.mxu1 %vm527_vm1, %v30473_v13  ;;  %v16197_v13 = vrot.slane %v30991_v8, 4 }
 0x829   : > { %24953 = vmatprep.subr.msk.mxu0 %vm769_vm0, %v16197_v13 }
 0x82a   : > { %24812 = vmatmul.mubr.msk.f32.gmra.mrb[100].mxu1 %vm527_vm1, %v30477_v3  ;;  %v15145_v3 = vld [vmem:[#allocation4 + $0x39] sm:$0xff]  ;;  %24954 = vmatpush3.msk.msra.mxu0 %vm769_vm0, %v16197_v13 }
 0x82b   : > { %24814 = vmatprep.mubr.msk.f32.mxu1 %vm527_vm1, %v30481_v22  ;;  %v15146_v22 = vld [vmem:[#allocation4 + $0x49] sm:$0xff]  ;;  %25003 = vmatprep.subr.msk.mxu0 %vm769_vm0, %v30991_v8 }
 0x82e   : > { %24815 = vmatmul.mubr.msk.f32.gmra.mrb[102].mxu1 %vm527_vm1, %v30485_v19  ;;  %v15147_v19 = vld [vmem:[#allocation4 + $0x51] sm:$0xff] }
 0x82f   : > { %24817 = vmatprep.mubr.msk.f32.mxu1 %vm527_vm1, %v30489_v57  ;;  %v15148_v57 = vld [vmem:[#allocation4 + $0x61] sm:$0xff] }
 0x832   : > { %24818 = vmatmul.mubr.msk.f32.gmra.mrb[104].mxu1 %vm527_vm1, %v30493_v50  ;;  %v15149_v50 = vld [vmem:[#allocation4 + $0x69] sm:$0xff] }
 0x833   : > { %24820 = vmatprep.mubr.msk.f32.mxu1 %vm527_vm1, %v30497_v15  ;;  %v15150_v15 = vld [vmem:[#allocation4 + $0x79] sm:$0xff] }
 0x836   : > { %24821 = vmatmul.mubr.msk.f32.gmra.mrb[106].mxu1 %vm527_vm1, %v30501_v36  ;;  %v15151_v36 = vld [vmem:[#allocation4 + $0x81] sm:$0xff] }
 0x837   : > { %24823 = vmatprep.mubr.msk.f32.mxu1 %vm527_vm1, %v30505_v53  ;;  %v15152_v53 = vld [vmem:[#allocation4 + $0x91] sm:$0xff] }
 0x83a   : > { %24824 = vmatmul.mubr.msk.f32.gmra.mrb[108].mxu1 %vm527_vm1, %v30509_v52  ;;  %v32807_v52 = vld [vmem:[#allocation90_spill] sm:$0xff] }
 0x83b   : > { %24826 = vmatprep.mubr.msk.f32.mxu1 %vm527_vm1, %v30513_v20  ;;  %v32808_v20 = vld [vmem:[#allocation92_spill] sm:$0xff] }
 0x83e   : > { %24827 = vmatmul.mubr.msk.f32.gmra.mrb[110].mxu1 %vm527_vm1, %v30517_v30  ;;  %v32809_v30 = vld [vmem:[#allocation96_spill] sm:$0xff] }
 0x83f   : > { %24829 = vmatprep.mubr.msk.f32.mxu1 %vm527_vm1, %v30521_v14  ;;  %v32810_v14 = vld [vmem:[#allocation98_spill] sm:$0xff] }
 0x842   : > { %24830 = vmatmul.mubr.msk.f32.gmra.mrb[112].mxu1 %vm527_vm1, %v30525_v27  ;;  %v32811_v27 = vld [vmem:[#allocation100_spill] sm:$0xff] }
 0x843   : > { %24832 = vmatprep.mubr.msk.f32.mxu1 %vm527_vm1, %v30529_v38  ;;  %v15562_v38 = vld [vmem:[#allocation4 + $0x19a] sm:$0xff] }
 0x846   : > { %24833 = vmatmul.mubr.msk.f32.gmra.mrb[114].mxu1 %vm527_vm1, %v30533_v39  ;;  %v15563_v39 = vld [vmem:[#allocation4 + $0x1a2] sm:$0xff] }
 0x847   : > { %24835 = vmatprep.mubr.msk.f32.mxu1 %vm527_vm1, %v30537_v59 }
 0x84a   : > { %24836 = vmatmul.mubr.msk.f32.gmra.mrb[116].mxu1 %vm527_vm1, %v30541_v62 }
 0x84b   : > { %24838 = vmatprep.mubr.msk.f32.mxu1 %vm527_vm1, %v30545_v33 }
 0x84e   : > { %24839 = vmatmul.mubr.msk.f32.gmra.mrb[118].mxu1 %vm527_vm1, %v30549_v40 }
 0x84f   : > { %24841 = vmatprep.mubr.msk.f32.mxu1 %vm527_vm1, %v30553_v29 }
 0x852   : > { %24842 = vmatmul.mubr.msk.f32.gmra.mrb[120].mxu1 %vm527_vm1, %v30557_v24 }
 0x853   : > { %24844 = vmatprep.mubr.msk.f32.mxu1 %vm527_vm1, %v30561_v34 }
 0x856   : > { %24845 = vmatmul.mubr.msk.f32.gmra.mrb[122].mxu1 %vm527_vm1, %v30565_v56 }
 0x857   : > { %24847 = vmatprep.mubr.msk.f32.mxu1 %vm527_vm1, %v30765_v9 }
 0x85a   : > { %24848 = vmatmul.mubr.msk.f32.gmra.mrb[124].mxu1 %vm527_vm1, %v30769_v49 }
 0x85b   : > { %24850 = vmatprep.mubr.msk.f32.mxu1 %vm527_vm1, %v14786_v47 }
 0x85e   : > { %24851 = vmatmul.mubr.msk.f32.gmra.mrb[126].mxu1 %vm527_vm1, %v14787_v7 }
 0x85f   : > { %24855 = vmatprep.mubr.msk.f32.mxu1 %vm527_vm1, %v15144_v21 }
 0x862   : > { %24856 = vmatmul.mubr.msk.f32.vlgmr.msra.gmra.mrb[96].mxu1 %vm527_vm1, %v15145_v3 }
 0x863   : > { %24904 = vmatpush3.msk.msra.mxu1 %vm769_vm0, %v12489_v61  ;;  %24858 = vmatprep.mubr.msk.f32.mxu1 %vm527_vm1, %v15146_v22 }
 0x866   : > { %24859 = vmatmul.mubr.msk.f32.gmra.mrb[98].mxu1 %vm527_vm1, %v15147_v19 }
 0x867   : > { %24861 = vmatprep.mubr.msk.f32.mxu1 %vm527_vm1, %v15148_v57 }
 0x86a   : > { %24862 = vmatmul.mubr.msk.f32.gmra.mrb[100].mxu1 %vm527_vm1, %v15149_v50 }
 0x86b   : > { %24864 = vmatprep.mubr.msk.f32.mxu1 %vm527_vm1, %v15150_v15 }
 0x86e   : > { %24865 = vmatmul.mubr.msk.f32.gmra.mrb[102].mxu1 %vm527_vm1, %v15151_v36 }
 0x86f   : > { %24867 = vmatprep.mubr.msk.f32.mxu1 %vm527_vm1, %v15152_v53 }
 0x872   : > { %24868 = vmatmul.mubr.msk.f32.gmra.mrb[104].mxu1 %vm527_vm1, %v30325_v42  ;;  %v15174_v42 = vld [vmem:[#allocation4 + $0x199] sm:$0xff] }
 0x873   : > { %24870 = vmatprep.mubr.msk.f32.mxu1 %vm527_vm1, %v30330_v31  ;;  %v15175_v31 = vld [vmem:[#allocation4 + $0x1a1] sm:$0xff] }
 0x876   : > { %24871 = vmatmul.mubr.msk.f32.gmra.mrb[106].mxu1 %vm527_vm1, %v30339_v16  ;;  %v32793_v16 = vld [vmem:[#allocation74_spill] sm:$0xff] }
 0x877   : > { %24873 = vmatprep.mubr.msk.f32.mxu1 %vm527_vm1, %v30344_v51  ;;  %v32794_v51 = vld [vmem:[#allocation75_spill] sm:$0xff] }
 0x87a   : > { %24874 = vmatmul.mubr.msk.f32.gmra.mrb[108].mxu1 %vm527_vm1, %v30353_v2  ;;  %v32795_v2 = vld [vmem:[#allocation76_spill] sm:$0xff] }
 0x87b   : > { %24876 = vmatprep.mubr.msk.f32.mxu1 %vm527_vm1, %v30358_v28  ;;  %v32796_v28 = vld [vmem:[#allocation77_spill] sm:$0xff] }
 0x87e   : > { %24877 = vmatmul.mubr.msk.f32.gmra.mrb[110].mxu1 %vm527_vm1, %v30367_v32  ;;  %v32797_v32 = vld [vmem:[#allocation78_spill] sm:$0xff] }
 0x87f   : > { %24879 = vmatprep.mubr.msk.f32.mxu1 %vm527_vm1, %v30372_v11  ;;  %v32798_v11 = vld [vmem:[#allocation79_spill] sm:$0xff] }
 0x882   : > { %24880 = vmatmul.mubr.msk.f32.gmra.mrb[112].mxu1 %vm527_vm1, %v30381_v17  ;;  %v32799_v17 = vld [vmem:[#allocation80_spill] sm:$0xff] }
 0x883   : > { %24882 = vmatprep.mubr.msk.f32.mxu1 %vm527_vm1, %v30386_v1  ;;  %v32800_v1 = vld [vmem:[#allocation81_spill] sm:$0xff] }
 0x886   : > { %24883 = vmatmul.mubr.msk.f32.gmra.mrb[114].mxu1 %vm527_vm1, %v30399_v43  ;;  %v32801_v43 = vld [vmem:[#allocation82_spill] sm:$0xff] }
 0x887   : > { %24885 = vmatprep.mubr.msk.f32.mxu1 %vm527_vm1, %v30404_v12  ;;  %v32802_v12 = vld [vmem:[#allocation83_spill] sm:$0xff] }
 0x88a   : > { %24886 = vmatmul.mubr.msk.f32.gmra.mrb[116].mxu1 %vm527_vm1, %v30413_v60  ;;  %v32803_v60 = vld [vmem:[#allocation86_spill] sm:$0xff] }
 0x88b   : > { %24888 = vmatprep.mubr.msk.f32.mxu1 %vm527_vm1, %v30417_v18  ;;  %v32804_v18 = vld [vmem:[#allocation84_spill] sm:$0xff] }
 0x88e   : > { %24889 = vmatmul.mubr.msk.f32.gmra.mrb[118].mxu1 %vm527_vm1, %v30421_v25  ;;  %v32805_v25 = vld [vmem:[#allocation88_spill] sm:$0xff] }
 0x88f   : > { %24891 = vmatprep.mubr.msk.f32.mxu1 %vm527_vm1, %v30425_v44  ;;  %v32806_v44 = vld [vmem:[#allocation85_spill] sm:$0xff] }
 0x892   : > { %24892 = vmatmul.mubr.msk.f32.gmra.mrb[120].mxu1 %vm527_vm1, %v32765_v6 }
 0x893   : > { %24894 = vmatprep.mubr.msk.f32.mxu1 %vm527_vm1, %v32766_v55 }
 0x896   : > { %24895 = vmatmul.mubr.msk.f32.gmra.mrb[122].mxu1 %vm527_vm1, %v32767_v58 }
 0x897   : > { %24897 = vmatprep.mubr.msk.f32.mxu1 %vm527_vm1, %v30841_v4 }
 0x89a   : > { %24898 = vmatmul.mubr.msk.f32.gmra.mrb[124].mxu1 %vm527_vm1, %v30845_v23 }
 0x89b   : > { %24900 = vmatprep.mubr.msk.f32.mxu1 %vm527_vm1, %v15174_v42  ;;  %v31153_v42 = vld [vmem:[%s32170_s13 + $0x8] sm:$0xff] }
 0x89e   : > { %24901 = vmatmul.mubr.msk.f32.gmra.mrb[126].mxu1 %vm527_vm1, %v15175_v31 }
 0x89f   : > { %24905 = vmatprep.mubr.msk.f32.mxu1 %vm527_vm1, %v32793_v16 }
 0x8a2   : > { %24906 = vmatmul.mubr.msk.f32.vlgmr.msra.gmra.mrb[96].mxu1 %vm527_vm1, %v32794_v51 }
 0x8a3   : > { %24908 = vmatprep.mubr.msk.f32.mxu1 %vm527_vm1, %v32795_v2 }
 0x8a6   : > { %24909 = vmatmul.mubr.msk.f32.gmra.mrb[98].mxu1 %vm527_vm1, %v32796_v28 }
 0x8a7   : > { %24911 = vmatprep.mubr.msk.f32.mxu1 %vm527_vm1, %v32797_v32 }
 0x8aa   : > { %24912 = vmatmul.mubr.msk.f32.gmra.mrb[100].mxu1 %vm527_vm1, %v32798_v11 }
 0x8ab   : > { %24914 = vmatprep.mubr.msk.f32.mxu1 %vm527_vm1, %v32799_v17 }
 0x8ae   : > { %24915 = vmatmul.mubr.msk.f32.gmra.mrb[102].mxu1 %vm527_vm1, %v32800_v1 }
 0x8af   : > { %24917 = vmatprep.mubr.msk.f32.mxu1 %vm527_vm1, %v32801_v43 }
 0x8b2   : > { %24918 = vmatmul.mubr.msk.f32.gmra.mrb[104].mxu1 %vm527_vm1, %v32802_v12 }
 0x8b3   : > { %24920 = vmatprep.mubr.msk.f32.mxu1 %vm527_vm1, %v32803_v60 }
 0x8b6   : > { %24921 = vmatmul.mubr.msk.f32.gmra.mrb[106].mxu1 %vm527_vm1, %v32804_v18 }
 0x8b7   : > { %24923 = vmatprep.mubr.msk.f32.mxu1 %vm527_vm1, %v32805_v25 }
 0x8ba   : > { %24924 = vmatmul.mubr.msk.f32.gmra.mrb[108].mxu1 %vm527_vm1, %v32806_v44 }
 0x8bb   : > { %24926 = vmatprep.mubr.msk.f32.mxu1 %vm527_vm1, %v32807_v52 }
 0x8be   : > { %24927 = vmatmul.mubr.msk.f32.gmra.mrb[110].mxu1 %vm527_vm1, %v32784_v41 }
 0x8bf   : > { %24929 = vmatprep.mubr.msk.f32.mxu1 %vm527_vm1, %v32808_v20 }
 0x8c2   : > { %24930 = vmatmul.mubr.msk.f32.gmra.mrb[112].mxu1 %vm527_vm1, %v32786_v26 }
 0x8c3   : > { %24932 = vmatprep.mubr.msk.f32.mxu1 %vm527_vm1, %v32787_v46 }
 0x8c6   : > { %24933 = vmatmul.mubr.msk.f32.gmra.mrb[114].mxu1 %vm527_vm1, %v32788_v35 }
 0x8c7   : > { %24935 = vmatprep.mubr.msk.f32.mxu1 %vm527_vm1, %v32809_v30 }
 0x8ca   : > { %24936 = vmatmul.mubr.msk.f32.gmra.mrb[116].mxu1 %vm527_vm1, %v32790_v37 }
 0x8cb   : > { %24938 = vmatprep.mubr.msk.f32.mxu1 %vm527_vm1, %v32810_v14 }
 0x8ce   : > { %24939 = vmatmul.mubr.msk.f32.gmra.mrb[118].mxu1 %vm527_vm1, %v30681_v0 }
 0x8cf   : > { %24941 = vmatprep.mubr.msk.f32.mxu1 %vm527_vm1, %v32792_v10 }
 0x8d2   : > { %24942 = vmatmul.mubr.msk.f32.gmra.mrb[120].mxu1 %vm527_vm1, %v30689_v54  ;;  %v31117_v54 = vld [vmem:[%s32169_s12] ss:$0 sm:$0xff] }
 0x8d3   : > { %24944 = vmatprep.mubr.msk.f32.mxu1 %vm527_vm1, %v32811_v27 }
 0x8d6   : > { %24945 = vmatmul.mubr.msk.f32.gmra.mrb[122].mxu1 %vm527_vm1, %v30697_v48 }
 0x8d7   : > { %24947 = vmatprep.mubr.msk.f32.mxu1 %vm527_vm1, %v30913_v63 }
 0x8da   : > { %24948 = vmatmul.mubr.msk.f32.gmra.mrb[124].mxu1 %vm527_vm1, %v30917_v5 }
 0x8db   : > { %24950 = vmatprep.mubr.msk.f32.mxu1 %vm527_vm1, %v15562_v38 }
 0x8de   : > { %24951 = vmatmul.mubr.msk.f32.gmra.mrb[126].mxu1 %vm527_vm1, %v15563_v39 }
 0x975   : > { %v24907_v59 = vpop.f32.mrb[96].mxu1 }
 0x976   : > { %v15928_v62 = vadd.f32 %v24907_v59, %v31117_v54  ;;  %v15729_v33 = vpop.f32.mrb[97].mxu1 }
 0x977   : > { %v15927_v40 = vadd.f32 %v31117_v54, %v15729_v33 }
 0x978   : > { %vm15960_vm5 = vcmp.ge.f32.partialorder %v15928_v62, 0.0  ;;  %v15992_v29 = vmul.f32 0.2, %v15928_v62 }
 0x979   : > { %vm15959_vm9 = vcmp.ge.f32.partialorder %v15927_v40, 0.0  ;;  %v15991_v24 = vmul.f32 0.2, %v15927_v40  ;;  %v24910_v34 = vpop.f32.mrb[98].mxu1 }
 0x97a   : > { %v16024_v56 = vsel %vm15960_vm5, %v15928_v62, %v15992_v29  ;;  %v15930_v61 = vadd.f32 %v24910_v34, %v31117_v54  ;;  %v15739_v48 = vpop.f32.mrb[99].mxu1 }
 0x97b   : > { %16058 = vst.msk [vmem:[#allocation5 + $0x21] sm:$0xff] %vm527_vm1, %v16024_v56  ;;  %v16023_v0 = vsel %vm15959_vm9, %v15927_v40, %v15991_v24  ;;  %v15929_v9 = vadd.f32 %v31117_v54, %v15739_v48 }
 0x97c   : > { %16110 = vst.msk [vmem:[#allocation5 + $0x23] sm:$0x40] %vm583_vm3, %v16024_v56  ;;  %vm15962_vm4 = vcmp.ge.f32.partialorder %v15930_v61, 0.0  ;;  %v15994_v49 = vmul.f32 0.2, %v15930_v61 }
 0x97d   : > { %16057 = vst.msk [vmem:[#allocation5 + $0x19] sm:$0xff] %vm527_vm1, %v16023_v0  ;;  %vm15961_vm6 = vcmp.ge.f32.partialorder %v15929_v9, 0.0  ;;  %v15993_v6 = vmul.f32 0.2, %v15929_v9  ;;  %v24913_v55 = vpop.f32.mrb[100].mxu1 }
 0x97e   : > { %16092 = vst.msk [vmem:[#allocation5 + $0x17] sm:$0x2] %vm564_vm2, %v16023_v0  ;;  %v16026_v58 = vsel %vm15962_vm4, %v15930_v61, %v15994_v49  ;;  %v15932_v4 = vadd.f32 %v24913_v55, %v31117_v54  ;;  %v15749_v23 = vpop.f32.mrb[101].mxu1 }
 0x97f   : > { %16056 = vst.msk [vmem:[#allocation5 + $0x9] sm:$0xff] %vm527_vm1, %v16026_v58  ;;  %16060 = vst.msk [vmem:[#allocation5 + $0x39] sm:$0xff] %vm527_vm1, %v16026_v58  ;;  %v16025_v45 = vsel %vm15961_vm6, %v15929_v9, %v15993_v6  ;;  %v15931_v10 = vadd.f32 %v31117_v54, %v15749_v23 }
 0x980   : > { %16109 = vst.msk [vmem:[#allocation5 + $0xb] sm:$0x40] %vm583_vm3, %v16026_v58  ;;  %16111 = vst.msk [vmem:[#allocation5 + $0x3b] sm:$0x40] %vm583_vm3, %v16026_v58  ;;  %vm15964_vm8 = vcmp.ge.f32.partialorder %v15932_v4, 0.0 }
 0x981   : > { %16055 = vst.msk [vmem:[#allocation5 + $0x1] sm:$0xff] %vm527_vm1, %v16025_v45  ;;  %16059 = vst.msk [vmem:[#allocation5 + $0x31] sm:$0xff] %vm527_vm1, %v16025_v45  ;;  %v15996_v26 = vmul.f32 0.2, %v15932_v4  ;;  %vm15963_vm10 = vcmp.ge.f32.partialorder %v15931_v10, 0.0  ;;  %v24916_v35 = vpop.f32.mrb[102].mxu1 }
 0x982   : > { %16091 = vst.msk [vmem:[#allocation5 - $0x1] sm:$0x2] %vm564_vm2, %v16025_v45  ;;  %16093 = vst.msk [vmem:[#allocation5 + $0x2f] sm:$0x2] %vm564_vm2, %v16025_v45  ;;  %v15995_v46 = vmul.f32 0.2, %v15931_v10  ;;  %v15934_v37 = vadd.f32 %v24916_v35, %v31117_v54 }
 0x983   : > { %v16028_v63 = vsel %vm15964_vm8, %v15932_v4, %v15996_v26  ;;  %v15759_v5 = vpop.f32.mrb[103].mxu1  ;;  %v31170_v1 = vld [vmem:[#allocation5 + $0x21] sm:$0xff] }
 0x984   : > { %16062 = vst.msk [vmem:[#allocation5 + $0x51] sm:$0xff] %vm527_vm1, %v16028_v63  ;;  %v16027_v41 = vsel %vm15963_vm10, %v15931_v10, %v15995_v46  ;;  %v15933_v47 = vadd.f32 %v31117_v54, %v15759_v5  ;;  %vm15966_vm11 = vcmp.ge.f32.partialorder %v15934_v37, 0.0  ;;  %v15998_v7 = vmul.f32 0.2, %v15934_v37  ;;  %v31156_v51 = vld [vmem:[#allocation5 + $0x19] sm:$0xff] }
 0x985   : > { %16112 = vst.msk [vmem:[#allocation5 + $0x53] sm:$0x40] %vm583_vm3, %v16028_v63  ;;  %v24919_v13 = vpop.f32.mrb[104].mxu1 }
 0x986   : > { %16061 = vst.msk [vmem:[#allocation5 + $0x49] sm:$0xff] %vm527_vm1, %v16027_v41  ;;  %vm15965_vm12 = vcmp.ge.f32.partialorder %v15933_v47, 0.0  ;;  %v15997_v21 = vmul.f32 0.2, %v15933_v47  ;;  %v16030_v3 = vsel %vm15966_vm11, %v15934_v37, %v15998_v7  ;;  %v15936_v22 = vadd.f32 %v24919_v13, %v31117_v54  ;;  %v15769_v19 = vpop.f32.mrb[105].mxu1  ;;  %v16165_v53 = vld [vmem:[#allocation5 + $0x9] sm:$0xff] }
 0x987   : > { %16094 = vst.msk [vmem:[#allocation5 + $0x47] sm:$0x2] %vm564_vm2, %v16027_v41  ;;  %v15935_v50 = vadd.f32 %v31117_v54, %v15769_v19  ;;  %v31184_v14 = vld [vmem:[#allocation5 + $0x39] sm:$0xff] }
 0x988   : > { %16064 = vst.msk [vmem:[#allocation5 + $0x69] sm:$0xff] %vm527_vm1, %v16030_v3  ;;  %v16029_v57 = vsel %vm15965_vm12, %v15933_v47, %v15997_v21  ;;  %v16164_v15 = vld [vmem:[#allocation5 + $0x1] sm:$0xff]  ;;  %vm15968_vm13 = vcmp.ge.f32.partialorder %v15936_v22, 0.0  ;;  %v16000_v36 = vmul.f32 0.2, %v15936_v22  ;;  %v31174_v60 = vld [vmem:[#allocation5 + $0x31] sm:$0xff] }
 0x989   : > { %16113 = vst.msk [vmem:[#allocation5 + $0x6b] sm:$0x40] %vm583_vm3, %v16030_v3  ;;  %24955 = vmatprep.mubr.msk.f32.mxu0 %vm527_vm1, %v16164_v15  ;;  %vm15967_vm14 = vcmp.ge.f32.partialorder %v15935_v50, 0.0  ;;  %v15999_v31 = vmul.f32 0.2, %v15935_v50  ;;  %v24922_v16 = vpop.f32.mrb[106].mxu1 }
 0x98a   : > { %16063 = vst.msk [vmem:[#allocation5 + $0x61] sm:$0xff] %vm527_vm1, %v16029_v57  ;;  %24956 = vmatmul.mubr.msk.f32.vlgmr.msra.gmra.mrb[64].mxu0 %vm527_vm1, %v16165_v53  ;;  %v16032_v2 = vsel %vm15968_vm13, %v15936_v22, %v16000_v36  ;;  %v15938_v28 = vadd.f32 %v24922_v16, %v31117_v54  ;;  %v15779_v32 = vpop.f32.mrb[107].mxu1 }
 0x98b   : > { %16095 = vst.msk [vmem:[#allocation5 + $0x5f] sm:$0x2] %vm564_vm2, %v16029_v57  ;;  %25004 = vmatpush3.msk.msra.mxu0 %vm769_vm0, %v30991_v8  ;;  %24958 = vmatprep.mubr.msk.f32.mxu0 %vm527_vm1, %v31156_v51  ;;  %v16031_v11 = vsel %vm15967_vm14, %v15935_v50, %v15999_v31  ;;  %v15937_v17 = vadd.f32 %v31117_v54, %v15779_v32  ;;  %v31198_v34 = vld [vmem:[#allocation5 + $0x51] sm:$0xff] }
 0x98c   : > { %16066 = vst.msk [vmem:[#allocation5 + $0x81] sm:$0xff] %vm527_vm1, %v16032_v2  ;;  %25053 = vmatprep.subr.msk.mxu0 %vm769_vm0, %v31153_v42  ;;  %16065 = vst.msk [vmem:[#allocation5 + $0x79] sm:$0xff] %vm527_vm1, %v16031_v11  ;;  %vm15970_vm15 = vcmp.ge.f32.partialorder %v15938_v28, 0.0  ;;  %v16002_v8 = vmul.f32 0.2, %v15938_v28 }
 0x98d   : > { %16114 = vst.msk [vmem:[#allocation5 + $0x83] sm:$0x40] %vm583_vm3, %v16032_v2  ;;  %vm15969_vm7 = vcmp.ge.f32.partialorder %v15937_v17, 0.0  ;;  %v16001_v43 = vmul.f32 0.2, %v15937_v17  ;;  %v24925_v12 = vpop.f32.mrb[108].mxu1 }
 0x98e   : > { %16096 = vst.msk [vmem:[#allocation5 + $0x77] sm:$0x2] %vm564_vm2, %v16031_v11  ;;  %24959 = vmatmul.mubr.msk.f32.gmra.mrb[66].mxu0 %vm527_vm1, %v31170_v1  ;;  %v16034_v18 = vsel %vm15970_vm15, %v15938_v28, %v16002_v8  ;;  %v15940_v25 = vadd.f32 %v24925_v12, %v31117_v54  ;;  %v15789_v44 = vpop.f32.mrb[109].mxu1  ;;  %v31188_v39 = vld [vmem:[#allocation5 + $0x49] sm:$0xff] }
 0x98f   : > { %24961 = vmatprep.mubr.msk.f32.mxu0 %vm527_vm1, %v31174_v60  ;;  %16068 = vst.msk [vmem:[#allocation5 + $0x99] sm:$0xff] %vm527_vm1, %v16034_v18  ;;  %v16033_v52 = vsel %vm15969_vm7, %v15937_v17, %v16001_v43  ;;  %v15939_v20 = vadd.f32 %v31117_v54, %v15789_v44  ;;  %v31212_v4 = vld [vmem:[#allocation5 + $0x69] sm:$0xff] }
 0x990   : > { %16115 = vst.msk [vmem:[#allocation5 + $0x9b] sm:$0x40] %vm583_vm3, %v16034_v18  ;;  %vm15972_vm5 = vcmp.ge.f32.partialorder %v15940_v25, 0.0  ;;  %v16004_v30 = vmul.f32 0.2, %v15940_v25 }
 0x991   : > { %16067 = vst.msk [vmem:[#allocation5 + $0x91] sm:$0xff] %vm527_vm1, %v16033_v52  ;;  %vm15971_vm9 = vcmp.ge.f32.partialorder %v15939_v20, 0.0  ;;  %v16003_v27 = vmul.f32 0.2, %v15939_v20  ;;  %v24928_v38 = vpop.f32.mrb[110].mxu1  ;;  %v31202_v48 = vld [vmem:[#allocation5 + $0x61] sm:$0xff] }
 0x992   : > { %16097 = vst.msk [vmem:[#allocation5 + $0x8f] sm:$0x2] %vm564_vm2, %v16033_v52  ;;  %24962 = vmatmul.mubr.msk.f32.gmra.mrb[68].mxu0 %vm527_vm1, %v31184_v14  ;;  %v16036_v59 = vsel %vm15972_vm5, %v15940_v25, %v16004_v30  ;;  %v15942_v62 = vadd.f32 %v24928_v38, %v31117_v54  ;;  %v15799_v33 = vpop.f32.mrb[111].mxu1 }
 0x993   : > { %24964 = vmatprep.mubr.msk.f32.mxu0 %vm527_vm1, %v31188_v39  ;;  %16070 = vst.msk [vmem:[#allocation5 + $0xb1] sm:$0xff] %vm527_vm1, %v16036_v59  ;;  %v16035_v40 = vsel %vm15971_vm9, %v15939_v20, %v16003_v27  ;;  %v15941_v29 = vadd.f32 %v31117_v54, %v15799_v33  ;;  %v31216_v10 = vld [vmem:[#allocation5 + $0x79] sm:$0xff]  ;;  %v31226_v41 = vld [vmem:[#allocation5 + $0x81] sm:$0xff] }
 0x994   : > { %16116 = vst.msk [vmem:[#allocation5 + $0xb3] sm:$0x40] %vm583_vm3, %v16036_v59  ;;  %vm15974_vm4 = vcmp.ge.f32.partialorder %v15942_v62, 0.0  ;;  %v16006_v24 = vmul.f32 0.2, %v15942_v62 }
 0x995   : > { %16069 = vst.msk [vmem:[#allocation5 + $0xa9] sm:$0xff] %vm527_vm1, %v16035_v40  ;;  %vm15973_vm6 = vcmp.ge.f32.partialorder %v15941_v29, 0.0  ;;  %v16005_v56 = vmul.f32 0.2, %v15941_v29  ;;  %v24931_v61 = vpop.f32.mrb[112].mxu1 }
 0x996   : > { %16098 = vst.msk [vmem:[#allocation5 + $0xa7] sm:$0x2] %vm564_vm2, %v16035_v40  ;;  %24965 = vmatmul.mubr.msk.f32.gmra.mrb[70].mxu0 %vm527_vm1, %v31198_v34  ;;  %v16038_v0 = vsel %vm15974_vm4, %v15942_v62, %v16006_v24  ;;  %v15944_v9 = vadd.f32 %v24931_v61, %v31117_v54  ;;  %v15809_v49 = vpop.f32.mrb[113].mxu1  ;;  %v31240_v15 = vld [vmem:[#allocation5 + $0x99] sm:$0xff] }
 0x997   : > { %24967 = vmatprep.mubr.msk.f32.mxu0 %vm527_vm1, %v31202_v48  ;;  %16072 = vst.msk [vmem:[#allocation5 + $0xc9] sm:$0xff] %vm527_vm1, %v16038_v0  ;;  %v16037_v6 = vsel %vm15973_vm6, %v15941_v29, %v16005_v56  ;;  %v15943_v55 = vadd.f32 %v31117_v54, %v15809_v49 }
 0x998   : > { %16117 = vst.msk [vmem:[#allocation5 + $0xcb] sm:$0x40] %vm583_vm3, %v16038_v0  ;;  %vm15976_vm8 = vcmp.ge.f32.partialorder %v15944_v9, 0.0  ;;  %v16008_v58 = vmul.f32 0.2, %v15944_v9  ;;  %v31230_v21 = vld [vmem:[#allocation5 + $0x91] sm:$0xff] }
 0x999   : > { %16071 = vst.msk [vmem:[#allocation5 + $0xc1] sm:$0xff] %vm527_vm1, %v16037_v6  ;;  %vm15975_vm10 = vcmp.ge.f32.partialorder %v15943_v55, 0.0  ;;  %v16007_v23 = vmul.f32 0.2, %v15943_v55  ;;  %v24934_v45 = vpop.f32.mrb[114].mxu1 }
 0x99a   : > { %16099 = vst.msk [vmem:[#allocation5 + $0xbf] sm:$0x2] %vm564_vm2, %v16037_v6  ;;  %24968 = vmatmul.mubr.msk.f32.gmra.mrb[72].mxu0 %vm527_vm1, %v31212_v4  ;;  %v16040_v26 = vsel %vm15976_vm8, %v15944_v9, %v16008_v58  ;;  %v15946_v46 = vadd.f32 %v24934_v45, %v31117_v54  ;;  %v15819_v35 = vpop.f32.mrb[115].mxu1  ;;  %v31254_v8 = vld [vmem:[#allocation5 + $0xb1] sm:$0xff] }
 0x99b   : > { %24970 = vmatprep.mubr.msk.f32.mxu0 %vm527_vm1, %v31216_v10  ;;  %16074 = vst.msk [vmem:[#allocation5 + $0xe1] sm:$0xff] %vm527_vm1, %v16040_v26  ;;  %v16039_v63 = vsel %vm15975_vm10, %v15943_v55, %v16007_v23  ;;  %v15945_v37 = vadd.f32 %v31117_v54, %v15819_v35 }
 0x99c   : > { %16118 = vst.msk [vmem:[#allocation5 + $0xe3] sm:$0x40] %vm583_vm3, %v16040_v26  ;;  %vm15978_vm11 = vcmp.ge.f32.partialorder %v15946_v46, 0.0  ;;  %v16010_v5 = vmul.f32 0.2, %v15946_v46  ;;  %v31244_v31 = vld [vmem:[#allocation5 + $0xa9] sm:$0xff] }
 0x99d   : > { %16073 = vst.msk [vmem:[#allocation5 + $0xd9] sm:$0xff] %vm527_vm1, %v16039_v63  ;;  %vm15977_vm12 = vcmp.ge.f32.partialorder %v15945_v37, 0.0  ;;  %v16009_v47 = vmul.f32 0.2, %v15945_v37  ;;  %v24937_v7 = vpop.f32.mrb[116].mxu1 }
 0x99e   : > { %16100 = vst.msk [vmem:[#allocation5 + $0xd7] sm:$0x2] %vm564_vm2, %v16039_v63  ;;  %24971 = vmatmul.mubr.msk.f32.gmra.mrb[74].mxu0 %vm527_vm1, %v31226_v41  ;;  %v16042_v13 = vsel %vm15978_vm11, %v15946_v46, %v16010_v5  ;;  %v15948_v3 = vadd.f32 %v24937_v7, %v31117_v54  ;;  %v15829_v22 = vpop.f32.mrb[117].mxu1  ;;  %v31268_v38 = vld [vmem:[#allocation5 + $0xc9] sm:$0xff] }
 0x99f   : > { %24973 = vmatprep.mubr.msk.f32.mxu0 %vm527_vm1, %v31230_v21  ;;  %16076 = vst.msk [vmem:[#allocation5 + $0xf9] sm:$0xff] %vm527_vm1, %v16042_v13  ;;  %v16041_v19 = vsel %vm15977_vm12, %v15945_v37, %v16009_v47  ;;  %v15947_v57 = vadd.f32 %v31117_v54, %v15829_v22 }
 0x9a0   : > { %16119 = vst.msk [vmem:[#allocation5 + $0xfb] sm:$0x40] %vm583_vm3, %v16042_v13  ;;  %vm15980_vm13 = vcmp.ge.f32.partialorder %v15948_v3, 0.0  ;;  %v16012_v50 = vmul.f32 0.2, %v15948_v3  ;;  %v31258_v18 = vld [vmem:[#allocation5 + $0xc1] sm:$0xff] }
 0x9a1   : > { %16075 = vst.msk [vmem:[#allocation5 + $0xf1] sm:$0xff] %vm527_vm1, %v16041_v19  ;;  %vm15979_vm14 = vcmp.ge.f32.partialorder %v15947_v57, 0.0  ;;  %v16011_v36 = vmul.f32 0.2, %v15947_v57  ;;  %v24940_v53 = vpop.f32.mrb[118].mxu1 }
 0x9a2   : > { %16101 = vst.msk [vmem:[#allocation5 + $0xef] sm:$0x2] %vm564_vm2, %v16041_v19  ;;  %24974 = vmatmul.mubr.msk.f32.gmra.mrb[76].mxu0 %vm527_vm1, %v31240_v15  ;;  %v16044_v16 = vsel %vm15980_vm13, %v15948_v3, %v16012_v50  ;;  %v15950_v2 = vadd.f32 %v24940_v53, %v31117_v54  ;;  %v15839_v28 = vpop.f32.mrb[119].mxu1  ;;  %v31282_v9 = vld [vmem:[#allocation5 + $0xe1] sm:$0xff] }
 0x9a3   : > { %24976 = vmatprep.mubr.msk.f32.mxu0 %vm527_vm1, %v31244_v31  ;;  %16078 = vst.msk [vmem:[#allocation5 + $0x111] sm:$0xff] %vm527_vm1, %v16044_v16  ;;  %v16043_v32 = vsel %vm15979_vm14, %v15947_v57, %v16011_v36  ;;  %v15949_v11 = vadd.f32 %v31117_v54, %v15839_v28 }
 0x9a4   : > { %16120 = vst.msk [vmem:[#allocation5 + $0x113] sm:$0x40] %vm583_vm3, %v16044_v16  ;;  %vm15982_vm15 = vcmp.ge.f32.partialorder %v15950_v2, 0.0  ;;  %v16014_v17 = vmul.f32 0.2, %v15950_v2  ;;  %v31272_v33 = vld [vmem:[#allocation5 + $0xd9] sm:$0xff] }
 0x9a5   : > { %16077 = vst.msk [vmem:[#allocation5 + $0x109] sm:$0xff] %vm527_vm1, %v16043_v32  ;;  %vm15981_vm7 = vcmp.ge.f32.partialorder %v15949_v11, 0.0  ;;  %v16013_v43 = vmul.f32 0.2, %v15949_v11  ;;  %v24943_v12 = vpop.f32.mrb[120].mxu1 }
 0x9a6   : > { %16102 = vst.msk [vmem:[#allocation5 + $0x107] sm:$0x2] %vm564_vm2, %v16043_v32  ;;  %24977 = vmatmul.mubr.msk.f32.gmra.mrb[78].mxu0 %vm527_vm1, %v31254_v8  ;;  %v16046_v25 = vsel %vm15982_vm15, %v15950_v2, %v16014_v17  ;;  %v15952_v44 = vadd.f32 %v24943_v12, %v31117_v54  ;;  %v15849_v52 = vpop.f32.mrb[121].mxu1  ;;  %v31296_v63 = vld [vmem:[#allocation5 + $0xf9] sm:$0xff] }
 0x9a7   : > { %24979 = vmatprep.mubr.msk.f32.mxu0 %vm527_vm1, %v31258_v18  ;;  %16080 = vst.msk [vmem:[#allocation5 + $0x129] sm:$0xff] %vm527_vm1, %v16046_v25  ;;  %v16045_v20 = vsel %vm15981_vm7, %v15949_v11, %v16013_v43  ;;  %v15951_v30 = vadd.f32 %v31117_v54, %v15849_v52  ;;  %v16133_v52 = vld [vmem:[#allocation5 + $0x8] sm:$0xff] }
 0x9a8   : > { %16121 = vst.msk [vmem:[#allocation5 + $0x12b] sm:$0x40] %vm583_vm3, %v16046_v25  ;;  %vm15984_vm5 = vcmp.ge.f32.partialorder %v15952_v44, 0.0  ;;  %v16016_v27 = vmul.f32 0.2, %v15952_v44  ;;  %v31286_v55 = vld [vmem:[#allocation5 + $0xf1] sm:$0xff] }
 0x9a9   : > { %16079 = vst.msk [vmem:[#allocation5 + $0x121] sm:$0xff] %vm527_vm1, %v16045_v20  ;;  %vm15983_vm9 = vcmp.ge.f32.partialorder %v15951_v30, 0.0  ;;  %v16015_v59 = vmul.f32 0.2, %v15951_v30  ;;  %v24946_v62 = vpop.f32.mrb[122].mxu1  ;;  %v16132_v25 = vld [vmem:[#allocation5] sm:$0xff] }
 0x9aa   : > { %16103 = vst.msk [vmem:[#allocation5 + $0x11f] sm:$0x2] %vm564_vm2, %v16045_v20  ;;  %24980 = vmatmul.mubr.msk.f32.gmra.mrb[80].mxu0 %vm527_vm1, %v31268_v38  ;;  %v16048_v40 = vsel %vm15984_vm5, %v15952_v44, %v16016_v27  ;;  %v15954_v29 = vadd.f32 %v24946_v62, %v31117_v54  ;;  %v15859_v24 = vpop.f32.mrb[123].mxu1  ;;  %v31314_v50 = vld [vmem:[#allocation5 + $0x111] sm:$0xff]  ;;  %v32400_v44 = vrot.slane %v31153_v42, 4  ;;  %v31378_v62 = vld [vmem:[#allocation5 + $0x48] sm:$0xff] }
 0x9ab   : > { %24982 = vmatprep.mubr.msk.f32.mxu0 %vm527_vm1, %v31272_v33  ;;  %16082 = vst.msk [vmem:[#allocation5 + $0x141] sm:$0xff] %vm527_vm1, %v16048_v40  ;;  %v16047_v56 = vsel %vm15983_vm9, %v15951_v30, %v16015_v59  ;;  %v15953_v61 = vadd.f32 %v31117_v54, %v15859_v24  ;;  %v31357_v20 = vld [vmem:[#allocation5 + $0x18] sm:$0xff]  ;;  %v31366_v30 = vld [vmem:[#allocation5 + $0x20] sm:$0xff]  ;;  %v31370_v27 = vld [vmem:[#allocation5 + $0x30] sm:$0xff] }
 0x9ac   : > { %16122 = vst.msk [vmem:[#allocation5 + $0x143] sm:$0x40] %vm583_vm3, %v16048_v40  ;;  %vm15986_vm4 = vcmp.ge.f32.partialorder %v15954_v29, 0.0  ;;  %v16018_v0 = vmul.f32 0.2, %v15954_v29  ;;  %v31300_v47 = vld [vmem:[#allocation5 + $0x109] sm:$0xff] }
 0x9ad   : > { %16081 = vst.msk [vmem:[#allocation5 + $0x139] sm:$0xff] %vm527_vm1, %v16047_v56  ;;  %vm15985_vm6 = vcmp.ge.f32.partialorder %v15953_v61, 0.0  ;;  %v16017_v49 = vmul.f32 0.2, %v15953_v61  ;;  %v24949_v6 = vpop.f32.mrb[124].mxu1  ;;  %v31374_v59 = vld [vmem:[#allocation5 + $0x38] sm:$0xff] }
 0x9ae   : > { %16104 = vst.msk [vmem:[#allocation5 + $0x137] sm:$0x2] %vm564_vm2, %v16047_v56  ;;  %24983 = vmatmul.mubr.msk.f32.gmra.mrb[82].mxu0 %vm527_vm1, %v31282_v9  ;;  %v16050_v58 = vsel %vm15986_vm4, %v15954_v29, %v16018_v0  ;;  %v15956_v23 = vadd.f32 %v24949_v6, %v31117_v54  ;;  %v15869_v45 = vpop.f32.mrb[125].mxu1  ;;  %v31326_v2 = vld [vmem:[#allocation5 + $0x129] sm:$0xff]  ;;  %v31386_v29 = vld [vmem:[#allocation5 + $0x60] sm:$0xff]  ;;  %v31394_v56 = vld [vmem:[#allocation5 + $0x78] sm:$0xff] }
 0x9af   : > { %24985 = vmatprep.mubr.msk.f32.mxu0 %vm527_vm1, %v31286_v55  ;;  %16084 = vst.msk [vmem:[#allocation5 + $0x159] sm:$0xff] %vm527_vm1, %v16050_v58  ;;  %v16049_v26 = vsel %vm15985_vm6, %v15953_v61, %v16017_v49  ;;  %v15955_v46 = vadd.f32 %v31117_v54, %v15869_v45  ;;  %v31382_v40 = vld [vmem:[#allocation5 + $0x50] sm:$0xff]  ;;  %v31390_v24 = vld [vmem:[#allocation5 + $0x68] sm:$0xff]  ;;  %v31398_v61 = vld [vmem:[#allocation5 + $0x80] sm:$0xff] }
 0x9b0   : > { %16123 = vst.msk [vmem:[#allocation5 + $0x15b] sm:$0x40] %vm583_vm3, %v16050_v58  ;;  %vm15988_vm8 = vcmp.ge.f32.partialorder %v15956_v23, 0.0  ;;  %v16020_v35 = vmul.f32 0.2, %v15956_v23  ;;  %v31318_v53 = vld [vmem:[#allocation5 + $0x121] sm:$0xff] }
 0x9b1   : > { %16083 = vst.msk [vmem:[#allocation5 + $0x151] sm:$0xff] %vm527_vm1, %v16049_v26  ;;  %vm15987_vm10 = vcmp.ge.f32.partialorder %v15955_v46, 0.0  ;;  %v16019_v37 = vmul.f32 0.2, %v15955_v46  ;;  %v24952_v5 = vpop.f32.mrb[126].mxu1  ;;  %v31402_v0 = vld [vmem:[#allocation5 + $0x90] sm:$0xff] }
 0x9b2   : > { %16105 = vst.msk [vmem:[#allocation5 + $0x14f] sm:$0x2] %vm564_vm2, %v16049_v26  ;;  %24986 = vmatmul.mubr.msk.f32.gmra.mrb[84].mxu0 %vm527_vm1, %v31296_v63  ;;  %v16052_v7 = vsel %vm15988_vm8, %v15956_v23, %v16020_v35  ;;  %v15958_v13 = vadd.f32 %v24952_v5, %v31117_v54  ;;  %v15879_v3 = vpop.f32.mrb[127].mxu1  ;;  %v31334_v32 = vld [vmem:[#allocation5 + $0x141] sm:$0xff]  ;;  %v31406_v49 = vld [vmem:[#allocation5 + $0x98] sm:$0xff]  ;;  %v31414_v58 = vld [vmem:[#allocation5 + $0xb0] sm:$0xff] }
 0x9b3   : > { %24988 = vmatprep.mubr.msk.f32.mxu0 %vm527_vm1, %v31300_v47  ;;  %16086 = vst.msk [vmem:[#allocation5 + $0x171] sm:$0xff] %vm527_vm1, %v16052_v7  ;;  %16090 = vst.msk [vmem:[#allocation5 + $0x1a1] sm:$0xff] %vm527_vm1, %v16052_v7  ;;  %v16051_v22 = vsel %vm15987_vm10, %v15955_v46, %v16019_v37  ;;  %v15957_v19 = vadd.f32 %v31117_v54, %v15879_v3  ;;  %v31410_v6 = vld [vmem:[#allocation5 + $0xa8] sm:$0xff]  ;;  %v31418_v23 = vld [vmem:[#allocation5 + $0xc0] sm:$0xff] }
 0x9b4   : > { %16124 = vst.msk [vmem:[#allocation5 + $0x173] sm:$0x40] %vm583_vm3, %v16052_v7  ;;  %16126 = vst.msk [vmem:[#allocation5 + $0x1a3] sm:$0x40] %vm583_vm3, %v16052_v7  ;;  %vm15990_vm11 = vcmp.ge.f32.partialorder %v15958_v13, 0.0  ;;  %v31330_v28 = vld [vmem:[#allocation5 + $0x139] sm:$0xff] }
 0x9b5   : > { %16085 = vst.msk [vmem:[#allocation5 + $0x169] sm:$0xff] %vm527_vm1, %v16051_v22  ;;  %16089 = vst.msk [vmem:[#allocation5 + $0x199] sm:$0xff] %vm527_vm1, %v16051_v22  ;;  %v16022_v57 = vmul.f32 0.2, %v15958_v13  ;;  %vm15989_vm12 = vcmp.ge.f32.partialorder %v15957_v19, 0.0  ;;  %v31422_v45 = vld [vmem:[#allocation5 + $0xc8] sm:$0xff] }
 0x9b6   : > { %16106 = vst.msk [vmem:[#allocation5 + $0x167] sm:$0x2] %vm564_vm2, %v16051_v22  ;;  %16108 = vst.msk [vmem:[#allocation5 + $0x197] sm:$0x2] %vm564_vm2, %v16051_v22  ;;  %v16021_v36 = vmul.f32 0.2, %v15957_v19  ;;  %24989 = vmatmul.mubr.msk.f32.gmra.mrb[86].mxu0 %vm527_vm1, %v31314_v50 }
 0x9b7   : > { %v16054_v54 = vsel %vm15990_vm11, %v15958_v13, %v16022_v57  ;;  %24991 = vmatprep.mubr.msk.f32.mxu0 %vm527_vm1, %v31318_v53  ;;  %v31342_v17 = vld [vmem:[#allocation5 + $0x159] sm:$0xff]  ;;  %v31434_v35 = vld [vmem:[#allocation5 + $0xf0] sm:$0xff]  ;;  %v31442_v5 = vld [vmem:[#allocation5 + $0x108] sm:$0xff] }
 0x9b8   : > { %16088 = vst.msk [vmem:[#allocation5 + $0x189] sm:$0xff] %vm527_vm1, %v16054_v54  ;;  %v16053_v16 = vsel %vm15989_vm12, %v15957_v19, %v16021_v36  ;;  %v31338_v11 = vld [vmem:[#allocation5 + $0x151] sm:$0xff]  ;;  %32812 = vst [vmem:[#allocation97_spill] sm:$0xff] %v31342_v17  ;;  %v31430_v46 = vld [vmem:[#allocation5 + $0xe0] sm:$0xff] }
 0x9b9   : > { %16125 = vst.msk [vmem:[#allocation5 + $0x18b] sm:$0x40] %vm583_vm3, %v16054_v54  ;;  %v31426_v26 = vld [vmem:[#allocation5 + $0xd8] sm:$0xff]  ;;  %v31446_v7 = vld [vmem:[#allocation5 + $0x110] sm:$0xff]  ;;  %v31450_v13 = vld [vmem:[#allocation5 + $0x120] sm:$0xff] }
 0x9ba   : > { %16087 = vst.msk [vmem:[#allocation5 + $0x181] sm:$0xff] %vm527_vm1, %v16053_v16  ;;  %24992 = vmatmul.mubr.msk.f32.gmra.mrb[88].mxu0 %vm527_vm1, %v31326_v2  ;;  %v31350_v12 = vld [vmem:[#allocation5 + $0x171] sm:$0xff]  ;;  %v31454_v3 = vld [vmem:[#allocation5 + $0x128] sm:$0xff]  ;;  %v31462_v19 = vld [vmem:[#allocation5 + $0x140] sm:$0xff] }
 0x9bb   : > { %16107 = vst.msk [vmem:[#allocation5 + $0x17f] sm:$0x2] %vm564_vm2, %v16053_v16  ;;  %24994 = vmatprep.mubr.msk.f32.mxu0 %vm527_vm1, %v31330_v28  ;;  %32814 = vst [vmem:[#allocation99_spill] sm:$0xff] %v31350_v12  ;;  %v31438_v37 = vld [vmem:[#allocation5 + $0xf8] sm:$0xff]  ;;  %v31466_v57 = vld [vmem:[#allocation5 + $0x150] sm:$0xff] }
 0x9bc   : > { %v31346_v43 = vld [vmem:[#allocation5 + $0x169] sm:$0xff]  ;;  %v31458_v22 = vld [vmem:[#allocation5 + $0x138] sm:$0xff] }
 0x9bd   : > { %32813 = vst [vmem:[#allocation102_spill] sm:$0xff] %v31346_v43  ;;  %v31470_v36 = vld [vmem:[#allocation5 + $0x158] sm:$0xff]  ;;  %v31474_v54 = vld [vmem:[#allocation5 + $0x168] sm:$0xff]  ;;  %v31478_v16 = vld [vmem:[#allocation5 + $0x170] sm:$0xff] }
 0x9be   : > { %24995 = vmatmul.mubr.msk.f32.gmra.mrb[90].mxu0 %vm527_vm1, %v31334_v32 }
 0x9bf   : > { %24997 = vmatprep.mubr.msk.f32.mxu0 %vm527_vm1, %v31338_v11 }
 0x9c2   : > { %24998 = vmatmul.mubr.msk.f32.gmra.mrb[92].mxu0 %vm527_vm1, %v31342_v17  ;;  %v31502_v17 = vld [vmem:[#allocation5 + $0x32] sm:$0xff] }
 0x9c3   : > { %25000 = vmatprep.mubr.msk.f32.mxu0 %vm527_vm1, %v31346_v43  ;;  %v32815_v43 = vrot.slane %v31153_v42, 4  ;;  %32817 = vst [vmem:[#allocation101_spill] sm:$0xff] %v31502_v17 }
 0x9c6   : > { %25001 = vmatmul.mubr.msk.f32.gmra.mrb[94].mxu0 %vm527_vm1, %v31350_v12  ;;  %v31489_v12 = vld [vmem:[#allocation5 + $0x1a] sm:$0xff] }
 0x9c7   : > { %25005 = vmatprep.mubr.msk.f32.mxu0 %vm527_vm1, %v16132_v25  ;;  %v16844_v25 = vld [vmem:[#allocation5 + $0x2] sm:$0xff] }
 0x9ca   : > { %25006 = vmatmul.mubr.msk.f32.vlgmr.msra.gmra.mrb[64].mxu0 %vm527_vm1, %v16133_v52  ;;  %v16845_v52 = vld [vmem:[#allocation5 + $0xa] sm:$0xff] }
 0x9cb   : > { %25054 = vmatpush3.msk.msra.mxu0 %vm769_vm0, %v31153_v42  ;;  %25008 = vmatprep.mubr.msk.f32.mxu0 %vm527_vm1, %v31357_v20  ;;  %v31510_v42 = vld [vmem:[#allocation5 + $0x4a] sm:$0xff] }
 0x9cc   : > { %25103 = vmatprep.subr.msk.mxu0 %vm769_vm0, %v32400_v44  ;;  %v31486_v44 = vld [vmem:[%s32170_s13 + $0x10] sm:$0xff]  ;;  %32819 = vst [vmem:[#allocation103_spill] sm:$0xff] %v31510_v42 }
 0x9ce   : > { %25009 = vmatmul.mubr.msk.f32.gmra.mrb[66].mxu0 %vm527_vm1, %v31366_v30 }
 0x9cf   : > { %25011 = vmatprep.mubr.msk.f32.mxu0 %vm527_vm1, %v31370_v27 }
 0x9d2   : > { %25012 = vmatmul.mubr.msk.f32.gmra.mrb[68].mxu0 %vm527_vm1, %v31374_v59 }
 0x9d3   : > { %25014 = vmatprep.mubr.msk.f32.mxu0 %vm527_vm1, %v31378_v62 }
 0x9d6   : > { %25015 = vmatmul.mubr.msk.f32.gmra.mrb[70].mxu0 %vm527_vm1, %v31382_v40 }
 0x9d7   : > { %25017 = vmatprep.mubr.msk.f32.mxu0 %vm527_vm1, %v31386_v29 }
 0x9da   : > { %25018 = vmatmul.mubr.msk.f32.gmra.mrb[72].mxu0 %vm527_vm1, %v31390_v24 }
 0x9db   : > { %25020 = vmatprep.mubr.msk.f32.mxu0 %vm527_vm1, %v31394_v56 }
 0x9de   : > { %25021 = vmatmul.mubr.msk.f32.gmra.mrb[74].mxu0 %vm527_vm1, %v31398_v61 }
 0x9df   : > { %25023 = vmatprep.mubr.msk.f32.mxu0 %vm527_vm1, %v31402_v0 }
 0x9e2   : > { %25024 = vmatmul.mubr.msk.f32.gmra.mrb[76].mxu0 %vm527_vm1, %v31406_v49 }
 0x9e3   : > { %25026 = vmatprep.mubr.msk.f32.mxu0 %vm527_vm1, %v31410_v6 }
 0x9e6   : > { %25027 = vmatmul.mubr.msk.f32.gmra.mrb[78].mxu0 %vm527_vm1, %v31414_v58 }
 0x9e7   : > { %25029 = vmatprep.mubr.msk.f32.mxu0 %vm527_vm1, %v31418_v23 }
 0x9ea   : > { %25030 = vmatmul.mubr.msk.f32.gmra.mrb[80].mxu0 %vm527_vm1, %v31422_v45 }
 0x9eb   : > { %25032 = vmatprep.mubr.msk.f32.mxu0 %vm527_vm1, %v31426_v26 }
 0x9ee   : > { %25033 = vmatmul.mubr.msk.f32.gmra.mrb[82].mxu0 %vm527_vm1, %v31430_v46 }
 0x9ef   : > { %25035 = vmatprep.mubr.msk.f32.mxu0 %vm527_vm1, %v31434_v35 }
 0x9f2   : > { %25036 = vmatmul.mubr.msk.f32.gmra.mrb[84].mxu0 %vm527_vm1, %v31438_v37 }
 0x9f3   : > { %25038 = vmatprep.mubr.msk.f32.mxu0 %vm527_vm1, %v31442_v5 }
 0x9f6   : > { %25039 = vmatmul.mubr.msk.f32.gmra.mrb[86].mxu0 %vm527_vm1, %v31446_v7 }
 0x9f7   : > { %25041 = vmatprep.mubr.msk.f32.mxu0 %vm527_vm1, %v31450_v13 }
 0x9fa   : > { %25042 = vmatmul.mubr.msk.f32.gmra.mrb[88].mxu0 %vm527_vm1, %v31454_v3 }
 0x9fb   : > { %25044 = vmatprep.mubr.msk.f32.mxu0 %vm527_vm1, %v31458_v22 }
 0x9fe   : > { %25045 = vmatmul.mubr.msk.f32.gmra.mrb[90].mxu0 %vm527_vm1, %v31462_v19 }
 0x9ff   : > { %25047 = vmatprep.mubr.msk.f32.mxu0 %vm527_vm1, %v31466_v57 }
 0xa02   : > { %25048 = vmatmul.mubr.msk.f32.gmra.mrb[92].mxu0 %vm527_vm1, %v31470_v36 }
 0xa03   : > { %25050 = vmatprep.mubr.msk.f32.mxu0 %vm527_vm1, %v31474_v54 }
 0xa06   : > { %25051 = vmatmul.mubr.msk.f32.gmra.mrb[94].mxu0 %vm527_vm1, %v31478_v16 }
 0xa07   : > { %25055 = vmatprep.mubr.msk.f32.mxu0 %vm527_vm1, %v16844_v25  ;;  %v31498_v25 = vld [vmem:[#allocation5 + $0x22] sm:$0xff] }
 0xa08   : > { %32816 = vst [vmem:[#allocation104_spill] sm:$0xff] %v31498_v25 }
 0xa0a   : > { %25056 = vmatmul.mubr.msk.f32.vlgmr.msra.gmra.mrb[64].mxu0 %vm527_vm1, %v16845_v52  ;;  %v31506_v52 = vld [vmem:[#allocation5 + $0x3a] sm:$0xff] }
 0xa0b   : > { %25104 = vmatpush3.msk.msra.mxu0 %vm769_vm0, %v32815_v43  ;;  %25058 = vmatprep.mubr.msk.f32.mxu0 %vm527_vm1, %v31489_v12  ;;  %32818 = vst [vmem:[#allocation106_spill] sm:$0xff] %v31506_v52  ;;  %v31514_v43 = vld [vmem:[#allocation5 + $0x52] sm:$0xff] }
 0xa0c   : > { %25153 = vmatprep.subr.msk.mxu0 %vm769_vm0, %v31486_v44  ;;  %32820 = vst [vmem:[#allocation108_spill] sm:$0xff] %v31514_v43 }
 0xa0e   : > { %25059 = vmatmul.mubr.msk.f32.gmra.mrb[66].mxu0 %vm527_vm1, %v31498_v25  ;;  %v31518_v25 = vld [vmem:[#allocation5 + $0x62] sm:$0xff] }
 0xa0f   : > { %25061 = vmatprep.mubr.msk.f32.mxu0 %vm527_vm1, %v31502_v17  ;;  %32821 = vst [vmem:[#allocation105_spill] sm:$0xff] %v31518_v25  ;;  %v31522_v17 = vld [vmem:[#allocation5 + $0x6a] sm:$0xff] }
 0xa10   : > { %32822 = vst [vmem:[#allocation110_spill] sm:$0xff] %v31522_v17 }
 0xa12   : > { %25062 = vmatmul.mubr.msk.f32.gmra.mrb[68].mxu0 %vm527_vm1, %v31506_v52  ;;  %v31526_v52 = vld [vmem:[#allocation5 + $0x7a] sm:$0xff] }
 0xa13   : > { %25064 = vmatprep.mubr.msk.f32.mxu0 %vm527_vm1, %v31510_v42  ;;  %32823 = vst [vmem:[#allocation107_spill] sm:$0xff] %v31526_v52  ;;  %v31530_v42 = vld [vmem:[#allocation5 + $0x82] sm:$0xff] }
 0xa14   : > { %32824 = vst [vmem:[#allocation112_spill] sm:$0xff] %v31530_v42 }
 0xa16   : > { %25065 = vmatmul.mubr.msk.f32.gmra.mrb[70].mxu0 %vm527_vm1, %v31514_v43  ;;  %v31534_v43 = vld [vmem:[#allocation5 + $0x92] sm:$0xff] }
 0xa17   : > { %25067 = vmatprep.mubr.msk.f32.mxu0 %vm527_vm1, %v31518_v25  ;;  %32825 = vst [vmem:[#allocation109_spill] sm:$0xff] %v31534_v43  ;;  %v31538_v25 = vld [vmem:[#allocation5 + $0x9a] sm:$0xff] }
 0xa18   : > { %32826 = vst [vmem:[#allocation114_spill] sm:$0xff] %v31538_v25 }
 0xa1a   : > { %25068 = vmatmul.mubr.msk.f32.gmra.mrb[72].mxu0 %vm527_vm1, %v31522_v17  ;;  %v31542_v17 = vld [vmem:[#allocation5 + $0xaa] sm:$0xff] }
 0xa1b   : > { %25070 = vmatprep.mubr.msk.f32.mxu0 %vm527_vm1, %v31526_v52  ;;  %32827 = vst [vmem:[#allocation111_spill] sm:$0xff] %v31542_v17  ;;  %v31546_v52 = vld [vmem:[#allocation5 + $0xb2] sm:$0xff] }
 0xa1c   : > { %32828 = vst [vmem:[#allocation116_spill] sm:$0xff] %v31546_v52 }
 0xa1e   : > { %25071 = vmatmul.mubr.msk.f32.gmra.mrb[74].mxu0 %vm527_vm1, %v31530_v42  ;;  %v31550_v42 = vld [vmem:[#allocation5 + $0xc2] sm:$0xff] }
 0xa1f   : > { %25073 = vmatprep.mubr.msk.f32.mxu0 %vm527_vm1, %v31534_v43  ;;  %32829 = vst [vmem:[#allocation113_spill] sm:$0xff] %v31550_v42  ;;  %v31554_v43 = vld [vmem:[#allocation5 + $0xca] sm:$0xff] }
 0xa20   : > { %32830 = vst [vmem:[#allocation118_spill] sm:$0xff] %v31554_v43 }
 0xa22   : > { %25074 = vmatmul.mubr.msk.f32.gmra.mrb[76].mxu0 %vm527_vm1, %v31538_v25  ;;  %v31558_v25 = vld [vmem:[#allocation5 + $0xda] sm:$0xff] }
 0xa23   : > { %25076 = vmatprep.mubr.msk.f32.mxu0 %vm527_vm1, %v31542_v17  ;;  %32831 = vst [vmem:[#allocation115_spill] sm:$0xff] %v31558_v25  ;;  %v31562_v17 = vld [vmem:[#allocation5 + $0xe2] sm:$0xff] }
 0xa24   : > { %32832 = vst [vmem:[#allocation120_spill] sm:$0xff] %v31562_v17 }
 0xa26   : > { %25077 = vmatmul.mubr.msk.f32.gmra.mrb[78].mxu0 %vm527_vm1, %v31546_v52  ;;  %v31566_v52 = vld [vmem:[#allocation5 + $0xf2] sm:$0xff] }
 0xa27   : > { %25079 = vmatprep.mubr.msk.f32.mxu0 %vm527_vm1, %v31550_v42  ;;  %32833 = vst [vmem:[#allocation117_spill] sm:$0xff] %v31566_v52  ;;  %v31570_v42 = vld [vmem:[#allocation5 + $0xfa] sm:$0xff] }
 0xa28   : > { %32834 = vst [vmem:[#allocation122_spill] sm:$0xff] %v31570_v42 }
 0xa2a   : > { %25080 = vmatmul.mubr.msk.f32.gmra.mrb[80].mxu0 %vm527_vm1, %v31554_v43  ;;  %v31574_v43 = vld [vmem:[#allocation5 + $0x10a] sm:$0xff] }
 0xa2b   : > { %25082 = vmatprep.mubr.msk.f32.mxu0 %vm527_vm1, %v31558_v25  ;;  %32835 = vst [vmem:[#allocation119_spill] sm:$0xff] %v31574_v43  ;;  %v31578_v25 = vld [vmem:[#allocation5 + $0x112] sm:$0xff] }
 0xa2c   : > { %32836 = vst [vmem:[#allocation124_spill] sm:$0xff] %v31578_v25 }
 0xa2e   : > { %25083 = vmatmul.mubr.msk.f32.gmra.mrb[82].mxu0 %vm527_vm1, %v31562_v17  ;;  %v31582_v17 = vld [vmem:[#allocation5 + $0x122] sm:$0xff] }
 0xa2f   : > { %25085 = vmatprep.mubr.msk.f32.mxu0 %vm527_vm1, %v31566_v52  ;;  %32837 = vst [vmem:[#allocation121_spill] sm:$0xff] %v31582_v17  ;;  %v31586_v52 = vld [vmem:[#allocation5 + $0x12a] sm:$0xff] }
 0xa30   : > { %32838 = vst [vmem:[#allocation126_spill] sm:$0xff] %v31586_v52 }
 0xa32   : > { %25086 = vmatmul.mubr.msk.f32.gmra.mrb[84].mxu0 %vm527_vm1, %v31570_v42  ;;  %v31590_v42 = vld [vmem:[#allocation5 + $0x13a] sm:$0xff] }
 0xa33   : > { %25088 = vmatprep.mubr.msk.f32.mxu0 %vm527_vm1, %v31574_v43  ;;  %32839 = vst [vmem:[#allocation123_spill] sm:$0xff] %v31590_v42  ;;  %v31594_v43 = vld [vmem:[#allocation5 + $0x142] sm:$0xff] }
 0xa36   : > { %25089 = vmatmul.mubr.msk.f32.gmra.mrb[86].mxu0 %vm527_vm1, %v31578_v25  ;;  %v31598_v25 = vld [vmem:[#allocation5 + $0x152] sm:$0xff] }
 0xa37   : > { %25091 = vmatprep.mubr.msk.f32.mxu0 %vm527_vm1, %v31582_v17  ;;  %32840 = vst [vmem:[#allocation125_spill] sm:$0xff] %v31598_v25  ;;  %v31602_v17 = vld [vmem:[#allocation5 + $0x15a] sm:$0xff] }
 0xa3a   : > { %25092 = vmatmul.mubr.msk.f32.gmra.mrb[88].mxu0 %vm527_vm1, %v31586_v52  ;;  %v31606_v52 = vld [vmem:[#allocation5 + $0x16a] sm:$0xff] }
 0xa3b   : > { %25094 = vmatprep.mubr.msk.f32.mxu0 %vm527_vm1, %v31590_v42  ;;  %32841 = vst [vmem:[#allocation129_spill] sm:$0xff] %v31606_v52  ;;  %v31610_v42 = vld [vmem:[#allocation5 + $0x172] sm:$0xff] }
 0xa3e   : > { %25095 = vmatmul.mubr.msk.f32.gmra.mrb[90].mxu0 %vm527_vm1, %v31594_v43 }
 0xa3f   : > { %25097 = vmatprep.mubr.msk.f32.mxu0 %vm527_vm1, %v31598_v25  ;;  %v18041_v25 = vrot.slane %v31486_v44, 4 }
 0xa42   : > { %25098 = vmatmul.mubr.msk.f32.gmra.mrb[92].mxu0 %vm527_vm1, %v31602_v17 }
 0xa43   : > { %25100 = vmatprep.mubr.msk.f32.mxu0 %vm527_vm1, %v31606_v52 }
 0xa46   : > { %25101 = vmatmul.mubr.msk.f32.gmra.mrb[94].mxu0 %vm527_vm1, %v31610_v42 }
 0xa47   : > { %25105 = vmatprep.mubr.msk.f32.mxu0 %vm527_vm1, %v31357_v20  ;;  %v31682_v20 = vld [vmem:[#allocation5 + $0x188] sm:$0xff] }
 0xa4a   : > { %25106 = vmatmul.mubr.msk.f32.vlgmr.msra.gmra.mrb[64].mxu0 %vm527_vm1, %v31366_v30  ;;  %v31691_v30 = vld [vmem:[%s32170_s13 + $0x18] sm:$0xff] }
 0xa4b   : > { %25154 = vmatpush3.msk.msra.mxu0 %vm769_vm0, %v31486_v44  ;;  %25108 = vmatprep.mubr.msk.f32.mxu0 %vm527_vm1, %v31370_v27  ;;  %v31678_v44 = vld [vmem:[#allocation5 + $0x180] sm:$0xff] }
 0xa4c   : > { %25203 = vmatprep.subr.msk.mxu0 %vm769_vm0, %v18041_v25 }
 0xa4e   : > { %25109 = vmatmul.mubr.msk.f32.gmra.mrb[66].mxu0 %vm527_vm1, %v31374_v59 }
 0xa4f   : > { %25111 = vmatprep.mubr.msk.f32.mxu0 %vm527_vm1, %v31378_v62 }
 0xa52   : > { %25112 = vmatmul.mubr.msk.f32.gmra.mrb[68].mxu0 %vm527_vm1, %v31382_v40 }
 0xa53   : > { %25114 = vmatprep.mubr.msk.f32.mxu0 %vm527_vm1, %v31386_v29 }
 0xa56   : > { %25115 = vmatmul.mubr.msk.f32.gmra.mrb[70].mxu0 %vm527_vm1, %v31390_v24 }
 0xa57   : > { %25117 = vmatprep.mubr.msk.f32.mxu0 %vm527_vm1, %v31394_v56 }
 0xa5a   : > { %25118 = vmatmul.mubr.msk.f32.gmra.mrb[72].mxu0 %vm527_vm1, %v31398_v61 }
 0xa5b   : > { %25120 = vmatprep.mubr.msk.f32.mxu0 %vm527_vm1, %v31402_v0 }
 0xa5e   : > { %25121 = vmatmul.mubr.msk.f32.gmra.mrb[74].mxu0 %vm527_vm1, %v31406_v49 }
 0xa5f   : > { %25123 = vmatprep.mubr.msk.f32.mxu0 %vm527_vm1, %v31410_v6 }
 0xa62   : > { %25124 = vmatmul.mubr.msk.f32.gmra.mrb[76].mxu0 %vm527_vm1, %v31414_v58 }
 0xa63   : > { %25126 = vmatprep.mubr.msk.f32.mxu0 %vm527_vm1, %v31418_v23 }
 0xa66   : > { %25127 = vmatmul.mubr.msk.f32.gmra.mrb[78].mxu0 %vm527_vm1, %v31422_v45 }
 0xa67   : > { %25129 = vmatprep.mubr.msk.f32.mxu0 %vm527_vm1, %v31426_v26 }
 0xa6a   : > { %25130 = vmatmul.mubr.msk.f32.gmra.mrb[80].mxu0 %vm527_vm1, %v31430_v46 }
 0xa6b   : > { %25132 = vmatprep.mubr.msk.f32.mxu0 %vm527_vm1, %v31434_v35 }
 0xa6e   : > { %25133 = vmatmul.mubr.msk.f32.gmra.mrb[82].mxu0 %vm527_vm1, %v31438_v37 }
 0xa6f   : > { %25135 = vmatprep.mubr.msk.f32.mxu0 %vm527_vm1, %v31442_v5 }
 0xa72   : > { %25136 = vmatmul.mubr.msk.f32.gmra.mrb[84].mxu0 %vm527_vm1, %v31446_v7 }
 0xa73   : > { %25138 = vmatprep.mubr.msk.f32.mxu0 %vm527_vm1, %v31450_v13 }
 0xa76   : > { %25139 = vmatmul.mubr.msk.f32.gmra.mrb[86].mxu0 %vm527_vm1, %v31454_v3 }
 0xa77   : > { %25141 = vmatprep.mubr.msk.f32.mxu0 %vm527_vm1, %v31458_v22 }
 0xa7a   : > { %25142 = vmatmul.mubr.msk.f32.gmra.mrb[88].mxu0 %vm527_vm1, %v31462_v19 }
 0xa7b   : > { %25144 = vmatprep.mubr.msk.f32.mxu0 %vm527_vm1, %v31466_v57 }
 0xa7e   : > { %25145 = vmatmul.mubr.msk.f32.gmra.mrb[90].mxu0 %vm527_vm1, %v31470_v36 }
 0xa7f   : > { %25147 = vmatprep.mubr.msk.f32.mxu0 %vm527_vm1, %v31474_v54 }
 0xa82   : > { %25148 = vmatmul.mubr.msk.f32.gmra.mrb[92].mxu0 %vm527_vm1, %v31478_v16 }
 0xa83   : > { %25150 = vmatprep.mubr.msk.f32.mxu0 %vm527_vm1, %v31678_v44 }
 0xa86   : > { %25151 = vmatmul.mubr.msk.f32.gmra.mrb[94].mxu0 %vm527_vm1, %v31682_v20 }
 0xa87   : > { %25155 = vmatprep.mubr.msk.f32.mxu0 %vm527_vm1, %v31156_v51  ;;  %v32842_v51 = vld [vmem:[#allocation97_spill] sm:$0xff] }
 0xa8a   : > { %25156 = vmatmul.mubr.msk.f32.vlgmr.msra.gmra.mrb[64].mxu0 %vm527_vm1, %v31170_v1  ;;  %v32843_v1 = vld [vmem:[#allocation102_spill] sm:$0xff] }
 0xa8b   : > { %25204 = vmatpush3.msk.msra.mxu0 %vm769_vm0, %v18041_v25  ;;  %25158 = vmatprep.mubr.msk.f32.mxu0 %vm527_vm1, %v31174_v60  ;;  %v32844_v60 = vld [vmem:[#allocation99_spill] sm:$0xff]  ;;  %v32854_v25 = vld [vmem:[#allocation109_spill] sm:$0xff] }
 0xa8c   : > { %25253 = vmatprep.subr.msk.mxu0 %vm769_vm0, %v31691_v30 }
 0xa8e   : > { %25159 = vmatmul.mubr.msk.f32.gmra.mrb[66].mxu0 %vm527_vm1, %v31184_v14  ;;  %v31754_v14 = vld [vmem:[#allocation5 + $0x181] sm:$0xff] }
 0xa8f   : > { %25161 = vmatprep.mubr.msk.f32.mxu0 %vm527_vm1, %v31188_v39  ;;  %v31758_v39 = vld [vmem:[#allocation5 + $0x189] sm:$0xff] }
 0xa92   : > { %25162 = vmatmul.mubr.msk.f32.gmra.mrb[68].mxu0 %vm527_vm1, %v31198_v34  ;;  %v18818_v34 = vrot.slane %v31691_v30, 4 }
 0xa93   : > { %25164 = vmatprep.mubr.msk.f32.mxu0 %vm527_vm1, %v31202_v48  ;;  %v32845_v48 = vld [vmem:[#allocation104_spill] sm:$0xff] }
 0xa96   : > { %25165 = vmatmul.mubr.msk.f32.gmra.mrb[70].mxu0 %vm527_vm1, %v31212_v4  ;;  %v32846_v4 = vld [vmem:[#allocation101_spill] sm:$0xff] }
 0xa97   : > { %25167 = vmatprep.mubr.msk.f32.mxu0 %vm527_vm1, %v31216_v10  ;;  %v32847_v10 = vld [vmem:[#allocation106_spill] sm:$0xff] }
 0xa9a   : > { %25168 = vmatmul.mubr.msk.f32.gmra.mrb[72].mxu0 %vm527_vm1, %v31226_v41  ;;  %v32848_v41 = vld [vmem:[#allocation103_spill] sm:$0xff] }
 0xa9b   : > { %25170 = vmatprep.mubr.msk.f32.mxu0 %vm527_vm1, %v31230_v21  ;;  %v32849_v21 = vld [vmem:[#allocation108_spill] sm:$0xff] }
 0xa9e   : > { %25171 = vmatmul.mubr.msk.f32.gmra.mrb[74].mxu0 %vm527_vm1, %v31240_v15  ;;  %v32850_v15 = vld [vmem:[#allocation105_spill] sm:$0xff] }
 0xa9f   : > { %25173 = vmatprep.mubr.msk.f32.mxu0 %vm527_vm1, %v31244_v31  ;;  %v32851_v31 = vld [vmem:[#allocation110_spill] sm:$0xff] }
 0xaa2   : > { %25174 = vmatmul.mubr.msk.f32.gmra.mrb[76].mxu0 %vm527_vm1, %v31254_v8  ;;  %v32852_v8 = vld [vmem:[#allocation107_spill] sm:$0xff] }
 0xaa3   : > { %25176 = vmatprep.mubr.msk.f32.mxu0 %vm527_vm1, %v31258_v18 }
 0xaa6   : > { %25177 = vmatmul.mubr.msk.f32.gmra.mrb[78].mxu0 %vm527_vm1, %v31268_v38 }
 0xaa7   : > { %25179 = vmatprep.mubr.msk.f32.mxu0 %vm527_vm1, %v31272_v33 }
 0xaaa   : > { %25180 = vmatmul.mubr.msk.f32.gmra.mrb[80].mxu0 %vm527_vm1, %v31282_v9 }
 0xaab   : > { %25182 = vmatprep.mubr.msk.f32.mxu0 %vm527_vm1, %v31286_v55 }
 0xaae   : > { %25183 = vmatmul.mubr.msk.f32.gmra.mrb[82].mxu0 %vm527_vm1, %v31296_v63 }
 0xaaf   : > { %25185 = vmatprep.mubr.msk.f32.mxu0 %vm527_vm1, %v31300_v47 }
 0xab2   : > { %25186 = vmatmul.mubr.msk.f32.gmra.mrb[84].mxu0 %vm527_vm1, %v31314_v50 }
 0xab3   : > { %25188 = vmatprep.mubr.msk.f32.mxu0 %vm527_vm1, %v31318_v53 }
 0xab6   : > { %25189 = vmatmul.mubr.msk.f32.gmra.mrb[86].mxu0 %vm527_vm1, %v31326_v2 }
 0xab7   : > { %25191 = vmatprep.mubr.msk.f32.mxu0 %vm527_vm1, %v31330_v28 }
 0xaba   : > { %25192 = vmatmul.mubr.msk.f32.gmra.mrb[88].mxu0 %vm527_vm1, %v31334_v32 }
 0xabb   : > { %25194 = vmatprep.mubr.msk.f32.mxu0 %vm527_vm1, %v31338_v11 }
 0xabe   : > { %25195 = vmatmul.mubr.msk.f32.gmra.mrb[90].mxu0 %vm527_vm1, %v32842_v51 }
 0xabf   : > { %25197 = vmatprep.mubr.msk.f32.mxu0 %vm527_vm1, %v32843_v1 }
 0xac2   : > { %25198 = vmatmul.mubr.msk.f32.gmra.mrb[92].mxu0 %vm527_vm1, %v32844_v60 }
 0xac3   : > { %25200 = vmatprep.mubr.msk.f32.mxu0 %vm527_vm1, %v31754_v14 }
 0xac6   : > { %25201 = vmatmul.mubr.msk.f32.gmra.mrb[94].mxu0 %vm527_vm1, %v31758_v39 }
 0xac7   : > { %25205 = vmatprep.mubr.msk.f32.mxu0 %vm527_vm1, %v31489_v12  ;;  %v32853_v12 = vld [vmem:[#allocation112_spill] sm:$0xff] }
 0xaca   : > { %25206 = vmatmul.mubr.msk.f32.vlgmr.msra.gmra.mrb[64].mxu0 %vm527_vm1, %v32845_v48  ;;  %v32856_v48 = vld [vmem:[#allocation111_spill] sm:$0xff] }
 0xacb   : > { %25254 = vmatpush3.msk.msra.mxu0 %vm769_vm0, %v31691_v30  ;;  %25208 = vmatprep.mubr.msk.f32.mxu0 %vm527_vm1, %v32846_v4  ;;  %v32855_v30 = vld [vmem:[#allocation114_spill] sm:$0xff] }
 0xacc   : > { %25303 = vmatprep.subr.msk.mxu0 %vm769_vm0, %v18818_v34 }
 0xace   : > { %25209 = vmatmul.mubr.msk.f32.gmra.mrb[66].mxu0 %vm527_vm1, %v32847_v10 }
 0xacf   : > { %25211 = vmatprep.mubr.msk.f32.mxu0 %vm527_vm1, %v32848_v41 }
 0xad2   : > { %25212 = vmatmul.mubr.msk.f32.gmra.mrb[68].mxu0 %vm527_vm1, %v32849_v21  ;;  %v32857_v21 = vld [vmem:[#allocation116_spill] sm:$0xff] }
 0xad3   : > { %25214 = vmatprep.mubr.msk.f32.mxu0 %vm527_vm1, %v32850_v15  ;;  %v32858_v15 = vld [vmem:[#allocation113_spill] sm:$0xff] }
 0xad6   : > { %25215 = vmatmul.mubr.msk.f32.gmra.mrb[70].mxu0 %vm527_vm1, %v32851_v31  ;;  %v32859_v31 = vld [vmem:[#allocation118_spill] sm:$0xff] }
 0xad7   : > { %25217 = vmatprep.mubr.msk.f32.mxu0 %vm527_vm1, %v32852_v8  ;;  %v32860_v8 = vld [vmem:[#allocation115_spill] sm:$0xff] }
 0xada   : > { %25218 = vmatmul.mubr.msk.f32.gmra.mrb[72].mxu0 %vm527_vm1, %v32853_v12  ;;  %v32861_v12 = vld [vmem:[#allocation120_spill] sm:$0xff] }
 0xadb   : > { %25220 = vmatprep.mubr.msk.f32.mxu0 %vm527_vm1, %v32854_v25  ;;  %v32862_v25 = vld [vmem:[#allocation117_spill] sm:$0xff] }
 0xade   : > { %25221 = vmatmul.mubr.msk.f32.gmra.mrb[74].mxu0 %vm527_vm1, %v32855_v30  ;;  %v32863_v30 = vld [vmem:[#allocation122_spill] sm:$0xff] }
 0xadf   : > { %25223 = vmatprep.mubr.msk.f32.mxu0 %vm527_vm1, %v32856_v48  ;;  %v32864_v48 = vld [vmem:[#allocation119_spill] sm:$0xff] }
 0xae2   : > { %25224 = vmatmul.mubr.msk.f32.gmra.mrb[76].mxu0 %vm527_vm1, %v32857_v21  ;;  %v32865_v21 = vld [vmem:[#allocation124_spill] sm:$0xff] }
 0xae3   : > { %25226 = vmatprep.mubr.msk.f32.mxu0 %vm527_vm1, %v32858_v15  ;;  %v32866_v15 = vld [vmem:[#allocation121_spill] sm:$0xff] }
 0xae6   : > { %25227 = vmatmul.mubr.msk.f32.gmra.mrb[78].mxu0 %vm527_vm1, %v32859_v31  ;;  %v32867_v31 = vld [vmem:[#allocation126_spill] sm:$0xff] }
 0xae7   : > { %25229 = vmatprep.mubr.msk.f32.mxu0 %vm527_vm1, %v32860_v8  ;;  %v32868_v8 = vld [vmem:[#allocation123_spill] sm:$0xff] }
 0xaea   : > { %25230 = vmatmul.mubr.msk.f32.gmra.mrb[80].mxu0 %vm527_vm1, %v32861_v12 }
 0xaeb   : > { %25232 = vmatprep.mubr.msk.f32.mxu0 %vm527_vm1, %v32862_v25  ;;  %v32869_v25 = vld [vmem:[#allocation125_spill] sm:$0xff] }
 0xaee   : > { %25233 = vmatmul.mubr.msk.f32.gmra.mrb[82].mxu0 %vm527_vm1, %v32863_v30 }
 0xaef   : > { %25235 = vmatprep.mubr.msk.f32.mxu0 %vm527_vm1, %v32864_v48 }
 0xaf2   : > { %25236 = vmatmul.mubr.msk.f32.gmra.mrb[84].mxu0 %vm527_vm1, %v32865_v21 }
 0xaf3   : > { %25238 = vmatprep.mubr.msk.f32.mxu0 %vm527_vm1, %v32866_v15  ;;  %v31826_v15 = vld [vmem:[#allocation5 + $0x182] sm:$0xff] }
 0xaf6   : > { %25239 = vmatmul.mubr.msk.f32.gmra.mrb[86].mxu0 %vm527_vm1, %v32867_v31 }
 0xaf7   : > { %25241 = vmatprep.mubr.msk.f32.mxu0 %vm527_vm1, %v32868_v8  ;;  %v31830_v8 = vld [vmem:[#allocation5 + $0x18a] sm:$0xff] }
 0xafa   : > { %25242 = vmatmul.mubr.msk.f32.gmra.mrb[88].mxu0 %vm527_vm1, %v31594_v43 }
 0xafb   : > { %25244 = vmatprep.mubr.msk.f32.mxu0 %vm527_vm1, %v32869_v25 }
 0xafe   : > { %25245 = vmatmul.mubr.msk.f32.gmra.mrb[90].mxu0 %vm527_vm1, %v31602_v17 }
 0xaff   : > { %25247 = vmatprep.mubr.msk.f32.mxu0 %vm527_vm1, %v31606_v52  ;;  %v16131_v52 = vld [vmem:[%s32170_s13 + $0x20] sm:$0xf] }
 0xb02   : > { %25248 = vmatmul.mubr.msk.f32.gmra.mrb[92].mxu0 %vm527_vm1, %v31610_v42 }
 0xb03   : > { %25250 = vmatprep.mubr.msk.f32.mxu0 %vm527_vm1, %v31826_v15 }
 0xb06   : > { %25251 = vmatmul.mubr.msk.f32.gmra.mrb[94].mxu0 %vm527_vm1, %v31830_v8 }
 0xb07   : > { %25255 = vmatprep.mubr.msk.f32.mxu0 %vm527_vm1, %v31370_v27  ;;  %v18428_v27 = vld [vmem:[#allocation5 + $0x198] sm:$0xff] }
 0xb0a   : > { %25256 = vmatmul.mubr.msk.f32.vlgmr.msra.gmra.mrb[64].mxu0 %vm527_vm1, %v31374_v59  ;;  %v18429_v59 = vld [vmem:[#allocation5 + $0x1a0] sm:$0xff] }
 0xb0b   : > { %25304 = vmatpush3.msk.msra.mxu0 %vm769_vm0, %v18818_v34  ;;  %25258 = vmatprep.mubr.msk.f32.mxu0 %vm527_vm1, %v31378_v62  ;;  %v18786_v62 = vld [vmem:[#allocation5 + $0x31] sm:$0xff] }
 0xb0c   : > { %25353 = vmatprep.subr.msk.mxu0 %vm769_vm0, %v16131_v52 }
 0xb0e   : > { %25259 = vmatmul.mubr.msk.f32.gmra.mrb[66].mxu0 %vm527_vm1, %v31382_v40  ;;  %v18787_v40 = vld [vmem:[#allocation5 + $0x39] sm:$0xff] }
 0xb0f   : > { %25261 = vmatprep.mubr.msk.f32.mxu0 %vm527_vm1, %v31386_v29  ;;  %v18788_v29 = vld [vmem:[#allocation5 + $0x49] sm:$0xff] }
 0xb12   : > { %25262 = vmatmul.mubr.msk.f32.gmra.mrb[68].mxu0 %vm527_vm1, %v31390_v24  ;;  %v18789_v24 = vld [vmem:[#allocation5 + $0x51] sm:$0xff] }
 0xb13   : > { %25264 = vmatprep.mubr.msk.f32.mxu0 %vm527_vm1, %v31394_v56  ;;  %v18790_v56 = vld [vmem:[#allocation5 + $0x61] sm:$0xff] }
 0xb16   : > { %25265 = vmatmul.mubr.msk.f32.gmra.mrb[70].mxu0 %vm527_vm1, %v31398_v61  ;;  %v18791_v61 = vld [vmem:[#allocation5 + $0x69] sm:$0xff] }
 0xb17   : > { %25267 = vmatprep.mubr.msk.f32.mxu0 %vm527_vm1, %v31402_v0  ;;  %v18792_v0 = vld [vmem:[#allocation5 + $0x79] sm:$0xff] }
 0xb1a   : > { %25268 = vmatmul.mubr.msk.f32.gmra.mrb[72].mxu0 %vm527_vm1, %v31406_v49  ;;  %v18793_v49 = vld [vmem:[#allocation5 + $0x81] sm:$0xff] }
 0xb1b   : > { %25270 = vmatprep.mubr.msk.f32.mxu0 %vm527_vm1, %v31410_v6  ;;  %v18794_v6 = vld [vmem:[#allocation5 + $0x91] sm:$0xff] }
 0xb1e   : > { %25271 = vmatmul.mubr.msk.f32.gmra.mrb[74].mxu0 %vm527_vm1, %v31414_v58  ;;  %v18795_v58 = vld [vmem:[#allocation5 + $0x99] sm:$0xff] }
 0xb1f   : > { %25273 = vmatprep.mubr.msk.f32.mxu0 %vm527_vm1, %v31418_v23  ;;  %v18796_v23 = vld [vmem:[#allocation5 + $0xa9] sm:$0xff] }
 0xb22   : > { %25274 = vmatmul.mubr.msk.f32.gmra.mrb[76].mxu0 %vm527_vm1, %v31422_v45  ;;  %v18797_v45 = vld [vmem:[#allocation5 + $0xb1] sm:$0xff] }
 0xb23   : > { %25276 = vmatprep.mubr.msk.f32.mxu0 %vm527_vm1, %v31426_v26  ;;  %v32881_v26 = vld [vmem:[#allocation115_spill] sm:$0xff] }
 0xb26   : > { %25277 = vmatmul.mubr.msk.f32.gmra.mrb[78].mxu0 %vm527_vm1, %v31430_v46  ;;  %v32882_v46 = vld [vmem:[#allocation117_spill] sm:$0xff] }
 0xb27   : > { %25279 = vmatprep.mubr.msk.f32.mxu0 %vm527_vm1, %v31434_v35  ;;  %v32883_v35 = vld [vmem:[#allocation121_spill] sm:$0xff] }
 0xb2a   : > { %25280 = vmatmul.mubr.msk.f32.gmra.mrb[80].mxu0 %vm527_vm1, %v31438_v37  ;;  %v32884_v37 = vld [vmem:[#allocation123_spill] sm:$0xff] }
 0xb2b   : > { %25282 = vmatprep.mubr.msk.f32.mxu0 %vm527_vm1, %v31442_v5  ;;  %v32885_v5 = vld [vmem:[#allocation129_spill] sm:$0xff] }
 0xb2e   : > { %25283 = vmatmul.mubr.msk.f32.gmra.mrb[82].mxu0 %vm527_vm1, %v31446_v7  ;;  %v19204_v7 = vld [vmem:[#allocation5 + $0x19a] sm:$0xff] }
 0xb2f   : > { %25285 = vmatprep.mubr.msk.f32.mxu0 %vm527_vm1, %v31450_v13  ;;  %v19205_v13 = vld [vmem:[#allocation5 + $0x1a2] sm:$0xff] }
 0xb32   : > { %25286 = vmatmul.mubr.msk.f32.gmra.mrb[84].mxu0 %vm527_vm1, %v31454_v3 }
 0xb33   : > { %25288 = vmatprep.mubr.msk.f32.mxu0 %vm527_vm1, %v31458_v22 }
 0xb36   : > { %25289 = vmatmul.mubr.msk.f32.gmra.mrb[86].mxu0 %vm527_vm1, %v31462_v19 }
 0xb37   : > { %25291 = vmatprep.mubr.msk.f32.mxu0 %vm527_vm1, %v31466_v57 }
 0xb3a   : > { %25292 = vmatmul.mubr.msk.f32.gmra.mrb[88].mxu0 %vm527_vm1, %v31470_v36 }
 0xb3b   : > { %25294 = vmatprep.mubr.msk.f32.mxu0 %vm527_vm1, %v31474_v54 }
 0xb3e   : > { %25295 = vmatmul.mubr.msk.f32.gmra.mrb[90].mxu0 %vm527_vm1, %v31478_v16 }
 0xb3f   : > { %25297 = vmatprep.mubr.msk.f32.mxu0 %vm527_vm1, %v31678_v44  ;;  %v32886_v44 = vld [vmem:[#allocation7_spill] sm:$0xff] }
 0xb42   : > { %25298 = vmatmul.mubr.msk.f32.gmra.mrb[92].mxu0 %vm527_vm1, %v31682_v20 }
 0xb43   : > { %25300 = vmatprep.mubr.msk.f32.mxu0 %vm527_vm1, %v18428_v27 }
 0xb46   : > { %25301 = vmatmul.mubr.msk.f32.gmra.mrb[94].mxu0 %vm527_vm1, %v18429_v59 }
 0xb47   : > { %25305 = vmatprep.mubr.msk.f32.mxu0 %vm527_vm1, %v18786_v62 }
 0xb4a   : > { %25306 = vmatmul.mubr.msk.f32.vlgmr.msra.gmra.mrb[64].mxu0 %vm527_vm1, %v18787_v40 }
 0xb4b   : > { %25354 = vmatpush3.msk.msra.mxu0 %vm769_vm0, %v16131_v52  ;;  %25308 = vmatprep.mubr.msk.f32.mxu0 %vm527_vm1, %v18788_v29 }
 0xb4e   : > { %25309 = vmatmul.mubr.msk.f32.gmra.mrb[66].mxu0 %vm527_vm1, %v18789_v24  ;;  %v32890_v24 = vld [vmem:[#allocation11_spill] sm:$0xff] }
 0xb4f   : > { %25311 = vmatprep.mubr.msk.f32.mxu0 %vm527_vm1, %v18790_v56 }
 0xb52   : > { %25312 = vmatmul.mubr.msk.f32.gmra.mrb[68].mxu0 %vm527_vm1, %v18791_v61 }
 0xb53   : > { %25314 = vmatprep.mubr.msk.f32.mxu0 %vm527_vm1, %v18792_v0 }
 0xb56   : > { %25315 = vmatmul.mubr.msk.f32.gmra.mrb[70].mxu0 %vm527_vm1, %v18793_v49  ;;  %v32891_v49 = vld [vmem:[#allocation10_spill] sm:$0xff] }
 0xb57   : > { %25317 = vmatprep.mubr.msk.f32.mxu0 %vm527_vm1, %v18794_v6 }
 0xb5a   : > { %25318 = vmatmul.mubr.msk.f32.gmra.mrb[72].mxu0 %vm527_vm1, %v18795_v58 }
 0xb5b   : > { %25320 = vmatprep.mubr.msk.f32.mxu0 %vm527_vm1, %v18796_v23 }
 0xb5e   : > { %25321 = vmatmul.mubr.msk.f32.gmra.mrb[74].mxu0 %vm527_vm1, %v18797_v45 }
 0xb5f   : > { %25323 = vmatprep.mubr.msk.f32.mxu0 %vm527_vm1, %v31258_v18  ;;  %v18816_v18 = vld [vmem:[#allocation5 + $0x199] sm:$0xff] }
 0xb62   : > { %25324 = vmatmul.mubr.msk.f32.gmra.mrb[76].mxu0 %vm527_vm1, %v31268_v38  ;;  %v18817_v38 = vld [vmem:[#allocation5 + $0x1a1] sm:$0xff] }
 0xb63   : > { %25326 = vmatprep.mubr.msk.f32.mxu0 %vm527_vm1, %v31272_v33  ;;  %v32870_v33 = vld [vmem:[#allocation108_spill] sm:$0xff] }
 0xb66   : > { %25327 = vmatmul.mubr.msk.f32.gmra.mrb[78].mxu0 %vm527_vm1, %v31282_v9  ;;  %v32871_v9 = vld [vmem:[#allocation105_spill] sm:$0xff] }
 0xb67   : > { %25329 = vmatprep.mubr.msk.f32.mxu0 %vm527_vm1, %v31286_v55  ;;  %v32872_v55 = vld [vmem:[#allocation110_spill] sm:$0xff] }
 0xb6a   : > { %25330 = vmatmul.mubr.msk.f32.gmra.mrb[80].mxu0 %vm527_vm1, %v31296_v63  ;;  %v32873_v63 = vld [vmem:[#allocation107_spill] sm:$0xff] }
 0xb6b   : > { %25332 = vmatprep.mubr.msk.f32.mxu0 %vm527_vm1, %v31300_v47  ;;  %v32874_v47 = vld [vmem:[#allocation112_spill] sm:$0xff] }
 0xb6e   : > { %25333 = vmatmul.mubr.msk.f32.gmra.mrb[82].mxu0 %vm527_vm1, %v31314_v50  ;;  %v32875_v50 = vld [vmem:[#allocation109_spill] sm:$0xff] }
 0xb6f   : > { %25335 = vmatprep.mubr.msk.f32.mxu0 %vm527_vm1, %v31318_v53  ;;  %v32876_v53 = vld [vmem:[#allocation114_spill] sm:$0xff] }
 0xb72   : > { %25336 = vmatmul.mubr.msk.f32.gmra.mrb[84].mxu0 %vm527_vm1, %v31326_v2  ;;  %v32877_v2 = vld [vmem:[#allocation111_spill] sm:$0xff] }
 0xb73   : > { %25338 = vmatprep.mubr.msk.f32.mxu0 %vm527_vm1, %v31330_v28  ;;  %v32878_v28 = vld [vmem:[#allocation116_spill] sm:$0xff] }
 0xb76   : > { %25339 = vmatmul.mubr.msk.f32.gmra.mrb[86].mxu0 %vm527_vm1, %v31334_v32  ;;  %v32879_v32 = vld [vmem:[#allocation113_spill] sm:$0xff] }
 0xb77   : > { %25341 = vmatprep.mubr.msk.f32.mxu0 %vm527_vm1, %v31338_v11  ;;  %v32880_v11 = vld [vmem:[#allocation118_spill] sm:$0xff] }
 0xb7a   : > { %25342 = vmatmul.mubr.msk.f32.gmra.mrb[88].mxu0 %vm527_vm1, %v32842_v51 }
 0xb7b   : > { %25344 = vmatprep.mubr.msk.f32.mxu0 %vm527_vm1, %v32843_v1 }
 0xb7e   : > { %25345 = vmatmul.mubr.msk.f32.gmra.mrb[90].mxu0 %vm527_vm1, %v32844_v60  ;;  %v32887_v60 = vld [vmem:[#allocation6_spill] sm:$0xff] }
 0xb7f   : > { %25347 = vmatprep.mubr.msk.f32.mxu0 %vm527_vm1, %v31754_v14 }
 0xb82   : > { %25348 = vmatmul.mubr.msk.f32.gmra.mrb[92].mxu0 %vm527_vm1, %v31758_v39 }
 0xb83   : > { %25350 = vmatprep.mubr.msk.f32.mxu0 %vm527_vm1, %v18816_v18 }
 0xb86   : > { %25351 = vmatmul.mubr.msk.f32.gmra.mrb[94].mxu0 %vm527_vm1, %v18817_v38 }
 0xb87   : > { %25355 = vmatprep.mubr.msk.f32.mxu0 %vm527_vm1, %v32846_v4 }
 0xb8a   : > { %25356 = vmatmul.mubr.msk.f32.vlgmr.msra.gmra.mrb[64].mxu0 %vm527_vm1, %v32847_v10 }
 0xb8b   : > { %25358 = vmatprep.mubr.msk.f32.mxu0 %vm527_vm1, %v32848_v41 }
 0xb8e   : > { %25359 = vmatmul.mubr.msk.f32.gmra.mrb[66].mxu0 %vm527_vm1, %v32870_v33 }
 0xb8f   : > { %25361 = vmatprep.mubr.msk.f32.mxu0 %vm527_vm1, %v32871_v9  ;;  %v32892_v9 = vld [vmem:[#allocation13_spill] sm:$0xff] }
 0xb92   : > { %25362 = vmatmul.mubr.msk.f32.gmra.mrb[68].mxu0 %vm527_vm1, %v32872_v55 }
 0xb93   : > { %25364 = vmatprep.mubr.msk.f32.mxu0 %vm527_vm1, %v32873_v63 }
 0xb96   : > { %25365 = vmatmul.mubr.msk.f32.gmra.mrb[70].mxu0 %vm527_vm1, %v32874_v47 }
 0xb97   : > { %25367 = vmatprep.mubr.msk.f32.mxu0 %vm527_vm1, %v32875_v50  ;;  %v32893_v50 = vld [vmem:[#allocation12_spill] sm:$0xff] }
 0xb9a   : > { %25368 = vmatmul.mubr.msk.f32.gmra.mrb[72].mxu0 %vm527_vm1, %v32876_v53 }
 0xb9b   : > { %25370 = vmatprep.mubr.msk.f32.mxu0 %vm527_vm1, %v32877_v2 }
 0xb9e   : > { %25371 = vmatmul.mubr.msk.f32.gmra.mrb[74].mxu0 %vm527_vm1, %v32878_v28 }
 0xb9f   : > { %25373 = vmatprep.mubr.msk.f32.mxu0 %vm527_vm1, %v32879_v32 }
 0xba2   : > { %25374 = vmatmul.mubr.msk.f32.gmra.mrb[76].mxu0 %vm527_vm1, %v32880_v11 }
 0xba3   : > { %25376 = vmatprep.mubr.msk.f32.mxu0 %vm527_vm1, %v32881_v26 }
 0xba6   : > { %25377 = vmatmul.mubr.msk.f32.gmra.mrb[78].mxu0 %vm527_vm1, %v32861_v12 }
 0xba7   : > { %25379 = vmatprep.mubr.msk.f32.mxu0 %vm527_vm1, %v32882_v46 }
 0xbaa   : > { %25380 = vmatmul.mubr.msk.f32.gmra.mrb[80].mxu0 %vm527_vm1, %v32863_v30 }
 0xbab   : > { %25382 = vmatprep.mubr.msk.f32.mxu0 %vm527_vm1, %v32864_v48 }
 0xbae   : > { %25383 = vmatmul.mubr.msk.f32.gmra.mrb[82].mxu0 %vm527_vm1, %v32865_v21 }
 0xbaf   : > { %25385 = vmatprep.mubr.msk.f32.mxu0 %vm527_vm1, %v32883_v35  ;;  %v32894_v35 = vld [vmem:[#allocation15_spill] sm:$0xff] }
 0xbb2   : > { %25386 = vmatmul.mubr.msk.f32.gmra.mrb[84].mxu0 %vm527_vm1, %v32867_v31 }
 0xbb3   : > { %25388 = vmatprep.mubr.msk.f32.mxu0 %vm527_vm1, %v32884_v37 }
 0xbb6   : > { %25389 = vmatmul.mubr.msk.f32.gmra.mrb[86].mxu0 %vm527_vm1, %v31594_v43 }
 0xbb7   : > { %25391 = vmatprep.mubr.msk.f32.mxu0 %vm527_vm1, %v32869_v25  ;;  %v32889_v25 = vld [vmem:[#allocation8_spill] sm:$0xff] }
 0xbba   : > { %25392 = vmatmul.mubr.msk.f32.gmra.mrb[88].mxu0 %vm527_vm1, %v31602_v17  ;;  %v32017_v17 = vld [vmem:[%s32171_s14] ss:$0 sm:$0xff] }
 0xbbb   : > { %25394 = vmatprep.mubr.msk.f32.mxu0 %vm527_vm1, %v32885_v5 }
 0xbbe   : > { %25395 = vmatmul.mubr.msk.f32.gmra.mrb[90].mxu0 %vm527_vm1, %v31610_v42 }
 0xbbf   : > { %25397 = vmatprep.mubr.msk.f32.mxu0 %vm527_vm1, %v31826_v15  ;;  %v32888_v15 = vld [vmem:[#allocation9_spill] sm:$0xff] }
 0xbc2   : > { %25398 = vmatmul.mubr.msk.f32.gmra.mrb[92].mxu0 %vm527_vm1, %v31830_v8 }
 0xbc3   : > { %25400 = vmatprep.mubr.msk.f32.mxu0 %vm527_vm1, %v19204_v7 }
 0xbc6   : > { %25401 = vmatmul.mubr.msk.f32.gmra.mrb[94].mxu0 %vm527_vm1, %v19205_v13  ;;  %v32895_v13 = vld [vmem:[#allocation14_spill] sm:$0xff] }
 0xc5d   : > { %v25357_v3 = vpop.f32.mrb[64].mxu0 }
 0xc5e   : > { %v19570_v22 = vadd.f32 %v25357_v3, %v32017_v17  ;;  %v19371_v19 = vpop.f32.mrb[65].mxu0 }
 0xc5f   : > { %v19569_v57 = vadd.f32 %v32017_v17, %v19371_v19 }
 0xc60   : > { %vm19602_vm0 = vcmp.ge.f32.partialorder %v19570_v22, 0.0  ;;  %v19634_v36 = vmul.f32 0.2, %v19570_v22 }
 0xc61   : > { %vm19601_vm2 = vcmp.ge.f32.partialorder %v19569_v57, 0.0  ;;  %v19633_v54 = vmul.f32 0.2, %v19569_v57  ;;  %v25360_v16 = vpop.f32.mrb[66].mxu0 }
 0xc62   : > { %v19666_v52 = vsel %vm19602_vm0, %v19570_v22, %v19634_v36  ;;  %v19572_v42 = vadd.f32 %v25360_v16, %v32017_v17  ;;  %v19381_v43 = vpop.f32.mrb[67].mxu0 }
 0xc63   : > { %v19698_v20 = vadd.f32 %v19666_v52, %v32886_v44  ;;  %v19665_v51 = vsel %vm19601_vm2, %v19569_v57, %v19633_v54  ;;  %v19571_v1 = vadd.f32 %v32017_v17, %v19381_v43  ;;  %v32896_v52 = vld [vmem:[#allocation17_spill] sm:$0xff] }
 0xc64   : > { %v19697_v14 = vadd.f32 %v19665_v51, %v32887_v60  ;;  %vm19604_vm3 = vcmp.ge.f32.partialorder %v19572_v42, 0.0  ;;  %v19636_v39 = vmul.f32 0.2, %v19572_v42 }
 0xc65   : > { %19730 = vst.msk [vmem:[%s32026_s21 + $0x8] sm:$0xff] %vm527_vm1, %v19698_v20  ;;  %vm19603_vm13 = vcmp.ge.f32.partialorder %v19571_v1, 0.0  ;;  %v19635_v34 = vmul.f32 0.2, %v19571_v1  ;;  %v25363_v4 = vpop.f32.mrb[68].mxu0  ;;  %v32897_v20 = vld [vmem:[#allocation16_spill] sm:$0xff] }
 0xc66   : > { %19729 = vst.msk [vmem:[%s32026_s21] sm:$0xff] %vm527_vm1, %v19697_v14  ;;  %v19668_v10 = vsel %vm19604_vm3, %v19572_v42, %v19636_v39  ;;  %v19574_v41 = vadd.f32 %v25363_v4, %v32017_v17  ;;  %v19391_v21 = vpop.f32.mrb[69].mxu0 }
 0xc67   : > { %v19700_v31 = vadd.f32 %v19668_v10, %v32888_v15  ;;  %v19667_v8 = vsel %vm19603_vm13, %v19571_v1, %v19635_v34  ;;  %v19573_v12 = vadd.f32 %v32017_v17, %v19391_v21  ;;  %v32898_v10 = vld [vmem:[#allocation19_spill] sm:$0xff] }
 0xc68   : > { %v19699_v30 = vadd.f32 %v19667_v8, %v32889_v25  ;;  %vm19606_vm14 = vcmp.ge.f32.partialorder %v19574_v41, 0.0  ;;  %v19638_v48 = vmul.f32 0.2, %v19574_v41 }
 0xc69   : > { %19732 = vst.msk [vmem:[%s32026_s21 + $0x18] sm:$0xff] %vm527_vm1, %v19700_v31  ;;  %vm19605_vm15 = vcmp.ge.f32.partialorder %v19573_v12, 0.0  ;;  %v19637_v27 = vmul.f32 0.2, %v19573_v12  ;;  %v25366_v59 = vpop.f32.mrb[70].mxu0  ;;  %v32899_v31 = vld [vmem:[#allocation18_spill] sm:$0xff] }
 0xc6a   : > { %19731 = vst.msk [vmem:[%s32026_s21 + $0x10] sm:$0xff] %vm527_vm1, %v19699_v30  ;;  %v19670_v62 = vsel %vm19606_vm14, %v19574_v41, %v19638_v48  ;;  %v19576_v40 = vadd.f32 %v25366_v59, %v32017_v17  ;;  %v19401_v29 = vpop.f32.mrb[71].mxu0 }
 0xc6b   : > { %v19702_v56 = vadd.f32 %v19670_v62, %v32890_v24  ;;  %v19669_v61 = vsel %vm19605_vm15, %v19573_v12, %v19637_v27  ;;  %v19575_v0 = vadd.f32 %v32017_v17, %v19401_v29  ;;  %v32900_v62 = vld [vmem:[#allocation21_spill] sm:$0xff] }
 0xc6c   : > { %v19701_v6 = vadd.f32 %v19669_v61, %v32891_v49  ;;  %vm19608_vm7 = vcmp.ge.f32.partialorder %v19576_v40, 0.0  ;;  %v19640_v58 = vmul.f32 0.2, %v19576_v40 }
 0xc6d   : > { %19734 = vst.msk [vmem:[%s32026_s21 + $0x28] sm:$0xff] %vm527_vm1, %v19702_v56  ;;  %vm19607_vm5 = vcmp.ge.f32.partialorder %v19575_v0, 0.0  ;;  %v19639_v23 = vmul.f32 0.2, %v19575_v0  ;;  %v25369_v45 = vpop.f32.mrb[72].mxu0  ;;  %v32901_v56 = vld [vmem:[#allocation20_spill] sm:$0xff] }
 0xc6e   : > { %19733 = vst.msk [vmem:[%s32026_s21 + $0x20] sm:$0xff] %vm527_vm1, %v19701_v6  ;;  %v19672_v18 = vsel %vm19608_vm7, %v19576_v40, %v19640_v58  ;;  %v19578_v38 = vadd.f32 %v25369_v45, %v32017_v17  ;;  %v19411_v33 = vpop.f32.mrb[73].mxu0 }
 0xc6f   : > { %v19704_v55 = vadd.f32 %v19672_v18, %v32892_v9  ;;  %v19671_v63 = vsel %vm19607_vm5, %v19575_v0, %v19639_v23  ;;  %v19577_v47 = vadd.f32 %v32017_v17, %v19411_v33  ;;  %v32902_v18 = vld [vmem:[#allocation23_spill] sm:$0xff] }
 0xc70   : > { %v19703_v53 = vadd.f32 %v19671_v63, %v32893_v50  ;;  %vm19610_vm9 = vcmp.ge.f32.partialorder %v19578_v38, 0.0  ;;  %v19642_v2 = vmul.f32 0.2, %v19578_v38 }
 0xc71   : > { %19736 = vst.msk [vmem:[%s32026_s21 + $0x38] sm:$0xff] %vm527_vm1, %v19704_v55  ;;  %vm19609_vm4 = vcmp.ge.f32.partialorder %v19577_v47, 0.0  ;;  %v19641_v28 = vmul.f32 0.2, %v19577_v47  ;;  %v25372_v32 = vpop.f32.mrb[74].mxu0  ;;  %v32903_v55 = vld [vmem:[#allocation22_spill] sm:$0xff] }
 0xc72   : > { %19735 = vst.msk [vmem:[%s32026_s21 + $0x30] sm:$0xff] %vm527_vm1, %v19703_v53  ;;  %v19674_v11 = vsel %vm19610_vm9, %v19578_v38, %v19642_v2  ;;  %v19580_v26 = vadd.f32 %v25372_v32, %v32017_v17  ;;  %v19421_v46 = vpop.f32.mrb[75].mxu0 }
 0xc73   : > { %v19706_v37 = vadd.f32 %v19674_v11, %v32894_v35  ;;  %v19673_v5 = vsel %vm19609_vm4, %v19577_v47, %v19641_v28  ;;  %v19579_v7 = vadd.f32 %v32017_v17, %v19421_v46  ;;  %v32904_v11 = vld [vmem:[#allocation25_spill] sm:$0xff] }
 0xc74   : > { %v19705_v3 = vadd.f32 %v19673_v5, %v32895_v13  ;;  %vm19612_vm6 = vcmp.ge.f32.partialorder %v19580_v26, 0.0  ;;  %v19644_v22 = vmul.f32 0.2, %v19580_v26 }
 0xc75   : > { %19738 = vst.msk [vmem:[%s32026_s21 + $0x48] sm:$0xff] %vm527_vm1, %v19706_v37  ;;  %vm19611_vm8 = vcmp.ge.f32.partialorder %v19579_v7, 0.0  ;;  %v19643_v19 = vmul.f32 0.2, %v19579_v7  ;;  %v25375_v57 = vpop.f32.mrb[76].mxu0  ;;  %v32905_v37 = vld [vmem:[#allocation24_spill] sm:$0xff] }
 0xc76   : > { %19737 = vst.msk [vmem:[%s32026_s21 + $0x40] sm:$0xff] %vm527_vm1, %v19705_v3  ;;  %v19676_v36 = vsel %vm19612_vm6, %v19580_v26, %v19644_v22  ;;  %v19582_v54 = vadd.f32 %v25375_v57, %v32017_v17  ;;  %v19431_v16 = vpop.f32.mrb[77].mxu0 }
 0xc77   : > { %v19708_v42 = vadd.f32 %v19676_v36, %v32896_v52  ;;  %v19675_v43 = vsel %vm19611_vm8, %v19579_v7, %v19643_v19  ;;  %v19581_v44 = vadd.f32 %v32017_v17, %v19431_v16  ;;  %v32906_v36 = vld [vmem:[#allocation27_spill] sm:$0xff] }
 0xc78   : > { %v19707_v51 = vadd.f32 %v19675_v43, %v32897_v20  ;;  %vm19614_vm10 = vcmp.ge.f32.partialorder %v19582_v54, 0.0  ;;  %v19646_v1 = vmul.f32 0.2, %v19582_v54 }
 0xc79   : > { %19740 = vst.msk [vmem:[%s32026_s21 + $0x58] sm:$0xff] %vm527_vm1, %v19708_v42  ;;  %vm19613_vm11 = vcmp.ge.f32.partialorder %v19581_v44, 0.0  ;;  %v19645_v60 = vmul.f32 0.2, %v19581_v44  ;;  %v25378_v14 = vpop.f32.mrb[78].mxu0  ;;  %v32907_v42 = vld [vmem:[#allocation26_spill] sm:$0xff] }
 0xc7a   : > { %19739 = vst.msk [vmem:[%s32026_s21 + $0x50] sm:$0xff] %vm527_vm1, %v19707_v51  ;;  %v19678_v39 = vsel %vm19614_vm10, %v19582_v54, %v19646_v1  ;;  %v19584_v34 = vadd.f32 %v25378_v14, %v32017_v17  ;;  %v19441_v4 = vpop.f32.mrb[79].mxu0 }
 0xc7b   : > { %v19710_v41 = vadd.f32 %v19678_v39, %v32898_v10  ;;  %v19677_v21 = vsel %vm19613_vm11, %v19581_v44, %v19645_v60  ;;  %v19583_v15 = vadd.f32 %v32017_v17, %v19441_v4  ;;  %v32908_v39 = vld [vmem:[#allocation29_spill] sm:$0xff] }
 0xc7c   : > { %v19709_v8 = vadd.f32 %v19677_v21, %v32899_v31  ;;  %vm19616_vm12 = vcmp.ge.f32.partialorder %v19584_v34, 0.0  ;;  %v19648_v12 = vmul.f32 0.2, %v19584_v34 }
 0xc7d   : > { %19742 = vst.msk [vmem:[%s32026_s21 + $0x68] sm:$0xff] %vm527_vm1, %v19710_v41  ;;  %vm19615_vm0 = vcmp.ge.f32.partialorder %v19583_v15, 0.0  ;;  %v19647_v25 = vmul.f32 0.2, %v19583_v15  ;;  %v25381_v30 = vpop.f32.mrb[80].mxu0  ;;  %v32909_v41 = vld [vmem:[#allocation28_spill] sm:$0xff] }
 0xc7e   : > { %19741 = vst.msk [vmem:[%s32026_s21 + $0x60] sm:$0xff] %vm527_vm1, %v19709_v8  ;;  %v19680_v48 = vsel %vm19616_vm12, %v19584_v34, %v19648_v12  ;;  %v19586_v27 = vadd.f32 %v25381_v30, %v32017_v17  ;;  %v19451_v59 = vpop.f32.mrb[81].mxu0 }
 0xc7f   : > { %v19712_v40 = vadd.f32 %v19680_v48, %v32900_v62  ;;  %v19679_v29 = vsel %vm19615_vm0, %v19583_v15, %v19647_v25  ;;  %v19585_v24 = vadd.f32 %v32017_v17, %v19451_v59  ;;  %v32910_v48 = vld [vmem:[#allocation31_spill] sm:$0xff] }
 0xc80   : > { %v19711_v61 = vadd.f32 %v19679_v29, %v32901_v56  ;;  %vm19618_vm2 = vcmp.ge.f32.partialorder %v19586_v27, 0.0  ;;  %v19650_v0 = vmul.f32 0.2, %v19586_v27 }
 0xc81   : > { %19744 = vst.msk [vmem:[%s32026_s21 + $0x78] sm:$0xff] %vm527_vm1, %v19712_v40  ;;  %vm19617_vm3 = vcmp.ge.f32.partialorder %v19585_v24, 0.0  ;;  %v19649_v49 = vmul.f32 0.2, %v19585_v24  ;;  %v25384_v6 = vpop.f32.mrb[82].mxu0  ;;  %v32911_v40 = vld [vmem:[#allocation30_spill] sm:$0xff] }
 0xc82   : > { %19743 = vst.msk [vmem:[%s32026_s21 + $0x70] sm:$0xff] %vm527_vm1, %v19711_v61  ;;  %v19682_v58 = vsel %vm19618_vm2, %v19586_v27, %v19650_v0  ;;  %v19588_v23 = vadd.f32 %v25384_v6, %v32017_v17  ;;  %v19461_v45 = vpop.f32.mrb[83].mxu0 }
 0xc83   : > { %v19714_v38 = vadd.f32 %v19682_v58, %v32902_v18  ;;  %v19681_v33 = vsel %vm19617_vm3, %v19585_v24, %v19649_v49  ;;  %v19587_v9 = vadd.f32 %v32017_v17, %v19461_v45  ;;  %v32912_v58 = vld [vmem:[#allocation33_spill] sm:$0xff] }
 0xc84   : > { %v19713_v63 = vadd.f32 %v19681_v33, %v32903_v55  ;;  %vm19620_vm13 = vcmp.ge.f32.partialorder %v19588_v23, 0.0  ;;  %v19652_v47 = vmul.f32 0.2, %v19588_v23 }
 0xc85   : > { %19746 = vst.msk [vmem:[%s32026_s21 + $0x88] sm:$0xff] %vm527_vm1, %v19714_v38  ;;  %vm19619_vm14 = vcmp.ge.f32.partialorder %v19587_v9, 0.0  ;;  %v19651_v50 = vmul.f32 0.2, %v19587_v9  ;;  %v25387_v53 = vpop.f32.mrb[84].mxu0  ;;  %v32913_v38 = vld [vmem:[#allocation32_spill] sm:$0xff] }
 0xc86   : > { %19745 = vst.msk [vmem:[%s32026_s21 + $0x80] sm:$0xff] %vm527_vm1, %v19713_v63  ;;  %v19684_v2 = vsel %vm19620_vm13, %v19588_v23, %v19652_v47  ;;  %v19590_v28 = vadd.f32 %v25387_v53, %v32017_v17  ;;  %v19471_v32 = vpop.f32.mrb[85].mxu0 }
 0xc87   : > { %v19716_v26 = vadd.f32 %v19684_v2, %v32904_v11  ;;  %v19683_v46 = vsel %vm19619_vm14, %v19587_v9, %v19651_v50  ;;  %v19589_v35 = vadd.f32 %v32017_v17, %v19471_v32  ;;  %v32914_v2 = vld [vmem:[#allocation35_spill] sm:$0xff] }
 0xc88   : > { %v19715_v5 = vadd.f32 %v19683_v46, %v32905_v37  ;;  %vm19622_vm15 = vcmp.ge.f32.partialorder %v19590_v28, 0.0  ;;  %v19654_v7 = vmul.f32 0.2, %v19590_v28 }
 0xc89   : > { %19748 = vst.msk [vmem:[%s32026_s21 + $0x98] sm:$0xff] %vm527_vm1, %v19716_v26  ;;  %vm19621_vm7 = vcmp.ge.f32.partialorder %v19589_v35, 0.0  ;;  %v19653_v13 = vmul.f32 0.2, %v19589_v35  ;;  %v25390_v3 = vpop.f32.mrb[86].mxu0  ;;  %v32915_v26 = vld [vmem:[#allocation34_spill] sm:$0xff] }
 0xc8a   : > { %19747 = vst.msk [vmem:[%s32026_s21 + $0x90] sm:$0xff] %vm527_vm1, %v19715_v5  ;;  %v19686_v22 = vsel %vm19622_vm15, %v19590_v28, %v19654_v7  ;;  %v19592_v19 = vadd.f32 %v25390_v3, %v32017_v17  ;;  %v19481_v57 = vpop.f32.mrb[87].mxu0  ;;  %v32916_v7 = vld [vmem:[#allocation37_spill] sm:$0xff] }
 0xc8b   : > { %v19718_v54 = vadd.f32 %v19686_v22, %v32906_v36  ;;  %v19685_v16 = vsel %vm19621_vm7, %v19589_v35, %v19653_v13  ;;  %v19591_v52 = vadd.f32 %v32017_v17, %v19481_v57  ;;  %v32917_v22 = vld [vmem:[#allocation36_spill] sm:$0xff] }
 0xc8c   : > { %v19717_v43 = vadd.f32 %v19685_v16, %v32907_v42  ;;  %vm19624_vm5 = vcmp.ge.f32.partialorder %v19592_v19, 0.0  ;;  %v19656_v44 = vmul.f32 0.2, %v19592_v19 }
 0xc8d   : > { %19750 = vst.msk [vmem:[%s32026_s21 + $0xa8] sm:$0xff] %vm527_vm1, %v19718_v54  ;;  %vm19623_vm9 = vcmp.ge.f32.partialorder %v19591_v52, 0.0  ;;  %v19655_v20 = vmul.f32 0.2, %v19591_v52  ;;  %v25393_v51 = vpop.f32.mrb[88].mxu0 }
 0xc8e   : > { %19749 = vst.msk [vmem:[%s32026_s21 + $0xa0] sm:$0xff] %vm527_vm1, %v19717_v43  ;;  %v19688_v1 = vsel %vm19624_vm5, %v19592_v19, %v19656_v44  ;;  %v19594_v60 = vadd.f32 %v25393_v51, %v32017_v17  ;;  %v19491_v14 = vpop.f32.mrb[89].mxu0 }
 0xc8f   : > { %v19720_v34 = vadd.f32 %v19688_v1, %v32908_v39  ;;  %v19687_v4 = vsel %vm19623_vm9, %v19591_v52, %v19655_v20  ;;  %v19593_v10 = vadd.f32 %v32017_v17, %v19491_v14 }
 0xc90   : > { %v19719_v21 = vadd.f32 %v19687_v4, %v32909_v41  ;;  %vm19626_vm4 = vcmp.ge.f32.partialorder %v19594_v60, 0.0  ;;  %v19658_v15 = vmul.f32 0.2, %v19594_v60 }
 0xc91   : > { %19752 = vst.msk [vmem:[%s32026_s21 + $0xb8] sm:$0xff] %vm527_vm1, %v19720_v34  ;;  %vm19625_vm6 = vcmp.ge.f32.partialorder %v19593_v10, 0.0  ;;  %v19657_v31 = vmul.f32 0.2, %v19593_v10  ;;  %v25396_v8 = vpop.f32.mrb[90].mxu0 }
 0xc92   : > { %19751 = vst.msk [vmem:[%s32026_s21 + $0xb0] sm:$0xff] %vm527_vm1, %v19719_v21  ;;  %v19690_v12 = vsel %vm19626_vm4, %v19594_v60, %v19658_v15  ;;  %v19596_v25 = vadd.f32 %v25396_v8, %v32017_v17  ;;  %v19501_v30 = vpop.f32.mrb[91].mxu0 }
 0xc93   : > { %v19722_v27 = vadd.f32 %v19690_v12, %v32910_v48  ;;  %v19689_v59 = vsel %vm19625_vm6, %v19593_v10, %v19657_v31  ;;  %v19595_v62 = vadd.f32 %v32017_v17, %v19501_v30 }
 0xc94   : > { %v19721_v29 = vadd.f32 %v19689_v59, %v32911_v40  ;;  %vm19628_vm8 = vcmp.ge.f32.partialorder %v19596_v25, 0.0  ;;  %v19660_v24 = vmul.f32 0.2, %v19596_v25 }
 0xc95   : > { %19754 = vst.msk [vmem:[%s32026_s21 + $0xc8] sm:$0xff] %vm527_vm1, %v19722_v27  ;;  %vm19627_vm10 = vcmp.ge.f32.partialorder %v19595_v62, 0.0  ;;  %v19659_v56 = vmul.f32 0.2, %v19595_v62  ;;  %v25399_v61 = vpop.f32.mrb[92].mxu0 }
 0xc96   : > { %19753 = vst.msk [vmem:[%s32026_s21 + $0xc0] sm:$0xff] %vm527_vm1, %v19721_v29  ;;  %v19692_v0 = vsel %vm19628_vm8, %v19596_v25, %v19660_v24  ;;  %v19598_v49 = vadd.f32 %v25399_v61, %v32017_v17  ;;  %v19511_v6 = vpop.f32.mrb[93].mxu0 }
 0xc97   : > { %v19724_v23 = vadd.f32 %v19692_v0, %v32912_v58  ;;  %v19691_v45 = vsel %vm19627_vm10, %v19595_v62, %v19659_v56  ;;  %v19597_v18 = vadd.f32 %v32017_v17, %v19511_v6 }
 0xc98   : > { %v19723_v33 = vadd.f32 %v19691_v45, %v32913_v38  ;;  %vm19630_vm11 = vcmp.ge.f32.partialorder %v19598_v49, 0.0  ;;  %v19662_v9 = vmul.f32 0.2, %v19598_v49 }
 0xc99   : > { %19756 = vst.msk [vmem:[%s32026_s21 + $0xd8] sm:$0xff] %vm527_vm1, %v19724_v23  ;;  %vm19629_vm12 = vcmp.ge.f32.partialorder %v19597_v18, 0.0  ;;  %v19661_v55 = vmul.f32 0.2, %v19597_v18  ;;  %v25402_v63 = vpop.f32.mrb[94].mxu0 }
 0xc9a   : > { %19755 = vst.msk [vmem:[%s32026_s21 + $0xd0] sm:$0xff] %vm527_vm1, %v19723_v33  ;;  %v19694_v47 = vsel %vm19630_vm11, %v19598_v49, %v19662_v9  ;;  %v19600_v50 = vadd.f32 %v25402_v63, %v32017_v17  ;;  %v19521_v53 = vpop.f32.mrb[95].mxu0 }
 0xc9b   : > { %v19726_v28 = vadd.f32 %v19694_v47, %v32914_v2  ;;  %v19693_v32 = vsel %vm19629_vm12, %v19597_v18, %v19661_v55  ;;  %v19599_v11 = vadd.f32 %v32017_v17, %v19521_v53 }
 0xc9c   : > { %v19725_v46 = vadd.f32 %v19693_v32, %v32915_v26  ;;  %vm19632_vm0 = vcmp.ge.f32.partialorder %v19600_v50, 0.0  ;;  %v19664_v35 = vmul.f32 0.2, %v19600_v50 }
 0xc9d   : > { %19758 = vst.msk [vmem:[%s32026_s21 + $0xe8] sm:$0xff] %vm527_vm1, %v19726_v28  ;;  %vm19631_vm2 = vcmp.ge.f32.partialorder %v19599_v11, 0.0  ;;  %v19663_v37 = vmul.f32 0.2, %v19599_v11 }
 0xc9e   : > { %19757 = vst.msk [vmem:[%s32026_s21 + $0xe0] sm:$0xff] %vm527_vm1, %v19725_v46  ;;  %v19696_v5 = vsel %vm19632_vm0, %v19600_v50, %v19664_v35 }
 0xc9f   : > { %v19728_v13 = vadd.f32 %v19696_v5, %v32916_v7  ;;  %v19695_v3 = vsel %vm19631_vm2, %v19599_v11, %v19663_v37 }
 0xca0   : > { %v19727_v19 = vadd.f32 %v19695_v3, %v32917_v22 }
 0xca1   : > { %19760 = vst.msk [vmem:[%s32026_s21 + $0xf8] sm:$0xff] %vm527_vm1, %v19728_v13 }
 0xca2   : > { %19759 = vst.msk [vmem:[%s32026_s21 + $0xf0] sm:$0xff] %vm527_vm1, %v19727_v19 }
 0xca3 PF: > { %s25_s18 = sadd.s32 1, %s26761_s18  }
 0xca4   : > { %p22_p4 = scmp.ge.s32.totalorder %s25_s18, 4  }
 0xca6   :  { %24 = sbr.rel (!%p22_p4) target bundleno = 1 (0x1), region = 120 }

</bundles_post_ra>
